<compile_context>
chip_gen: v6e
topology: v6e:2x2x1
jax: 0.10.0
libtpu: 0.0.40
codegen_flags: <defaults>
</compile_context>

<pallas_src>
import jax
import jax.numpy as jnp
from jax.experimental import pallas as pl
from jax.experimental.pallas import tpu as pltpu

NUM_FEATURES = 146
REPR = 256                     # repr_len
HIDDEN = 2 * REPR              # GENConv MLP expansion = 2
NUM_BLOCKS = 25
T_SOFTMAX = 0.01               # GENConv t
MSG_EPS = 1e-7                 # GENConv message eps
LN_EPS = 1e-5                  # torch.nn.LayerNorm default eps
ROW_PAD = 128                  # pad node count to a multiple of this (MXU M alignment)
MXU_DTYPE = jnp.bfloat16       # matmul operand dtype (accumulation stays f32)


# ----------------------------------------------------------------------------- kernel

def _gnn_kernel(x_ref, wenc_ref, benc_ref, adj_hbm, deg_ref,
                lng_ref, lnb_ref, w1_ref, b1_ref, mg_ref, mb_ref, w2_ref, b2_ref,
                hg_ref, hb_ref, wf1_ref, bf1_ref, wo_ref, bo_ref,
                o_ref,
                adj_s, h_s, pre_s, dma_sem):
    """One grid step == one DeepGCN block (layer index l = program_id(0)).

    l == 0 : encoder + h = GENConv(h0)                       (layers[0].conv)
    l >= 1 : h = h + GENConv(relu(LayerNorm_l(h)))            ('res+' block)
    l == L-1 : additionally run the head and write o_ref.
    """
    l = pl.program_id(0)

    def layer_norm(v, g, b):
        m = jnp.mean(v, axis=-1, keepdims=True)
        var = jnp.maximum(jnp.mean(v * v, axis=-1, keepdims=True) - m * m, 0.0)
        return (v - m) * jax.lax.rsqrt(var + LN_EPS) * g + b

    @pl.when(l == 0)
    def _():
        # Pull the 0/1 adjacency into VMEM exactly once (single-buffered); the
        # encoder matmul below overlaps the DMA.
        cp = pltpu.make_async_copy(adj_hbm, adj_s, dma_sem)
        cp.start()
        pre_s[...] = (jnp.dot(x_ref[...], wenc_ref[...],
                              preferred_element_type=jnp.float32) + benc_ref[...])
        h_s[...] = jnp.zeros_like(h_s)
        cp.wait()

    @pl.when(l > 0)
    def _():
        h = h_s[...]
        ln = layer_norm(h, lng_ref[...], lnb_ref[...])
        pre_s[...] = jnp.maximum(ln, 0.0)
        # TODO(synk): dropout(p=0.1) here is the identity (eval-mode semantics).

    pre = pre_s[...]                                     # (Np, 256) f32

    # --- GENConv softmax(t) aggregation: one fused adjacency matmul (MXU) ------
    #   num = adj @ (e*msg) = adj @ msg + adj @ ((e-1)*msg)
    #   den = adj @ e       = degree    + adj @ (e-1)
    # (e-1) keeps full bf16 relative precision; t=0.01 so no max-shift is needed
    # (any shift cancels exactly in num/den).
    msg = jnp.maximum(pre, 0.0) + MSG_EPS                # relu(x_j) + eps
    em1 = jnp.exp(T_SOFTMAX * msg) - 1.0                 # e - 1, small & well-scaled
    rhs = jnp.concatenate([msg, em1 * msg, em1], axis=-1).astype(MXU_DTYPE)
    r = jnp.dot(adj_s[...], rhs, preferred_element_type=jnp.float32)   # (Np, 768)
    num = r[:, :REPR] + r[:, REPR:2 * REPR]
    den = deg_ref[...] + r[:, 2 * REPR:]
    agg = num * pl.reciprocal(jnp.maximum(den, 1e-12), approx=True)

    # --- GENConv MLP: Linear(256->512) -> LayerNorm -> ReLU -> Linear(512->256) -
    hc = (agg + pre).astype(MXU_DTYPE)                   # + x_dst (in==out, no lin)
    h1 = jnp.dot(hc, w1_ref[...], preferred_element_type=jnp.float32) + b1_ref[...]
    h1 = jnp.maximum(layer_norm(h1, mg_ref[...], mb_ref[...]), 0.0)
    conv_out = (jnp.dot(h1.astype(MXU_DTYPE), w2_ref[...],
                        preferred_element_type=jnp.float32) + b2_ref[...])

    new_h = h_s[...] + conv_out                          # residual (0 for block 0)
    h_s[...] = new_h

    @pl.when(l == pl.num_programs(0) - 1)
    def _():
        # head: layers[0].act(layers[0].norm(x)) -> fc1 -> relu -> output_layer
        y = jnp.maximum(layer_norm(new_h, hg_ref[...], hb_ref[...]), 0.0)
        y = jnp.maximum(
            jnp.dot(y, wf1_ref[...], preferred_element_type=jnp.float32)
            + bf1_ref[...], 0.0)
        o_ref[...] = (jnp.dot(y, wo_ref[...], preferred_element_type=jnp.float32)
                      + bo_ref[...])


# ----------------------------------------------------------------------------- wrapper

def _vmem_limit_bytes(n_pad):
    resident = (
        n_pad * n_pad * 2                               # adj scratch (single-buffered bf16)
        + 2 * n_pad * REPR * 4                          # residual + pre-activation scratch
        + 2 * n_pad * NUM_FEATURES * 4                  # node features
        + 2 * n_pad * 128 * 4                           # degree (lane padded)
        + 2 * 2 * (REPR * HIDDEN + HIDDEN * REPR) * 2   # streamed conv weights (2 bufs)
        + 8 * n_pad * (3 * REPR) * 4                    # fused-matmul temporaries headroom
    )
    return int(min(100 * 1024 * 1024, max(resident + (4 << 20), 32 << 20)))


def gnn_forward(x, adj, params):
    n = x.shape[0]
    n_pad = pl.cdiv(n, ROW_PAD) * ROW_PAD

    # Fold the in-place rescale x[:,121:] = x[:,121:]/100 - 0.5 into the encoder
    # weights (exact algebraic rewrite).
    w, b = params["enc"]
    w_eff = w.at[121:, :].multiply(1.0 / 100.0)
    b_eff = (b - 0.5 * jnp.sum(w[121:, :], axis=0)).reshape(1, -1)

    # Pad nodes to a multiple of 128; padded rows/cols of adj are zero so they
    # never influence real nodes and are dropped at the end.
    x_p = jnp.zeros((n_pad, NUM_FEATURES), jnp.float32).at[:n, :].set(x)
    adj_p = jnp.zeros((n_pad, n_pad), MXU_DTYPE).at[:n, :n].set(adj.astype(MXU_DTYPE))
    # Per-destination in-degree (== adj @ 1), constant across layers.
    deg = jnp.zeros((n_pad, 1), jnp.float32).at[:n, :].set(
        jnp.sum(adj, axis=-1, keepdims=True))

    w1 = params["w1"].astype(MXU_DTYPE)                  # (25, 256, 512)
    w2 = params["w2"].astype(MXU_DTYPE)                  # (25, 512, 256)
    vec = lambda a: a.reshape(NUM_BLOCKS, 1, -1)         # per-layer vectors -> (L,1,dim)
    head_g = params["ln_g"][0].reshape(1, -1)            # layers[0].norm (head only)
    head_b = params["ln_b"][0].reshape(1, -1)
    wf1, bf1 = params["fc1"]
    wo, bo = params["out"]

    grid_spec = pltpu.PrefetchScalarGridSpec(
        num_scalar_prefetch=0,
        grid=(NUM_BLOCKS,),
        in_specs=[
            pl.BlockSpec((n_pad, NUM_FEATURES), lambda l: (0, 0)),    # x (l==0 only)
            pl.BlockSpec((NUM_FEATURES, REPR), lambda l: (0, 0)),     # encoder W
            pl.BlockSpec((1, REPR), lambda l: (0, 0)),                # encoder b
            pl.BlockSpec(memory_space=pl.ANY),                        # adj (HBM, manual DMA)
            pl.BlockSpec((n_pad, 1), lambda l: (0, 0)),               # degree
            pl.BlockSpec((None, 1, REPR), lambda l: (l, 0, 0)),       # block LN gamma
            pl.BlockSpec((None, 1, REPR), lambda l: (l, 0, 0)),       # block LN beta
            pl.BlockSpec((None, REPR, HIDDEN), lambda l: (l, 0, 0)),  # conv W1 (bf16)
            pl.BlockSpec((None, 1, HIDDEN), lambda l: (l, 0, 0)),     # conv b1
            pl.BlockSpec((None, 1, HIDDEN), lambda l: (l, 0, 0)),     # conv LN gamma
            pl.BlockSpec((None, 1, HIDDEN), lambda l: (l, 0, 0)),     # conv LN beta
            pl.BlockSpec((None, HIDDEN, REPR), lambda l: (l, 0, 0)),  # conv W2 (bf16)
            pl.BlockSpec((None, 1, REPR), lambda l: (l, 0, 0)),       # conv b2
            pl.BlockSpec((1, REPR), lambda l: (0, 0)),                # head LN gamma
            pl.BlockSpec((1, REPR), lambda l: (0, 0)),                # head LN beta
            pl.BlockSpec((REPR, REPR // 2), lambda l: (0, 0)),        # fc1 W
            pl.BlockSpec((1, REPR // 2), lambda l: (0, 0)),           # fc1 b
            pl.BlockSpec((REPR // 2, 1), lambda l: (0, 0)),           # output W
            pl.BlockSpec((1, 1), lambda l: (0, 0)),                   # output b
        ],
        out_specs=pl.BlockSpec((n_pad, 1), lambda l: (0, 0)),
        scratch_shapes=[
            pltpu.VMEM((n_pad, n_pad), MXU_DTYPE),   # adjacency (single-buffered)
            pltpu.VMEM((n_pad, REPR), jnp.float32),  # residual-stream carry
            pltpu.VMEM((n_pad, REPR), jnp.float32),  # encoder / LN+ReLU buffer
            pltpu.SemaphoreType.DMA(()),             # adj DMA completion
        ],
    )
    out = pl.pallas_call(
        _gnn_kernel,
        out_shape=jax.ShapeDtypeStruct((n_pad, 1), jnp.float32),
        grid_spec=grid_spec,
        compiler_params=pltpu.CompilerParams(
            dimension_semantics=("arbitrary",),       # layers carry state -> sequential
            vmem_limit_bytes=_vmem_limit_bytes(n_pad),
        ),
    )(x_p, w_eff, b_eff, adj_p, deg,
      vec(params["ln_g"]), vec(params["ln_b"]),
      w1, vec(params["b1"]), vec(params["mlp_g"]), vec(params["mlp_b"]),
      w2, vec(params["b2"]),
      head_g, head_b, wf1, bf1.reshape(1, -1), wo, bo.reshape(1, -1))
    return out[:n]


# ----------------------------------------------------------------------------- model params

def init_params(key):
    def lin(k, fan_in, fan_out):
        k1, k2 = jax.random.split(k)
        bound = 1.0 / jnp.sqrt(jnp.float32(fan_in))
        w = jax.random.uniform(k1, (fan_in, fan_out), jnp.float32, -bound, bound)
        b = jax.random.uniform(k2, (fan_out,), jnp.float32, -bound, bound)
        return w, b

    keys = jax.random.split(key, 3 + NUM_BLOCKS)
    w1s, b1s, w2s, b2s = [], [], [], []
    for i in range(NUM_BLOCKS):
        k1, k2 = jax.random.split(keys[3 + i])
        w1, b1 = lin(k1, REPR, HIDDEN)
        w2, b2 = lin(k2, HIDDEN, REPR)
        w1s.append(w1); b1s.append(b1); w2s.append(w2); b2s.append(b2)

    return {
        "enc": lin(keys[0], NUM_FEATURES, REPR),
        "fc1": lin(keys[1], REPR, REPR // 2),
        "out": lin(keys[2], REPR // 2, 1),
        # GENConv internal MLPs, stacked over the 25 layers.
        "w1": jnp.stack(w1s), "b1": jnp.stack(b1s),
        "w2": jnp.stack(w2s), "b2": jnp.stack(b2s),
        "mlp_g": jnp.ones((NUM_BLOCKS, HIDDEN), jnp.float32),
        "mlp_b": jnp.zeros((NUM_BLOCKS, HIDDEN), jnp.float32),
        # DeepGCNLayer norms (index 0 is layers[0].norm, used only in the head).
        "ln_g": jnp.ones((NUM_BLOCKS, REPR), jnp.float32),
        "ln_b": jnp.zeros((NUM_BLOCKS, REPR), jnp.float32),
    }


# ----------------------------------------------------------------------------- reference

def reference_forward(x, adj, params):
    """Pure-JAX reference with the same dtype policy and (e-1) aggregation rewrite."""
    def layer_norm(v, g, b):
        m = jnp.mean(v, -1, keepdims=True)
        var = jnp.maximum(jnp.mean(v * v, -1, keepdims=True) - m * m, 0.0)
        return (v - m) * jax.lax.rsqrt(var + LN_EPS) * g + b

    adj_b = adj.astype(MXU_DTYPE)
    deg = jnp.sum(adj, axis=-1, keepdims=True)

    def genconv(pre, l):
        msg = jnp.maximum(pre, 0.0) + MSG_EPS
        em1 = jnp.exp(T_SOFTMAX * msg) - 1.0
        num = (jnp.dot(adj_b, msg.astype(MXU_DTYPE), preferred_element_type=jnp.float32)
               + jnp.dot(adj_b, (em1 * msg).astype(MXU_DTYPE),
                         preferred_element_type=jnp.float32))
        den = deg + jnp.dot(adj_b, em1.astype(MXU_DTYPE),
                            preferred_element_type=jnp.float32)
        agg = num / jnp.maximum(den, 1e-12)
        hc = (agg + pre).astype(MXU_DTYPE)
        h1 = jnp.dot(hc, params["w1"][l].astype(MXU_DTYPE),
                     preferred_element_type=jnp.float32) + params["b1"][l]
        h1 = jnp.maximum(layer_norm(h1, params["mlp_g"][l], params["mlp_b"][l]), 0.0)
        return jnp.dot(h1.astype(MXU_DTYPE), params["w2"][l].astype(MXU_DTYPE),
                       preferred_element_type=jnp.float32) + params["b2"][l]

    # Original (unfolded) feature rescale, then encoder.
    x = x.at[:, 121:].set(x[:, 121:] / 100.0 - 0.5)
    h = x @ params["enc"][0] + params["enc"][1]

    h = genconv(h, 0)
    for l in range(1, NUM_BLOCKS):
        pre = jnp.maximum(layer_norm(h, params["ln_g"][l], params["ln_b"][l]), 0.0)
        h = h + genconv(pre, l)

    h = jnp.maximum(layer_norm(h, params["ln_g"][0], params["ln_b"][0]), 0.0)
    h = jnp.maximum(h @ params["fc1"][0] + params["fc1"][1], 0.0)
    return h @ params["out"][0] + params["out"][1]


# ----------------------------------------------------------------------------- main

if __name__ == "__main__":
    key = jax.random.PRNGKey(0)
    k_x, k_src, k_dst, k_p = jax.random.split(key, 4)

    N, E = 16, 40                                   # small synthetic graph
    x = jax.random.uniform(k_x, (N, NUM_FEATURES), jnp.float32, 0.0, 100.0)

    src = jax.random.randint(k_src, (E,), 0, N)
    dst = jax.random.randint(k_dst, (E,), 0, N)
    # dense adjacency mask: adj[dst, src] = 1  (messages flow source -> target)
    adj = jnp.zeros((N, N), jnp.float32).at[dst, src].set(1.0)

    params = init_params(k_p)

    out = jax.block_until_ready(jax.jit(gnn_forward)(x, adj, params))
    ref = jax.block_until_ready(jax.jit(reference_forward)(x, adj, params))

    assert out.shape == (N, 1), out.shape
    assert bool(jnp.all(jnp.isfinite(out)))
    max_err = float(jnp.max(jnp.abs(out - ref)))
    assert max_err < 2e-2, f"max abs error vs reference: {max_err}"
    print("KERNEL_OK")
</pallas_src>

<mosaic_0001>
module attributes {stable_mosaic.version = 11 : i64} {
  func.func @_gnn_kernel(%arg0: i32, %arg1: memref<128x146xf32, #tpu.memory_space<vmem>>, %arg2: memref<146x256xf32, #tpu.memory_space<vmem>>, %arg3: memref<1x256xf32, #tpu.memory_space<vmem>>, %arg4: memref<128x128xbf16, #tpu.memory_space<any>>, %arg5: memref<128x1xf32, #tpu.memory_space<vmem>>, %arg6: memref<1x1x256xf32, #tpu.memory_space<vmem>>, %arg7: memref<1x1x256xf32, #tpu.memory_space<vmem>>, %arg8: memref<1x256x512xbf16, #tpu.memory_space<vmem>>, %arg9: memref<1x1x512xf32, #tpu.memory_space<vmem>>, %arg10: memref<1x1x512xf32, #tpu.memory_space<vmem>>, %arg11: memref<1x1x512xf32, #tpu.memory_space<vmem>>, %arg12: memref<1x512x256xbf16, #tpu.memory_space<vmem>>, %arg13: memref<1x1x256xf32, #tpu.memory_space<vmem>>, %arg14: memref<1x256xf32, #tpu.memory_space<vmem>>, %arg15: memref<1x256xf32, #tpu.memory_space<vmem>>, %arg16: memref<256x128xf32, #tpu.memory_space<vmem>>, %arg17: memref<1x128xf32, #tpu.memory_space<vmem>>, %arg18: memref<128x1xf32, #tpu.memory_space<vmem>>, %arg19: memref<1x1xf32, #tpu.memory_space<vmem>>, %arg20: memref<128x1xf32, #tpu.memory_space<vmem>>, %arg21: memref<128x128xbf16, #tpu.memory_space<vmem>>, %arg22: memref<128x256xf32, #tpu.memory_space<vmem>>, %arg23: memref<128x256xf32, #tpu.memory_space<vmem>>, %arg24: memref<!tpu.dma_semaphore, #tpu.memory_space<semaphore_mem>>) attributes {dimension_semantics = [#tpu.dimension_semantics<arbitrary>], iteration_bounds = array<i64: 25>, scalar_prefetch = 0 : i64, scratch_operands = 4 : i64, tpu.core_type = #tpu.core_type<tc>, window_params = [{pipeline_mode = #tpu.pipeline_mode<synchronous>, transform_indices = @transform_0, window_bounds = array<i64: 128, 146>}, {pipeline_mode = #tpu.pipeline_mode<synchronous>, transform_indices = @transform_1, window_bounds = array<i64: 146, 256>}, {pipeline_mode = #tpu.pipeline_mode<synchronous>, transform_indices = @transform_2, window_bounds = array<i64: 1, 256>}, {}, {pipeline_mode = #tpu.pipeline_mode<synchronous>, transform_indices = @transform_4, window_bounds = array<i64: 128, 1>}, {transform_indices = @transform_5, window_bounds = array<i64: 1, 1, 256>}, {transform_indices = @transform_6, window_bounds = array<i64: 1, 1, 256>}, {transform_indices = @transform_7, window_bounds = array<i64: 1, 256, 512>}, {transform_indices = @transform_8, window_bounds = array<i64: 1, 1, 512>}, {transform_indices = @transform_9, window_bounds = array<i64: 1, 1, 512>}, {transform_indices = @transform_10, window_bounds = array<i64: 1, 1, 512>}, {transform_indices = @transform_11, window_bounds = array<i64: 1, 512, 256>}, {transform_indices = @transform_12, window_bounds = array<i64: 1, 1, 256>}, {pipeline_mode = #tpu.pipeline_mode<synchronous>, transform_indices = @transform_13, window_bounds = array<i64: 1, 256>}, {pipeline_mode = #tpu.pipeline_mode<synchronous>, transform_indices = @transform_14, window_bounds = array<i64: 1, 256>}, {pipeline_mode = #tpu.pipeline_mode<synchronous>, transform_indices = @transform_15, window_bounds = array<i64: 256, 128>}, {pipeline_mode = #tpu.pipeline_mode<synchronous>, transform_indices = @transform_16, window_bounds = array<i64: 1, 128>}, {pipeline_mode = #tpu.pipeline_mode<synchronous>, transform_indices = @transform_17, window_bounds = array<i64: 128, 1>}, {pipeline_mode = #tpu.pipeline_mode<synchronous>, transform_indices = @transform_18, window_bounds = array<i64: 1, 1>}, {pipeline_mode = #tpu.pipeline_mode<synchronous>, transform_indices = @transform_19, window_bounds = array<i64: 128, 1>}]} {
    %c0_i32 = arith.constant 0 : i32
    %0 = arith.cmpi eq, %arg0, %c0_i32 : i32
    %1 = arith.extui %0 : i1 to i32
    %c0_i32_0 = arith.constant 0 : i32
    %2 = arith.cmpi ne, %1, %c0_i32_0 : i32
    scf.if %2 {
      tpu.enqueue_dma source(%arg4 : memref<128x128xbf16, #tpu.memory_space<any>>) target(%arg21 : memref<128x128xbf16, #tpu.memory_space<vmem>>) target_semaphore(%arg24 : memref<!tpu.dma_semaphore, #tpu.memory_space<semaphore_mem>>)
      %c0_45 = arith.constant 0 : index
      %c0_46 = arith.constant 0 : index
      %85 = vector.load %arg1[%c0_45, %c0_46] : memref<128x146xf32, #tpu.memory_space<vmem>>, vector<128x146xf32>
      %c0_47 = arith.constant 0 : index
      %c0_48 = arith.constant 0 : index
      %86 = vector.load %arg2[%c0_47, %c0_48] : memref<146x256xf32, #tpu.memory_space<vmem>>, vector<146x256xf32>
      %cst_49 = arith.constant dense<0.000000e+00> : vector<128x256xf32>
      %87 = tpu.matmul %85, %86, %cst_49 {dimension_numbers = #tpu.dot_dimension_numbers<[1], [0], [0], [1], [0, 0, 1, 1], [], []>} : vector<128x146xf32>, vector<146x256xf32>, vector<128x256xf32> -> vector<128x256xf32>
      %c0_50 = arith.constant 0 : index
      %c0_51 = arith.constant 0 : index
      %88 = vector.load %arg3[%c0_50, %c0_51] : memref<1x256xf32, #tpu.memory_space<vmem>>, vector<1x256xf32>
      %89 = vector.broadcast %88 : vector<1x256xf32> to vector<128x256xf32>
      %90 = arith.addf %87, %89 : vector<128x256xf32>
      %c0_52 = arith.constant 0 : index
      %c0_53 = arith.constant 0 : index
      %91 = vector.load %arg23[%c0_52, %c0_53] : memref<128x256xf32, #tpu.memory_space<vmem>>, vector<128x256xf32>
      tpu.vector_store %arg23[%c0_52, %c0_53], %90 {strides = array<i32>} : memref<128x256xf32, #tpu.memory_space<vmem>>, vector<128x256xf32>,
      %cst_54 = arith.constant 0.000000e+00 : f32
      %92 = vector.broadcast %cst_54 : f32 to vector<128x256xf32>
      %c0_55 = arith.constant 0 : index
      %c0_56 = arith.constant 0 : index
      %93 = vector.load %arg22[%c0_55, %c0_56] : memref<128x256xf32, #tpu.memory_space<vmem>>, vector<128x256xf32>
      tpu.vector_store %arg22[%c0_55, %c0_56], %92 {strides = array<i32>} : memref<128x256xf32, #tpu.memory_space<vmem>>, vector<128x256xf32>,
      tpu.wait_dma2 semaphore(%arg24 : memref<!tpu.dma_semaphore, #tpu.memory_space<semaphore_mem>>) src(%arg4 : memref<128x128xbf16, #tpu.memory_space<any>>) dst(%arg21 : memref<128x128xbf16, #tpu.memory_space<vmem>>)
    } else {
    }
    %c0_i32_1 = arith.constant 0 : i32
    %3 = arith.cmpi sgt, %arg0, %c0_i32_1 : i32
    %4 = arith.extui %3 : i1 to i32
    %c0_i32_2 = arith.constant 0 : i32
    %5 = arith.cmpi ne, %4, %c0_i32_2 : i32
    scf.if %5 {
      %c0_45 = arith.constant 0 : index
      %c0_46 = arith.constant 0 : index
      %85 = vector.load %arg22[%c0_45, %c0_46] : memref<128x256xf32, #tpu.memory_space<vmem>>, vector<128x256xf32>
      %c0_47 = arith.constant 0 : index
      %c0_48 = arith.constant 0 : index
      %c0_49 = arith.constant 0 : index
      %86 = vector.load %arg6[%c0_47, %c0_48, %c0_49] : memref<1x1x256xf32, #tpu.memory_space<vmem>>, vector<1x1x256xf32>
      %87 = vector.shape_cast %86 : vector<1x1x256xf32> to vector<1x256xf32>
      %c0_50 = arith.constant 0 : index
      %c0_51 = arith.constant 0 : index
      %c0_52 = arith.constant 0 : index
      %88 = vector.load %arg7[%c0_50, %c0_51, %c0_52] : memref<1x1x256xf32, #tpu.memory_space<vmem>>, vector<1x1x256xf32>
      %89 = vector.shape_cast %88 : vector<1x1x256xf32> to vector<1x256xf32>
      %cst_53 = arith.constant dense<0.000000e+00> : vector<128xf32>
      %90 = vector.multi_reduction <add>, %85, %cst_53 [1] : vector<128x256xf32> to vector<128xf32>
      %91 = vector.shape_cast %90 : vector<128xf32> to vector<128x1xf32>
      %cst_54 = arith.constant 2.560000e+02 : f32
      %92 = vector.broadcast %cst_54 : f32 to vector<128x1xf32>
      %93 = arith.divf %91, %92 : vector<128x1xf32>
      %94 = arith.mulf %85, %85 : vector<128x256xf32>
      %cst_55 = arith.constant dense<0.000000e+00> : vector<128xf32>
      %95 = vector.multi_reduction <add>, %94, %cst_55 [1] : vector<128x256xf32> to vector<128xf32>
      %96 = vector.shape_cast %95 : vector<128xf32> to vector<128x1xf32>
      %cst_56 = arith.constant 2.560000e+02 : f32
      %97 = vector.broadcast %cst_56 : f32 to vector<128x1xf32>
      %98 = arith.divf %96, %97 : vector<128x1xf32>
      %99 = arith.mulf %93, %93 : vector<128x1xf32>
      %100 = arith.subf %98, %99 : vector<128x1xf32>
      %cst_57 = arith.constant 0.000000e+00 : f32
      %101 = vector.broadcast %cst_57 : f32 to vector<128x1xf32>
      %102 = arith.maximumf %100, %101 : vector<128x1xf32>
      %103 = vector.broadcast %93 : vector<128x1xf32> to vector<128x256xf32>
      %104 = arith.subf %85, %103 : vector<128x256xf32>
      %cst_58 = arith.constant 9.99999974E-6 : f32
      %105 = vector.broadcast %cst_58 : f32 to vector<128x1xf32>
      %106 = arith.addf %102, %105 : vector<128x1xf32>
      %107 = math.rsqrt %106 : vector<128x1xf32>
      %108 = vector.broadcast %107 : vector<128x1xf32> to vector<128x256xf32>
      %109 = arith.mulf %104, %108 : vector<128x256xf32>
      %110 = vector.broadcast %87 : vector<1x256xf32> to vector<128x256xf32>
      %111 = arith.mulf %109, %110 : vector<128x256xf32>
      %112 = vector.broadcast %89 : vector<1x256xf32> to vector<128x256xf32>
      %113 = arith.addf %111, %112 : vector<128x256xf32>
      %cst_59 = arith.constant 0.000000e+00 : f32
      %114 = vector.broadcast %cst_59 : f32 to vector<128x256xf32>
      %115 = arith.maximumf %113, %114 : vector<128x256xf32>
      %c0_60 = arith.constant 0 : index
      %c0_61 = arith.constant 0 : index
      %116 = vector.load %arg23[%c0_60, %c0_61] : memref<128x256xf32, #tpu.memory_space<vmem>>, vector<128x256xf32>
      tpu.vector_store %arg23[%c0_60, %c0_61], %115 {strides = array<i32>} : memref<128x256xf32, #tpu.memory_space<vmem>>, vector<128x256xf32>,
    } else {
    }
    %c0 = arith.constant 0 : index
    %c0_3 = arith.constant 0 : index
    %6 = vector.load %arg23[%c0, %c0_3] : memref<128x256xf32, #tpu.memory_space<vmem>>, vector<128x256xf32>
    %cst = arith.constant 0.000000e+00 : f32
    %7 = vector.broadcast %cst : f32 to vector<128x256xf32>
    %8 = arith.maximumf %6, %7 : vector<128x256xf32>
    %cst_4 = arith.constant 1.000000e-07 : f32
    %9 = vector.broadcast %cst_4 : f32 to vector<128x256xf32>
    %10 = arith.addf %8, %9 : vector<128x256xf32>
    %cst_5 = arith.constant 0.00999999977 : f32
    %11 = vector.broadcast %cst_5 : f32 to vector<128x256xf32>
    %12 = arith.mulf %11, %10 : vector<128x256xf32>
    %13 = math.exp %12 : vector<128x256xf32>
    %cst_6 = arith.constant 1.000000e+00 : f32
    %14 = vector.broadcast %cst_6 : f32 to vector<128x256xf32>
    %15 = arith.subf %13, %14 : vector<128x256xf32>
    %16 = arith.mulf %15, %10 : vector<128x256xf32>
    %17 = tpu.concatenate %10, %16, %15 in 1 : vector<128x256xf32>, vector<128x256xf32>, vector<128x256xf32> -> vector<128x768xf32>
    %18 = arith.truncf %17 : vector<128x768xf32> to vector<128x768xbf16>
    %c0_7 = arith.constant 0 : index
    %c0_8 = arith.constant 0 : index
    %19 = vector.load %arg21[%c0_7, %c0_8] : memref<128x128xbf16, #tpu.memory_space<vmem>>, vector<128x128xbf16>
    %cst_9 = arith.constant dense<0.000000e+00> : vector<128x768xf32>
    %20 = tpu.matmul %19, %18, %cst_9 {dimension_numbers = #tpu.dot_dimension_numbers<[1], [0], [0], [1], [0, 0, 1, 1], [], []>} : vector<128x128xbf16>, vector<128x768xbf16>, vector<128x768xf32> -> vector<128x768xf32>
    %21 = vector.extract_strided_slice %20 {offsets = [0, 0], sizes = [128, 256], strides = [1, 1]} : vector<128x768xf32> to vector<128x256xf32>
    %22 = vector.extract_strided_slice %20 {offsets = [0, 256], sizes = [128, 256], strides = [1, 1]} : vector<128x768xf32> to vector<128x256xf32>
    %23 = arith.addf %21, %22 : vector<128x256xf32>
    %c0_10 = arith.constant 0 : index
    %c0_11 = arith.constant 0 : index
    %24 = vector.load %arg5[%c0_10, %c0_11] : memref<128x1xf32, #tpu.memory_space<vmem>>, vector<128x1xf32>
    %25 = vector.extract_strided_slice %20 {offsets = [0, 512], sizes = [128, 256], strides = [1, 1]} : vector<128x768xf32> to vector<128x256xf32>
    %26 = vector.broadcast %24 : vector<128x1xf32> to vector<128x256xf32>
    %27 = arith.addf %26, %25 : vector<128x256xf32>
    %cst_12 = arith.constant 9.99999996E-13 : f32
    %28 = vector.broadcast %cst_12 : f32 to vector<128x256xf32>
    %29 = arith.maximumf %27, %28 : vector<128x256xf32>
    %30 = tpu.reciprocal %29 {approx = true} : vector<128x256xf32> -> vector<128x256xf32>
    %31 = arith.mulf %23, %30 : vector<128x256xf32>
    %32 = arith.addf %31, %6 : vector<128x256xf32>
    %33 = arith.truncf %32 : vector<128x256xf32> to vector<128x256xbf16>
    %c0_13 = arith.constant 0 : index
    %c0_14 = arith.constant 0 : index
    %c0_15 = arith.constant 0 : index
    %34 = vector.load %arg8[%c0_13, %c0_14, %c0_15] : memref<1x256x512xbf16, #tpu.memory_space<vmem>>, vector<1x256x512xbf16>
    %35 = vector.shape_cast %34 : vector<1x256x512xbf16> to vector<256x512xbf16>
    %cst_16 = arith.constant dense<0.000000e+00> : vector<128x512xf32>
    %36 = tpu.matmul %33, %35, %cst_16 {dimension_numbers = #tpu.dot_dimension_numbers<[1], [0], [0], [1], [0, 0, 1, 1], [], []>} : vector<128x256xbf16>, vector<256x512xbf16>, vector<128x512xf32> -> vector<128x512xf32>
    %c0_17 = arith.constant 0 : index
    %c0_18 = arith.constant 0 : index
    %c0_19 = arith.constant 0 : index
    %37 = vector.load %arg9[%c0_17, %c0_18, %c0_19] : memref<1x1x512xf32, #tpu.memory_space<vmem>>, vector<1x1x512xf32>
    %38 = vector.shape_cast %37 : vector<1x1x512xf32> to vector<1x512xf32>
    %39 = vector.broadcast %38 : vector<1x512xf32> to vector<128x512xf32>
    %40 = arith.addf %36, %39 : vector<128x512xf32>
    %c0_20 = arith.constant 0 : index
    %c0_21 = arith.constant 0 : index
    %c0_22 = arith.constant 0 : index
    %41 = vector.load %arg10[%c0_20, %c0_21, %c0_22] : memref<1x1x512xf32, #tpu.memory_space<vmem>>, vector<1x1x512xf32>
    %42 = vector.shape_cast %41 : vector<1x1x512xf32> to vector<1x512xf32>
    %c0_23 = arith.constant 0 : index
    %c0_24 = arith.constant 0 : index
    %c0_25 = arith.constant 0 : index
    %43 = vector.load %arg11[%c0_23, %c0_24, %c0_25] : memref<1x1x512xf32, #tpu.memory_space<vmem>>, vector<1x1x512xf32>
    %44 = vector.shape_cast %43 : vector<1x1x512xf32> to vector<1x512xf32>
    %cst_26 = arith.constant dense<0.000000e+00> : vector<128xf32>
    %45 = vector.multi_reduction <add>, %40, %cst_26 [1] : vector<128x512xf32> to vector<128xf32>
    %46 = vector.shape_cast %45 : vector<128xf32> to vector<128x1xf32>
    %cst_27 = arith.constant 5.120000e+02 : f32
    %47 = vector.broadcast %cst_27 : f32 to vector<128x1xf32>
    %48 = arith.divf %46, %47 : vector<128x1xf32>
    %49 = arith.mulf %40, %40 : vector<128x512xf32>
    %cst_28 = arith.constant dense<0.000000e+00> : vector<128xf32>
    %50 = vector.multi_reduction <add>, %49, %cst_28 [1] : vector<128x512xf32> to vector<128xf32>
    %51 = vector.shape_cast %50 : vector<128xf32> to vector<128x1xf32>
    %cst_29 = arith.constant 5.120000e+02 : f32
    %52 = vector.broadcast %cst_29 : f32 to vector<128x1xf32>
    %53 = arith.divf %51, %52 : vector<128x1xf32>
    %54 = arith.mulf %48, %48 : vector<128x1xf32>
    %55 = arith.subf %53, %54 : vector<128x1xf32>
    %cst_30 = arith.constant 0.000000e+00 : f32
    %56 = vector.broadcast %cst_30 : f32 to vector<128x1xf32>
    %57 = arith.maximumf %55, %56 : vector<128x1xf32>
    %58 = vector.broadcast %48 : vector<128x1xf32> to vector<128x512xf32>
    %59 = arith.subf %40, %58 : vector<128x512xf32>
    %cst_31 = arith.constant 9.99999974E-6 : f32
    %60 = vector.broadcast %cst_31 : f32 to vector<128x1xf32>
    %61 = arith.addf %57, %60 : vector<128x1xf32>
    %62 = math.rsqrt %61 : vector<128x1xf32>
    %63 = vector.broadcast %62 : vector<128x1xf32> to vector<128x512xf32>
    %64 = arith.mulf %59, %63 : vector<128x512xf32>
    %65 = vector.broadcast %42 : vector<1x512xf32> to vector<128x512xf32>
    %66 = arith.mulf %64, %65 : vector<128x512xf32>
    %67 = vector.broadcast %44 : vector<1x512xf32> to vector<128x512xf32>
    %68 = arith.addf %66, %67 : vector<128x512xf32>
    %cst_32 = arith.constant 0.000000e+00 : f32
    %69 = vector.broadcast %cst_32 : f32 to vector<128x512xf32>
    %70 = arith.maximumf %68, %69 : vector<128x512xf32>
    %71 = arith.truncf %70 : vector<128x512xf32> to vector<128x512xbf16>
    %c0_33 = arith.constant 0 : index
    %c0_34 = arith.constant 0 : index
    %c0_35 = arith.constant 0 : index
    %72 = vector.load %arg12[%c0_33, %c0_34, %c0_35] : memref<1x512x256xbf16, #tpu.memory_space<vmem>>, vector<1x512x256xbf16>
    %73 = vector.shape_cast %72 : vector<1x512x256xbf16> to vector<512x256xbf16>
    %cst_36 = arith.constant dense<0.000000e+00> : vector<128x256xf32>
    %74 = tpu.matmul %71, %73, %cst_36 {dimension_numbers = #tpu.dot_dimension_numbers<[1], [0], [0], [1], [0, 0, 1, 1], [], []>} : vector<128x512xbf16>, vector<512x256xbf16>, vector<128x256xf32> -> vector<128x256xf32>
    %c0_37 = arith.constant 0 : index
    %c0_38 = arith.constant 0 : index
    %c0_39 = arith.constant 0 : index
    %75 = vector.load %arg13[%c0_37, %c0_38, %c0_39] : memref<1x1x256xf32, #tpu.memory_space<vmem>>, vector<1x1x256xf32>
    %76 = vector.shape_cast %75 : vector<1x1x256xf32> to vector<1x256xf32>
    %77 = vector.broadcast %76 : vector<1x256xf32> to vector<128x256xf32>
    %78 = arith.addf %74, %77 : vector<128x256xf32>
    %c0_40 = arith.constant 0 : index
    %c0_41 = arith.constant 0 : index
    %79 = vector.load %arg22[%c0_40, %c0_41] : memref<128x256xf32, #tpu.memory_space<vmem>>, vector<128x256xf32>
    %80 = arith.addf %79, %78 : vector<128x256xf32>
    %c0_42 = arith.constant 0 : index
    %c0_43 = arith.constant 0 : index
    %81 = vector.load %arg22[%c0_42, %c0_43] : memref<128x256xf32, #tpu.memory_space<vmem>>, vector<128x256xf32>
    tpu.vector_store %arg22[%c0_42, %c0_43], %80 {strides = array<i32>} : memref<128x256xf32, #tpu.memory_space<vmem>>, vector<128x256xf32>,
    %c24_i32 = arith.constant 24 : i32
    %82 = arith.cmpi eq, %arg0, %c24_i32 : i32
    %83 = arith.extui %82 : i1 to i32
    %c0_i32_44 = arith.constant 0 : i32
    %84 = arith.cmpi ne, %83, %c0_i32_44 : i32
    scf.if %84 {
      %c0_45 = arith.constant 0 : index
      %c0_46 = arith.constant 0 : index
      %85 = vector.load %arg14[%c0_45, %c0_46] : memref<1x256xf32, #tpu.memory_space<vmem>>, vector<1x256xf32>
      %c0_47 = arith.constant 0 : index
      %c0_48 = arith.constant 0 : index
      %86 = vector.load %arg15[%c0_47, %c0_48] : memref<1x256xf32, #tpu.memory_space<vmem>>, vector<1x256xf32>
      %cst_49 = arith.constant dense<0.000000e+00> : vector<128xf32>
      %87 = vector.multi_reduction <add>, %80, %cst_49 [1] : vector<128x256xf32> to vector<128xf32>
      %88 = vector.shape_cast %87 : vector<128xf32> to vector<128x1xf32>
      %cst_50 = arith.constant 2.560000e+02 : f32
      %89 = vector.broadcast %cst_50 : f32 to vector<128x1xf32>
      %90 = arith.divf %88, %89 : vector<128x1xf32>
      %91 = arith.mulf %80, %80 : vector<128x256xf32>
      %cst_51 = arith.constant dense<0.000000e+00> : vector<128xf32>
      %92 = vector.multi_reduction <add>, %91, %cst_51 [1] : vector<128x256xf32> to vector<128xf32>
      %93 = vector.shape_cast %92 : vector<128xf32> to vector<128x1xf32>
      %cst_52 = arith.constant 2.560000e+02 : f32
      %94 = vector.broadcast %cst_52 : f32 to vector<128x1xf32>
      %95 = arith.divf %93, %94 : vector<128x1xf32>
      %96 = arith.mulf %90, %90 : vector<128x1xf32>
      %97 = arith.subf %95, %96 : vector<128x1xf32>
      %cst_53 = arith.constant 0.000000e+00 : f32
      %98 = vector.broadcast %cst_53 : f32 to vector<128x1xf32>
      %99 = arith.maximumf %97, %98 : vector<128x1xf32>
      %100 = vector.broadcast %90 : vector<128x1xf32> to vector<128x256xf32>
      %101 = arith.subf %80, %100 : vector<128x256xf32>
      %cst_54 = arith.constant 9.99999974E-6 : f32
      %102 = vector.broadcast %cst_54 : f32 to vector<128x1xf32>
      %103 = arith.addf %99, %102 : vector<128x1xf32>
      %104 = math.rsqrt %103 : vector<128x1xf32>
      %105 = vector.broadcast %104 : vector<128x1xf32> to vector<128x256xf32>
      %106 = arith.mulf %101, %105 : vector<128x256xf32>
      %107 = vector.broadcast %85 : vector<1x256xf32> to vector<128x256xf32>
      %108 = arith.mulf %106, %107 : vector<128x256xf32>
      %109 = vector.broadcast %86 : vector<1x256xf32> to vector<128x256xf32>
      %110 = arith.addf %108, %109 : vector<128x256xf32>
      %cst_55 = arith.constant 0.000000e+00 : f32
      %111 = vector.broadcast %cst_55 : f32 to vector<128x256xf32>
      %112 = arith.maximumf %110, %111 : vector<128x256xf32>
      %c0_56 = arith.constant 0 : index
      %c0_57 = arith.constant 0 : index
      %113 = vector.load %arg16[%c0_56, %c0_57] : memref<256x128xf32, #tpu.memory_space<vmem>>, vector<256x128xf32>
      %cst_58 = arith.constant dense<0.000000e+00> : vector<128x128xf32>
      %114 = tpu.matmul %112, %113, %cst_58 {dimension_numbers = #tpu.dot_dimension_numbers<[1], [0], [0], [1], [0, 0, 1, 1], [], []>} : vector<128x256xf32>, vector<256x128xf32>, vector<128x128xf32> -> vector<128x128xf32>
      %c0_59 = arith.constant 0 : index
      %c0_60 = arith.constant 0 : index
      %115 = vector.load %arg17[%c0_59, %c0_60] : memref<1x128xf32, #tpu.memory_space<vmem>>, vector<1x128xf32>
      %116 = vector.broadcast %115 : vector<1x128xf32> to vector<128x128xf32>
      %117 = arith.addf %114, %116 : vector<128x128xf32>
      %cst_61 = arith.constant 0.000000e+00 : f32
      %118 = vector.broadcast %cst_61 : f32 to vector<128x128xf32>
      %119 = arith.maximumf %117, %118 : vector<128x128xf32>
      %c0_62 = arith.constant 0 : index
      %c0_63 = arith.constant 0 : index
      %120 = vector.load %arg18[%c0_62, %c0_63] : memref<128x1xf32, #tpu.memory_space<vmem>>, vector<128x1xf32>
      %cst_64 = arith.constant dense<0.000000e+00> : vector<128x1xf32>
      %121 = tpu.matmul %119, %120, %cst_64 {dimension_numbers = #tpu.dot_dimension_numbers<[1], [0], [0], [1], [0, 0, 1, 1], [], []>} : vector<128x128xf32>, vector<128x1xf32>, vector<128x1xf32> -> vector<128x1xf32>
      %c0_65 = arith.constant 0 : index
      %c0_66 = arith.constant 0 : index
      %122 = vector.load %arg19[%c0_65, %c0_66] : memref<1x1xf32, #tpu.memory_space<vmem>>, vector<1x1xf32>
      %123 = vector.broadcast %122 : vector<1x1xf32> to vector<128x1xf32>
      %124 = arith.addf %121, %123 : vector<128x1xf32>
      %c0_67 = arith.constant 0 : index
      %c0_68 = arith.constant 0 : index
      %125 = vector.load %arg20[%c0_67, %c0_68] : memref<128x1xf32, #tpu.memory_space<vmem>>, vector<128x1xf32>
      tpu.vector_store %arg20[%c0_67, %c0_68], %124 {strides = array<i32>} : memref<128x1xf32, #tpu.memory_space<vmem>>, vector<128x1xf32>,
    } else {
    }
    return
  }
  func.func @transform_0(%arg0: i32) -> (i32, i32) {
    %c0_i32 = arith.constant 0 : i32
    %c0_i32_0 = arith.constant 0 : i32
    %c0_i32_1 = arith.constant 0 : i32
    return %c0_i32, %c0_i32_0 : i32, i32
  }
  func.func @transform_1(%arg0: i32) -> (i32, i32) {
    %c0_i32 = arith.constant 0 : i32
    %c0_i32_0 = arith.constant 0 : i32
    %c0_i32_1 = arith.constant 0 : i32
    return %c0_i32, %c0_i32_0 : i32, i32
  }
  func.func @transform_2(%arg0: i32) -> (i32, i32) {
    %c0_i32 = arith.constant 0 : i32
    %c0_i32_0 = arith.constant 0 : i32
    %c0_i32_1 = arith.constant 0 : i32
    return %c0_i32, %c0_i32_0 : i32, i32
  }
  func.func @transform_4(%arg0: i32) -> (i32, i32) {
    %c0_i32 = arith.constant 0 : i32
    %c0_i32_0 = arith.constant 0 : i32
    %c0_i32_1 = arith.constant 0 : i32
    return %c0_i32, %c0_i32_0 : i32, i32
  }
  func.func @transform_5(%arg0: i32) -> (i32, i32, i32) {
    %c0_i32 = arith.constant 0 : i32
    %c0_i32_0 = arith.constant 0 : i32
    %c0_i32_1 = arith.constant 0 : i32
    return %arg0, %c0_i32, %c0_i32_0 : i32, i32, i32
  }
  func.func @transform_6(%arg0: i32) -> (i32, i32, i32) {
    %c0_i32 = arith.constant 0 : i32
    %c0_i32_0 = arith.constant 0 : i32
    %c0_i32_1 = arith.constant 0 : i32
    return %arg0, %c0_i32, %c0_i32_0 : i32, i32, i32
  }
  func.func @transform_7(%arg0: i32) -> (i32, i32, i32) {
    %c0_i32 = arith.constant 0 : i32
    %c0_i32_0 = arith.constant 0 : i32
    %c0_i32_1 = arith.constant 0 : i32
    return %arg0, %c0_i32, %c0_i32_0 : i32, i32, i32
  }
  func.func @transform_8(%arg0: i32) -> (i32, i32, i32) {
    %c0_i32 = arith.constant 0 : i32
    %c0_i32_0 = arith.constant 0 : i32
    %c0_i32_1 = arith.constant 0 : i32
    return %arg0, %c0_i32, %c0_i32_0 : i32, i32, i32
  }
  func.func @transform_9(%arg0: i32) -> (i32, i32, i32) {
    %c0_i32 = arith.constant 0 : i32
    %c0_i32_0 = arith.constant 0 : i32
    %c0_i32_1 = arith.constant 0 : i32
    return %arg0, %c0_i32, %c0_i32_0 : i32, i32, i32
  }
  func.func @transform_10(%arg0: i32) -> (i32, i32, i32) {
    %c0_i32 = arith.constant 0 : i32
    %c0_i32_0 = arith.constant 0 : i32
    %c0_i32_1 = arith.constant 0 : i32
    return %arg0, %c0_i32, %c0_i32_0 : i32, i32, i32
  }
  func.func @transform_11(%arg0: i32) -> (i32, i32, i32) {
    %c0_i32 = arith.constant 0 : i32
    %c0_i32_0 = arith.constant 0 : i32
    %c0_i32_1 = arith.constant 0 : i32
    return %arg0, %c0_i32, %c0_i32_0 : i32, i32, i32
  }
  func.func @transform_12(%arg0: i32) -> (i32, i32, i32) {
    %c0_i32 = arith.constant 0 : i32
    %c0_i32_0 = arith.constant 0 : i32
    %c0_i32_1 = arith.constant 0 : i32
    return %arg0, %c0_i32, %c0_i32_0 : i32, i32, i32
  }
  func.func @transform_13(%arg0: i32) -> (i32, i32) {
    %c0_i32 = arith.constant 0 : i32
    %c0_i32_0 = arith.constant 0 : i32
    %c0_i32_1 = arith.constant 0 : i32
    return %c0_i32, %c0_i32_0 : i32, i32
  }
  func.func @transform_14(%arg0: i32) -> (i32, i32) {
    %c0_i32 = arith.constant 0 : i32
    %c0_i32_0 = arith.constant 0 : i32
    %c0_i32_1 = arith.constant 0 : i32
    return %c0_i32, %c0_i32_0 : i32, i32
  }
  func.func @transform_15(%arg0: i32) -> (i32, i32) {
    %c0_i32 = arith.constant 0 : i32
    %c0_i32_0 = arith.constant 0 : i32
    %c0_i32_1 = arith.constant 0 : i32
    return %c0_i32, %c0_i32_0 : i32, i32
  }
  func.func @transform_16(%arg0: i32) -> (i32, i32) {
    %c0_i32 = arith.constant 0 : i32
    %c0_i32_0 = arith.constant 0 : i32
    %c0_i32_1 = arith.constant 0 : i32
    return %c0_i32, %c0_i32_0 : i32, i32
  }
  func.func @transform_17(%arg0: i32) -> (i32, i32) {
    %c0_i32 = arith.constant 0 : i32
    %c0_i32_0 = arith.constant 0 : i32
    %c0_i32_1 = arith.constant 0 : i32
    return %c0_i32, %c0_i32_0 : i32, i32
  }
  func.func @transform_18(%arg0: i32) -> (i32, i32) {
    %c0_i32 = arith.constant 0 : i32
    %c0_i32_0 = arith.constant 0 : i32
    %c0_i32_1 = arith.constant 0 : i32
    return %c0_i32, %c0_i32_0 : i32, i32
  }
  func.func @transform_19(%arg0: i32) -> (i32, i32) {
    %c0_i32 = arith.constant 0 : i32
    %c0_i32_0 = arith.constant 0 : i32
    %c0_i32_1 = arith.constant 0 : i32
    return %c0_i32, %c0_i32_0 : i32, i32
  }
}

</mosaic_0001>

<bundles_post_ra>
// kernel: gnn_forward.1
= control target key start
LH: loop header
LB: loop body
LE: loop exit
PB: predicated region body
PF: predicated region fallthrough
CT: control target
= control target key end

     0   :  { %s6657_s20 = smov 0   ;;  %s9698_s0 = inlined_call_operand.vmem [shape: f32[128,146], index: 0, kind: input, shape index: {}]   ;;  %s9699_s1 = inlined_call_operand.vmem [shape: f32[146,256], index: 1, kind: input, shape index: {}]   ;;  %s9700_s2 = inlined_call_operand.vmem [shape: f32[1,256], index: 2, kind: input, shape index: {}]   ;;  %s9701_s3 = inlined_call_operand.vmem [shape: bf16[128,128], index: 3, kind: input, shape index: {}]   ;;  %s9702_s4 = inlined_call_operand.vmem [shape: f32[128,1], index: 4, kind: input, shape index: {}]   ;;  %s9703_s5 = inlined_call_operand.vmem [shape: f32[25,1,256], index: 5, kind: input, shape index: {}]   ;;  %s9704_s6 = inlined_call_operand.vmem [shape: f32[25,1,256], index: 6, kind: input, shape index: {}]   ;;  %s9705_s7 = inlined_call_operand.vmem [shape: bf16[25,256,512], index: 7, kind: input, shape index: {}]   ;;  %s9706_s8 = inlined_call_operand.vmem [shape: f32[25,1,512], index: 8, kind: input, shape index: {}]   ;;  %s9707_s9 = inlined_call_operand.vmem [shape: f32[25,1,512], index: 9, kind: input, shape index: {}]   ;;  %s9708_s10 = inlined_call_operand.vmem [shape: f32[25,1,512], index: 10, kind: input, shape index: {}]   ;;  %s9709_s11 = inlined_call_operand.vmem [shape: bf16[25,512,256], index: 11, kind: input, shape index: {}]   ;;  %s9710_s12 = inlined_call_operand.vmem [shape: f32[25,1,256], index: 12, kind: input, shape index: {}]   ;;  %s9711_s13 = inlined_call_operand.vmem [shape: f32[1,256], index: 13, kind: input, shape index: {}]   ;;  %s9712_s14 = inlined_call_operand.vmem [shape: f32[1,256], index: 14, kind: input, shape index: {}]   ;;  %s9713_s15 = inlined_call_operand.vmem [shape: f32[256,128], index: 15, kind: input, shape index: {}]   ;;  %s9714_s16 = inlined_call_operand.vmem [shape: f32[1,128], index: 16, kind: input, shape index: {}]   ;;  %s9715_s17 = inlined_call_operand.vmem [shape: f32[128,1], index: 17, kind: input, shape index: {}]   ;;  %s9716_s18 = inlined_call_operand.<no memory space> [shape: f32[1,1], index: 18, kind: input, shape index: {}]   ;;  %s9717_s19 = inlined_call_operand.vmem [shape: f32[128,1], index: 19, kind: output, shape index: {}]  }
   0x1   :  { %9777 = sst [smem:[#allocation59_spill]] %s9698_s0  ;;  %v24_v0 = vstv %s9716_s18 }
   0x2   :  { %9778 = sst [smem:[#allocation60_spill]] %s9699_s1  ;;  %25 = vst [vmem:[#allocation6] sm:$0x1] %v24_v0 }
   0x3   :  { %9779 = sst [smem:[#allocation61_spill]] %s9700_s2 }
   0x4   :  { %9780 = sst [smem:[#allocation62_spill]] %s9701_s3 }
   0x5   :  { %9781 = sst [smem:[#allocation63_spill]] %s9705_s7 }
   0x6   :  { %9782 = sst [smem:[#allocation64_spill]] %s9714_s16 }
   0x7   :  { %9783 = sst [smem:[#allocation65_spill]] %s9717_s19 }
   0x8 LB: > { %9784 = sst [smem:[#allocation9_spill]] %s6550_s20  ;;  %s6663_s21 = sadd.s32 4294967295, %s6550_s20   ;;  %s6550_s20 = sphi %s6657_s20, %s31_s20  }
   0x9   : > { %p5645_p0 = scmp.ge.s32.totalorder %s6550_s20, 1  ;;  %p574_p1 = scmp.lt.s32.totalorder %s6550_s20, 26 }
   0xb   : > { %p575_p2 = pnand %p5645_p0, %p574_p1 }
   0xd   : > { %578 = sbr.rel (%p575_p2) target bundleno = 2201 (0x899), region = 92 }
  0x12   : > { %p652_p3 = scmp.lt.s32.totalorder %s6663_s21, 24  ;;  %s9785_s7 = sld [smem:[#allocation63_spill]] }
  0x13   : > { %p5656_p4 = scmp.ne.s32.totalorder %s6663_s21, 0 }
  0x14   : > { %s653_s18 = scalar_select %p652_p3, %s6663_s21, 24 }
  0x15   : > { %690 = sbr.rel (%p5656_p4) target bundleno = 306 (0x132), region = 96  ;;  %s9786_s2 = sld [smem:[#allocation62_spill]] (!%p5656_p4) }
  0x16   : > { %s6669_s1 = sshll.u32 %s653_s18, 1  ;;  %s5850_s22 = sshll.u32 %s653_s18, 9 }
  0x17   : > { %s6684_s0 = sshll.u32 %s653_s18, 2  ;;  %s6701_s18 = scalar_lea.vmem %s9709_s11, %s5850_s22 }
  0x18   : > { %s6682_s29 = scalar_lea.vmem %s9785_s7, %s5850_s22  ;;  %s676_s26 = scalar_lea.vmem %s9708_s10, %s6684_s0 }
  0x1b   : > { %v724_v1 = vld [vmem:[%s9786_s2] sm:$0xff]  ;;  %v726_v2 = vld [vmem:[%s9786_s2 + $0x8] sm:$0xff]  ;;  %v728_v3 = vld [vmem:[%s9786_s2 + $0x10] sm:$0xff] }
  0x1c   : > { %725 = vst [vmem:[#allocation2] sm:$0xff] %v724_v1  ;;  %727 = vst [vmem:[#allocation2 + $0x8] sm:$0xff] %v726_v2  ;;  %v730_v4 = vld [vmem:[%s9786_s2 + $0x18] sm:$0xff]  ;;  %v732_v5 = vld [vmem:[%s9786_s2 + $0x20] sm:$0xff] }
  0x1d   : > { %729 = vst [vmem:[#allocation2 + $0x10] sm:$0xff] %v728_v3  ;;  %v734_v6 = vld [vmem:[%s9786_s2 + $0x28] sm:$0xff]  ;;  %731 = vst [vmem:[#allocation2 + $0x18] sm:$0xff] %v730_v4  ;;  %v736_v7 = vld [vmem:[%s9786_s2 + $0x30] sm:$0xff] }
  0x1e   : > { %733 = vst [vmem:[#allocation2 + $0x20] sm:$0xff] %v732_v5  ;;  %735 = vst [vmem:[#allocation2 + $0x28] sm:$0xff] %v734_v6  ;;  %v738_v8 = vld [vmem:[%s9786_s2 + $0x38] sm:$0xff] }
  0x1f   : > { %737 = vst [vmem:[#allocation2 + $0x30] sm:$0xff] %v736_v7  ;;  %739 = vst [vmem:[#allocation2 + $0x38] sm:$0xff] %v738_v8 }
  0x20   : > { %747 = vsyncadd [#allocation5], 1024  ;;  %s9787_s16 = sld [smem:[#allocation60_spill]]  ;;  %vm879_vm0 = vcmask 1041408   ;;  %vm830_vm1 = vcmask 146432  }
  0x21   : > { %s9788_s23 = sld [smem:[#allocation59_spill]] }
  0x22   : > { %s9789_s20 = sld [smem:[#allocation61_spill]] }
  0x26   : > { %v811_v9 = vld [vmem:[%s9787_s16 + $0xf8] sm:$0xff]  ;;  %v810_v10 = vld [vmem:[%s9787_s16 + $0xf0] sm:$0xff]  ;;  %v809_v11 = vld [vmem:[%s9787_s16 + $0xe8] sm:$0xff] }
  0x27   : > { %886 = vmatprep.subr.mxu0 %v811_v9  ;;  %6020 = vmatprep.subr.mxu1 %v811_v9  ;;  %v808_v12 = vld [vmem:[%s9787_s16 + $0xe0] sm:$0xff]  ;;  %v807_v13 = vld [vmem:[%s9787_s16 + $0xd8] sm:$0xff]  ;;  %v806_v14 = vld [vmem:[%s9787_s16 + $0xd0] sm:$0xff] }
  0x28   : > { %887 = vmatpush1.msra.mxu0 %v810_v10  ;;  %6039 = vmatpush1.msra.mxu1 %v810_v10  ;;  %v805_v15 = vld [vmem:[%s9787_s16 + $0xc8] sm:$0xff]  ;;  %v804_v16 = vld [vmem:[%s9787_s16 + $0xc0] sm:$0xff]  ;;  %v803_v17 = vld [vmem:[%s9787_s16 + $0xb8] sm:$0xff] }
  0x29   : > { %888 = vmatprep.subr.mxu0 %v809_v11  ;;  %6021 = vmatprep.subr.mxu1 %v809_v11  ;;  %v802_v18 = vld [vmem:[%s9787_s16 + $0xb0] sm:$0xff]  ;;  %v801_v19 = vld [vmem:[%s9787_s16 + $0xa8] sm:$0xff]  ;;  %v800_v20 = vld [vmem:[%s9787_s16 + $0xa0] sm:$0xff] }
  0x2a   : > { %889 = vmatpush1.msra.mxu0 %v808_v12  ;;  %6040 = vmatpush1.msra.mxu1 %v808_v12  ;;  %v799_v21 = vld [vmem:[%s9787_s16 + $0x98] sm:$0xff]  ;;  %v798_v22 = vld [vmem:[%s9787_s16 + $0x90] sm:$0xff]  ;;  %v797_v23 = vld [vmem:[%s9787_s16 + $0x88] sm:$0xff] }
  0x2b   : > { %890 = vmatprep.subr.mxu0 %v807_v13  ;;  %6022 = vmatprep.subr.mxu1 %v807_v13  ;;  %v796_v24 = vld [vmem:[%s9787_s16 + $0x80] sm:$0xff]  ;;  %v795_v25 = vld [vmem:[%s9787_s16 + $0x78] sm:$0xff]  ;;  %v794_v26 = vld [vmem:[%s9787_s16 + $0x70] sm:$0xff] }
  0x2c   : > { %891 = vmatpush1.msra.mxu0 %v806_v14  ;;  %6041 = vmatpush1.msra.mxu1 %v806_v14  ;;  %v793_v27 = vld [vmem:[%s9787_s16 + $0x68] sm:$0xff]  ;;  %v792_v28 = vld [vmem:[%s9787_s16 + $0x60] sm:$0xff]  ;;  %v791_v29 = vld [vmem:[%s9787_s16 + $0x58] sm:$0xff] }
  0x2d   : > { %892 = vmatprep.subr.mxu0 %v805_v15  ;;  %6023 = vmatprep.subr.mxu1 %v805_v15  ;;  %v790_v30 = vld [vmem:[%s9787_s16 + $0x50] sm:$0xff]  ;;  %v789_v31 = vld [vmem:[%s9787_s16 + $0x48] sm:$0xff]  ;;  %v788_v32 = vld [vmem:[%s9787_s16 + $0x40] sm:$0xff]  ;;  %v6552_v15 = vmov 0.0  }
  0x2e   : > { %893 = vmatpush1.msra.mxu0 %v804_v16  ;;  %6042 = vmatpush1.msra.mxu1 %v804_v16  ;;  %v787_v33 = vld [vmem:[%s9787_s16 + $0x38] sm:$0xff]  ;;  %v786_v34 = vld [vmem:[%s9787_s16 + $0x30] sm:$0xff]  ;;  %v785_v35 = vld [vmem:[%s9787_s16 + $0x28] sm:$0xff]  ;;  %1079 = vst [vmem:[#allocation3 + $0xb0] sm:$0xff] %v6552_v15  ;;  %v820_v16 = vlaneseq }
  0x2f   : > { %894 = vmatprep.subr.mxu0 %v803_v17  ;;  %6024 = vmatprep.subr.mxu1 %v803_v17  ;;  %v784_v36 = vld [vmem:[%s9787_s16 + $0x20] sm:$0xff]  ;;  %v783_v37 = vld [vmem:[%s9787_s16 + $0x18] sm:$0xff]  ;;  %v782_v38 = vld [vmem:[%s9787_s16 + $0x10] sm:$0xff]  ;;  %1080 = vst [vmem:[#allocation3] sm:$0xff] %v6552_v15 }
  0x30   : > { %895 = vmatpush1.msra.mxu0 %v802_v18  ;;  %6043 = vmatpush1.msra.mxu1 %v802_v18  ;;  %v781_v39 = vld [vmem:[%s9787_s16 + $0x8] sm:$0xff]  ;;  %v780_v40 = vld [vmem:[%s9787_s16] sm:$0xff]  ;;  %v815_v43 = vld [vmem:[%s9787_s16 + $0x118] sm:$0xff]  ;;  %1081 = vst [vmem:[#allocation3 + $0xd8] sm:$0xff] %v6552_v15  ;;  %v821_v17 = vshrl.u32 %v820_v16, 7 }
  0x31   : > { %896 = vmatprep.subr.mxu0 %v801_v19  ;;  %6025 = vmatprep.subr.mxu1 %v801_v19  ;;  %v817_v41 = vld [vmem:[%s9787_s16 + $0x128] sm:$0x3]  ;;  %v816_v42 = vld [vmem:[%s9787_s16 + $0x120] sm:$0x3]  ;;  %v814_v44 = vld [vmem:[%s9787_s16 + $0x110] sm:$0xff]  ;;  %1082 = vst [vmem:[#allocation3 + $0x18] sm:$0xff] %v6552_v15 }
  0x32   : > { %897 = vmatpush1.msra.mxu0 %v800_v20  ;;  %6044 = vmatpush1.msra.mxu1 %v800_v20  ;;  %v813_v45 = vld [vmem:[%s9787_s16 + $0x108] sm:$0xff]  ;;  %v812_v46 = vld [vmem:[%s9787_s16 + $0x100] sm:$0xff]  ;;  %v751_v51 = vld [vmem:[%s9788_s23 + $0x18] sm:$0xff]  ;;  %1083 = vst [vmem:[#allocation3 + $0x50] sm:$0xff] %v6552_v15  ;;  %v822_v18 = vsub.s32 0, %v821_v17  ;;  %v826_v20 = vsub.s32 1, %v821_v17 }
  0x33   : > { %898 = vmatprep.subr.mxu0 %v799_v21  ;;  %6026 = vmatprep.subr.mxu1 %v799_v21  ;;  %v749_v47 = vld [vmem:[%s9788_s23 + $0x8] sm:$0xff]  ;;  %v748_v49 = vld [vmem:[%s9788_s23] sm:$0xff]  ;;  %v767_v52 = vld [vmem:[%s9788_s23 + $0x98] sm:$0xff]  ;;  %1084 = vst [vmem:[#allocation3 + $0x68] sm:$0xff] %v6552_v15 }
  0x34   : > { %899 = vmatpush1.msra.mxu0 %v798_v22  ;;  %6045 = vmatpush1.msra.mxu1 %v798_v22  ;;  %v765_v48 = vld [vmem:[%s9788_s23 + $0x88] sm:$0xff]  ;;  %v764_v50 = vld [vmem:[%s9788_s23 + $0x80] sm:$0xff]  ;;  %v750_v53 = vld [vmem:[%s9788_s23 + $0x10] sm:$0xff]  ;;  %1085 = vst [vmem:[#allocation3 + $0x30] sm:$0xff] %v6552_v15 }
  0x35   : > { %900 = vmatprep.subr.mxu0 %v797_v23  ;;  %6027 = vmatprep.subr.mxu1 %v797_v23  ;;  %v766_v54 = vld [vmem:[%s9788_s23 + $0x90] sm:$0xff]  ;;  %v753_v55 = vld [vmem:[%s9788_s23 + $0x28] sm:$0xff]  ;;  %v752_v57 = vld [vmem:[%s9788_s23 + $0x20] sm:$0xff]  ;;  %1086 = vst [vmem:[#allocation3 + $0x48] sm:$0xff] %v6552_v15 }
  0x36   : > { %901 = vmatpush1.msra.mxu0 %v796_v24  ;;  %6046 = vmatpush1.msra.mxu1 %v796_v24  ;;  %v769_v56 = vld [vmem:[%s9788_s23 + $0xa8] sm:$0xff]  ;;  %v768_v58 = vld [vmem:[%s9788_s23 + $0xa0] sm:$0xff]  ;;  %v755_v59 = vld [vmem:[%s9788_s23 + $0x38] sm:$0xff]  ;;  %1087 = vst [vmem:[#allocation3 + $0x80] sm:$0xff] %v6552_v15 }
  0x37   : > { %902 = vmatprep.subr.mxu0 %v795_v25  ;;  %6028 = vmatprep.subr.mxu1 %v795_v25  ;;  %v771_v60 = vld [vmem:[%s9788_s23 + $0xb8] sm:$0xff]  ;;  %v754_v61 = vld [vmem:[%s9788_s23 + $0x30] sm:$0xff]  ;;  %v757_v63 = vld [vmem:[%s9788_s23 + $0x48] sm:$0xff]  ;;  %1088 = vst [vmem:[#allocation3 + $0x88] sm:$0xff] %v6552_v15 }
  0x38   : > { %903 = vmatpush1.msra.mxu0 %v794_v26  ;;  %6047 = vmatpush1.msra.mxu1 %v794_v26  ;;  %v770_v62 = vld [vmem:[%s9788_s23 + $0xb0] sm:$0xff]  ;;  %v773_v0 = vld [vmem:[%s9788_s23 + $0xc8] sm:$0xff]  ;;  %v756_v1 = vld [vmem:[%s9788_s23 + $0x40] sm:$0xff]  ;;  %1089 = vst [vmem:[#allocation3 + $0xe8] sm:$0xff] %v6552_v15 }
  0x39   : > { %904 = vmatprep.subr.mxu0 %v793_v27  ;;  %6029 = vmatprep.subr.mxu1 %v793_v27  ;;  %v772_v2 = vld [vmem:[%s9788_s23 + $0xc0] sm:$0xff]  ;;  %v759_v3 = vld [vmem:[%s9788_s23 + $0x58] sm:$0xff]  ;;  %v758_v5 = vld [vmem:[%s9788_s23 + $0x50] sm:$0xff]  ;;  %1090 = vst [vmem:[#allocation3 + $0xb8] sm:$0xff] %v6552_v15 }
  0x3a   : > { %905 = vmatpush1.msra.mxu0 %v792_v28  ;;  %6048 = vmatpush1.msra.mxu1 %v792_v28  ;;  %v775_v4 = vld [vmem:[%s9788_s23 + $0xd8] sm:$0xff]  ;;  %v774_v6 = vld [vmem:[%s9788_s23 + $0xd0] sm:$0xff]  ;;  %v761_v7 = vld [vmem:[%s9788_s23 + $0x68] sm:$0xff]  ;;  %1091 = vst [vmem:[#allocation3 + $0x60] sm:$0xff] %v6552_v15 }
  0x3b   : > { %906 = vmatprep.subr.mxu0 %v791_v29  ;;  %6030 = vmatprep.subr.mxu1 %v791_v29  ;;  %v777_v8 = vld [vmem:[%s9788_s23 + $0xe8] sm:$0xff]  ;;  %v760_v9 = vld [vmem:[%s9788_s23 + $0x60] sm:$0xff]  ;;  %v763_v11 = vld [vmem:[%s9788_s23 + $0x78] sm:$0xff]  ;;  %1092 = vst [vmem:[#allocation3 + $0xf0] sm:$0xff] %v6552_v15 }
  0x3c   : > { %907 = vmatpush1.msra.mxu0 %v790_v30  ;;  %6049 = vmatpush1.msra.mxu1 %v790_v30  ;;  %v776_v10 = vld [vmem:[%s9788_s23 + $0xe0] sm:$0xff]  ;;  %v779_v12 = vld [vmem:[%s9788_s23 + $0xf8] sm:$0xff]  ;;  %v762_v13 = vld [vmem:[%s9788_s23 + $0x70] sm:$0xff]  ;;  %1093 = vst [vmem:[#allocation3 + $0x8] sm:$0xff] %v6552_v15 }
  0x3d   : > { %908 = vmatprep.subr.mxu0 %v789_v31  ;;  %6031 = vmatprep.subr.mxu1 %v789_v31  ;;  %v778_v14 = vld [vmem:[%s9788_s23 + $0xf0] sm:$0xff]  ;;  %1094 = vst [vmem:[#allocation3 + $0x78] sm:$0xff] %v6552_v15  ;;  %1095 = vst [vmem:[#allocation3 + $0x38] sm:$0xff] %v6552_v15  ;;  %v818_v19 = vld [vmem:[%s9789_s20] sm:$0x3] }
  0x3e   : > { %909 = vmatpush1.msra.mxu0 %v788_v32  ;;  %6050 = vmatpush1.msra.mxu1 %v788_v32  ;;  %1096 = vst [vmem:[#allocation3 + $0x58] sm:$0xff] %v6552_v15  ;;  %1097 = vst [vmem:[#allocation3 + $0x40] sm:$0xff] %v6552_v15  ;;  %v6961_v21 = vrot.slane %v818_v19, %v822_v18  ;;  %v6963_v22 = vrot.slane %v818_v19, %v826_v20 }
  0x3f   : > { %910 = vmatprep.subr.mxu0 %v787_v33  ;;  %6032 = vmatprep.subr.mxu1 %v787_v33  ;;  %1098 = vst [vmem:[#allocation3 + $0xc8] sm:$0xff] %v6552_v15  ;;  %1099 = vst [vmem:[#allocation3 + $0xe0] sm:$0xff] %v6552_v15 }
  0x40   : > { %911 = vmatpush1.msra.mxu0 %v786_v34  ;;  %6051 = vmatpush1.msra.mxu1 %v786_v34  ;;  %1100 = vst [vmem:[#allocation3 + $0x90] sm:$0xff] %v6552_v15  ;;  %1101 = vst [vmem:[#allocation3 + $0x70] sm:$0xff] %v6552_v15 }
  0x41   : > { %912 = vmatprep.subr.mxu0 %v785_v35  ;;  %6033 = vmatprep.subr.mxu1 %v785_v35  ;;  %1102 = vst [vmem:[#allocation3 + $0xc0] sm:$0xff] %v6552_v15  ;;  %1103 = vst [vmem:[#allocation3 + $0xa8] sm:$0xff] %v6552_v15 }
  0x42   : > { %913 = vmatpush1.msra.mxu0 %v784_v36  ;;  %6052 = vmatpush1.msra.mxu1 %v784_v36  ;;  %1104 = vst [vmem:[#allocation3 + $0xd0] sm:$0xff] %v6552_v15  ;;  %1105 = vst [vmem:[#allocation3 + $0x10] sm:$0xff] %v6552_v15 }
  0x43   : > { %914 = vmatprep.subr.mxu0 %v783_v37  ;;  %6034 = vmatprep.subr.mxu1 %v783_v37  ;;  %1106 = vst [vmem:[#allocation3 + $0x28] sm:$0xff] %v6552_v15  ;;  %1107 = vst [vmem:[#allocation3 + $0xa0] sm:$0xff] %v6552_v15 }
  0x44   : > { %915 = vmatpush1.msra.mxu0 %v782_v38  ;;  %6053 = vmatpush1.msra.mxu1 %v782_v38  ;;  %1108 = vst [vmem:[#allocation3 + $0xf8] sm:$0xff] %v6552_v15  ;;  %1109 = vst [vmem:[#allocation3 + $0x20] sm:$0xff] %v6552_v15 }
  0x45   : > { %916 = vmatprep.subr.mxu0 %v781_v39  ;;  %6035 = vmatprep.subr.mxu1 %v781_v39  ;;  %1110 = vst [vmem:[#allocation3 + $0x98] sm:$0xff] %v6552_v15 }
  0x46   : > { %917 = vmatpush1.msra.mxu0 %v780_v40  ;;  %6054 = vmatpush1.msra.mxu1 %v780_v40 }
  0x47   : > { %5657 = vmatprep.subr.msk.mxu0 %vm879_vm0, %v817_v41  ;;  %6036 = vmatprep.subr.msk.mxu1 %vm879_vm0, %v817_v41 }
  0x48   : > { %5658 = vmatpush2.msk.msra.mxu0 %vm879_vm0, %v816_v42  ;;  %6055 = vmatpush2.msk.msra.mxu1 %vm879_vm0, %v816_v42 }
  0x49   : > { %946 = vmatprep.subr.mxu0 %v815_v43  ;;  %6037 = vmatprep.subr.mxu1 %v815_v43 }
  0x4a   : > { %947 = vmatpush2.msra.mxu0 %v814_v44  ;;  %6056 = vmatpush2.msra.mxu1 %v814_v44 }
  0x4b   : > { %948 = vmatprep.subr.mxu0 %v813_v45  ;;  %6038 = vmatprep.subr.mxu1 %v813_v45 }
  0x4c   : > { %949 = vmatpush2.msra.mxu0 %v812_v46  ;;  %6057 = vmatpush2.msra.mxu1 %v812_v46 }
  0x4d   : > { %5659 = vmatprep.mubr.msk.f32.mxu0 %vm830_vm1, %v749_v47  ;;  %5667 = vmatprep.mubr.msk.f32.mxu1 %vm830_vm1, %v765_v48 }
  0x4e   : > { %951 = vmatmul.mubr.f32.vlgmr.msra.gmra.mxu0 %v748_v49  ;;  %999 = vmatmul.mubr.f32.vlgmr.msra.gmra.mxu1 %v764_v50 }
  0x4f   : > { %5660 = vmatprep.mubr.msk.f32.mxu0 %vm830_vm1, %v751_v51  ;;  %5668 = vmatprep.mubr.msk.f32.mxu1 %vm830_vm1, %v767_v52 }
  0x52   : > { %957 = vmatmul.mubr.f32.gmra.mxu0 %v750_v53  ;;  %1005 = vmatmul.mubr.f32.gmra.mxu1 %v766_v54 }
  0x53   : > { %5661 = vmatprep.mubr.msk.f32.mxu0 %vm830_vm1, %v753_v55  ;;  %5669 = vmatprep.mubr.msk.f32.mxu1 %vm830_vm1, %v769_v56 }
  0x56   : > { %963 = vmatmul.mubr.f32.gmra.mxu0 %v752_v57  ;;  %1011 = vmatmul.mubr.f32.gmra.mxu1 %v768_v58 }
  0x57   : > { %5662 = vmatprep.mubr.msk.f32.mxu0 %vm830_vm1, %v755_v59  ;;  %5670 = vmatprep.mubr.msk.f32.mxu1 %vm830_vm1, %v771_v60 }
  0x5a   : > { %969 = vmatmul.mubr.f32.gmra.mxu0 %v754_v61  ;;  %1017 = vmatmul.mubr.f32.gmra.mxu1 %v770_v62 }
  0x5b   : > { %5663 = vmatprep.mubr.msk.f32.mxu0 %vm830_vm1, %v757_v63  ;;  %5671 = vmatprep.mubr.msk.f32.mxu1 %vm830_vm1, %v773_v0 }
  0x5e   : > { %975 = vmatmul.mubr.f32.gmra.mxu0 %v756_v1  ;;  %1023 = vmatmul.mubr.f32.gmra.mxu1 %v772_v2 }
  0x5f   : > { %5664 = vmatprep.mubr.msk.f32.mxu0 %vm830_vm1, %v759_v3  ;;  %5672 = vmatprep.mubr.msk.f32.mxu1 %vm830_vm1, %v775_v4 }
  0x62   : > { %981 = vmatmul.mubr.f32.gmra.mxu0 %v758_v5  ;;  %1029 = vmatmul.mubr.f32.gmra.mxu1 %v774_v6 }
  0x63   : > { %5665 = vmatprep.mubr.msk.f32.mxu0 %vm830_vm1, %v761_v7  ;;  %5673 = vmatprep.mubr.msk.f32.mxu1 %vm830_vm1, %v777_v8 }
  0x66   : > { %987 = vmatmul.mubr.f32.gmra.mxu0 %v760_v9  ;;  %1035 = vmatmul.mubr.f32.gmra.mxu1 %v776_v10 }
  0x67   : > { %5666 = vmatprep.mubr.msk.f32.mxu0 %vm830_vm1, %v763_v11  ;;  %5674 = vmatprep.mubr.msk.f32.mxu1 %vm830_vm1, %v779_v12 }
  0x6a   : > { %993 = vmatmul.mubr.f32.gmra.mxu0 %v762_v13  ;;  %1041 = vmatmul.mubr.f32.gmra.mxu1 %v778_v14 }
 0x10e   : > { %v952_v23 = vpop.f32.mrf.mxu0  ;;  %v1000_v24 = vpop.f32.mrf.mxu1 }
 0x10f   : > { %v953_v25 = vadd.f32 %v952_v23, %v6961_v21  ;;  %v1001_v26 = vadd.f32 %v1000_v24, %v6961_v21 }
 0x110   : > { %v954_v27 = vpop.f32.mrf.mxu0  ;;  %v1002_v28 = vpop.f32.mrf.mxu1 }
 0x111   : > { %1047 = vst [vmem:[#allocation4 + $0x80] sm:$0xff] %v953_v25  ;;  %1063 = vst [vmem:[#allocation4 + $0x10] sm:$0xff] %v1001_v26  ;;  %v955_v29 = vadd.f32 %v954_v27, %v6963_v22  ;;  %v1003_v30 = vadd.f32 %v1002_v28, %v6963_v22 }
 0x112   : > { %v958_v31 = vpop.f32.mrf.mxu0  ;;  %v1006_v32 = vpop.f32.mrf.mxu1 }
 0x113   : > { %1048 = vst [vmem:[#allocation4 + $0xc8] sm:$0xff] %v955_v29  ;;  %1064 = vst [vmem:[#allocation4 + $0x70] sm:$0xff] %v1003_v30  ;;  %v959_v33 = vadd.f32 %v958_v31, %v6961_v21  ;;  %v1007_v34 = vadd.f32 %v1006_v32, %v6961_v21 }
 0x114   : > { %v960_v35 = vpop.f32.mrf.mxu0  ;;  %v1008_v36 = vpop.f32.mrf.mxu1 }
 0x115   : > { %1049 = vst [vmem:[#allocation4 + $0xe8] sm:$0xff] %v959_v33  ;;  %1065 = vst [vmem:[#allocation4 + $0x50] sm:$0xff] %v1007_v34  ;;  %v961_v37 = vadd.f32 %v960_v35, %v6963_v22  ;;  %v1009_v38 = vadd.f32 %v1008_v36, %v6963_v22 }
 0x116   : > { %v964_v39 = vpop.f32.mrf.mxu0  ;;  %v1012_v40 = vpop.f32.mrf.mxu1 }
 0x117   : > { %1050 = vst [vmem:[#allocation4 + $0x78] sm:$0xff] %v961_v37  ;;  %1066 = vst [vmem:[#allocation4 + $0xa0] sm:$0xff] %v1009_v38  ;;  %v965_v41 = vadd.f32 %v964_v39, %v6961_v21  ;;  %v1013_v42 = vadd.f32 %v1012_v40, %v6961_v21 }
 0x118   : > { %v966_v43 = vpop.f32.mrf.mxu0  ;;  %v1014_v44 = vpop.f32.mrf.mxu1 }
 0x119   : > { %1051 = vst [vmem:[#allocation4 + $0x8] sm:$0xff] %v965_v41  ;;  %1067 = vst [vmem:[#allocation4 + $0xd8] sm:$0xff] %v1013_v42  ;;  %v967_v45 = vadd.f32 %v966_v43, %v6963_v22  ;;  %v1015_v46 = vadd.f32 %v1014_v44, %v6963_v22 }
 0x11a   : > { %v970_v47 = vpop.f32.mrf.mxu0  ;;  %v1018_v48 = vpop.f32.mrf.mxu1 }
 0x11b   : > { %1052 = vst [vmem:[#allocation4 + $0x90] sm:$0xff] %v967_v45  ;;  %1068 = vst [vmem:[#allocation4 + $0x30] sm:$0xff] %v1015_v46  ;;  %v971_v49 = vadd.f32 %v970_v47, %v6961_v21  ;;  %v1019_v50 = vadd.f32 %v1018_v48, %v6961_v21 }
 0x11c   : > { %v972_v51 = vpop.f32.mrf.mxu0  ;;  %v1020_v52 = vpop.f32.mrf.mxu1 }
 0x11d   : > { %1053 = vst [vmem:[#allocation4 + $0x58] sm:$0xff] %v971_v49  ;;  %1069 = vst [vmem:[#allocation4 + $0x20] sm:$0xff] %v1019_v50  ;;  %v973_v53 = vadd.f32 %v972_v51, %v6963_v22  ;;  %v1021_v54 = vadd.f32 %v1020_v52, %v6963_v22 }
 0x11e   : > { %v976_v55 = vpop.f32.mrf.mxu0  ;;  %v1024_v56 = vpop.f32.mrf.mxu1 }
 0x11f   : > { %1054 = vst [vmem:[#allocation4 + $0xa8] sm:$0xff] %v973_v53  ;;  %1070 = vst [vmem:[#allocation4 + $0xf0] sm:$0xff] %v1021_v54  ;;  %v977_v57 = vadd.f32 %v976_v55, %v6961_v21  ;;  %v1025_v58 = vadd.f32 %v1024_v56, %v6961_v21 }
 0x120   : > { %v978_v59 = vpop.f32.mrf.mxu0  ;;  %v1026_v60 = vpop.f32.mrf.mxu1 }
 0x121   : > { %1055 = vst [vmem:[#allocation4 + $0xd0] sm:$0xff] %v977_v57  ;;  %1071 = vst [vmem:[#allocation4 + $0x88] sm:$0xff] %v1025_v58  ;;  %v979_v61 = vadd.f32 %v978_v59, %v6963_v22  ;;  %v1027_v62 = vadd.f32 %v1026_v60, %v6963_v22 }
 0x122   : > { %v982_v63 = vpop.f32.mrf.mxu0  ;;  %v1030_v0 = vpop.f32.mrf.mxu1 }
 0x123   : > { %1056 = vst [vmem:[#allocation4 + $0xb0] sm:$0xff] %v979_v61  ;;  %1072 = vst [vmem:[#allocation4 + $0x48] sm:$0xff] %v1027_v62  ;;  %v983_v1 = vadd.f32 %v982_v63, %v6961_v21  ;;  %v1031_v2 = vadd.f32 %v1030_v0, %v6961_v21 }
 0x124   : > { %v984_v3 = vpop.f32.mrf.mxu0  ;;  %v1032_v4 = vpop.f32.mrf.mxu1 }
 0x125   : > { %1057 = vst [vmem:[#allocation4 + $0x38] sm:$0xff] %v983_v1  ;;  %1073 = vst [vmem:[#allocation4 + $0xf8] sm:$0xff] %v1031_v2  ;;  %v985_v5 = vadd.f32 %v984_v3, %v6963_v22  ;;  %v1033_v6 = vadd.f32 %v1032_v4, %v6963_v22 }
 0x126   : > { %v988_v7 = vpop.f32.mrf.mxu0  ;;  %v1036_v8 = vpop.f32.mrf.mxu1 }
 0x127   : > { %1058 = vst [vmem:[#allocation4 + $0x40] sm:$0xff] %v985_v5  ;;  %1074 = vst [vmem:[#allocation4 + $0xc0] sm:$0xff] %v1033_v6  ;;  %v989_v9 = vadd.f32 %v988_v7, %v6961_v21  ;;  %v1037_v10 = vadd.f32 %v1036_v8, %v6961_v21 }
 0x128   : > { %v990_v11 = vpop.f32.mrf.mxu0  ;;  %v1038_v12 = vpop.f32.mrf.mxu1 }
 0x129   : > { %1059 = vst [vmem:[#allocation4 + $0xe0] sm:$0xff] %v989_v9  ;;  %1075 = vst [vmem:[#allocation4 + $0xb8] sm:$0xff] %v1037_v10  ;;  %v991_v13 = vadd.f32 %v990_v11, %v6963_v22  ;;  %v1039_v14 = vadd.f32 %v1038_v12, %v6963_v22 }
 0x12a   : > { %v994_v15 = vpop.f32.mrf.mxu0  ;;  %v1042_v16 = vpop.f32.mrf.mxu1 }
 0x12b   : > { %1060 = vst [vmem:[#allocation4 + $0x60] sm:$0xff] %v991_v13  ;;  %1076 = vst [vmem:[#allocation4] sm:$0xff] %v1039_v14  ;;  %v995_v17 = vadd.f32 %v994_v15, %v6961_v21  ;;  %v1043_v18 = vadd.f32 %v1042_v16, %v6961_v21 }
 0x12c   : > { %v996_v19 = vpop.f32.mrf.mxu0  ;;  %v1044_v20 = vpop.f32.mrf.mxu1 }
 0x12d   : > { %1061 = vst [vmem:[#allocation4 + $0x18] sm:$0xff] %v995_v17  ;;  %1077 = vst [vmem:[#allocation4 + $0x28] sm:$0xff] %v1043_v18  ;;  %v997_v23 = vadd.f32 %v996_v19, %v6963_v22  ;;  %v1045_v24 = vadd.f32 %v1044_v20, %v6963_v22 }
 0x12f   : > { %1062 = vst [vmem:[#allocation4 + $0x68] sm:$0xff] %v997_v23  ;;  %1078 = vst [vmem:[#allocation4 + $0x98] sm:$0xff] %v1045_v24 }
 0x130   : > { %6546 = dma.done.wait [#allocation5], 1024 }
 0x131   : > { %6547 = vsyncadd [#allocation5], 4294966272 }
 0x132 PF: > { %p5675_p5 = scmp.le.s32.totalorder %s6663_s21, 0 }
 0x134   : > { %1118 = sbr.rel (%p5675_p5) target bundleno = 569 (0x239), region = 134 }
 0x139   : > { %v6998_v25 = vld [vmem:[#allocation3 + $0x50] sm:$0xff]  ;;  %v7000_v26 = vld [vmem:[#allocation3 + $0x68] sm:$0xff]  ;;  %v7006_v28 = vld [vmem:[#allocation3] sm:$0xff]  ;;  %s9799_s28 = scalar_lea.vmem %s9703_s5, %s6669_s1  ;;  %s9800_s25 = scalar_lea.vmem %s9704_s6, %s6669_s1 }
 0x13a   : > { %v7002_v21 = vld [vmem:[#allocation3 + $0xb0] sm:$0xff]  ;;  %v1159_v27 = vadd.f32 %v7000_v26, %v6998_v25  ;;  %v7010_v29 = vld [vmem:[#allocation3 + $0x48] sm:$0xff]  ;;  %v7014_v31 = vld [vmem:[#allocation3 + $0xd8] sm:$0xff]  ;;  %v1219_v10 = vmul.f32 %v7006_v28, %v7006_v28  ;;  %v1222_v15 = vmul.f32 %v6998_v25, %v6998_v25  ;;  %v1223_v16 = vmul.f32 %v7000_v26, %v7000_v26 }
 0x13b   : > { %v7008_v22 = vld [vmem:[#allocation3 + $0x30] sm:$0xff]  ;;  %v1153_v30 = vadd.f32 %v7006_v28, %v7002_v21  ;;  %v7016_v32 = vld [vmem:[#allocation3 + $0x18] sm:$0xff]  ;;  %v7022_v35 = vld [vmem:[#allocation3 + $0xe8] sm:$0xff]  ;;  %v1220_v6 = vmul.f32 %v7014_v31, %v7014_v31  ;;  %v1218_v9 = vmul.f32 %v7002_v21, %v7002_v21  ;;  %v1225_v13 = vmul.f32 %v7010_v29, %v7010_v29 }
 0x13c   : > { %1160 = vadd.xlane.f32.xlu1 %v1159_v27  ;;  %v1162_v33 = vadd.f32 %v7010_v29, %v7008_v22  ;;  %v1156_v34 = vadd.f32 %v7016_v32, %v7014_v31  ;;  %v7024_v36 = vld [vmem:[#allocation3 + $0xb8] sm:$0xff]  ;;  %v7026_v37 = vld [vmem:[#allocation3 + $0x80] sm:$0xff]  ;;  %v7028_v38 = vld [vmem:[#allocation3 + $0x88] sm:$0xff]  ;;  %v1221_v7 = vmul.f32 %v7016_v32, %v7016_v32  ;;  %v1224_v12 = vmul.f32 %v7008_v22, %v7008_v22 }
 0x13d   : > { %1154 = vadd.xlane.f32.xlu0 %v1153_v30  ;;  %v1168_v39 = vadd.f32 %v7024_v36, %v7022_v35  ;;  %v1165_v40 = vadd.f32 %v7028_v38, %v7026_v37  ;;  %v7034_v41 = vld [vmem:[#allocation3 + $0x8] sm:$0xff]  ;;  %v7036_v42 = vld [vmem:[#allocation3 + $0x78] sm:$0xff]  ;;  %v7038_v43 = vld [vmem:[#allocation3 + $0x60] sm:$0xff]  ;;  %v1250_v14 = vadd.f32 %v1219_v10, %v1218_v9  ;;  %v1228_v18 = vmul.f32 %v7022_v35, %v7022_v35 }
 0x13e   : > { %v7040_v44 = vld [vmem:[#allocation3 + $0xf0] sm:$0xff]  ;;  %v1174_v45 = vadd.f32 %v7036_v42, %v7034_v41  ;;  %v7046_v47 = vld [vmem:[#allocation3 + $0x40] sm:$0xff]  ;;  %v7048_v48 = vld [vmem:[#allocation3 + $0xc8] sm:$0xff]  ;;  %v1253_v11 = vadd.f32 %v1221_v7, %v1220_v6  ;;  %v1259_v17 = vadd.f32 %v1225_v13, %v1224_v12  ;;  %v1229_v19 = vmul.f32 %v7024_v36, %v7024_v36 }
 0x13f   : > { %v1171_v46 = vadd.f32 %v7040_v44, %v7038_v43  ;;  %v7050_v49 = vld [vmem:[#allocation3 + $0x38] sm:$0xff]  ;;  %v1180_v51 = vadd.f32 %v7048_v48, %v7046_v47  ;;  %v7058_v53 = vld [vmem:[#allocation3 + $0x70] sm:$0xff]  ;;  %v7060_v54 = vld [vmem:[#allocation3 + $0xc0] sm:$0xff]  ;;  %v1256_v20 = vadd.f32 %v1223_v16, %v1222_v15  ;;  %v1226_v23 = vmul.f32 %v7026_v37, %v7026_v37 }
 0x140   : > { %1163 = vadd.xlane.f32.xlu1 %v1162_v33  ;;  %v7052_v50 = vld [vmem:[#allocation3 + $0x58] sm:$0xff]  ;;  %v7062_v55 = vld [vmem:[#allocation3 + $0xe0] sm:$0xff]  ;;  %v7064_v56 = vld [vmem:[#allocation3 + $0x90] sm:$0xff]  ;;  %v1186_v57 = vadd.f32 %v7060_v54, %v7058_v53  ;;  %v1227_v24 = vmul.f32 %v7028_v38, %v7028_v38  ;;  %v1265_v27 = vadd.f32 %v1229_v19, %v1228_v18  ;;  %v1232_v30 = vmul.f32 %v7034_v41, %v7034_v41 }
 0x141   : > { %1157 = vadd.xlane.f32.xlu0 %v1156_v34  ;;  %v1177_v52 = vadd.f32 %v7052_v50, %v7050_v49  ;;  %9790 = vst [vmem:[#allocation10_spill] sm:$0xff] %v7064_v56  ;;  %v1183_v58 = vadd.f32 %v7064_v56, %v7062_v55  ;;  %v7070_v59 = vld [vmem:[#allocation3 + $0x10] sm:$0xff]  ;;  %v7072_v60 = vld [vmem:[#allocation3 + $0x28] sm:$0xff]  ;;  %v7082_v1 = vld [vmem:[#allocation3 + $0x20] sm:$0xff]  ;;  %v1233_v33 = vmul.f32 %v7036_v42, %v7036_v42 }
 0x142   : > { %9791 = vst [vmem:[#allocation11_spill] sm:$0xff] %v7070_v59  ;;  %9792 = vst [vmem:[#allocation12_spill] sm:$0xff] %v7072_v60  ;;  %v7074_v61 = vld [vmem:[#allocation3 + $0xa8] sm:$0xff]  ;;  %v7076_v62 = vld [vmem:[#allocation3 + $0xd0] sm:$0xff]  ;;  %v1192_v63 = vadd.f32 %v7072_v60, %v7070_v59  ;;  %v1262_v34 = vadd.f32 %v1227_v24, %v1226_v23  ;;  %v1238_v7 = vmul.f32 %v7062_v55, %v7062_v55 }
 0x143   : > { %9793 = vst [vmem:[#allocation13_spill] sm:$0xff] %v7074_v61  ;;  %9794 = vst [vmem:[#allocation14_spill] sm:$0xff] %v7076_v62  ;;  %v1189_v0 = vadd.f32 %v7076_v62, %v7074_v61  ;;  %v7084_v2 = vld [vmem:[#allocation3 + $0x98] sm:$0xff]  ;;  %v7086_v3 = vld [vmem:[#allocation3 + $0xa0] sm:$0xff]  ;;  %v1244_v10 = vmul.f32 %v7070_v59, %v7070_v59  ;;  %v1242_v13 = vmul.f32 %v7074_v61, %v7074_v61 }
 0x144   : > { %1169 = vadd.xlane.f32.xlu1 %v1168_v39  ;;  %9795 = vst [vmem:[#allocation15_spill] sm:$0xff] %v7082_v1  ;;  %9796 = vst [vmem:[#allocation16_spill] sm:$0xff] %v7084_v2  ;;  %v7088_v4 = vld [vmem:[#allocation3 + $0xf8] sm:$0xff]  ;;  %v1198_v5 = vadd.f32 %v7084_v2, %v7082_v1  ;;  %v1230_v39 = vmul.f32 %v7038_v43, %v7038_v43  ;;  %v1248_v16 = vmul.f32 %v7082_v1, %v7082_v1 }
 0x145   : > { %1166 = vadd.xlane.f32.xlu0 %v1165_v40  ;;  %9797 = vst [vmem:[#allocation17_spill] sm:$0xff] %v7086_v3  ;;  %9798 = vst [vmem:[#allocation18_spill] sm:$0xff] %v7088_v4  ;;  %v1195_v8 = vadd.f32 %v7088_v4, %v7086_v3  ;;  %v1231_v40 = vmul.f32 %v7040_v44, %v7040_v44  ;;  %v1246_v19 = vmul.f32 %v7086_v3, %v7086_v3 }
 0x148   : > { %1175 = vadd.xlane.f32.xlu1 %v1174_v45  ;;  %v1271_v45 = vadd.f32 %v1233_v33, %v1232_v30 }
 0x149   : > { %1172 = vadd.xlane.f32.xlu0 %v1171_v46  ;;  %v1236_v46 = vmul.f32 %v7046_v47, %v7046_v47 }
 0x14c   : > { %1181 = vadd.xlane.f32.xlu1 %v1180_v51  ;;  %v1237_v51 = vmul.f32 %v7048_v48, %v7048_v48 }
 0x14d   : > { %1178 = vadd.xlane.f32.xlu0 %v1177_v52  ;;  %v1268_v52 = vadd.f32 %v1231_v40, %v1230_v39 }
 0x150   : > { %1187 = vadd.xlane.f32.xlu1 %v1186_v57  ;;  %v1234_v57 = vmul.f32 %v7050_v49, %v7050_v49 }
 0x151   : > { %1184 = vadd.xlane.f32.xlu0 %v1183_v58  ;;  %v1235_v58 = vmul.f32 %v7052_v50, %v7052_v50 }
 0x153   : > { %v1274_v6 = vadd.f32 %v1235_v58, %v1234_v57  ;;  %v1459_v57 = vlaneseq }
 0x154   : > { %1193 = vadd.xlane.f32.xlu1 %v1192_v63  ;;  %v1277_v63 = vadd.f32 %v1237_v51, %v1236_v46 }
 0x155   : > { %1190 = vadd.xlane.f32.xlu0 %v1189_v0  ;;  %v1240_v0 = vmul.f32 %v7058_v53, %v7058_v53 }
 0x158   : > { %1199 = vadd.xlane.f32.xlu1 %v1198_v5  ;;  %v1241_v5 = vmul.f32 %v7060_v54, %v7060_v54 }
 0x159   : > { %1196 = vadd.xlane.f32.xlu0 %v1195_v8  ;;  %v1239_v8 = vmul.f32 %v7064_v56, %v7064_v56 }
 0x15a   : > { %v1283_v9 = vadd.f32 %v1241_v5, %v1240_v0  ;;  %v1460_v0 = vshrl.u32 %v1459_v57, 7 }
 0x15b   : > { %v1280_v12 = vadd.f32 %v1239_v8, %v1238_v7 }
 0x15c   : > { %1254 = vadd.xlane.f32.xlu1 %v1253_v11  ;;  %v1245_v11 = vmul.f32 %v7072_v60, %v7072_v60  ;;  %v1461_v7 = vsub.s32 0, %v1460_v0  ;;  %v1465_v8 = vsub.s32 1, %v1460_v0 }
 0x15d   : > { %1251 = vadd.xlane.f32.xlu0 %v1250_v14  ;;  %v1243_v14 = vmul.f32 %v7076_v62, %v7076_v62 }
 0x15e   : > { %v1289_v15 = vadd.f32 %v1245_v11, %v1244_v10  ;;  %v1151_v10 = vld [vmem:[%s9799_s28] sm:$0x3] }
 0x15f   : > { %v1286_v18 = vadd.f32 %v1243_v14, %v1242_v13  ;;  %v1152_v11 = vld [vmem:[%s9800_s25] sm:$0x3] }
 0x160   : > { %1260 = vadd.xlane.f32.xlu1 %v1259_v17  ;;  %v1249_v17 = vmul.f32 %v7084_v2, %v7084_v2 }
 0x161   : > { %1257 = vadd.xlane.f32.xlu0 %v1256_v20  ;;  %v1247_v20 = vmul.f32 %v7088_v4, %v7088_v4 }
 0x162   : > { %v1295_v23 = vadd.f32 %v1249_v17, %v1248_v16  ;;  %v7190_v17 = vrot.slane %v1151_v10, %v1461_v7 }
 0x163   : > { %v1292_v24 = vadd.f32 %v1247_v20, %v1246_v19  ;;  %v7194_v19 = vrot.slane %v1152_v11, %v1461_v7 }
 0x164   : > { %1266 = vadd.xlane.f32.xlu1 %v1265_v27 }
 0x165   : > { %1263 = vadd.xlane.f32.xlu0 %v1262_v34 }
 0x168   : > { %1272 = vadd.xlane.f32.xlu1 %v1271_v45 }
 0x169   : > { %1269 = vadd.xlane.f32.xlu0 %v1268_v52 }
 0x16c   : > { %1278 = vadd.xlane.f32.xlu1 %v1277_v63 }
 0x16d   : > { %1275 = vadd.xlane.f32.xlu0 %v1274_v6 }
 0x170   : > { %1284 = vadd.xlane.f32.xlu1 %v1283_v9 }
 0x171   : > { %1281 = vadd.xlane.f32.xlu0 %v1280_v12 }
 0x174   : > { %1290 = vadd.xlane.f32.xlu1 %v1289_v15 }
 0x175   : > { %1287 = vadd.xlane.f32.xlu0 %v1286_v18  ;;  %v7192_v18 = vrot.slane %v1151_v10, %v1465_v8 }
 0x178   : > { %1296 = vadd.xlane.f32.xlu1 %v1295_v23 }
 0x179   : > { %1293 = vadd.xlane.f32.xlu0 %v1292_v24 }
 0x1c5   : > { %v1161_v27 = vpop.xlane.xlu1 %1160 }
 0x1c6   : > { %v1155_v30 = vpop.xlane.xlu0 %1154  ;;  %v7168_v9 = vmul.f32 0.00390625, %v1161_v27  ;;  %v7202_v27 = vrot.slane %v1152_v11, %v1465_v8 }
 0x1c7   : > { %v7180_v12 = vmul.f32 0.00390625, %v1155_v30 }
 0x1c8   : > { %v1316_v0 = vmul.f32 %v7168_v9, %v7168_v9 }
 0x1c9   : > { %v1164_v33 = vpop.xlane.xlu1 %1163  ;;  %v1314_v57 = vmul.f32 %v7180_v12, %v7180_v12 }
 0x1ca   : > { %v1158_v34 = vpop.xlane.xlu0 %1157  ;;  %v7184_v14 = vmul.f32 0.00390625, %v1164_v33 }
 0x1cb   : > { %v7186_v15 = vmul.f32 0.00390625, %v1158_v34 }
 0x1cc   : > { %v1317_v30 = vmul.f32 %v7184_v14, %v7184_v14 }
 0x1cd   : > { %v1170_v39 = vpop.xlane.xlu1 %1169  ;;  %v1315_v10 = vmul.f32 %v7186_v15, %v7186_v15 }
 0x1ce   : > { %v1167_v40 = vpop.xlane.xlu0 %1166  ;;  %v7200_v24 = vmul.f32 0.00390625, %v1170_v39 }
 0x1cf   : > { %v7214_v39 = vmul.f32 0.00390625, %v1167_v40 }
 0x1d0   : > { %v1319_v2 = vmul.f32 %v7200_v24, %v7200_v24 }
 0x1d1   : > { %v1176_v45 = vpop.xlane.xlu1 %1175 }
 0x1d2   : > { %v1173_v46 = vpop.xlane.xlu0 %1172  ;;  %v7220_v20 = vmul.f32 0.00390625, %v1176_v45 }
 0x1d3   : > { %v7232_v23 = vmul.f32 0.00390625, %v1173_v46 }
 0x1d5   : > { %v1182_v51 = vpop.xlane.xlu1 %1181 }
 0x1d6   : > { %v7158_v52 = vpop.xlane.xlu0 %1178  ;;  %v7246_v3 = vmul.f32 0.00390625, %v1182_v51 }
 0x1d9   : > { %v7160_v58 = vpop.xlane.xlu1 %1187 }
 0x1da   : > { %v7162_v63 = vpop.xlane.xlu0 %1184 }
 0x1dd   : > { %v7164_v5 = vpop.xlane.xlu1 %1193 }
 0x1de   : > { %v7166_v6 = vpop.xlane.xlu0 %1190 }
 0x1e1   : > { %v7182_v13 = vpop.xlane.xlu1 %1199 }
 0x1e2   : > { %v7188_v16 = vpop.xlane.xlu0 %1196 }
 0x1e5   : > { %v1255_v34 = vpop.xlane.xlu1 %1254 }
 0x1e6   : > { %v1299_v8 = vmul.f32 0.00390625, %v1255_v34  ;;  %v1252_v11 = vpop.xlane.xlu0 %1251 }
 0x1e7   : > { %v1298_v33 = vmul.f32 0.00390625, %v1252_v11 }
 0x1e8   : > { %v1331_v7 = vsub.f32 %v1299_v8, %v1315_v10 }
 0x1e9   : > { %v1330_v45 = vsub.f32 %v1298_v33, %v1314_v57  ;;  %v1261_v11 = vpop.xlane.xlu1 %1260  ;;  %v1318_v33 = vmul.f32 %v7214_v39, %v7214_v39 }
 0x1ea   : > { %v1347_v1 = vmax.f32 %v1331_v7, 0.0  ;;  %v1301_v62 = vmul.f32 0.00390625, %v1261_v11  ;;  %v1258_v34 = vpop.xlane.xlu0 %1257 }
 0x1eb   : > { %v1346_v10 = vmax.f32 %v1330_v45, 0.0  ;;  %v1300_v46 = vmul.f32 0.00390625, %v1258_v34  ;;  %v1321_v45 = vmul.f32 %v7220_v20, %v7220_v20  ;;  %v7253_v34 = vmul.f32 0.00390625, %v7158_v52 }
 0x1ec   : > { %v1395_v4 = vadd.f32 1e-05, %v1347_v1  ;;  %v1333_v61 = vsub.f32 %v1301_v62, %v1317_v30  ;;  %v1323_v1 = vmul.f32 %v7246_v3, %v7246_v3 }
 0x1ed   : > { %v1394_v11 = vadd.f32 1e-05, %v1346_v10  ;;  %v1332_v40 = vsub.f32 %v1300_v46, %v1316_v0  ;;  %v1267_v60 = vpop.xlane.xlu1 %1266  ;;  %v1320_v46 = vmul.f32 %v7232_v23, %v7232_v23 }
 0x1ee   : > { %6084 = vrsqrt.f32 %v1395_v4  ;;  %v1349_v8 = vmax.f32 %v1333_v61, 0.0  ;;  %v1303_v59 = vmul.f32 0.00390625, %v1267_v60  ;;  %v1264_v57 = vpop.xlane.xlu0 %1263 }
 0x1ef   : > { %6086 = vrsqrt.f32 %v1394_v11  ;;  %v1348_v62 = vmax.f32 %v1332_v40, 0.0  ;;  %v1302_v51 = vmul.f32 0.00390625, %v1264_v57  ;;  %v7276_v40 = vmul.f32 0.00390625, %v7164_v5 }
 0x1f0   : > { %v1397_v0 = vadd.f32 1e-05, %v1349_v8  ;;  %v1335_v10 = vsub.f32 %v1303_v59, %v1319_v2 }
 0x1f1   : > { %v1396_v61 = vadd.f32 1e-05, %v1348_v62  ;;  %v1334_v60 = vsub.f32 %v1302_v51, %v1318_v33  ;;  %v1273_v52 = vpop.xlane.xlu1 %1272  ;;  %v7270_v62 = vmul.f32 0.00390625, %v7160_v58  ;;  %v7273_v33 = vmul.f32 0.00390625, %v7162_v63  ;;  %9801 = vst [vmem:[#allocation19_spill] sm:$0xff] %v7276_v40 }
 0x1f2   : > { %6088 = vrsqrt.f32 %v1397_v0  ;;  %v1351_v57 = vmax.f32 %v1335_v10, 0.0  ;;  %v1305_v11 = vmul.f32 0.00390625, %v1273_v52  ;;  %v1270_v8 = vpop.xlane.xlu0 %1269  ;;  %v7279_v0 = vmul.f32 0.00390625, %v7166_v6 }
 0x1f3   : > { %6090 = vrsqrt.f32 %v1396_v61  ;;  %v1350_v2 = vmax.f32 %v1334_v60, 0.0  ;;  %v1304_v30 = vmul.f32 0.00390625, %v1270_v8  ;;  %v1322_v58 = vmul.f32 %v7253_v34, %v7253_v34 }
 0x1f4   : > { %v1399_v51 = vadd.f32 1e-05, %v1351_v57  ;;  %v1337_v4 = vsub.f32 %v1305_v11, %v1321_v45  ;;  %9802 = vst [vmem:[#allocation20_spill] sm:$0xff] %v7279_v0  ;;  %v7284_v63 = vmul.f32 0.00390625, %v7182_v13  ;;  %v1325_v6 = vmul.f32 %v7270_v62, %v7270_v62 }
 0x1f5   : > { %v1398_v10 = vadd.f32 1e-05, %v1350_v2  ;;  %v1336_v52 = vsub.f32 %v1304_v30, %v1320_v46  ;;  %v1279_v59 = vpop.xlane.xlu1 %1278  ;;  %v1324_v30 = vmul.f32 %v7273_v33, %v7273_v33  ;;  %v7292_v2 = vmul.f32 %v7276_v40, %v7276_v40 }
 0x1f6   : > { %6092 = vrsqrt.f32 %v1399_v51  ;;  %v1353_v61 = vmax.f32 %v1337_v4, 0.0  ;;  %v1307_v60 = vmul.f32 0.00390625, %v1279_v59  ;;  %v1276_v8 = vpop.xlane.xlu0 %1275  ;;  %9803 = vst [vmem:[#allocation21_spill] sm:$0xff] %v7284_v63  ;;  %v7296_v13 = vmul.f32 %v7279_v0, %v7279_v0 }
 0x1f7   : > { %6094 = vrsqrt.f32 %v1398_v10  ;;  %v1352_v45 = vmax.f32 %v1336_v52, 0.0  ;;  %v1306_v5 = vmul.f32 0.00390625, %v1276_v8  ;;  %v7299_v51 = vmul.f32 0.00390625, %v7188_v16 }
 0x1f8   : > { %v1401_v57 = vadd.f32 1e-05, %v1353_v61  ;;  %v1339_v11 = vsub.f32 %v1307_v60, %v1323_v1  ;;  %v7303_v8 = vmul.f32 %v7284_v63, %v7284_v63  ;;  %v9805_v16 = vsub.f32 %v7016_v32, %v7186_v15 }
 0x1f9   : > { %v1400_v46 = vadd.f32 1e-05, %v1352_v45  ;;  %v1338_v4 = vsub.f32 %v1306_v5, %v1322_v58  ;;  %v1285_v59 = vpop.xlane.xlu1 %1284  ;;  %v9804_v5 = vsub.f32 %v7014_v31, %v7186_v15 }
 0x1fa   : > { %6096 = vrsqrt.f32 %v1401_v57  ;;  %v1355_v1 = vmax.f32 %v1339_v11, 0.0  ;;  %v1309_v10 = vmul.f32 0.00390625, %v1285_v59  ;;  %v1282_v52 = vpop.xlane.xlu0 %1281 }
 0x1fb   : > { %v6085_v61 = vpop.eup %6084  ;;  %6098 = vrsqrt.f32 %v1400_v46  ;;  %v1354_v60 = vmax.f32 %v1338_v4, 0.0  ;;  %v1308_v58 = vmul.f32 0.00390625, %v1282_v52  ;;  %v9806_v46 = vsub.f32 %v7002_v21, %v7180_v12 }
 0x1fc   : > { %v6087_v45 = vpop.eup %6086  ;;  %v1428_v7 = vmul.f32 %v6085_v61, %v9804_v5  ;;  %v1429_v57 = vmul.f32 %v6085_v61, %v9805_v16  ;;  %v1403_v11 = vadd.f32 1e-05, %v1355_v1  ;;  %v1341_v59 = vsub.f32 %v1309_v10, %v1325_v6 }
 0x1fd   : > { %v1426_v4 = vmul.f32 %v6087_v45, %v9806_v46  ;;  %v9807_v52 = vsub.f32 %v7006_v28, %v7180_v12  ;;  %v1402_v0 = vadd.f32 1e-05, %v1354_v60  ;;  %v1340_v40 = vsub.f32 %v1308_v58, %v1324_v30 }
 0x1fe   : > { %v1471_v56 = vmul.f32 %v7190_v17, %v1428_v7  ;;  %v1472_v31 = vmul.f32 %v7192_v18, %v1429_v57  ;;  %6100 = vrsqrt.f32 %v1403_v11  ;;  %v7319_v5 = vmax.f32 %v1341_v59, 0.0 }
 0x1ff   : > { %v1427_v63 = vmul.f32 %v6087_v45, %v9807_v52  ;;  %v6089_v32 = vpop.eup %6088  ;;  %v1469_v15 = vmul.f32 %v7190_v17, %v1426_v4  ;;  %6102 = vrsqrt.f32 %v1402_v0  ;;  %v7323_v21 = vmax.f32 %v1340_v40, 0.0 }
 0x200   : > { %v6091_v1 = vpop.eup %6090  ;;  %v1514_v28 = vadd.f32 %v7194_v19, %v1471_v56  ;;  %v1515_v12 = vadd.f32 %v7202_v27, %v1472_v31  ;;  %v9808_v7 = vsub.f32 %v7008_v22, %v7184_v14  ;;  %v9809_v10 = vsub.f32 %v7010_v29, %v7184_v14 }
 0x201   : > { %v1470_v6 = vmul.f32 %v7192_v18, %v1427_v63  ;;  %v1512_v60 = vadd.f32 %v7194_v19, %v1469_v15  ;;  %v9810_v40 = vsub.f32 %v6998_v25, %v7168_v9  ;;  %v9811_v56 = vsub.f32 %v7000_v26, %v7168_v9 }
 0x202   : > { %v1432_v30 = vmul.f32 %v6089_v32, %v9808_v7  ;;  %v1433_v61 = vmul.f32 %v6089_v32, %v9809_v10  ;;  %v1546_v45 = vmax.f32 %v1514_v28, 0.0  ;;  %v1547_v16 = vmax.f32 %v1515_v12, 0.0 }
 0x203   : > { %v1513_v63 = vadd.f32 %v7202_v27, %v1470_v6  ;;  %v1430_v0 = vmul.f32 %v6091_v1, %v9810_v40  ;;  %v1431_v58 = vmul.f32 %v6091_v1, %v9811_v56  ;;  %v6093_v29 = vpop.eup %6092  ;;  %v1544_v14 = vmax.f32 %v1512_v60, 0.0 }
 0x204   : > { %v1475_v22 = vmul.f32 %v7190_v17, %v1432_v30  ;;  %v1476_v57 = vmul.f32 %v7192_v18, %v1433_v61  ;;  %v6095_v4 = vpop.eup %6094  ;;  %1578 = vst [vmem:[#allocation4 + $0xe8] sm:$0xff] %v1546_v45  ;;  %1579 = vst [vmem:[#allocation4 + $0x78] sm:$0xff] %v1547_v16  ;;  %v9812_v9 = vsub.f32 %v7022_v35, %v7200_v24 }
 0x205   : > { %v1545_v11 = vmax.f32 %v1513_v63, 0.0  ;;  %v1473_v59 = vmul.f32 %v7190_v17, %v1430_v0  ;;  %v1474_v46 = vmul.f32 %v7192_v18, %v1431_v58  ;;  %v9813_v31 = vsub.f32 %v7024_v36, %v7200_v24  ;;  %1576 = vst [vmem:[#allocation4 + $0x80] sm:$0xff] %v1544_v14 }
 0x206   : > { %v1518_v25 = vadd.f32 %v7194_v19, %v1475_v22  ;;  %v1519_v26 = vadd.f32 %v7202_v27, %v1476_v57  ;;  %v1436_v52 = vmul.f32 %v6093_v29, %v9812_v9  ;;  %v9814_v1 = vsub.f32 %v7026_v37, %v7214_v39 }
 0x207   : > { %v1437_v32 = vmul.f32 %v6093_v29, %v9813_v31  ;;  %1577 = vst [vmem:[#allocation4 + $0xc8] sm:$0xff] %v1545_v11  ;;  %v1516_v15 = vadd.f32 %v7194_v19, %v1473_v59  ;;  %v1517_v6 = vadd.f32 %v7202_v27, %v1474_v46  ;;  %v9815_v12 = vsub.f32 %v7028_v38, %v7214_v39  ;;  %v6097_v24 = vpop.eup %6096 }
 0x208   : > { %v1434_v28 = vmul.f32 %v6095_v4, %v9814_v1  ;;  %v1550_v35 = vmax.f32 %v1518_v25, 0.0  ;;  %v1551_v30 = vmax.f32 %v1519_v26, 0.0  ;;  %v1479_v10 = vmul.f32 %v7190_v17, %v1436_v52  ;;  %v6099_v0 = vpop.eup %6098 }
 0x209   : > { %v1435_v7 = vmul.f32 %v6095_v4, %v9815_v12  ;;  %v1480_v36 = vmul.f32 %v7192_v18, %v1437_v32  ;;  %v1548_v61 = vmax.f32 %v1516_v15, 0.0  ;;  %v1549_v60 = vmax.f32 %v1517_v6, 0.0 }
 0x20a   : > { %v1477_v63 = vmul.f32 %v7190_v17, %v1434_v28  ;;  %1582 = vst [vmem:[#allocation4 + $0x58] sm:$0xff] %v1550_v35  ;;  %1583 = vst [vmem:[#allocation4 + $0xa8] sm:$0xff] %v1551_v30  ;;  %v1522_v37 = vadd.f32 %v7194_v19, %v1479_v10  ;;  %v9816_v39 = vsub.f32 %v7034_v41, %v7220_v20  ;;  %v1291_v41 = vpop.xlane.xlu1 %1290 }
 0x20b   : > { %v1478_v40 = vmul.f32 %v7192_v18, %v1435_v7  ;;  %v1523_v38 = vadd.f32 %v7202_v27, %v1480_v36  ;;  %v9817_v58 = vsub.f32 %v7036_v42, %v7220_v20  ;;  %1580 = vst [vmem:[#allocation4 + $0x8] sm:$0xff] %v1548_v61  ;;  %1581 = vst [vmem:[#allocation4 + $0x90] sm:$0xff] %v1549_v60  ;;  %v6101_v4 = vpop.eup %6100 }
 0x20c   : > { %v1440_v56 = vmul.f32 %v6097_v24, %v9816_v39  ;;  %v1520_v16 = vadd.f32 %v7194_v19, %v1477_v63  ;;  %v9818_v57 = vsub.f32 %v7038_v43, %v7232_v23  ;;  %v9819_v14 = vsub.f32 %v7040_v44, %v7232_v23  ;;  %v1288_v43 = vpop.xlane.xlu0 %1287  ;;  %v6103_v31 = vpop.eup %6102 }
 0x20d   : > { %v1441_v45 = vmul.f32 %v6097_v24, %v9817_v58  ;;  %v1521_v22 = vadd.f32 %v7202_v27, %v1478_v40  ;;  %v1554_v59 = vmax.f32 %v1522_v37, 0.0  ;;  %v1555_v46 = vmax.f32 %v1523_v38, 0.0 }
 0x20e   : > { %v1438_v29 = vmul.f32 %v6099_v0, %v9818_v57  ;;  %v1439_v11 = vmul.f32 %v6099_v0, %v9819_v14  ;;  %v1483_v42 = vmul.f32 %v7190_v17, %v1440_v56  ;;  %v1552_v25 = vmax.f32 %v1520_v16, 0.0  ;;  %v1297_v40 = vpop.xlane.xlu1 %1296 }
 0x20f   : > { %v1484_v20 = vmul.f32 %v7192_v18, %v1441_v45  ;;  %v1553_v26 = vmax.f32 %v1521_v22, 0.0  ;;  %1586 = vst [vmem:[#allocation4 + $0x38] sm:$0xff] %v1554_v59  ;;  %1587 = vst [vmem:[#allocation4 + $0x40] sm:$0xff] %v1555_v46  ;;  %v9820_v32 = vsub.f32 %v7046_v47, %v7246_v3  ;;  %v9821_v6 = vsub.f32 %v7048_v48, %v7246_v3 }
 0x210   : > { %v1481_v9 = vmul.f32 %v7190_v17, %v1438_v29  ;;  %v1482_v52 = vmul.f32 %v7192_v18, %v1439_v11  ;;  %v1526_v44 = vadd.f32 %v7194_v19, %v1483_v42  ;;  %1584 = vst [vmem:[#allocation4 + $0xd0] sm:$0xff] %v1552_v25  ;;  %v9822_v7 = vsub.f32 %v7050_v49, %v7253_v34  ;;  %v1294_v58 = vpop.xlane.xlu0 %1293 }
 0x211   : > { %v1527_v23 = vadd.f32 %v7202_v27, %v1484_v20  ;;  %v1444_v15 = vmul.f32 %v6101_v4, %v9820_v32  ;;  %v1445_v1 = vmul.f32 %v6101_v4, %v9821_v6  ;;  %1585 = vst [vmem:[#allocation4 + $0xb0] sm:$0xff] %v1553_v26  ;;  %v9823_v30 = vsub.f32 %v7052_v50, %v7253_v34 }
 0x212   : > { %v1524_v28 = vadd.f32 %v7194_v19, %v1481_v9  ;;  %v1525_v12 = vadd.f32 %v7202_v27, %v1482_v52  ;;  %v1442_v35 = vmul.f32 %v6103_v31, %v9822_v7  ;;  %v1558_v47 = vmax.f32 %v1526_v44, 0.0  ;;  %v9826_v7 = vld [vmem:[#allocation11_spill] sm:$0xff] }
 0x213   : > { %v1443_v10 = vmul.f32 %v6103_v31, %v9823_v30  ;;  %v1559_v36 = vmax.f32 %v1527_v23, 0.0  ;;  %v1487_v24 = vmul.f32 %v7190_v17, %v1444_v15  ;;  %v1488_v48 = vmul.f32 %v7192_v18, %v1445_v1  ;;  %v9824_v31 = vld [vmem:[#allocation10_spill] sm:$0xff] }
 0x214   : > { %v1556_v3 = vmax.f32 %v1524_v28, 0.0  ;;  %v1557_v61 = vmax.f32 %v1525_v12, 0.0  ;;  %v1485_v60 = vmul.f32 %v7190_v17, %v1442_v35  ;;  %1590 = vst [vmem:[#allocation4 + $0x18] sm:$0xff] %v1558_v47  ;;  %v1405_v34 = vadd.f32 1e-05, %v7319_v5  ;;  %v9828_v47 = vld [vmem:[#allocation20_spill] sm:$0xff] }
 0x215   : > { %v1486_v63 = vmul.f32 %v7192_v18, %v1443_v10  ;;  %1591 = vst [vmem:[#allocation4 + $0x68] sm:$0xff] %v1559_v36  ;;  %v1530_v49 = vadd.f32 %v7194_v19, %v1487_v24  ;;  %v1531_v50 = vadd.f32 %v7202_v27, %v1488_v48  ;;  %v1404_v0 = vadd.f32 1e-05, %v7323_v21  ;;  %v9829_v36 = vld [vmem:[#allocation13_spill] sm:$0xff]  ;;  %v9830_v48 = vld [vmem:[#allocation14_spill] sm:$0xff] }
 0x216   : > { %1588 = vst [vmem:[#allocation4 + $0xe0] sm:$0xff] %v1556_v3  ;;  %1589 = vst [vmem:[#allocation4 + $0x60] sm:$0xff] %v1557_v61  ;;  %v1528_v37 = vadd.f32 %v7194_v19, %v1485_v60  ;;  %v1311_v39 = vmul.f32 0.00390625, %v1291_v41  ;;  %v1310_v56 = vmul.f32 0.00390625, %v1288_v43  ;;  %6104 = vrsqrt.f32 %v1405_v34  ;;  %v9833_v34 = vld [vmem:[#allocation16_spill] sm:$0xff] }
 0x217   : > { %v1529_v38 = vadd.f32 %v7202_v27, %v1486_v63  ;;  %v1562_v45 = vmax.f32 %v1530_v49, 0.0  ;;  %v1563_v16 = vmax.f32 %v1531_v50, 0.0  ;;  %v1313_v22 = vmul.f32 0.00390625, %v1297_v40  ;;  %v9831_v40 = vld [vmem:[#allocation21_spill] sm:$0xff]  ;;  %v9832_v49 = vld [vmem:[#allocation15_spill] sm:$0xff] }
 0x218   : > { %v1560_v57 = vmax.f32 %v1528_v37, 0.0  ;;  %6106 = vrsqrt.f32 %v1404_v0  ;;  %v1343_v5 = vsub.f32 %v1311_v39, %v7292_v2  ;;  %v1342_v21 = vsub.f32 %v1310_v56, %v7296_v13 }
 0x219   : > { %v1561_v29 = vmax.f32 %v1529_v38, 0.0  ;;  %1594 = vst [vmem:[#allocation4 + $0x50] sm:$0xff] %v1562_v45  ;;  %1595 = vst [vmem:[#allocation4 + $0xa0] sm:$0xff] %v1563_v16  ;;  %v1345_v14 = vsub.f32 %v1313_v22, %v7303_v8  ;;  %v1328_v11 = vmul.f32 %v7299_v51, %v7299_v51  ;;  %v1312_v41 = vmul.f32 0.00390625, %v1294_v58 }
 0x21a   : > { %1592 = vst [vmem:[#allocation4 + $0x10] sm:$0xff] %v1560_v57  ;;  %v1359_v59 = vmax.f32 %v1343_v5, 0.0  ;;  %v1358_v46 = vmax.f32 %v1342_v21, 0.0  ;;  %v1384_v13 = vsub.f32 %v7058_v53, %v7270_v62  ;;  %v1385_v8 = vsub.f32 %v7060_v54, %v7270_v62  ;;  %v9825_v62 = vld [vmem:[#allocation19_spill] sm:$0xff]  ;;  %v9834_v57 = vld [vmem:[#allocation17_spill] sm:$0xff]  ;;  %v9835_v5 = vld [vmem:[#allocation18_spill] sm:$0xff] }
 0x21b   : > { %1593 = vst [vmem:[#allocation4 + $0x70] sm:$0xff] %v1561_v29  ;;  %v1361_v42 = vmax.f32 %v1345_v14, 0.0  ;;  %v1344_v20 = vsub.f32 %v1312_v41, %v1328_v11  ;;  %v1382_v43 = vsub.f32 %v7062_v55, %v7273_v33  ;;  %v1383_v44 = vsub.f32 %v9824_v31, %v7273_v33  ;;  %v9827_v55 = vld [vmem:[#allocation12_spill] sm:$0xff] }
 0x21c   : > { %v1407_v4 = vadd.f32 1e-05, %v1359_v59  ;;  %v1406_v25 = vadd.f32 1e-05, %v1358_v46  ;;  %v1388_v35 = vsub.f32 %v9826_v7, %v9825_v62  ;;  %v1389_v30 = vsub.f32 %v9827_v55, %v9825_v62 }
 0x21d   : > { %v1409_v26 = vadd.f32 1e-05, %v1361_v42  ;;  %v1360_v2 = vmax.f32 %v1344_v20, 0.0  ;;  %v1386_v24 = vsub.f32 %v9829_v36, %v9828_v47  ;;  %v1387_v3 = vsub.f32 %v9830_v48, %v9828_v47 }
 0x21e   : > { %6108 = vrsqrt.f32 %v1407_v4  ;;  %v1392_v50 = vsub.f32 %v9832_v49, %v9831_v40  ;;  %v1393_v0 = vsub.f32 %v9833_v34, %v9831_v40  ;;  %v1390_v29 = vsub.f32 %v9834_v57, %v7299_v51 }
 0x21f   : > { %6110 = vrsqrt.f32 %v1406_v25  ;;  %v1408_v9 = vadd.f32 1e-05, %v1360_v2  ;;  %v1391_v21 = vsub.f32 %v9835_v5, %v7299_v51 }
 0x220   : > { %6112 = vrsqrt.f32 %v1409_v26 }
 0x221   : > { %6114 = vrsqrt.f32 %v1408_v9 }
 0x223   : > { %v6105_v52 = vpop.eup %6104 }
 0x224   : > { %v1448_v32 = vmul.f32 %v6105_v52, %v1384_v13  ;;  %v1449_v15 = vmul.f32 %v6105_v52, %v1385_v8 }
 0x225   : > { %v6107_v23 = vpop.eup %6106 }
 0x226   : > { %v1446_v6 = vmul.f32 %v6107_v23, %v1382_v43  ;;  %v1447_v1 = vmul.f32 %v6107_v23, %v1383_v44  ;;  %v1491_v28 = vmul.f32 %v7190_v17, %v1448_v32  ;;  %v1492_v12 = vmul.f32 %v7192_v18, %v1449_v15 }
 0x228   : > { %v1489_v53 = vmul.f32 %v7190_v17, %v1446_v6  ;;  %v1490_v54 = vmul.f32 %v7192_v18, %v1447_v1  ;;  %v1534_v33 = vadd.f32 %v7194_v19, %v1491_v28  ;;  %v1535_v10 = vadd.f32 %v7202_v27, %v1492_v12 }
 0x22a   : > { %v1532_v61 = vadd.f32 %v7194_v19, %v1489_v53  ;;  %v1533_v60 = vadd.f32 %v7202_v27, %v1490_v54  ;;  %v1566_v37 = vmax.f32 %v1534_v33, 0.0  ;;  %v1567_v38 = vmax.f32 %v1535_v10, 0.0 }
 0x22b   : > { %v6109_v63 = vpop.eup %6108 }
 0x22c   : > { %v6111_v39 = vpop.eup %6110  ;;  %v1564_v56 = vmax.f32 %v1532_v61, 0.0  ;;  %v1565_v58 = vmax.f32 %v1533_v60, 0.0  ;;  %v1452_v45 = vmul.f32 %v6109_v63, %v1388_v35  ;;  %v1453_v16 = vmul.f32 %v6109_v63, %v1389_v30  ;;  %1598 = vst [vmem:[#allocation4 + $0x20] sm:$0xff] %v1566_v37  ;;  %1599 = vst [vmem:[#allocation4 + $0xf0] sm:$0xff] %v1567_v38 }
 0x22d   : > { %v6113_v22 = vpop.eup %6112  ;;  %v1450_v14 = vmul.f32 %v6111_v39, %v1386_v24  ;;  %v1451_v11 = vmul.f32 %v6111_v39, %v1387_v3 }
 0x22e   : > { %v6115_v41 = vpop.eup %6114  ;;  %1596 = vst [vmem:[#allocation4 + $0xd8] sm:$0xff] %v1564_v56  ;;  %1597 = vst [vmem:[#allocation4 + $0x30] sm:$0xff] %v1565_v58  ;;  %v1495_v59 = vmul.f32 %v7190_v17, %v1452_v45  ;;  %v1496_v46 = vmul.f32 %v7192_v18, %v1453_v16  ;;  %v1456_v42 = vmul.f32 %v6113_v22, %v1392_v50 }
 0x22f   : > { %v1457_v20 = vmul.f32 %v6113_v22, %v1393_v0  ;;  %v1493_v4 = vmul.f32 %v7190_v17, %v1450_v14  ;;  %v1494_v25 = vmul.f32 %v7192_v18, %v1451_v11  ;;  %v1454_v26 = vmul.f32 %v6115_v41, %v1390_v29 }
 0x230   : > { %v1455_v2 = vmul.f32 %v6115_v41, %v1391_v21  ;;  %v1538_v51 = vadd.f32 %v7194_v19, %v1495_v59  ;;  %v1539_v9 = vadd.f32 %v7202_v27, %v1496_v46  ;;  %v1499_v13 = vmul.f32 %v7190_v17, %v1456_v42 }
 0x231   : > { %v1500_v8 = vmul.f32 %v7192_v18, %v1457_v20  ;;  %v1536_v52 = vadd.f32 %v7194_v19, %v1493_v4  ;;  %v1537_v43 = vadd.f32 %v7202_v27, %v1494_v25  ;;  %v1497_v31 = vmul.f32 %v7190_v17, %v1454_v26 }
 0x232   : > { %v1498_v44 = vmul.f32 %v7192_v18, %v1455_v2  ;;  %v1570_v23 = vmax.f32 %v1538_v51, 0.0  ;;  %v1571_v32 = vmax.f32 %v1539_v9, 0.0  ;;  %v1542_v15 = vadd.f32 %v7194_v19, %v1499_v13 }
 0x233   : > { %v1543_v6 = vadd.f32 %v7202_v27, %v1500_v8  ;;  %v1568_v1 = vmax.f32 %v1536_v52, 0.0  ;;  %v1569_v28 = vmax.f32 %v1537_v43, 0.0  ;;  %v1540_v12 = vadd.f32 %v7194_v19, %v1497_v31 }
 0x234   : > { %v1541_v53 = vadd.f32 %v7202_v27, %v1498_v44  ;;  %1602 = vst [vmem:[#allocation4 + $0xf8] sm:$0xff] %v1570_v23  ;;  %1603 = vst [vmem:[#allocation4 + $0xc0] sm:$0xff] %v1571_v32  ;;  %v1574_v54 = vmax.f32 %v1542_v15, 0.0 }
 0x235   : > { %v1575_v62 = vmax.f32 %v1543_v6, 0.0  ;;  %1600 = vst [vmem:[#allocation4 + $0x88] sm:$0xff] %v1568_v1  ;;  %1601 = vst [vmem:[#allocation4 + $0x48] sm:$0xff] %v1569_v28  ;;  %v1572_v17 = vmax.f32 %v1540_v12, 0.0 }
 0x236   : > { %v1573_v18 = vmax.f32 %v1541_v53, 0.0  ;;  %1606 = vst [vmem:[#allocation4 + $0x28] sm:$0xff] %v1574_v54 }
 0x237   : > { %1607 = vst [vmem:[#allocation4 + $0x98] sm:$0xff] %v1575_v62  ;;  %1604 = vst [vmem:[#allocation4 + $0xb8] sm:$0xff] %v1572_v17 }
 0x238   : > { %1605 = vst [vmem:[#allocation4] sm:$0xff] %v1573_v18 }
 0x239 PF: > { %v6553_v36 = vmov 0   ;;  %v1629_v56 = vld [vmem:[#allocation4 + $0x30] sm:$0xff]  ;;  %v1628_v29 = vld [vmem:[#allocation4 + $0xd8] sm:$0xff]  ;;  %v1630_v5 = vld [vmem:[#allocation4 + $0x20] sm:$0xff]  ;;  %s9837_s20 = scalar_lea.vmem %s9706_s8, %s6684_s0  ;;  %s9874_s19 = scalar_lea.vmem %s9707_s9, %s6684_s0 }
 0x23a   : > { %2008 = vmatprep.mubr.bf16.mxu0 %v6553_v36  ;;  %2048 = vmatprep.mubr.bf16.mxu1 %v6553_v36  ;;  %v1631_v57 = vld [vmem:[#allocation4 + $0xf0] sm:$0xff]  ;;  %v1661_v42 = vmax.f32 %v1629_v56, 0.0  ;;  %v1660_v4 = vmax.f32 %v1628_v29, 0.0  ;;  %v1662_v25 = vmax.f32 %v1630_v5, 0.0  ;;  %v1627_v2 = vld [vmem:[#allocation4 + $0xa0] sm:$0xff]  ;;  %v1623_v53 = vld [vmem:[#allocation4 + $0x68] sm:$0xff]  ;;  %s9929_s30 = scalar_lea.vmem %s9710_s12, %s6669_s1 }
 0x23b   : > { %v1635_v47 = vld [vmem:[#allocation4 + $0xc0] sm:$0xff]  ;;  %6116 = vset.pattern.permute.xlu0 %v6553_v36  ;;  %6117 = vset.pattern.permute.xlu1 %v6553_v36  ;;  %v1634_v39 = vld [vmem:[#allocation4 + $0xf8] sm:$0xff]  ;;  %v1663_v20 = vmax.f32 %v1631_v57, 0.0  ;;  %v1625_v26 = vld [vmem:[#allocation4 + $0x70] sm:$0xff]  ;;  %v1659_v17 = vmax.f32 %v1627_v2, 0.0  ;;  %p5844_p6 = scmp.ne.s32.totalorder %s6663_s21, 24 }
 0x23c   : > { %v1633_v10 = vld [vmem:[#allocation4 + $0x48] sm:$0xff]  ;;  %v1667_v3 = vmax.f32 %v1635_v47, 0.0  ;;  %v1666_v59 = vmax.f32 %v1634_v39, 0.0  ;;  %v7495_v13 = vadd.f32 1e-07, %v1661_v42  ;;  %v1657_v23 = vmax.f32 %v1625_v26, 0.0 }
 0x23d   : > { %v1638_v33 = vld [vmem:[#allocation4 + $0x28] sm:$0xff]  ;;  %v1665_v48 = vmax.f32 %v1633_v10, 0.0  ;;  %v7497_v8 = vadd.f32 1e-07, %v1663_v20  ;;  %v7499_v52 = vadd.f32 1e-07, %v1660_v4 }
 0x23e   : > { %v1639_v35 = vld [vmem:[#allocation4 + $0x98] sm:$0xff]  ;;  %v1670_v24 = vmax.f32 %v1638_v33, 0.0  ;;  %v1632_v61 = vld [vmem:[#allocation4 + $0x88] sm:$0xff]  ;;  %v7478_v34 = vadd.f32 1e-07, %v1667_v3  ;;  %v1624_v32 = vld [vmem:[#allocation4 + $0x10] sm:$0xff] }
 0x23f   : > { %v1637_v7 = vld [vmem:[#allocation4] sm:$0xff]  ;;  %v1636_v55 = vld [vmem:[#allocation4 + $0xb8] sm:$0xff]  ;;  %v1671_v19 = vmax.f32 %v1639_v35, 0.0  ;;  %v7476_v50 = vadd.f32 1e-07, %v1665_v48  ;;  %v1664_v22 = vmax.f32 %v1632_v61, 0.0  ;;  %v1895_v28 = vpack.c.bf16 %v7497_v8, %v7495_v13 }
 0x240   : > { %v1669_v30 = vmax.f32 %v1637_v7, 0.0  ;;  %v1668_v27 = vmax.f32 %v1636_v55, 0.0  ;;  %v7474_v49 = vadd.f32 1e-07, %v1670_v24  ;;  %v7492_v51 = vadd.f32 1e-07, %v1666_v59 }
 0x241   : > { %v7470_v63 = vadd.f32 1e-07, %v1671_v19  ;;  %v1901_v16 = vpack.c.bf16 %v7478_v34, %v7476_v50  ;;  %v7490_v46 = vadd.f32 1e-07, %v1664_v22  ;;  %v7501_v43 = vadd.f32 1e-07, %v1662_v25 }
 0x242   : > { %v7468_v60 = vadd.f32 1e-07, %v1669_v30  ;;  %v7472_v40 = vadd.f32 1e-07, %v1668_v27  ;;  %v1734_v58 = vmul.f32 0.01, %v7474_v49 }
 0x243   : > { %v1735_v21 = vmul.f32 0.01, %v7470_v63  ;;  %v1728_v9 = vmul.f32 0.01, %v7490_v46  ;;  %v1730_v31 = vmul.f32 0.01, %v7492_v51  ;;  %v1900_v44 = vpack.c.bf16 %v7492_v51, %v7490_v46 }
 0x244   : > { %v1733_v0 = vmul.f32 0.01, %v7468_v60  ;;  %v1907_v37 = vpack.c.bf16 %v7470_v63, %v7468_v60  ;;  %v1732_v38 = vmul.f32 0.01, %v7472_v40  ;;  %v1906_v45 = vpack.c.bf16 %v7474_v49, %v7472_v40  ;;  %v1626_v15 = vld [vmem:[#allocation4 + $0x50] sm:$0xff]  ;;  %v1621_v12 = vld [vmem:[#allocation4 + $0x60] sm:$0xff] }
 0x245   : > { %v1796_v41 = vmul.f32 1.442695, %v1734_v58  ;;  %v1798_v6 = vmul.f32 1.442695, %v1735_v21  ;;  %v7506_v1 = vmul.f32 1.442695, %v1728_v9  ;;  %v1894_v62 = vpack.c.bf16 %v7501_v43, %v7499_v52 }
 0x246   : > { %v1794_v14 = vmul.f32 1.442695, %v1733_v0  ;;  %1976 = vmatprep.subr.bf16.mxu0 %v1907_v37  ;;  %6058 = vmatprep.subr.bf16.mxu1 %v1907_v37  ;;  %v1792_v11 = vmul.f32 1.442695, %v1732_v38  ;;  %v1724_v54 = vmul.f32 0.01, %v7499_v52 }
 0x247   : > { %1977 = vmatpush1.bf16.msra.mxu0 %v1906_v45  ;;  %6066 = vmatpush1.bf16.msra.mxu1 %v1906_v45  ;;  %v7513_v18 = vadd.f32 1e-07, %v1657_v23  ;;  %v1620_v7 = vld [vmem:[#allocation4 + $0xe0] sm:$0xff]  ;;  %v7515_v35 = vmul.f32 1.442695, %v1730_v31  ;;  %v1656_v30 = vmax.f32 %v1624_v32, 0.0 }
 0x248   : > { %1978 = vmatprep.subr.bf16.mxu0 %v1901_v16  ;;  %6059 = vmatprep.subr.bf16.mxu1 %v1901_v16  ;;  %6318 = vpow2.f32 %v1792_v11  ;;  %v1726_v55 = vmul.f32 0.01, %v7501_v43  ;;  %v1658_v19 = vmax.f32 %v1626_v15, 0.0  ;;  %v7518_v33 = vadd.f32 1e-07, %v1659_v17  ;;  %v1622_v47 = vld [vmem:[#allocation4 + $0x18] sm:$0xff] }
 0x249   : > { %6320 = vpow2.f32 %v1796_v41  ;;  %v1653_v27 = vmax.f32 %v1621_v12, 0.0  ;;  %v1655_v10 = vmax.f32 %v1623_v53, 0.0  ;;  %v1617_v24 = vld [vmem:[#allocation4 + $0xb0] sm:$0xff]  ;;  %v7520_v48 = vadd.f32 1e-07, %v1656_v30  ;;  %v1619_v0 = vld [vmem:[#allocation4 + $0x40] sm:$0xff] }
 0x24a   : > { %v7522_v3 = vadd.f32 1e-07, %v1658_v19  ;;  %v1652_v61 = vmax.f32 %v1620_v7, 0.0  ;;  %6322 = vpow2.f32 %v1794_v14  ;;  %v7524_v37 = vmul.f32 1.442695, %v1724_v54  ;;  %v1616_v14 = vld [vmem:[#allocation4 + $0xd0] sm:$0xff] }
 0x24b   : > { %1979 = vmatpush1.bf16.msra.mxu0 %v1900_v44  ;;  %6067 = vmatpush1.bf16.msra.mxu1 %v1900_v44  ;;  %v1889_v38 = vpack.c.bf16 %v7518_v33, %v7513_v18  ;;  %v7528_v39 = vadd.f32 1e-07, %v1653_v27  ;;  %v7530_v56 = vadd.f32 1e-07, %v1655_v10  ;;  %v7532_v58 = vmul.f32 1.442695, %v1726_v55 }
 0x24c   : > { %1980 = vmatprep.subr.bf16.mxu0 %v1895_v28  ;;  %6060 = vmatprep.subr.bf16.mxu1 %v1895_v28  ;;  %v1720_v45 = vmul.f32 0.01, %v7520_v48  ;;  %v1888_v16 = vpack.c.bf16 %v7522_v3, %v7520_v48  ;;  %v1654_v22 = vmax.f32 %v1622_v47, 0.0  ;;  %v7539_v29 = vadd.f32 1e-07, %v1652_v61  ;;  %v1618_v59 = vld [vmem:[#allocation4 + $0x38] sm:$0xff] }
 0x24d   : > { %v1883_v57 = vpack.c.bf16 %v7530_v56, %v7528_v39  ;;  %v1649_v5 = vmax.f32 %v1617_v24, 0.0  ;;  %v1651_v21 = vmax.f32 %v1619_v0, 0.0  ;;  %v1722_v11 = vmul.f32 0.01, %v7522_v3  ;;  %v1613_v4 = vld [vmem:[#allocation4 + $0x90] sm:$0xff]  ;;  %v1615_v25 = vld [vmem:[#allocation4 + $0xa8] sm:$0xff] }
 0x24e   : > { %v7542_v41 = vadd.f32 1e-07, %v1654_v22  ;;  %6324 = vpow2.f32 %v1798_v6  ;;  %v1768_v26 = vmul.f32 1.442695, %v1720_v45  ;;  %v1648_v9 = vmax.f32 %v1616_v14, 0.0  ;;  %v1612_v31 = vld [vmem:[#allocation4 + $0x8] sm:$0xff] }
 0x24f   : > { %1981 = vmatpush1.bf16.msra.mxu0 %v1894_v62  ;;  %6068 = vmatpush1.bf16.msra.mxu1 %v1894_v62  ;;  %v7544_v42 = vadd.f32 1e-07, %v1649_v5  ;;  %v7546_v20 = vadd.f32 1e-07, %v1651_v21  ;;  %v1614_v44 = vld [vmem:[#allocation4 + $0x58] sm:$0xff]  ;;  %v1650_v6 = vmax.f32 %v1618_v59, 0.0  ;;  %6326 = vpow2.f32 %v7506_v1 }
 0x250   : > { %1982 = vmatprep.subr.bf16.mxu0 %v1889_v38  ;;  %6061 = vmatprep.subr.bf16.mxu1 %v1889_v38  ;;  %v1882_v2 = vpack.c.bf16 %v7542_v41, %v7539_v29  ;;  %v1716_v23 = vmul.f32 0.01, %v7539_v29  ;;  %v1718_v32 = vmul.f32 0.01, %v7542_v41  ;;  %v7554_v28 = vadd.f32 1e-07, %v1648_v9 }
 0x251   : > { %v1877_v15 = vpack.c.bf16 %v7546_v20, %v7544_v42  ;;  %v1645_v12 = vmax.f32 %v1613_v4, 0.0  ;;  %v1647_v53 = vmax.f32 %v1615_v25, 0.0  ;;  %v1609_v54 = vld [vmem:[#allocation4 + $0xc8] sm:$0xff]  ;;  %v1611_v62 = vld [vmem:[#allocation4 + $0x78] sm:$0xff]  ;;  %v7556_v7 = vadd.f32 1e-07, %v1650_v6 }
 0x252   : > { %v1644_v55 = vmax.f32 %v1612_v31, 0.0  ;;  %v1646_v30 = vmax.f32 %v1614_v44, 0.0  ;;  %v1772_v19 = vmul.f32 1.442695, %v1722_v11  ;;  %v1608_v0 = vld [vmem:[#allocation4 + $0x80] sm:$0xff]  ;;  %6328 = vpow2.f32 %v7515_v35  ;;  %s9934_s22 = sld [smem:[#allocation64_spill]] (!%p5844_p6) }
 0x253   : > { %1983 = vmatpush1.bf16.msra.mxu0 %v1888_v16  ;;  %6069 = vmatpush1.bf16.msra.mxu1 %v1888_v16  ;;  %v7558_v27 = vadd.f32 1e-07, %v1645_v12  ;;  %v7560_v10 = vadd.f32 1e-07, %v1647_v53  ;;  %v1876_v47 = vpack.c.bf16 %v7556_v7, %v7554_v28  ;;  %v1641_v16 = vmax.f32 %v1609_v54, 0.0  ;;  %s9935_s27 = sld [smem:[#allocation65_spill]] (!%p5844_p6) }
 0x254   : > { %1984 = vmatprep.subr.bf16.mxu0 %v1883_v57  ;;  %6062 = vmatprep.subr.bf16.mxu1 %v1883_v57  ;;  %v7565_v24 = vadd.f32 1e-07, %v1644_v55  ;;  %v7567_v61 = vadd.f32 1e-07, %v1646_v30  ;;  %v1643_v22 = vmax.f32 %v1611_v62, 0.0  ;;  %v1610_v57 = vld [vmem:[#allocation4 + $0xe8] sm:$0xff]  ;;  %6330 = vpow2.f32 %v7524_v37 }
 0x255   : > { %v6319_v17 = vpop.eup %6318  ;;  %v1871_v45 = vpack.c.bf16 %v7560_v10, %v7558_v27  ;;  %v1760_v21 = vmul.f32 1.442695, %v1716_v23  ;;  %v1764_v1 = vmul.f32 1.442695, %v1718_v32  ;;  %v1712_v14 = vmul.f32 0.01, %v7554_v28 }
 0x256   : > { %v6321_v38 = vpop.eup %6320  ;;  %v1870_v11 = vpack.c.bf16 %v7567_v61, %v7565_v24  ;;  %v7576_v35 = vadd.f32 1e-07, %v1641_v16  ;;  %v7578_v59 = vadd.f32 1e-07, %v1643_v22  ;;  %v1640_v4 = vmax.f32 %v1608_v0, 0.0  ;;  %v7594_v30 = vld [vmem:[#allocation2] sm:$0xff]  }
 0x257   : > { %1985 = vmatpush1.bf16.msra.mxu0 %v1882_v2  ;;  %6070 = vmatpush1.bf16.msra.mxu1 %v1882_v2  ;;  %v6323_v5 = vpop.eup %6322  ;;  %6332 = vpow2.f32 %v7532_v58  ;;  %v1714_v25 = vmul.f32 0.01, %v7556_v7  ;;  %v1708_v2 = vmul.f32 0.01, %v7565_v24  ;;  %v1642_v9 = vmax.f32 %v1610_v57, 0.0 }
 0x258   : > { %1986 = vmatprep.subr.bf16.mxu0 %v1877_v15  ;;  %6063 = vmatprep.subr.bf16.mxu1 %v1877_v15  ;;  %6334 = vpow2.f32 %v1768_v26  ;;  %v1865_v31 = vpack.c.bf16 %v7578_v59, %v7576_v35  ;;  %v7585_v44 = vadd.f32 1e-07, %v1640_v4  ;;  %v5705_v32 = vadd.f32 -1.0, %v6323_v5 }
 0x259   : > { %6336 = vpow2.f32 %v1772_v19  ;;  %v7587_v23 = vadd.f32 1e-07, %v1642_v9  ;;  %v5704_v15 = vadd.f32 -1.0, %v6319_v17  ;;  %v1710_v58 = vmul.f32 0.01, %v7567_v61  ;;  %v7596_v19 = vld [vmem:[#allocation2 + $0x20] sm:$0xff]  }
 0x25a   : > { %6338 = vpow2.f32 %v1760_v21  ;;  %v5706_v26 = vadd.f32 -1.0, %v6321_v38  ;;  %v1752_v12 = vmul.f32 1.442695, %v1712_v14  ;;  %v1861_v54 = vmul.f32 %v5705_v32, %v7468_v60 }
 0x25b   : > { %1987 = vmatpush1.bf16.msra.mxu0 %v1876_v47  ;;  %6071 = vmatpush1.bf16.msra.mxu1 %v1876_v47  ;;  %v6325_v37 = vpop.eup %6324  ;;  %v1864_v53 = vpack.c.bf16 %v7587_v23, %v7585_v44  ;;  %v1860_v62 = vmul.f32 %v5704_v15, %v7472_v40  ;;  %v1756_v55 = vmul.f32 1.442695, %v1714_v25  ;;  %v1729_v16 = vmul.f32 0.01, %v7476_v50  ;;  %v2347_v25 = vld [vmem:[%s9702_s4] sm:$0xff] }
 0x25c   : > { %1988 = vmatprep.subr.bf16.mxu0 %v1871_v45  ;;  %6064 = vmatprep.subr.bf16.mxu1 %v1871_v45  ;;  %v5707_v6 = vadd.f32 -1.0, %v6325_v37  ;;  %v1862_v0 = vmul.f32 %v5706_v26, %v7474_v49  ;;  %v1744_v45 = vmul.f32 1.442695, %v1708_v2  ;;  %v1910_v38 = vpack.c.bf16 %v5706_v26, %v5704_v15  ;;  %v6327_v14 = vpop.eup %6326  ;;  %v7612_v2 = vld [vmem:[#allocation2 + $0x8] sm:$0xff]  }
 0x25d   : > { %v1731_v60 = vmul.f32 0.01, %v7478_v34  ;;  %6340 = vpow2.f32 %v1764_v1  ;;  %v1748_v40 = vmul.f32 1.442695, %v1710_v58  ;;  %v1704_v5 = vmul.f32 0.01, %v7585_v44  ;;  %2365 = vperm.xlu0 %6116, %v2347_v25  }
 0x25e   : > { %v1863_v17 = vmul.f32 %v5707_v6, %v7470_v63  ;;  %v1911_v47 = vpack.c.bf16 %v5707_v6, %v5705_v32  ;;  %v1908_v57 = vpack.c.bf16 %v1862_v0, %v1860_v62  ;;  %6342 = vpow2.f32 %v1752_v12  ;;  %v7616_v58 = vld [vmem:[#allocation2 + $0x28] sm:$0xff]   ;;  %v2349_v12 = vld [vmem:[%s9702_s4 + $0x10] sm:$0xff] }
 0x25f   : > { %1989 = vmatpush1.bf16.msra.mxu0 %v1870_v11  ;;  %6072 = vmatpush1.bf16.msra.mxu1 %v1870_v11  ;;  %v1786_v63 = vmul.f32 1.442695, %v1729_v16  ;;  %v1790_v21 = vmul.f32 1.442695, %v1731_v60  ;;  %6344 = vpow2.f32 %v1756_v55  ;;  %v1706_v49 = vmul.f32 0.01, %v7587_v23  ;;  %v6329_v4 = vpop.eup %6328 }
 0x260   : > { %1990 = vmatprep.subr.bf16.mxu0 %v1865_v31  ;;  %6065 = vmatprep.subr.bf16.mxu1 %v1865_v31  ;;  %v1909_v22 = vpack.c.bf16 %v1863_v17, %v1861_v54  ;;  %v1725_v11 = vmul.f32 0.01, %v7495_v13  ;;  %v1727_v1 = vmul.f32 0.01, %v7497_v8  ;;  %v1721_v32 = vmul.f32 0.01, %v7513_v18 }
 0x261   : > { %6346 = vpow2.f32 %v1786_v63  ;;  %v6331_v37 = vpop.eup %6330  ;;  %v1723_v6 = vmul.f32 0.01, %v7518_v33  ;;  %v2348_v26 = vld [vmem:[%s9702_s4 + $0x8] sm:$0xff]  ;;  %v1717_v62 = vmul.f32 0.01, %v7528_v39  ;;  %2375 = vperm.xlu1 %6117, %v2349_v12   ;;  %v2350_v16 = vld [vmem:[%s9702_s4 + $0x18] sm:$0xff] }
 0x262   : > { %6348 = vpow2.f32 %v1790_v21  ;;  %v1778_v9 = vmul.f32 1.442695, %v1725_v11  ;;  %v1782_v31 = vmul.f32 1.442695, %v1727_v1  ;;  %v1770_v54 = vmul.f32 1.442695, %v1721_v32  ;;  %2370 = vperm.xlu0 %6116, %v2348_v26  }
 0x263   : > { %1991 = vmatpush1.bf16.msra.mxu0 %v1864_v53  ;;  %6073 = vmatpush1.bf16.msra.mxu1 %v1864_v53  ;;  %6350 = vpow2.f32 %v1744_v45  ;;  %v1736_v17 = vmul.f32 1.442695, %v1704_v5  ;;  %v1719_v45 = vmul.f32 0.01, %v7530_v56  ;;  %v1740_v60 = vmul.f32 1.442695, %v1706_v49 }
 0x264   : > { %2202 = vmatprep.subr.bf16.mxu0 %v1911_v47  ;;  %2089 = vmatprep.subr.bf16.mxu1 %v1909_v22  ;;  %v6333_v15 = vpop.eup %6332  ;;  %6352 = vpow2.f32 %v1778_v9  ;;  %v1774_v47 = vmul.f32 1.442695, %v1723_v6  ;;  %v7632_v22 = vadd.f32 -1.0, %v6327_v14  ;;  %v7640_v5 = vadd.f32 -1.0, %v6329_v4  ;;  %v7647_v49 = vld [vmem:[#allocation2 + $0x10] sm:$0xff]  }
 0x265   : > { %v6335_v53 = vpop.eup %6334  ;;  %6354 = vpow2.f32 %v1782_v31  ;;  %v1766_v63 = vmul.f32 1.442695, %v1719_v45  ;;  %v1715_v21 = vmul.f32 0.01, %v7546_v20  ;;  %v7645_v14 = vadd.f32 -1.0, %v6331_v37  ;;  %v7649_v11 = vld [vmem:[#allocation2 + $0x30] sm:$0xff]   ;;  %2380 = vperm.xlu1 %6117, %v2350_v16  }
 0x266   : > { %2009 = vmatmul.mubr.bf16.vlgmr.msra.gmra.mxu0 %v7594_v30  ;;  %2049 = vmatmul.mubr.bf16.vlgmr.msra.gmra.mxu1 %v7596_v19  ;;  %v6337_v55 = vpop.eup %6336  ;;  %6356 = vpow2.f32 %v1748_v40  ;;  %v1713_v40 = vmul.f32 0.01, %v7544_v42  ;;  %v2353_v4 = vld [vmem:[%s9702_s4 + $0x30] sm:$0xff]  ;;  %v1709_v31 = vmul.f32 0.01, %v7558_v27  ;;  %v2352_v37 = vld [vmem:[%s9702_s4 + $0x28] sm:$0xff]  ;;  %v7664_v6 = vmul.f32 %v7632_v22, %v7490_v46 }
 0x267   : > { %2203 = vmatpush1.bf16.msra.mxu0 %v1910_v38  ;;  %2090 = vmatpush1.bf16.msra.mxu1 %v1908_v57  ;;  %v7626_v0 = vpop.eup %6338  ;;  %6358 = vpow2.f32 %v1770_v54  ;;  %v1762_v38 = vmul.f32 1.442695, %v1717_v62  ;;  %v2351_v57 = vld [vmem:[%s9702_s4 + $0x20] sm:$0xff]  ;;  %v1758_v9 = vmul.f32 1.442695, %v1715_v21  ;;  %v7666_v26 = vadd.f32 -1.0, %v6333_v15 }
 0x268   : > { %2018 = vmatprep.mubr.bf16.mxu0 %v6553_v36  ;;  %2058 = vmatprep.mubr.bf16.mxu1 %v6553_v36  ;;  %6360 = vpow2.f32 %v1774_v47  ;;  %v1754_v1 = vmul.f32 1.442695, %v1713_v40  ;;  %v1711_v12 = vmul.f32 0.01, %v7560_v10  ;;  %v7673_v62 = vmul.f32 %v7640_v5, %v7492_v51  ;;  %v2355_v15 = vld [vmem:[%s9702_s4 + $0x40] sm:$0xff]  ;;  %v2354_v16 = vld [vmem:[%s9702_s4 + $0x38] sm:$0xff] }
 0x269   : > { %6362 = vpow2.f32 %v1762_v38  ;;  %2385 = vperm.xlu0 %6116, %v2351_v57   ;;  %v1746_v47 = vmul.f32 1.442695, %v1709_v31  ;;  %v1705_v46 = vmul.f32 0.01, %v7576_v35  ;;  %2390 = vperm.xlu1 %6117, %v2352_v37   ;;  %v7691_v21 = vmul.f32 %v7645_v14, %v7499_v52 }
 0x26a   : > { %6364 = vpow2.f32 %v1736_v17  ;;  %v7654_v25 = vpop.eup %6340  ;;  %v7675_v17 = vadd.f32 -1.0, %v6335_v53  ;;  %v1750_v38 = vmul.f32 1.442695, %v1711_v12  ;;  %v1904_v53 = vpack.c.bf16 %v7640_v5, %v7632_v22 }
 0x26b   : > { %6366 = vpow2.f32 %v1766_v63  ;;  %v7660_v32 = vpop.eup %6342  ;;  %v1902_v5 = vpack.c.bf16 %v7673_v62, %v7664_v6  ;;  %v7710_v6 = vld [vmem:[#allocation2 + $0x38] sm:$0xff]  }
 0x26c   : > { %6368 = vpow2.f32 %v1754_v1  ;;  %v7669_v54 = vpop.eup %6344  ;;  %v7693_v1 = vadd.f32 -1.0, %v6337_v55  ;;  %v2356_v55 = vld [vmem:[%s9702_s4 + $0x48] sm:$0xff] }
 0x26d   : > { %6370 = vpow2.f32 %v1758_v9  ;;  %2395 = vperm.xlu0 %6116, %v2353_v4   ;;  %v1738_v4 = vmul.f32 1.442695, %v1705_v46  ;;  %2400 = vperm.xlu1 %6117, %v2354_v16   ;;  %v1898_v46 = vpack.c.bf16 %v7666_v26, %v7645_v14 }
 0x26e   : > { %2019 = vmatmul.mubr.bf16.gmra.mxu0 %v7612_v2  ;;  %2059 = vmatmul.mubr.bf16.gmra.mxu1 %v7616_v58  ;;  %v6347_v45 = vpop.eup %6346  ;;  %6372 = vpow2.f32 %v1740_v60  ;;  %v1707_v60 = vmul.f32 0.01, %v7578_v59  ;;  %v7723_v16 = vmul.f32 %v7693_v1, %v7522_v3 }
 0x26f   : > { %2028 = vmatprep.mubr.bf16.mxu0 %v6553_v36  ;;  %2068 = vmatprep.mubr.bf16.mxu1 %v6553_v36  ;;  %v6349_v51 = vpop.eup %6348  ;;  %v5701_v40 = vadd.f32 -1.0, %v6347_v45  ;;  %6374 = vpow2.f32 %v1746_v47  ;;  %v7708_v45 = vld [vmem:[#allocation2 + $0x18] sm:$0xff]  }
 0x270   : > { %v7687_v57 = vpop.eup %6350  ;;  %v5703_v63 = vadd.f32 -1.0, %v6349_v51  ;;  %6376 = vpow2.f32 %v1750_v38  ;;  %v1742_v52 = vmul.f32 1.442695, %v1707_v60  ;;  %v7718_v51 = vmul.f32 %v7675_v17, %v7520_v48 }
 0x271   : > { %v6353_v9 = vpop.eup %6352  ;;  %v1857_v22 = vmul.f32 %v5701_v40, %v7476_v50  ;;  %v1854_v50 = vmul.f32 %v7666_v26, %v7501_v43  ;;  %6378 = vpow2.f32 %v1738_v4  ;;  %2405 = vperm.xlu0 %6116, %v2355_v15   ;;  %v7727_v48 = vadd.f32 -1.0, %v7626_v0  ;;  %2410 = vperm.xlu1 %6117, %v2356_v55   ;;  %v2357_v0 = vld [vmem:[%s9702_s4 + $0x50] sm:$0xff] }
 0x272   : > { %v6355_v31 = vpop.eup %6354  ;;  %v1859_v37 = vmul.f32 %v5703_v63, %v7478_v34  ;;  %v1905_v12 = vpack.c.bf16 %v5703_v63, %v5701_v40  ;;  %v5697_v47 = vadd.f32 -1.0, %v6353_v9  ;;  %6380 = vpow2.f32 %v1742_v52 }
 0x273   : > { %v7712_v62 = vpop.eup %6356  ;;  %v5699_v38 = vadd.f32 -1.0, %v6355_v31  ;;  %v1896_v9 = vpack.c.bf16 %v1854_v50, %v7691_v21  ;;  %v1892_v55 = vpack.c.bf16 %v7693_v1, %v7675_v17  ;;  %v1844_v17 = vmul.f32 %v7727_v48, %v7539_v29  ;;  %v2359_v29 = vld [vmem:[%s9702_s4 + $0x60] sm:$0xff] }
 0x274   : > { %v6359_v34 = vpop.eup %6358  ;;  %v1903_v40 = vpack.c.bf16 %v1859_v37, %v1857_v22  ;;  %2204 = vmatprep.subr.bf16.mxu0 %v1905_v12  ;;  %v1853_v43 = vmul.f32 %v5697_v47, %v7495_v13  ;;  %v5684_v50 = vadd.f32 -1.0, %v7660_v32 }
 0x275   : > { %v6361_v60 = vpop.eup %6360  ;;  %2205 = vmatpush1.bf16.msra.mxu0 %v1904_v53  ;;  %v1855_v14 = vmul.f32 %v5699_v38, %v7497_v8  ;;  %v1899_v26 = vpack.c.bf16 %v5699_v38, %v5697_v47  ;;  %v5693_v63 = vadd.f32 -1.0, %v6359_v34  ;;  %v5690_v8 = vadd.f32 -1.0, %v7654_v25  ;;  %2415 = vperm.xlu0 %6116, %v2357_v0  }
 0x276   : > { %2029 = vmatmul.mubr.bf16.gmra.mxu0 %v7647_v49  ;;  %2069 = vmatmul.mubr.bf16.gmra.mxu1 %v7649_v11  ;;  %v6363_v15 = vpop.eup %6362  ;;  %v5695_v22 = vadd.f32 -1.0, %v6361_v60  ;;  %v5686_v38 = vadd.f32 -1.0, %v7669_v54  ;;  %v2360_v54 = vld [vmem:[%s9702_s4 + $0x68] sm:$0xff] }
 0x277   : > { %2038 = vmatprep.mubr.bf16.mxu0 %v6553_v36  ;;  %2078 = vmatprep.mubr.bf16.mxu1 %v6553_v36  ;;  %v7730_v13 = vpop.eup %6364  ;;  %v1897_v3 = vpack.c.bf16 %v1855_v14, %v1853_v43  ;;  %v1849_v53 = vmul.f32 %v5693_v63, %v7513_v18  ;;  %v5689_v4 = vadd.f32 -1.0, %v6363_v15  ;;  %v2358_v18 = vld [vmem:[%s9702_s4 + $0x58] sm:$0xff] }
 0x278   : > { %2091 = vmatprep.subr.bf16.mxu1 %v1903_v40  ;;  %2206 = vmatprep.subr.bf16.mxu0 %v1899_v26  ;;  %v6367_v52 = vpop.eup %6366  ;;  %v1851_v31 = vmul.f32 %v5695_v22, %v7518_v33  ;;  %v1893_v21 = vpack.c.bf16 %v5695_v22, %v5693_v63  ;;  %v1840_v63 = vmul.f32 %v5684_v50, %v7554_v28  ;;  %v5680_v22 = vadd.f32 -1.0, %v7687_v57 }
 0x279   : > { %2092 = vmatpush1.bf16.msra.mxu1 %v1902_v5  ;;  %v6369_v25 = vpop.eup %6368  ;;  %2207 = vmatpush1.bf16.msra.mxu0 %v1898_v46  ;;  %v1890_v5 = vpack.c.bf16 %v7723_v16, %v7718_v51  ;;  %v5691_v37 = vadd.f32 -1.0, %v6367_v52  ;;  %v1845_v33 = vmul.f32 %v5689_v4, %v7528_v39  ;;  %v1846_v39 = vmul.f32 %v5690_v8, %v7542_v41 }
 0x27a   : > { %2093 = vmatprep.subr.bf16.mxu1 %v1897_v3  ;;  %v6371_v1 = vpop.eup %6370  ;;  %v1891_v12 = vpack.c.bf16 %v1851_v31, %v1849_v53  ;;  %2208 = vmatprep.subr.bf16.mxu0 %v1893_v21  ;;  %v5685_v47 = vadd.f32 -1.0, %v6369_v25  ;;  %v1886_v41 = vpack.c.bf16 %v5690_v8, %v7727_v48  ;;  %v5682_v3 = vadd.f32 -1.0, %v7712_v62  ;;  %v2361_v48 = vld [vmem:[%s9702_s4 + $0x70] sm:$0xff] }
 0x27b   : > { %v6373_v46 = vpop.eup %6372  ;;  %v1847_v51 = vmul.f32 %v5691_v37, %v7530_v56  ;;  %v1887_v34 = vpack.c.bf16 %v5691_v37, %v5689_v4  ;;  %v5687_v40 = vadd.f32 -1.0, %v6371_v1  ;;  %2420 = vperm.xlu1 %6117, %v2358_v18   ;;  %2425 = vperm.xlu0 %6116, %v2359_v29   ;;  %v1880_v57 = vpack.c.bf16 %v5686_v38, %v5684_v50  ;;  %v6137_v50 = vld [vmem:[%s6682_s29 + $0xcc] ss:$16 sps:$4 sm:$0xff]  }
 0x27c   : > { %v6375_v43 = vpop.eup %6374  ;;  %v1841_v32 = vmul.f32 %v5685_v47, %v7544_v42  ;;  %v1842_v42 = vmul.f32 %v5686_v38, %v7556_v7  ;;  %v2362_v7 = vld [vmem:[%s9702_s4 + $0x78] sm:$0xff]  ;;  %v1836_v21 = vmul.f32 %v5680_v22, %v7565_v24  ;;  %v1874_v37 = vpack.c.bf16 %v5682_v3, %v5680_v22  ;;  %v6140_v38 = vld [vmem:[%s6682_s29 + $0xa4] ss:$16 sps:$4 sm:$0xff]  }
 0x27d   : > { %2094 = vmatpush1.bf16.msra.mxu1 %v1896_v9  ;;  %v6377_v56 = vpop.eup %6376  ;;  %2209 = vmatpush1.bf16.msra.mxu0 %v1892_v55  ;;  %v1885_v16 = vpack.c.bf16 %v1847_v51, %v1845_v33  ;;  %v1843_v60 = vmul.f32 %v5687_v40, %v7546_v20  ;;  %v5681_v14 = vadd.f32 -1.0, %v6375_v43  ;;  %v1881_v26 = vpack.c.bf16 %v5687_v40, %v5685_v47  ;;  %v6135_v47 = vld [vmem:[%s6682_s29 + $0xc8] ss:$16 sps:$4 sm:$0xff]   ;;  %v6143_v51 = vld [vmem:[%s6682_s29 + $0xac] ss:$16 sps:$4 sm:$0xff]  }
 0x27e   : > { %2039 = vmatmul.mubr.bf16.gmra.mxu0 %v7708_v45  ;;  %2079 = vmatmul.mubr.bf16.gmra.mxu1 %v7710_v6  ;;  %v5683_v15 = vadd.f32 -1.0, %v6377_v56  ;;  %v1884_v9 = vpack.c.bf16 %v1846_v39, %v1844_v17  ;;  %v6379_v20 = vpop.eup %6378  ;;  %v1878_v0 = vpack.c.bf16 %v1842_v42, %v1840_v63  ;;  %v5678_v55 = vadd.f32 -1.0, %v6373_v46  ;;  %v6141_v46 = vld [vmem:[%s6682_s29 + $0xa8] ss:$16 sps:$4 sm:$0xff]   ;;  %v6146_v39 = vld [vmem:[%s6682_s29 + $0x84] ss:$16 sps:$4 sm:$0xff]  }
 0x27f   : > { %2121 = vmatprep.mubr.bf16.mxu1 %v6553_v36  ;;  %2234 = vmatprep.mubr.bf16.mxu0 %v6553_v36  ;;  %v1879_v53 = vpack.c.bf16 %v1843_v60, %v1841_v32  ;;  %v1837_v4 = vmul.f32 %v5681_v14, %v7558_v27  ;;  %v6381_v8 = vpop.eup %6380  ;;  %v5677_v62 = vadd.f32 -1.0, %v6379_v20  ;;  %v1838_v27 = vmul.f32 %v5682_v3, %v7567_v61  ;;  %v6147_v40 = vld [vmem:[%s6682_s29 + $0x88] ss:$16 sps:$4 sm:$0xff]   ;;  %v6149_v29 = vld [vmem:[%s6682_s29 + $0x8c] ss:$16 sps:$4 sm:$0xff]  }
 0x280   : > { %2095 = vmatprep.subr.bf16.mxu1 %v1891_v12  ;;  %2210 = vmatprep.subr.bf16.mxu0 %v1887_v34  ;;  %v1839_v28 = vmul.f32 %v5683_v15, %v7560_v10  ;;  %v1875_v52 = vpack.c.bf16 %v5683_v15, %v5681_v14  ;;  %v5679_v31 = vadd.f32 -1.0, %v6381_v8  ;;  %v5676_v10 = vadd.f32 -1.0, %v7730_v13  ;;  %v6134_v12 = vld [vmem:[%s6682_s29 + $0xc4] ss:$16 sps:$4 sm:$0xff]   ;;  %v6144_v34 = vld [vmem:[%s6682_s29 + $0x80] ss:$16 sps:$4 sm:$0xff]  }
 0x281   : > { %2096 = vmatpush1.bf16.msra.mxu1 %v1890_v5  ;;  %2211 = vmatpush1.bf16.msra.mxu0 %v1886_v41  ;;  %v1833_v25 = vmul.f32 %v5677_v62, %v7576_v35  ;;  %v1872_v17 = vpack.c.bf16 %v1838_v27, %v1836_v21  ;;  %v1834_v61 = vmul.f32 %v5678_v55, %v7587_v23  ;;  %v6129_v23 = vld [vmem:[%s6682_s29 + $0xe8] ss:$16 sps:$4 sm:$0xff]   ;;  %v6152_v43 = vld [vmem:[%s6682_s29 + $0x64] ss:$16 sps:$4 sm:$0xff]   ;;  %v6156_v56 = vld [vmem:[%s6682_s29 + $0x40] ss:$16 sps:$4 sm:$0xff]  }
 0x282   : > { %2097 = vmatprep.subr.bf16.mxu1 %v1885_v16  ;;  %2430 = vperm.xlu1 %6117, %v2360_v54   ;;  %v1873_v18 = vpack.c.bf16 %v1839_v28, %v1837_v4  ;;  %v1835_v5 = vmul.f32 %v5679_v31, %v7578_v59  ;;  %v1869_v33 = vpack.c.bf16 %v5679_v31, %v5677_v62  ;;  %v6126_v59 = vld [vmem:[%s6682_s29 + $0xe0] ss:$16 sps:$4 sm:$0xff]   ;;  %v6153_v32 = vld [vmem:[%s6682_s29 + $0x68] ss:$16 sps:$4 sm:$0xff]   ;;  %v6155_v54 = vld [vmem:[%s6682_s29 + $0x6c] ss:$16 sps:$4 sm:$0xff]  }
 0x283   : > { %2212 = vmatprep.subr.bf16.mxu0 %v1881_v26  ;;  %2435 = vperm.xlu0 %6116, %v2361_v48   ;;  %v1832_v24 = vmul.f32 %v5676_v10, %v7585_v44  ;;  %v1868_v1 = vpack.c.bf16 %v5678_v55, %v5676_v10  ;;  %v6128_v44 = vld [vmem:[%s6682_s29 + $0xe4] ss:$16 sps:$4 sm:$0xff]   ;;  %v6159_v41 = vld [vmem:[%s6682_s29 + $0x48] ss:$16 sps:$4 sm:$0xff]   ;;  %v6161_v60 = vld [vmem:[%s6682_s29 + $0x4c] ss:$16 sps:$4 sm:$0xff]  }
 0x284   : > { %v1867_v13 = vpack.c.bf16 %v1835_v5, %v1833_v25  ;;  %v6158_v16 = vld [vmem:[%s6682_s29 + $0x44] ss:$16 sps:$4 sm:$0xff]   ;;  %v6165_v26 = vld [vmem:[%s6682_s29 + $0x28] ss:$16 sps:$4 sm:$0xff]   ;;  %v6167_v63 = vld [vmem:[%s6682_s29 + $0x2c] ss:$16 sps:$4 sm:$0xff]  }
 0x285   : > { %2098 = vmatpush1.bf16.msra.mxu1 %v1884_v9  ;;  %2213 = vmatpush1.bf16.msra.mxu0 %v1880_v57  ;;  %v1866_v35 = vpack.c.bf16 %v1834_v61, %v1832_v24  ;;  %v6164_v14 = vld [vmem:[%s6682_s29 + $0x24] ss:$16 sps:$4 sm:$0xff]   ;;  %v6168_v42 = vld [vmem:[%s6682_s29] ss:$16 sps:$4 sm:$0xff]   ;;  %v6171_v9 = vld [vmem:[%s6682_s29 + $0x8] ss:$16 sps:$4 sm:$0xff]  }
 0x286   : > { %2099 = vmatprep.subr.bf16.mxu1 %v1879_v53  ;;  %2440 = vperm.xlu1 %6117, %v2362_v7   ;;  %v6170_v15 = vld [vmem:[%s6682_s29 + $0x4] ss:$16 sps:$4 sm:$0xff]   ;;  %v6173_v22 = vld [vmem:[%s6682_s29 + $0xc] ss:$16 sps:$4 sm:$0xff]   ;;  %v6174_v48 = vld [vmem:[%s6682_s29 + $0x1e0] ss:$16 sps:$4 sm:$0xff]  }
 0x287   : > { %2214 = vmatprep.subr.bf16.mxu0 %v1875_v52  ;;  %v6179_v3 = vld [vmem:[%s6682_s29 + $0x1ec] ss:$16 sps:$4 sm:$0xff]   ;;  %v6177_v20 = vld [vmem:[%s6682_s29 + $0x1e8] ss:$16 sps:$4 sm:$0xff]   ;;  %v6182_v53 = vld [vmem:[%s6682_s29 + $0x1c4] ss:$16 sps:$4 sm:$0xff]  }
 0x288   : > { %v6183_v4 = vld [vmem:[%s6682_s29 + $0x1c8] ss:$16 sps:$4 sm:$0xff]   ;;  %v6191_v28 = vld [vmem:[%s6682_s29 + $0x1ac] ss:$16 sps:$4 sm:$0xff]   ;;  %v6186_v7 = vld [vmem:[%s6682_s29 + $0x1a0] ss:$16 sps:$4 sm:$0xff]  }
 0x289   : > { %2100 = vmatpush1.bf16.msra.mxu1 %v1878_v0  ;;  %2215 = vmatpush1.bf16.msra.mxu0 %v1874_v37  ;;  %v6189_v8 = vld [vmem:[%s6682_s29 + $0x1a8] ss:$16 sps:$4 sm:$0xff]   ;;  %v6194_v57 = vld [vmem:[%s6682_s29 + $0x184] ss:$16 sps:$4 sm:$0xff]   ;;  %v6197_v62 = vld [vmem:[%s6682_s29 + $0x18c] ss:$16 sps:$4 sm:$0xff]  }
 0x28a   : > { %2101 = vmatprep.subr.bf16.mxu1 %v1873_v18  ;;  %2216 = vmatprep.subr.bf16.mxu0 %v1869_v33  ;;  %v6192_v0 = vld [vmem:[%s6682_s29 + $0x180] ss:$16 sps:$4 sm:$0xff]   ;;  %v6195_v52 = vld [vmem:[%s6682_s29 + $0x188] ss:$16 sps:$4 sm:$0xff]   ;;  %v6200_v31 = vld [vmem:[%s6682_s29 + $0x164] ss:$16 sps:$4 sm:$0xff]  }
 0x28b   : > { %v6203_v21 = vld [vmem:[%s6682_s29 + $0x16c] ss:$16 sps:$4 sm:$0xff]   ;;  %v6198_v27 = vld [vmem:[%s6682_s29 + $0x160] ss:$16 sps:$4 sm:$0xff]   ;;  %v6201_v10 = vld [vmem:[%s6682_s29 + $0x168] ss:$16 sps:$4 sm:$0xff]  }
 0x28c   : > { %v6206_v55 = vld [vmem:[%s6682_s29 + $0x144] ss:$16 sps:$4 sm:$0xff]   ;;  %v6209_v18 = vld [vmem:[%s6682_s29 + $0x14c] ss:$16 sps:$4 sm:$0xff]   ;;  %v6204_v25 = vld [vmem:[%s6682_s29 + $0x140] ss:$16 sps:$4 sm:$0xff]  }
 0x28d   : > { %2102 = vmatpush1.bf16.msra.mxu1 %v1872_v17  ;;  %2217 = vmatpush1.bf16.msra.mxu0 %v1868_v1  ;;  %v6207_v5 = vld [vmem:[%s6682_s29 + $0x148] ss:$16 sps:$4 sm:$0xff]   ;;  %v6212_v37 = vld [vmem:[%s6682_s29 + $0x124] ss:$16 sps:$4 sm:$0xff]   ;;  %v6215_v33 = vld [vmem:[%s6682_s29 + $0x12c] ss:$16 sps:$4 sm:$0xff]  }
 0x28e   : > { %2103 = vmatprep.subr.bf16.mxu1 %v1867_v13  ;;  %v6210_v17 = vld [vmem:[%s6682_s29 + $0x120] ss:$16 sps:$4 sm:$0xff]   ;;  %v6213_v24 = vld [vmem:[%s6682_s29 + $0x128] ss:$16 sps:$4 sm:$0xff]   ;;  %v6218_v61 = vld [vmem:[%s6682_s29 + $0x104] ss:$16 sps:$4 sm:$0xff]  }
 0x28f   : > { %v6221_v13 = vld [vmem:[%s6682_s29 + $0x10c] ss:$16 sps:$4 sm:$0xff]   ;;  %v6216_v1 = vld [vmem:[%s6682_s29 + $0x100] ss:$16 sps:$4 sm:$0xff]  }
 0x290   : > { %2235 = vmatmul.mubr.bf16.vlgmr.msra.gmra.mxu0 %v7594_v30 }
 0x291   : > { %2104 = vmatpush1.bf16.msra.mxu1 %v1866_v35  ;;  %2244 = vmatprep.mubr.bf16.mxu0 %v6553_v36  ;;  %v6219_v35 = vld [vmem:[%s6682_s29 + $0x108] ss:$16 sps:$4 sm:$0xff]  }
 0x292   : > { %3025 = vmatprep.subr.bf16.mxu1 %v6128_v44 }
 0x294   : > { %2122 = vmatmul.mubr.bf16.vlgmr.msra.gmra.mxu1 %v7594_v30  ;;  %v6131_v30 = vld [vmem:[%s6682_s29 + $0xec] ss:$16 sps:$4 sm:$0xff]  }
 0x295   : > { %2131 = vmatprep.mubr.bf16.mxu1 %v6553_v36  ;;  %3138 = vmatprep.subr.bf16.mxu0 %v6131_v30 }
 0x296   : > { %3026 = vmatpush1.bf16.msra.mxu1 %v6126_v59  ;;  %3139 = vmatpush1.bf16.msra.mxu0 %v6129_v23 }
 0x297   : > { %3027 = vmatprep.subr.bf16.mxu1 %v6134_v12  ;;  %3140 = vmatprep.subr.bf16.mxu0 %v6137_v50 }
 0x298   : > { %2245 = vmatmul.mubr.bf16.gmra.mxu0 %v7612_v2 }
 0x299   : > { %2254 = vmatprep.mubr.bf16.mxu0 %v6553_v36 }
 0x29a   : > { %3141 = vmatpush1.bf16.msra.mxu0 %v6135_v47 }
 0x29b   : > { %3142 = vmatprep.subr.bf16.mxu0 %v6143_v51 }
 0x29c   : > { %2132 = vmatmul.mubr.bf16.gmra.mxu1 %v7612_v2  ;;  %v6132_v2 = vld [vmem:[%s6682_s29 + $0xc0] ss:$16 sps:$4 sm:$0xff]  }
 0x29d   : > { %2141 = vmatprep.mubr.bf16.mxu1 %v6553_v36  ;;  %3028 = vmatpush1.bf16.msra.mxu1 %v6132_v2 }
 0x29e   : > { %3029 = vmatprep.subr.bf16.mxu1 %v6140_v38  ;;  %3143 = vmatpush1.bf16.msra.mxu0 %v6141_v46 }
 0x29f   : > { %3144 = vmatprep.subr.bf16.mxu0 %v6149_v29 }
 0x2a0   : > { %2255 = vmatmul.mubr.bf16.gmra.mxu0 %v7647_v49 }
 0x2a1   : > { %2264 = vmatprep.mubr.bf16.mxu0 %v6553_v36 }
 0x2a2   : > { %3145 = vmatpush1.bf16.msra.mxu0 %v6147_v40 }
 0x2a3   : > { %3146 = vmatprep.subr.bf16.mxu0 %v6155_v54 }
 0x2a4   : > { %2142 = vmatmul.mubr.bf16.gmra.mxu1 %v7647_v49  ;;  %v6138_v49 = vld [vmem:[%s6682_s29 + $0xa0] ss:$16 sps:$4 sm:$0xff]  }
 0x2a5   : > { %2151 = vmatprep.mubr.bf16.mxu1 %v6553_v36  ;;  %3030 = vmatpush1.bf16.msra.mxu1 %v6138_v49 }
 0x2a6   : > { %3031 = vmatprep.subr.bf16.mxu1 %v6146_v39  ;;  %3147 = vmatpush1.bf16.msra.mxu0 %v6153_v32 }
 0x2a7   : > { %3148 = vmatprep.subr.bf16.mxu0 %v6161_v60 }
 0x2a8   : > { %2265 = vmatmul.mubr.bf16.gmra.mxu0 %v7708_v45 }
 0x2a9   : > { %2274 = vmatprep.mubr.bf16.mxu0 %v6553_v36  ;;  %3032 = vmatpush1.bf16.msra.mxu1 %v6144_v34 }
 0x2aa   : > { %3033 = vmatprep.subr.bf16.mxu1 %v6152_v43  ;;  %3149 = vmatpush1.bf16.msra.mxu0 %v6159_v41 }
 0x2ab   : > { %3150 = vmatprep.subr.bf16.mxu0 %v6167_v63 }
 0x2ac   : > { %2152 = vmatmul.mubr.bf16.gmra.mxu1 %v7708_v45  ;;  %v6150_v45 = vld [vmem:[%s6682_s29 + $0x60] ss:$16 sps:$4 sm:$0xff]  }
 0x2ad   : > { %2161 = vmatprep.mubr.bf16.mxu1 %v6553_v36  ;;  %3034 = vmatpush1.bf16.msra.mxu1 %v6150_v45 }
 0x2ae   : > { %3035 = vmatprep.subr.bf16.mxu1 %v6158_v16  ;;  %3151 = vmatpush1.bf16.msra.mxu0 %v6165_v26 }
 0x2af   : > { %3152 = vmatprep.subr.bf16.mxu0 %v6173_v22 }
 0x2b0   : > { %2275 = vmatmul.mubr.bf16.gmra.mxu0 %v7596_v19 }
 0x2b1   : > { %2284 = vmatprep.mubr.bf16.mxu0 %v6553_v36  ;;  %3036 = vmatpush1.bf16.msra.mxu1 %v6156_v56 }
 0x2b2   : > { %3037 = vmatprep.subr.bf16.mxu1 %v6164_v14  ;;  %3153 = vmatpush1.bf16.msra.mxu0 %v6171_v9 }
 0x2b3   : > { %3154 = vmatprep.subr.bf16.mxu0 %v6179_v3 }
 0x2b4   : > { %2162 = vmatmul.mubr.bf16.gmra.mxu1 %v7596_v19  ;;  %v6162_v19 = vld [vmem:[%s6682_s29 + $0x20] ss:$16 sps:$4 sm:$0xff]  }
 0x2b5   : > { %2171 = vmatprep.mubr.bf16.mxu1 %v6553_v36  ;;  %3038 = vmatpush1.bf16.msra.mxu1 %v6162_v19 }
 0x2b6   : > { %3039 = vmatprep.subr.bf16.mxu1 %v6170_v15  ;;  %3155 = vmatpush2.bf16.msra.mxu0 %v6177_v20 }
 0x2b8   : > { %2285 = vmatmul.mubr.bf16.gmra.mxu0 %v7616_v58 }
 0x2b9   : > { %2294 = vmatprep.mubr.bf16.mxu0 %v6553_v36  ;;  %3040 = vmatpush1.bf16.msra.mxu1 %v6168_v42 }
 0x2bc   : > { %2172 = vmatmul.mubr.bf16.gmra.mxu1 %v7616_v58  ;;  %v6176_v58 = vld [vmem:[%s6682_s29 + $0x1e4] ss:$16 sps:$4 sm:$0xff]  }
 0x2bd   : > { %2181 = vmatprep.mubr.bf16.mxu1 %v6553_v36  ;;  %3041 = vmatprep.subr.bf16.mxu1 %v6176_v58 }
 0x2be   : > { %3042 = vmatpush2.bf16.msra.mxu1 %v6174_v48 }
 0x2bf   : > { %3043 = vmatprep.subr.bf16.mxu1 %v6182_v53 }
 0x2c0   : > { %2295 = vmatmul.mubr.bf16.gmra.mxu0 %v7649_v11 }
 0x2c1   : > { %2304 = vmatprep.mubr.bf16.mxu0 %v6553_v36 }
 0x2c4   : > { %2182 = vmatmul.mubr.bf16.gmra.mxu1 %v7649_v11  ;;  %v6185_v11 = vld [vmem:[%s6682_s29 + $0x1cc] ss:$16 sps:$4 sm:$0xff]  }
 0x2c5   : > { %2191 = vmatprep.mubr.bf16.mxu1 %v6553_v36  ;;  %v6180_v36 = vld [vmem:[%s6682_s29 + $0x1c0] ss:$16 sps:$4 sm:$0xff]   ;;  %3156 = vmatprep.subr.bf16.mxu0 %v6185_v11 }
 0x2c6   : > { %3044 = vmatpush2.bf16.msra.mxu1 %v6180_v36  ;;  %3157 = vmatpush2.bf16.msra.mxu0 %v6183_v4 }
 0x2c7   : > { %3158 = vmatprep.subr.bf16.mxu0 %v6191_v28 }
 0x2c8   : > { %2305 = vmatmul.mubr.bf16.gmra.mxu0 %v7710_v6 }
 0x2ca   : > { %3159 = vmatpush2.bf16.msra.mxu0 %v6189_v8 }
 0x2cb   : > { %3160 = vmatprep.subr.bf16.mxu0 %v6197_v62 }
 0x2cc   : > { %2192 = vmatmul.mubr.bf16.gmra.mxu1 %v7710_v6  ;;  %v6188_v6 = vld [vmem:[%s6682_s29 + $0x1a4] ss:$16 sps:$4 sm:$0xff]  }
 0x2cd   : > { %3045 = vmatprep.subr.bf16.mxu1 %v6188_v6 }
 0x2ce   : > { %3046 = vmatpush2.bf16.msra.mxu1 %v6186_v7  ;;  %3161 = vmatpush2.bf16.msra.mxu0 %v6195_v52 }
 0x2cf   : > { %3047 = vmatprep.subr.bf16.mxu1 %v6194_v57  ;;  %3162 = vmatprep.subr.bf16.mxu0 %v6203_v21 }
 0x2d2   : > { %3048 = vmatpush2.bf16.msra.mxu1 %v6192_v0  ;;  %3163 = vmatpush2.bf16.msra.mxu0 %v6201_v10 }
 0x2d3   : > { %3049 = vmatprep.subr.bf16.mxu1 %v6200_v31  ;;  %3164 = vmatprep.subr.bf16.mxu0 %v6209_v18 }
 0x2d6   : > { %3050 = vmatpush2.bf16.msra.mxu1 %v6198_v27  ;;  %3165 = vmatpush2.bf16.msra.mxu0 %v6207_v5 }
 0x2d7   : > { %3051 = vmatprep.subr.bf16.mxu1 %v6206_v55  ;;  %3166 = vmatprep.subr.bf16.mxu0 %v6215_v33 }
 0x2d8   : > { %v2366_v22 = vpop.permute.xlu0 %2365 }
 0x2da   : > { %3052 = vmatpush2.bf16.msra.mxu1 %v6204_v25  ;;  %3167 = vmatpush2.bf16.msra.mxu0 %v6213_v24 }
 0x2db   : > { %3053 = vmatprep.subr.bf16.mxu1 %v6212_v37  ;;  %3168 = vmatprep.subr.bf16.mxu0 %v6221_v13 }
 0x2dc   : > { %v2376_v7 = vpop.permute.xlu1 %2375 }
 0x2dd   : > { %v2371_v11 = vpop.permute.xlu0 %2370 }
 0x2de   : > { %3054 = vmatpush2.bf16.msra.mxu1 %v6210_v17  ;;  %3169 = vmatpush2.bf16.msra.mxu0 %v6219_v35 }
 0x2df   : > { %3055 = vmatprep.subr.bf16.mxu1 %v6218_v61 }
 0x2e0   : > { %v2381_v5 = vpop.permute.xlu1 %2380 }
 0x2e2   : > { %3056 = vmatpush2.bf16.msra.mxu1 %v6216_v1 }
 0x326   : > { %v7878_v59 = vpop.f32.mrf.mxu0  ;;  %v7880_v44 = vpop.f32.mrf.mxu1 }
 0x328   : > { %v7882_v23 = vpop.f32.mrf.mxu0  ;;  %v7884_v30 = vpop.f32.mrf.mxu1 }
 0x32a   : > { %v7886_v2 = vpop.f32.mrf.mxu0  ;;  %v7888_v12 = vpop.f32.mrf.mxu1 }
 0x32c   : > { %v7890_v47 = vpop.f32.mrf.mxu0  ;;  %v7892_v50 = vpop.f32.mrf.mxu1 }
 0x32e   : > { %v7894_v49 = vpop.f32.mrf.mxu0  ;;  %v7896_v38 = vpop.f32.mrf.mxu1 }
 0x330   : > { %v7898_v46 = vpop.f32.mrf.mxu0  ;;  %v7900_v51 = vpop.f32.mrf.mxu1 }
 0x332   : > { %v7902_v34 = vpop.f32.mrf.mxu0  ;;  %v7904_v39 = vpop.f32.mrf.mxu1 }
 0x334   : > { %v7906_v40 = vpop.f32.mrf.mxu0  ;;  %v7908_v29 = vpop.f32.mrf.mxu1 }
 0x336   : > { %v7910_v45 = vpop.f32.mrf.mxu0  ;;  %v7912_v43 = vpop.f32.mrf.mxu1 }
 0x338   : > { %v7914_v32 = vpop.f32.mrf.mxu0  ;;  %v7916_v54 = vpop.f32.mrf.mxu1 }
 0x33a   : > { %v7918_v56 = vpop.f32.mrf.mxu0  ;;  %v7920_v16 = vpop.f32.mrf.mxu1 }
 0x33c   : > { %v7922_v41 = vpop.f32.mrf.mxu0  ;;  %v7924_v60 = vpop.f32.mrf.mxu1 }
 0x33e   : > { %v7926_v19 = vpop.f32.mrf.mxu0  ;;  %v7928_v14 = vpop.f32.mrf.mxu1 }
 0x340   : > { %v7930_v26 = vpop.f32.mrf.mxu0  ;;  %v7932_v63 = vpop.f32.mrf.mxu1 }
 0x342   : > { %v7934_v42 = vpop.f32.mrf.mxu0  ;;  %v7936_v15 = vpop.f32.mrf.mxu1 }
 0x344   : > { %v7938_v9 = vpop.f32.mrf.mxu0  ;;  %v7940_v58 = vpop.f32.mrf.mxu1 }
 0x350   : > { %v2236_v3 = vpop.f32.mrf.mxu0 }
 0x351   : > { %v2443_v48 = vadd.f32 %v2366_v22, %v2236_v3 }
 0x352   : > { %v2238_v53 = vpop.f32.mrf.mxu0 }
 0x353   : > { %v2475_v36 = vmax.f32 %v2443_v48, 1e-12  ;;  %v2444_v4 = vadd.f32 %v2366_v22, %v2238_v53  ;;  %v2386_v22 = vpop.permute.xlu0 %2385 }
 0x354   : > { %v2123_v20 = vpop.f32.mrf.mxu1  ;;  %v2240_v28 = vpop.f32.mrf.mxu0 }
 0x355   : > { %v2476_v8 = vmax.f32 %v2444_v4, 1e-12  ;;  %v2445_v57 = vadd.f32 %v2371_v11, %v2240_v28  ;;  %6382 = vrcp.f32 %v2475_v36 }
 0x356   : > { %v2125_v6 = vpop.f32.mrf.mxu1  ;;  %v2242_v0 = vpop.f32.mrf.mxu0 }
 0x357   : > { %v2477_v52 = vmax.f32 %v2445_v57, 1e-12  ;;  %v2446_v31 = vadd.f32 %v2371_v11, %v2242_v0  ;;  %6384 = vrcp.f32 %v2476_v8  ;;  %v2391_v8 = vpop.permute.xlu1 %2390 }
 0x358   : > { %v2127_v62 = vpop.f32.mrf.mxu1  ;;  %v2246_v27 = vpop.f32.mrf.mxu0 }
 0x359   : > { %6386 = vrcp.f32 %v2477_v52  ;;  %v2478_v10 = vmax.f32 %v2446_v31, 1e-12  ;;  %v2447_v55 = vadd.f32 %v2376_v7, %v2246_v27 }
 0x35a   : > { %v2129_v21 = vpop.f32.mrf.mxu1  ;;  %v2248_v25 = vpop.f32.mrf.mxu0 }
 0x35b   : > { %6388 = vrcp.f32 %v2478_v10  ;;  %v2479_v37 = vmax.f32 %v2447_v55, 1e-12  ;;  %v2448_v33 = vadd.f32 %v2376_v7, %v2248_v25  ;;  %v2317_v55 = vadd.f32 %v2127_v62, %v7886_v2 }
 0x35c   : > { %v7942_v18 = vpop.f32.mrf.mxu1  ;;  %v2250_v24 = vpop.f32.mrf.mxu0 }
 0x35d   : > { %v2480_v61 = vmax.f32 %v2448_v33, 1e-12  ;;  %v2449_v13 = vadd.f32 %v2381_v5, %v2250_v24  ;;  %6390 = vrcp.f32 %v2479_v37  ;;  %v2315_v37 = vadd.f32 %v2123_v20, %v7878_v59 }
 0x35e   : > { %v7944_v17 = vpop.f32.mrf.mxu1  ;;  %v2252_v35 = vpop.f32.mrf.mxu0  ;;  %v2316_v33 = vadd.f32 %v2125_v6, %v7882_v23 }
 0x35f   : > { %v2481_v3 = vmax.f32 %v2449_v13, 1e-12  ;;  %v2450_v48 = vadd.f32 %v2381_v5, %v2252_v35  ;;  %6392 = vrcp.f32 %v2480_v61  ;;  %v2396_v35 = vpop.permute.xlu0 %2395 }
 0x360   : > { %v7946_v1 = vpop.f32.mrf.mxu1  ;;  %v2256_v11 = vpop.f32.mrf.mxu0 }
 0x361   : > { %6394 = vrcp.f32 %v2481_v3  ;;  %v2482_v36 = vmax.f32 %v2450_v48, 1e-12  ;;  %v2451_v4 = vadd.f32 %v2386_v22, %v2256_v11 }
 0x362   : > { %v7948_v53 = vpop.f32.mrf.mxu1  ;;  %v2258_v7 = vpop.f32.mrf.mxu0 }
 0x363   : > { %6396 = vrcp.f32 %v2482_v36  ;;  %v2483_v57 = vmax.f32 %v2451_v4, 1e-12  ;;  %v6383_v0 = vpop.eup %6382  ;;  %v2452_v31 = vadd.f32 %v2386_v22, %v2258_v7  ;;  %v2318_v36 = vadd.f32 %v2129_v21, %v7890_v47 }
 0x364   : > { %v7950_v28 = vpop.f32.mrf.mxu1  ;;  %v2260_v27 = vpop.f32.mrf.mxu0  ;;  %v2539_v59 = vmul.f32 %v6383_v0, %v2315_v37  ;;  %v6480_v0 = vld [vmem:[#allocation4 + $0x78] sm:$0xff] }
 0x365   : > { %v6385_v10 = vpop.eup %6384  ;;  %v2453_v25 = vadd.f32 %v2391_v8, %v2260_v27  ;;  %v2484_v24 = vmax.f32 %v2452_v31, 1e-12  ;;  %6398 = vrcp.f32 %v2483_v57  ;;  %v2401_v27 = vpop.permute.xlu1 %2400 }
 0x366   : > { %v7952_v52 = vpop.f32.mrf.mxu1  ;;  %v6387_v5 = vpop.eup %6386  ;;  %v2540_v4 = vmul.f32 %v6385_v10, %v2316_v33 }
 0x367   : > { %v2262_v13 = vpop.f32.mrf.mxu0  ;;  %v2541_v3 = vmul.f32 %v6387_v5, %v2317_v55  ;;  %v2485_v48 = vmax.f32 %v2453_v25, 1e-12  ;;  %6400 = vrcp.f32 %v2484_v24  ;;  %v6478_v55 = vld [vmem:[#allocation4 + $0xe8] sm:$0xff] }
 0x368   : > { %v7957_v61 = vpop.f32.mrf.mxu1  ;;  %v2454_v11 = vadd.f32 %v2391_v8, %v2262_v13  ;;  %v6389_v22 = vpop.eup %6388  ;;  %v6479_v24 = vld [vmem:[#allocation4 + $0xc8] sm:$0xff] }
 0x369   : > { %v2266_v62 = vpop.f32.mrf.mxu0  ;;  %6402 = vrcp.f32 %v2485_v48  ;;  %v2542_v31 = vmul.f32 %v6389_v22, %v2318_v36  ;;  %v2573_v25 = vadd.f32 %v6478_v55, %v2541_v3  ;;  %v2572_v10 = vadd.f32 %v6479_v24, %v2540_v4 }
 0x36a   : > { %v7960_v2 = vpop.f32.mrf.mxu1  ;;  %v2486_v23 = vmax.f32 %v2454_v11, 1e-12  ;;  %v2455_v20 = vadd.f32 %v2396_v35, %v2266_v62  ;;  %v6391_v47 = vpop.eup %6390  ;;  %v6481_v11 = vld [vmem:[#allocation4 + $0x80] sm:$0xff]  ;;  %v2319_v36 = vadd.f32 %v7942_v18, %v7894_v49  ;;  %v2321_v3 = vadd.f32 %v7946_v1, %v7902_v34 }
 0x36b   : > { %v2268_v7 = vpop.f32.mrf.mxu0  ;;  %v2574_v37 = vadd.f32 %v6480_v0, %v2542_v31  ;;  %v2571_v62 = vadd.f32 %v6481_v11, %v2539_v59  ;;  %v6482_v0 = vld [vmem:[#allocation4 + $0x58] sm:$0xff]  ;;  %v6483_v11 = vld [vmem:[#allocation4 + $0x90] sm:$0xff] }
 0x36c   : > { %v7962_v6 = vpop.f32.mrf.mxu1  ;;  %6404 = vrcp.f32 %v2486_v23  ;;  %v2487_v57 = vmax.f32 %v2455_v20, 1e-12  ;;  %v2456_v8 = vadd.f32 %v2396_v35, %v2268_v7  ;;  %v6393_v33 = vpop.eup %6392  ;;  %v2320_v35 = vadd.f32 %v7944_v17, %v7898_v46 }
 0x36d   : > { %v2270_v5 = vpop.f32.mrf.mxu0  ;;  %v2604_v20 = vpack.c.bf16 %v2574_v37, %v2572_v10  ;;  %v2406_v7 = vpop.permute.xlu0 %2405  ;;  %v2603_v55 = vpack.c.bf16 %v2573_v25, %v2571_v62 }
 0x36e   : > { %v7964_v21 = vpop.f32.mrf.mxu1  ;;  %v2488_v13 = vmax.f32 %v2456_v8, 1e-12  ;;  %v2457_v48 = vadd.f32 %v2401_v27, %v2270_v5  ;;  %v6395_v22 = vpop.eup %6394  ;;  %6406 = vrcp.f32 %v2487_v57  ;;  %v2322_v5 = vadd.f32 %v7948_v53, %v7906_v40 }
 0x36f   : > { %v2272_v4 = vpop.f32.mrf.mxu0  ;;  %3057 = vmatprep.mubr.bf16.mxu1 %v2604_v20  ;;  %3170 = vmatprep.mubr.bf16.mxu0 %v2604_v20  ;;  %v2544_v34 = vmul.f32 %v6393_v33, %v2320_v35  ;;  %v2545_v18 = vmul.f32 %v6395_v22, %v2321_v3  ;;  %v2543_v57 = vmul.f32 %v6391_v47, %v2319_v36  ;;  %v2411_v10 = vpop.permute.xlu1 %2410  ;;  %v6484_v22 = vld [vmem:[#allocation4 + $0xa8] sm:$0xff] }
 0x370   : > { %v7972_v23 = vpop.f32.mrf.mxu1  ;;  %v2489_v31 = vmax.f32 %v2457_v48, 1e-12  ;;  %v2458_v8 = vadd.f32 %v2401_v27, %v2272_v4  ;;  %v6397_v59 = vpop.eup %6396  ;;  %6408 = vrcp.f32 %v2488_v13  ;;  %3058 = vmatmul.mubr.bf16.vlgmr.msra.gmra.mxu1 %v2603_v55  ;;  %3171 = vmatmul.mubr.bf16.vlgmr.msra.gmra.mxu0 %v2603_v55  ;;  %v6485_v4 = vld [vmem:[#allocation4 + $0x8] sm:$0xff]  ;;  %v2325_v55 = vadd.f32 %v7957_v61, %v7918_v56 }
 0x371   : > { %v2276_v46 = vpop.f32.mrf.mxu0  ;;  %v2546_v24 = vmul.f32 %v6397_v59, %v2322_v5  ;;  %v2577_v37 = vadd.f32 %v6482_v0, %v2545_v18  ;;  %v2576_v62 = vadd.f32 %v6483_v11, %v2544_v34  ;;  %v2575_v20 = vadd.f32 %v6485_v4, %v2543_v57  ;;  %v2416_v34 = vpop.permute.xlu0 %2415 }
 0x372   : > { %v7976_v49 = vpop.f32.mrf.mxu1  ;;  %6410 = vrcp.f32 %v2489_v31  ;;  %v2490_v17 = vmax.f32 %v2458_v8, 1e-12  ;;  %v2459_v1 = vadd.f32 %v2406_v7, %v2276_v46  ;;  %v6399_v13 = vpop.eup %6398  ;;  %v2323_v8 = vadd.f32 %v7950_v28, %v7910_v45 }
 0x373   : > { %v2278_v25 = vpop.f32.mrf.mxu0  ;;  %v2578_v35 = vadd.f32 %v6484_v22, %v2546_v24  ;;  %v2421_v0 = vpop.permute.xlu1 %2420 }
 0x374   : > { %v7978_v27 = vpop.f32.mrf.mxu1  ;;  %6412 = vrcp.f32 %v2490_v17  ;;  %v2491_v40 = vmax.f32 %v2459_v1, 1e-12  ;;  %v2460_v53 = vadd.f32 %v2406_v7, %v2278_v25  ;;  %v6401_v3 = vpop.eup %6400  ;;  %v2324_v7 = vadd.f32 %v7952_v52, %v7914_v32 }
 0x375   : > { %v2280_v33 = vpop.f32.mrf.mxu0  ;;  %v2606_v46 = vpack.c.bf16 %v2578_v35, %v2576_v62  ;;  %v2605_v1 = vpack.c.bf16 %v2577_v37, %v2575_v20  ;;  %v2326_v25 = vadd.f32 %v7960_v2, %v7922_v41  ;;  %v2547_v24 = vmul.f32 %v6399_v13, %v2323_v8  ;;  %v6486_v2 = vld [vmem:[#allocation4 + $0x38] sm:$0xff]  ;;  %v6487_v35 = vld [vmem:[#allocation4 + $0xb0] sm:$0xff] }
 0x376   : > { %v7980_v48 = vpop.f32.mrf.mxu1  ;;  %v2492_v47 = vmax.f32 %v2460_v53, 1e-12  ;;  %v2461_v36 = vadd.f32 %v2411_v10, %v2280_v33  ;;  %v6403_v31 = vpop.eup %6402  ;;  %6414 = vrcp.f32 %v2491_v40  ;;  %v2548_v56 = vmul.f32 %v6401_v3, %v2324_v7 }
 0x377   : > { %v2282_v5 = vpop.f32.mrf.mxu0  ;;  %3067 = vmatprep.mubr.bf16.mxu1 %v2606_v46  ;;  %3180 = vmatprep.mubr.bf16.mxu0 %v2606_v46  ;;  %v2549_v28 = vmul.f32 %v6403_v31, %v2325_v55  ;;  %v6489_v31 = vld [vmem:[#allocation4 + $0xd0] sm:$0xff]  ;;  %v2327_v55 = vadd.f32 %v7962_v6, %v7926_v19  ;;  %v2329_v46 = vadd.f32 %v7972_v23, %v7934_v42 }
 0x378   : > { %v7988_v59 = vpop.f32.mrf.mxu1  ;;  %v2493_v18 = vmax.f32 %v2461_v36, 1e-12  ;;  %v2462_v17 = vadd.f32 %v2411_v10, %v2282_v5  ;;  %6416 = vrcp.f32 %v2492_v47  ;;  %3068 = vmatmul.mubr.bf16.gmra.mxu1 %v2605_v1  ;;  %3181 = vmatmul.mubr.bf16.gmra.mxu0 %v2605_v1  ;;  %v2580_v3 = vadd.f32 %v6487_v35, %v2548_v56  ;;  %v6488_v47 = vld [vmem:[#allocation4 + $0x40] sm:$0xff]  ;;  %v2426_v1 = vpop.permute.xlu0 %2425 }
 0x379   : > { %v6405_v57 = vpop.eup %6404  ;;  %v2286_v32 = vpop.f32.mrf.mxu0  ;;  %v2581_v37 = vadd.f32 %v6486_v2, %v2549_v28  ;;  %v2579_v8 = vadd.f32 %v6489_v31, %v2547_v24  ;;  %v2328_v5 = vadd.f32 %v7964_v21, %v7930_v26  ;;  %v2330_v28 = vadd.f32 %v7976_v49, %v7938_v9  ;;  %v6490_v49 = vld [vmem:[#allocation4 + $0x18] sm:$0xff] }
 0x37a   : > { %v7992_v45 = vpop.f32.mrf.mxu1  ;;  %6418 = vrcp.f32 %v2493_v18  ;;  %v2494_v52 = vmax.f32 %v2462_v17, 1e-12  ;;  %v2463_v61 = vadd.f32 %v2416_v34, %v2286_v32  ;;  %v2550_v53 = vmul.f32 %v6405_v57, %v2326_v25 }
 0x37b   : > { %v2288_v40 = vpop.f32.mrf.mxu0  ;;  %v6407_v33 = vpop.eup %6406  ;;  %v2607_v32 = vpack.c.bf16 %v2581_v37, %v2579_v8 }
 0x37c   : > { %v7994_v10 = vpop.f32.mrf.mxu1  ;;  %6420 = vrcp.f32 %v2494_v52  ;;  %v2464_v41 = vadd.f32 %v2416_v34, %v2288_v40  ;;  %v2495_v11 = vmax.f32 %v2463_v61, 1e-12  ;;  %v2582_v36 = vadd.f32 %v6488_v47, %v2550_v53  ;;  %v2431_v53 = vpop.permute.xlu1 %2430 }
 0x37d   : > { %v2290_v22 = vpop.f32.mrf.mxu0  ;;  %v6409_v4 = vpop.eup %6408  ;;  %v2551_v52 = vmul.f32 %v6407_v33, %v2327_v55  ;;  %v2331_v33 = vadd.f32 %v7978_v27, %v7880_v44  ;;  %v2333_v55 = vadd.f32 %v7988_v59, %v7888_v12 }
 0x37e   : > { %v7996_v62 = vpop.f32.mrf.mxu1  ;;  %v2496_v13 = vmax.f32 %v2464_v41, 1e-12  ;;  %v2465_v20 = vadd.f32 %v2421_v0, %v2290_v22  ;;  %v2608_v17 = vpack.c.bf16 %v2582_v36, %v2580_v3  ;;  %v2552_v42 = vmul.f32 %v6409_v4, %v2328_v5  ;;  %v6491_v22 = vld [vmem:[#allocation4 + $0x60] sm:$0xff]  ;;  %v6492_v3 = vld [vmem:[#allocation4 + $0x68] sm:$0xff] }
 0x37f   : > { %v6411_v7 = vpop.eup %6410  ;;  %v2292_v18 = vpop.f32.mrf.mxu0  ;;  %v2334_v5 = vadd.f32 %v7992_v45, %v7892_v50 }
 0x380   : > { %v8004_v34 = vpop.f32.mrf.mxu1  ;;  %6422 = vrcp.f32 %v2496_v13  ;;  %v2497_v57 = vmax.f32 %v2465_v20, 1e-12  ;;  %v2466_v25 = vadd.f32 %v2421_v0, %v2292_v18  ;;  %3077 = vmatprep.mubr.bf16.mxu1 %v2608_v17  ;;  %3190 = vmatprep.mubr.bf16.mxu0 %v2608_v17  ;;  %v2553_v6 = vmul.f32 %v6411_v7, %v2329_v46  ;;  %v6493_v20 = vld [vmem:[#allocation4 + $0xe0] sm:$0xff] }
 0x381   : > { %v6413_v56 = vpop.eup %6412  ;;  %6424 = vrcp.f32 %v2495_v11  ;;  %v2296_v26 = vpop.f32.mrf.mxu0  ;;  %3078 = vmatmul.mubr.bf16.gmra.mxu1 %v2607_v32  ;;  %3191 = vmatmul.mubr.bf16.gmra.mxu0 %v2607_v32  ;;  %v2584_v35 = vadd.f32 %v6491_v22, %v2552_v42  ;;  %v2583_v31 = vadd.f32 %v6493_v20, %v2551_v52  ;;  %v2332_v7 = vadd.f32 %v7980_v48, %v7884_v30 }
 0x382   : > { %v8008_v19 = vpop.f32.mrf.mxu1  ;;  %6426 = vrcp.f32 %v2497_v57  ;;  %v2498_v21 = vmax.f32 %v2466_v25, 1e-12  ;;  %v2467_v23 = vadd.f32 %v2426_v1, %v2296_v26  ;;  %v2554_v40 = vmul.f32 %v6413_v56, %v2330_v28  ;;  %v2436_v25 = vpop.permute.xlu0 %2435  ;;  %v6494_v28 = vld [vmem:[#allocation4 + $0x50] sm:$0xff] }
 0x383   : > { %v2298_v24 = vpop.f32.mrf.mxu0  ;;  %v2585_v0 = vadd.f32 %v6490_v49, %v2553_v6  ;;  %v6415_v41 = vpop.eup %6414  ;;  %v2336_v22 = vadd.f32 %v7996_v62, %v7900_v51 }
 0x384   : > { %v8010_v61 = vpop.f32.mrf.mxu1  ;;  %6428 = vrcp.f32 %v2498_v21  ;;  %v2468_v9 = vadd.f32 %v2426_v1, %v2298_v24  ;;  %v2499_v2 = vmax.f32 %v2467_v23, 1e-12  ;;  %v2586_v47 = vadd.f32 %v6492_v3, %v2554_v40  ;;  %v2441_v23 = vpop.permute.xlu1 %2440  ;;  %v6495_v40 = vld [vmem:[#allocation4 + $0x70] sm:$0xff] }
 0x385   : > { %v2300_v11 = vpop.f32.mrf.mxu0  ;;  %v6417_v36 = vpop.eup %6416  ;;  %v2609_v1 = vpack.c.bf16 %v2585_v0, %v2583_v31  ;;  %v2555_v32 = vmul.f32 %v6415_v41, %v2331_v33  ;;  %v6497_v0 = vld [vmem:[#allocation4 + $0x10] sm:$0xff]  ;;  %v2338_v33 = vadd.f32 %v8008_v19, %v7908_v29 }
 0x386   : > { %v8012_v37 = vpop.f32.mrf.mxu1  ;;  %v2500_v4 = vmax.f32 %v2468_v9, 1e-12  ;;  %v2469_v13 = vadd.f32 %v2431_v53, %v2300_v11  ;;  %v2610_v18 = vpack.c.bf16 %v2586_v47, %v2584_v35  ;;  %v2556_v48 = vmul.f32 %v6417_v36, %v2332_v7  ;;  %v6496_v9 = vld [vmem:[#allocation4 + $0xa0] sm:$0xff]  ;;  %v6498_v19 = vld [vmem:[#allocation4 + $0x30] sm:$0xff] }
 0x387   : > { %v6419_v8 = vpop.eup %6418  ;;  %v2302_v46 = vpop.f32.mrf.mxu0  ;;  %v2587_v41 = vadd.f32 %v6497_v0, %v2555_v32  ;;  %v2335_v11 = vadd.f32 %v7994_v10, %v7896_v38  ;;  %v2337_v36 = vadd.f32 %v8004_v34, %v7904_v39 }
 0x388   : > { %6430 = vrcp.f32 %v2500_v4  ;;  %v8022_v17 = vpop.f32.mrf.mxu1  ;;  %v2501_v44 = vmax.f32 %v2469_v13, 1e-12  ;;  %v2470_v27 = vadd.f32 %v2431_v53, %v2302_v46  ;;  %3087 = vmatprep.mubr.bf16.mxu1 %v2610_v18  ;;  %3200 = vmatprep.mubr.bf16.mxu0 %v2610_v18  ;;  %v2557_v12 = vmul.f32 %v6419_v8, %v2333_v55  ;;  %v6500_v18 = vld [vmem:[#allocation4 + $0x20] sm:$0xff] }
 0x389   : > { %v6421_v57 = vpop.eup %6420  ;;  %6432 = vrcp.f32 %v2499_v2  ;;  %v2306_v30 = vpop.f32.mrf.mxu0  ;;  %3088 = vmatmul.mubr.bf16.gmra.mxu1 %v2609_v1  ;;  %3201 = vmatmul.mubr.bf16.gmra.mxu0 %v2609_v1  ;;  %v2588_v53 = vadd.f32 %v6495_v40, %v2556_v48  ;;  %v6501_v48 = vld [vmem:[#allocation4 + $0xd8] sm:$0xff] }
 0x38a   : > { %6434 = vrcp.f32 %v2501_v44  ;;  %v2502_v59 = vmax.f32 %v2470_v27, 1e-12  ;;  %v2471_v50 = vadd.f32 %v2436_v25, %v2306_v30  ;;  %v2558_v56 = vmul.f32 %v6421_v57, %v2334_v5  ;;  %v2189_v42 = vpop.f32.mrf.mxu1  ;;  %v6499_v5 = vld [vmem:[#allocation4 + $0xf0] sm:$0xff] }
 0x38b   : > { %v2308_v45 = vpop.f32.mrf.mxu0  ;;  %v2589_v26 = vadd.f32 %v6494_v28, %v2557_v12  ;;  %v2340_v57 = vadd.f32 %v8012_v37, %v7916_v54 }
 0x38c   : > { %6436 = vrcp.f32 %v2502_v59  ;;  %v2472_v6 = vadd.f32 %v2436_v25, %v2308_v45  ;;  %v2503_v52 = vmax.f32 %v2471_v50, 1e-12  ;;  %v2590_v49 = vadd.f32 %v6496_v9, %v2558_v56  ;;  %v2193_v31 = vpop.f32.mrf.mxu1  ;;  %v6505_v9 = vld [vmem:[#allocation4 + $0x88] sm:$0xff] }
 0x38d   : > { %v6423_v21 = vpop.eup %6422  ;;  %v2310_v24 = vpop.f32.mrf.mxu0  ;;  %v2611_v20 = vpack.c.bf16 %v2589_v26, %v2587_v41  ;;  %v2341_v25 = vadd.f32 %v8022_v17, %v7920_v16  ;;  %v2339_v59 = vadd.f32 %v8010_v61, %v7912_v43  ;;  %v2342_v50 = vadd.f32 %v2189_v42, %v7924_v60  ;;  %v6502_v17 = vld [vmem:[#allocation4 + $0x48] sm:$0xff] }
 0x38e   : > { %v6425_v2 = vpop.eup %6424  ;;  %v2504_v35 = vmax.f32 %v2472_v6, 1e-12  ;;  %v2473_v3 = vadd.f32 %v2441_v23, %v2310_v24  ;;  %v2612_v13 = vpack.c.bf16 %v2590_v49, %v2588_v53  ;;  %v2560_v38 = vmul.f32 %v6423_v21, %v2336_v22  ;;  %v2195_v29 = vpop.f32.mrf.mxu1  ;;  %v6504_v24 = vld [vmem:[#allocation4 + $0xf8] sm:$0xff] }
 0x38f   : > { %v6427_v47 = vpop.eup %6426  ;;  %v2312_v4 = vpop.f32.mrf.mxu0  ;;  %v2559_v34 = vmul.f32 %v6425_v2, %v2335_v11  ;;  %v2344_v42 = vadd.f32 %v2195_v29, %v7932_v63  ;;  %v2343_v41 = vadd.f32 %v2193_v31, %v7928_v14  ;;  %v6231_v29 = vld [vmem:[%s6701_s18 + $0x160] ss:$8 sps:$4 sm:$0xff]  }
 0x390   : > { %6438 = vrcp.f32 %v2504_v35  ;;  %v2505_v8 = vmax.f32 %v2473_v3, 1e-12  ;;  %v2474_v7 = vadd.f32 %v2441_v23, %v2312_v4  ;;  %3097 = vmatprep.mubr.bf16.mxu1 %v2612_v13  ;;  %3210 = vmatprep.mubr.bf16.mxu0 %v2612_v13  ;;  %v2561_v51 = vmul.f32 %v6427_v47, %v2337_v36  ;;  %v2197_v45 = vpop.f32.mrf.mxu1  ;;  %v6503_v23 = vld [vmem:[#allocation4 + $0xc0] sm:$0xff] }
 0x391   : > { %v6429_v10 = vpop.eup %6428  ;;  %6440 = vrcp.f32 %v2503_v52  ;;  %3098 = vmatmul.mubr.bf16.gmra.mxu1 %v2611_v20  ;;  %3211 = vmatmul.mubr.bf16.gmra.mxu0 %v2611_v20  ;;  %v2592_v55 = vadd.f32 %v6498_v19, %v2560_v38  ;;  %v2591_v32 = vadd.f32 %v6501_v48, %v2559_v34  ;;  %v2345_v40 = vadd.f32 %v2197_v45, %v7936_v15  ;;  %v6506_v15 = vld [vmem:[#allocation4] sm:$0xff]  ;;  %v6509_v20 = vld [vmem:[#allocation4 + $0xb8] sm:$0xff] }
 0x392   : > { %6442 = vrcp.f32 %v2505_v8  ;;  %v2506_v62 = vmax.f32 %v2474_v7, 1e-12  ;;  %v2562_v39 = vmul.f32 %v6429_v10, %v2338_v33  ;;  %v2593_v44 = vadd.f32 %v6500_v18, %v2561_v51  ;;  %v2199_v37 = vpop.f32.mrf.mxu1  ;;  %v6507_v33 = vld [vmem:[#allocation4 + $0x98] sm:$0xff]  ;;  %v6228_v34 = vld [vmem:[%s6701_s18 + $0x60] ss:$8 sps:$4 sm:$0xff]  }
 0x393   : > { %v2346_v2 = vadd.f32 %v2199_v37, %v7940_v58  ;;  %v6508_v58 = vld [vmem:[#allocation4 + $0x28] sm:$0xff]  ;;  %v6222_v7 = vld [vmem:[%s6701_s18 + $0x70] ss:$8 sps:$4 sm:$0xff]   ;;  %v6224_v38 = vld [vmem:[%s6701_s18 + $0x74] ss:$8 sps:$4 sm:$0xff]   ;;  %v2685_v45 = vlaneseq }
 0x394   : > { %6444 = vrcp.f32 %v2506_v62  ;;  %v2594_v46 = vadd.f32 %v6499_v5, %v2562_v39  ;;  %v2613_v56 = vpack.c.bf16 %v2593_v44, %v2591_v32  ;;  %v6225_v10 = vld [vmem:[%s6701_s18 + $0x170] ss:$8 sps:$4 sm:$0xff]   ;;  %v6227_v51 = vld [vmem:[%s6701_s18 + $0x174] ss:$8 sps:$4 sm:$0xff]   ;;  %v6230_v62 = vld [vmem:[%s6701_s18 + $0x64] ss:$8 sps:$4 sm:$0xff]   ;;  %4380 = vmatprep.subr.bf16.mxu1 %v6224_v38 }
 0x395   : > { %v6431_v27 = vpop.eup %6430  ;;  %v6233_v39 = vld [vmem:[%s6701_s18 + $0x164] ss:$8 sps:$4 sm:$0xff]   ;;  %4493 = vmatprep.subr.bf16.mxu0 %v6227_v51  ;;  %4381 = vmatpush1.bf16.msra.mxu1 %v6222_v7  ;;  %v6236_v19 = vld [vmem:[%s6701_s18 + $0x54] ss:$8 sps:$4 sm:$0xff]   ;;  %v6234_v5 = vld [vmem:[%s6701_s18 + $0x50] ss:$8 sps:$4 sm:$0xff]  }
 0x396   : > { %v6433_v1 = vpop.eup %6432  ;;  %v2614_v30 = vpack.c.bf16 %v2594_v46, %v2592_v55  ;;  %v2564_v28 = vmul.f32 %v6431_v27, %v2340_v57  ;;  %4494 = vmatpush1.bf16.msra.mxu0 %v6225_v10  ;;  %4382 = vmatprep.subr.bf16.mxu1 %v6230_v62  ;;  %v6239_v55 = vld [vmem:[%s6701_s18 + $0x154] ss:$8 sps:$4 sm:$0xff]   ;;  %v6237_v46 = vld [vmem:[%s6701_s18 + $0x150] ss:$8 sps:$4 sm:$0xff]   ;;  %v6242_v18 = vld [vmem:[%s6701_s18 + $0x44] ss:$8 sps:$4 sm:$0xff]  }
 0x397   : > { %v6435_v12 = vpop.eup %6434  ;;  %v2563_v16 = vmul.f32 %v6433_v1, %v2339_v59  ;;  %4495 = vmatprep.subr.bf16.mxu0 %v6233_v39  ;;  %v6245_v44 = vld [vmem:[%s6701_s18 + $0x144] ss:$8 sps:$4 sm:$0xff]   ;;  %v6240_v27 = vld [vmem:[%s6701_s18 + $0x40] ss:$8 sps:$4 sm:$0xff]   ;;  %v6248_v57 = vld [vmem:[%s6701_s18 + $0x34] ss:$8 sps:$4 sm:$0xff]  }
 0x398   : > { %3107 = vmatprep.mubr.bf16.mxu1 %v2614_v30  ;;  %3220 = vmatprep.mubr.bf16.mxu0 %v2614_v30  ;;  %v2565_v26 = vmul.f32 %v6435_v12, %v2341_v25  ;;  %v2596_v21 = vadd.f32 %v6502_v17, %v2564_v28  ;;  %v6243_v1 = vld [vmem:[%s6701_s18 + $0x140] ss:$8 sps:$4 sm:$0xff]   ;;  %v6251_v25 = vld [vmem:[%s6701_s18 + $0x134] ss:$8 sps:$4 sm:$0xff]   ;;  %v6246_v30 = vld [vmem:[%s6701_s18 + $0x30] ss:$8 sps:$4 sm:$0xff]  }
 0x399   : > { %v6437_v6 = vpop.eup %6436  ;;  %3108 = vmatmul.mubr.bf16.gmra.mxu1 %v2613_v56  ;;  %3221 = vmatmul.mubr.bf16.gmra.mxu0 %v2613_v56  ;;  %v2595_v49 = vadd.f32 %v6505_v9, %v2563_v16  ;;  %v6249_v48 = vld [vmem:[%s6701_s18 + $0x130] ss:$8 sps:$4 sm:$0xff]   ;;  %v6254_v32 = vld [vmem:[%s6701_s18 + $0x24] ss:$8 sps:$4 sm:$0xff]   ;;  %v6252_v59 = vld [vmem:[%s6701_s18 + $0x20] ss:$8 sps:$4 sm:$0xff]  }
 0x39a   : > { %v2566_v54 = vmul.f32 %v6437_v6, %v2342_v50  ;;  %v2597_v43 = vadd.f32 %v6504_v24, %v2565_v26  ;;  %4383 = vmatpush1.bf16.msra.mxu1 %v6228_v34  ;;  %4496 = vmatpush1.bf16.msra.mxu0 %v6231_v29  ;;  %v6257_v12 = vld [vmem:[%s6701_s18 + $0x124] ss:$8 sps:$4 sm:$0xff]   ;;  %v6255_v50 = vld [vmem:[%s6701_s18 + $0x120] ss:$8 sps:$4 sm:$0xff]   ;;  %v2686_v56 = vshrl.u32 %v2685_v45, 7 }
 0x39b   : > { %4384 = vmatprep.subr.bf16.mxu1 %v6236_v19  ;;  %4497 = vmatprep.subr.bf16.mxu0 %v6239_v55  ;;  %v2683_v26 = vld [vmem:[%s9837_s20] sm:$0xf] }
 0x39c   : > { %v2598_v52 = vadd.f32 %v6503_v23, %v2566_v54  ;;  %v2615_v11 = vpack.c.bf16 %v2597_v43, %v2595_v49  ;;  %v8067_v28 = vsub.s32 0, %v2686_v56  ;;  %v8074_v6 = vsub.s32 2, %v2686_v56 }
 0x39d   : > { %v6439_v61 = vpop.eup %6438  ;;  %v8076_v54 = vsub.s32 1, %v2686_v56 }
 0x39e   : > { %v6441_v60 = vpop.eup %6440  ;;  %v2616_v53 = vpack.c.bf16 %v2598_v52, %v2596_v21  ;;  %v2568_v22 = vmul.f32 %v6439_v61, %v2344_v42  ;;  %4385 = vmatpush1.bf16.msra.mxu1 %v6234_v5  ;;  %4498 = vmatpush1.bf16.msra.mxu0 %v6237_v46  ;;  %9836 = vst [vmem:[#allocation22_spill] sm:$0xff] %v8067_v28  ;;  %v8087_v52 = vsub.s32 3, %v2686_v56 }
 0x39f   : > { %v6443_v0 = vpop.eup %6442  ;;  %v2567_v63 = vmul.f32 %v6441_v60, %v2343_v41  ;;  %4386 = vmatprep.subr.bf16.mxu1 %v6242_v18  ;;  %4499 = vmatprep.subr.bf16.mxu0 %v6245_v44  ;;  %9838 = vst [vmem:[#allocation23_spill] sm:$0xff] %v8076_v54  ;;  %v8079_v16 = vrot.slane %v2683_v26, %v8067_v28 }
 0x3a0   : > { %3117 = vmatprep.mubr.bf16.mxu1 %v2616_v53  ;;  %3230 = vmatprep.mubr.bf16.mxu0 %v2616_v53  ;;  %v2569_v35 = vmul.f32 %v6443_v0, %v2345_v40  ;;  %v2600_v36 = vadd.f32 %v6506_v15, %v2568_v22  ;;  %v8082_v37 = vrot.slane %v2683_v26, %v8074_v6 }
 0x3a1   : > { %v6445_v3 = vpop.eup %6444  ;;  %3118 = vmatmul.mubr.bf16.gmra.mxu1 %v2615_v11  ;;  %3231 = vmatmul.mubr.bf16.gmra.mxu0 %v2615_v11  ;;  %v2599_v31 = vadd.f32 %v6509_v20, %v2567_v63  ;;  %v8085_v17 = vrot.slane %v2683_v26, %v8076_v54  ;;  %v8099_v40 = vrot.slane %v2683_v26, %v8087_v52 }
 0x3a2   : > { %v2570_v47 = vmul.f32 %v6445_v3, %v2346_v2  ;;  %v2601_v4 = vadd.f32 %v6508_v58, %v2569_v35  ;;  %4387 = vmatpush1.bf16.msra.mxu1 %v6240_v27  ;;  %4500 = vmatpush1.bf16.msra.mxu0 %v6243_v1 }
 0x3a3   : > { %4388 = vmatprep.subr.bf16.mxu1 %v6248_v57  ;;  %4501 = vmatprep.subr.bf16.mxu0 %v6251_v25 }
 0x3a4   : > { %v2602_v14 = vadd.f32 %v6507_v33, %v2570_v47  ;;  %v2617_v8 = vpack.c.bf16 %v2601_v4, %v2599_v31 }
 0x3a6   : > { %v2618_v13 = vpack.c.bf16 %v2602_v14, %v2600_v36  ;;  %4389 = vmatpush1.bf16.msra.mxu1 %v6246_v30  ;;  %4502 = vmatpush1.bf16.msra.mxu0 %v6249_v48 }
 0x3a7   : > { %4390 = vmatprep.subr.bf16.mxu1 %v6254_v32  ;;  %4503 = vmatprep.subr.bf16.mxu0 %v6257_v12 }
 0x3a8   : > { %3127 = vmatprep.mubr.bf16.mxu1 %v2618_v13  ;;  %3240 = vmatprep.mubr.bf16.mxu0 %v2618_v13 }
 0x3a9   : > { %3128 = vmatmul.mubr.bf16.gmra.mxu1 %v2617_v8  ;;  %3241 = vmatmul.mubr.bf16.gmra.mxu0 %v2617_v8 }
 0x3aa   : > { %4391 = vmatpush1.bf16.msra.mxu1 %v6252_v59  ;;  %4504 = vmatpush1.bf16.msra.mxu0 %v6255_v50 }
 0x430   : > { %v3059_v21 = vpop.f32.mrf.mxu1  ;;  %v3172_v23 = vpop.f32.mrf.mxu0 }
 0x431   : > { %v8090_v24 = vadd.f32 %v3059_v21, %v8079_v16  ;;  %v8093_v60 = vadd.f32 %v3172_v23, %v8082_v37 }
 0x432   : > { %v3061_v43 = vpop.f32.mrf.mxu1  ;;  %v3174_v61 = vpop.f32.mrf.mxu0 }
 0x433   : > { %v8096_v42 = vadd.f32 %v3061_v43, %v8085_v17  ;;  %v3350_v41 = vmul.f32 %v8090_v24, %v8090_v24  ;;  %v3352_v35 = vmul.f32 %v8093_v60, %v8093_v60  ;;  %v8116_v47 = vadd.f32 %v3174_v61, %v8099_v40 }
 0x434   : > { %v3063_v53 = vpop.f32.mrf.mxu1  ;;  %v3176_v9 = vpop.f32.mrf.mxu0 }
 0x435   : > { %v3253_v49 = vadd.f32 %v8096_v42, %v8090_v24  ;;  %v3351_v0 = vmul.f32 %v8096_v42, %v8096_v42  ;;  %v8108_v2 = vadd.f32 %v3063_v53, %v8079_v16  ;;  %v8119_v63 = vadd.f32 %v3176_v9, %v8082_v37 }
 0x436   : > { %v3065_v11 = vpop.f32.mrf.mxu1  ;;  %v3178_v22 = vpop.f32.mrf.mxu0  ;;  %v3353_v55 = vmul.f32 %v8116_v47, %v8116_v47 }
 0x437   : > { %v8113_v3 = vadd.f32 %v3065_v11, %v8085_v17  ;;  %v3254_v33 = vadd.f32 %v3253_v49, %v8093_v60  ;;  %v3414_v14 = vadd.f32 %v3351_v0, %v3350_v41  ;;  %v3354_v13 = vmul.f32 %v8108_v2, %v8108_v2 }
 0x438   : > { %v3069_v15 = vpop.f32.mrf.mxu1  ;;  %v3182_v36 = vpop.f32.mrf.mxu0  ;;  %v8133_v10 = vadd.f32 %v3178_v22, %v8099_v40  ;;  %v3356_v39 = vmul.f32 %v8119_v63, %v8119_v63 }
 0x439   : > { %v3258_v58 = vadd.f32 %v8113_v3, %v8108_v2  ;;  %v3355_v4 = vmul.f32 %v8113_v3, %v8113_v3  ;;  %v8129_v20 = vadd.f32 %v3069_v15, %v8079_v16  ;;  %v3255_v7 = vadd.f32 %v3254_v33, %v8116_v47 }
 0x43a   : > { %v3071_v31 = vpop.f32.mrf.mxu1  ;;  %v3184_v8 = vpop.f32.mrf.mxu0  ;;  %v3415_v38 = vadd.f32 %v3414_v14, %v3352_v35  ;;  %v8136_v51 = vadd.f32 %v3182_v36, %v8082_v37  ;;  %v3357_v50 = vmul.f32 %v8133_v10, %v8133_v10 }
 0x43b   : > { %v8139_v62 = vadd.f32 %v3071_v31, %v8085_v17  ;;  %3256 = vadd.xlane.f32.xlu0 %v3255_v7  ;;  %v3259_v19 = vadd.f32 %v3258_v58, %v8119_v63  ;;  %v3419_v5 = vadd.f32 %v3355_v4, %v3354_v13  ;;  %v3358_v27 = vmul.f32 %v8129_v20, %v8129_v20 }
 0x43c   : > { %v3073_v34 = vpop.f32.mrf.mxu1  ;;  %v3186_v29 = vpop.f32.mrf.mxu0  ;;  %v3416_v30 = vadd.f32 %v3415_v38, %v3353_v55  ;;  %v3360_v32 = vmul.f32 %v8136_v51, %v8136_v51  ;;  %v8159_v12 = vadd.f32 %v3184_v8, %v8099_v40 }
 0x43d   : > { %v3263_v46 = vadd.f32 %v8139_v62, %v8129_v20  ;;  %v3359_v18 = vmul.f32 %v8139_v62, %v8139_v62  ;;  %v8151_v44 = vadd.f32 %v3073_v34, %v8079_v16  ;;  %v3260_v25 = vadd.f32 %v3259_v19, %v8133_v10  ;;  %v6263_v34 = vld [vmem:[%s6701_s18 + $0x114] ss:$8 sps:$4 sm:$0xff]  }
 0x43e   : > { %v3075_v1 = vpop.f32.mrf.mxu1  ;;  %v3188_v57 = vpop.f32.mrf.mxu0  ;;  %v3420_v48 = vadd.f32 %v3419_v5, %v3356_v39  ;;  %v8167_v45 = vadd.f32 %v3186_v29, %v8082_v37  ;;  %v3361_v33 = vmul.f32 %v8159_v12, %v8159_v12  ;;  %v6260_v39 = vld [vmem:[%s6701_s18 + $0x14] ss:$8 sps:$4 sm:$0xff]   ;;  %4505 = vmatprep.subr.bf16.mxu0 %v6263_v34 }
 0x43f   : > { %v8162_v59 = vadd.f32 %v3075_v1, %v8085_v17  ;;  %3261 = vadd.xlane.f32.xlu1 %v3260_v25  ;;  %3417 = vadd.xlane.f32.xlu0 %v3416_v30  ;;  %v3264_v21 = vadd.f32 %v3263_v46, %v8136_v51  ;;  %v3424_v23 = vadd.f32 %v3359_v18, %v3358_v27  ;;  %v6258_v27 = vld [vmem:[%s6701_s18 + $0x10] ss:$8 sps:$4 sm:$0xff]  }
 0x440   : > { %v3362_v43 = vmul.f32 %v8151_v44, %v8151_v44  ;;  %v3421_v11 = vadd.f32 %v3420_v48, %v3357_v50  ;;  %v8181_v35 = vadd.f32 %v3188_v57, %v8099_v40  ;;  %v3364_v14 = vmul.f32 %v8167_v45, %v8167_v45  ;;  %v6261_v1 = vld [vmem:[%s6701_s18 + $0x110] ss:$8 sps:$4 sm:$0xff]   ;;  %4392 = vmatprep.subr.bf16.mxu1 %v6260_v39 }
 0x441   : > { %v3079_v56 = vpop.f32.mrf.mxu1  ;;  %v3192_v26 = vpop.f32.mrf.mxu0  ;;  %v3268_v61 = vadd.f32 %v8162_v59, %v8151_v44  ;;  %v3363_v53 = vmul.f32 %v8162_v59, %v8162_v59  ;;  %v3265_v41 = vadd.f32 %v3264_v21, %v8159_v12  ;;  %v3425_v22 = vadd.f32 %v3424_v23, %v3360_v32  ;;  %4393 = vmatpush1.bf16.msra.mxu1 %v6258_v27 }
 0x442   : > { %v8177_v9 = vadd.f32 %v3079_v56, %v8079_v16  ;;  %v8184_v15 = vadd.f32 %v3192_v26, %v8082_v37  ;;  %v3365_v48 = vmul.f32 %v8181_v35, %v8181_v35  ;;  %4506 = vmatpush1.bf16.msra.mxu0 %v6261_v1  ;;  %v6272_v1 = vld [vmem:[%s6701_s18 + $0xf4] ss:$8 sps:$4 sm:$0xff]  }
 0x443   : > { %v3081_v49 = vpop.f32.mrf.mxu1  ;;  %v3194_v0 = vpop.f32.mrf.mxu0  ;;  %3266 = vadd.xlane.f32.xlu1 %v3265_v41  ;;  %3422 = vadd.xlane.f32.xlu0 %v3421_v11  ;;  %v3269_v13 = vadd.f32 %v3268_v61, %v8167_v45  ;;  %v3429_v31 = vadd.f32 %v3363_v53, %v3362_v43  ;;  %v3426_v5 = vadd.f32 %v3425_v22, %v3361_v33 }
 0x444   : > { %v8187_v36 = vadd.f32 %v3081_v49, %v8085_v17  ;;  %v3366_v29 = vmul.f32 %v8177_v9, %v8177_v9  ;;  %v3368_v57 = vmul.f32 %v8184_v15, %v8184_v15  ;;  %v8211_v25 = vadd.f32 %v3194_v0, %v8099_v40  ;;  %v6266_v49 = vld [vmem:[%s6701_s18 + $0x4] ss:$8 sps:$4 sm:$0xff]  }
 0x445   : > { %v3083_v58 = vpop.f32.mrf.mxu1  ;;  %v3196_v4 = vpop.f32.mrf.mxu0  ;;  %v3270_v46 = vadd.f32 %v3269_v13, %v8181_v35  ;;  %v3430_v18 = vadd.f32 %v3429_v31, %v3364_v14  ;;  %v6269_v0 = vld [vmem:[%s6701_s18 + $0x104] ss:$8 sps:$4 sm:$0xff]   ;;  %4394 = vmatprep.subr.bf16.mxu1 %v6266_v49 }
 0x446   : > { %v3273_v8 = vadd.f32 %v8187_v36, %v8177_v9  ;;  %v3367_v7 = vmul.f32 %v8187_v36, %v8187_v36  ;;  %v8199_v38 = vadd.f32 %v3083_v58, %v8079_v16  ;;  %v8219_v32 = vadd.f32 %v3196_v4, %v8082_v37  ;;  %v6264_v58 = vld [vmem:[%s6701_s18] ss:$8 sps:$4 sm:$0xff]   ;;  %4507 = vmatprep.subr.bf16.mxu0 %v6269_v0 }
 0x447   : > { %v3085_v19 = vpop.f32.mrf.mxu1  ;;  %v3198_v55 = vpop.f32.mrf.mxu0  ;;  %3427 = vadd.xlane.f32.xlu1 %v3426_v5  ;;  %3271 = vadd.xlane.f32.xlu0 %v3270_v46  ;;  %v3431_v33 = vadd.f32 %v3430_v18, %v3365_v48  ;;  %v6267_v4 = vld [vmem:[%s6701_s18 + $0x100] ss:$8 sps:$4 sm:$0xff]  }
 0x448   : > { %v8214_v30 = vadd.f32 %v3085_v19, %v8085_v17  ;;  %v3274_v26 = vadd.f32 %v3273_v8, %v8184_v15  ;;  %v3434_v21 = vadd.f32 %v3367_v7, %v3366_v29  ;;  %v3370_v23 = vmul.f32 %v8199_v38, %v8199_v38  ;;  %4395 = vmatpush1.bf16.msra.mxu1 %v6264_v58 }
 0x449   : > { %v3089_v50 = vpop.f32.mrf.mxu1  ;;  %v3202_v56 = vpop.f32.mrf.mxu0  ;;  %v8237_v13 = vadd.f32 %v3198_v55, %v8099_v40  ;;  %v3369_v7 = vmul.f32 %v8211_v25, %v8211_v25  ;;  %v3372_v39 = vmul.f32 %v8219_v32, %v8219_v32  ;;  %4508 = vmatpush1.bf16.msra.mxu0 %v6267_v4  ;;  %4396 = vmatprep.subr.bf16.mxu1 %v6272_v1 }
 0x44a   : > { %v3278_v43 = vadd.f32 %v8214_v30, %v8199_v38  ;;  %v3371_v61 = vmul.f32 %v8214_v30, %v8214_v30  ;;  %v8229_v53 = vadd.f32 %v3089_v50, %v8079_v16  ;;  %v3275_v22 = vadd.f32 %v3274_v26, %v8211_v25 }
 0x44b   : > { %v3091_v41 = vpop.f32.mrf.mxu1  ;;  %v3204_v11 = vpop.f32.mrf.mxu0  ;;  %v3435_v14 = vadd.f32 %v3434_v21, %v3368_v57  ;;  %v8240_v31 = vadd.f32 %v3202_v56, %v8082_v37  ;;  %3432 = vadd.xlane.f32.xlu0 %v3431_v33  ;;  %v6275_v57 = vld [vmem:[%s6701_s18 + $0x1f4] ss:$8 sps:$4 sm:$0xff]  }
 0x44c   : > { %9839 = vst [vmem:[#allocation24_spill] sm:$0xff] %v8229_v53  ;;  %v8243_v8 = vadd.f32 %v3091_v41, %v8085_v17  ;;  %3276 = vadd.xlane.f32.xlu1 %v3275_v22  ;;  %v3279_v19 = vadd.f32 %v3278_v43, %v8219_v32  ;;  %v3439_v55 = vadd.f32 %v3371_v61, %v3370_v23  ;;  %v6270_v23 = vld [vmem:[%s6701_s18 + $0xf0] ss:$8 sps:$4 sm:$0xff]  }
 0x44d   : > { %9840 = vst [vmem:[#allocation25_spill] sm:$0xff] %v8240_v31  ;;  %v3093_v34 = vpop.f32.mrf.mxu1  ;;  %v3206_v29 = vpop.f32.mrf.mxu0  ;;  %v3374_v5 = vmul.f32 %v8229_v53, %v8229_v53  ;;  %v3436_v56 = vadd.f32 %v3435_v14, %v3369_v7  ;;  %v6273_v43 = vld [vmem:[%s6701_s18 + $0x1f0] ss:$8 sps:$4 sm:$0xff]   ;;  %v3376_v61 = vmul.f32 %v8240_v31, %v8240_v31  ;;  %v8267_v49 = vadd.f32 %v3204_v11, %v8099_v40 }
 0x44e   : > { %v3283_v46 = vadd.f32 %v8243_v8, %v8229_v53  ;;  %v3375_v18 = vmul.f32 %v8243_v8, %v8243_v8  ;;  %v8257_v27 = vadd.f32 %v3093_v34, %v8079_v16  ;;  %v3280_v26 = vadd.f32 %v3279_v19, %v8237_v13  ;;  %4509 = vmatprep.subr.bf16.mxu0 %v6275_v57  ;;  %v6281_v19 = vld [vmem:[%s6701_s18 + $0x1e4] ss:$8 sps:$4 sm:$0xff]   ;;  %v6291_v53 = vld [vmem:[%s6701_s18 + $0x1c0] ss:$8 sps:$4 sm:$0xff]  }
 0x44f   : > { %v3095_v48 = vpop.f32.mrf.mxu1  ;;  %v3208_v50 = vpop.f32.mrf.mxu0  ;;  %v3440_v21 = vadd.f32 %v3439_v55, %v3372_v39  ;;  %v3373_v41 = vmul.f32 %v8237_v13, %v8237_v13  ;;  %v8275_v22 = vadd.f32 %v3206_v29, %v8082_v37  ;;  %v6278_v29 = vld [vmem:[%s6701_s18 + $0xe4] ss:$8 sps:$4 sm:$0xff]   ;;  %4397 = vmatpush2.bf16.msra.mxu1 %v6270_v23  ;;  %4510 = vmatpush2.bf16.msra.mxu0 %v6273_v43 }
 0x450   : > { %9841 = vst [vmem:[#allocation26_spill] sm:$0xff] %v8257_v27  ;;  %v8270_v0 = vadd.f32 %v3095_v48, %v8085_v17  ;;  %3437 = vadd.xlane.f32.xlu1 %v3436_v56  ;;  %3281 = vadd.xlane.f32.xlu0 %v3280_v26  ;;  %v3284_v58 = vadd.f32 %v3283_v46, %v8240_v31  ;;  %v6276_v48 = vld [vmem:[%s6701_s18 + $0xe0] ss:$8 sps:$4 sm:$0xff]  }
 0x451   : > { %9842 = vst [vmem:[#allocation27_spill] sm:$0xff] %v8275_v22  ;;  %v3099_v33 = vpop.f32.mrf.mxu1  ;;  %v3212_v14 = vpop.f32.mrf.mxu0  ;;  %v3444_v11 = vadd.f32 %v3375_v18, %v3374_v5  ;;  %v3378_v4 = vmul.f32 %v8257_v27, %v8257_v27  ;;  %v3441_v18 = vadd.f32 %v3440_v21, %v3373_v41  ;;  %v6279_v56 = vld [vmem:[%s6701_s18 + $0x1e0] ss:$8 sps:$4 sm:$0xff]   ;;  %v8293_v26 = vadd.f32 %v3208_v50, %v8099_v40 }
 0x452   : > { %v3288_v7 = vadd.f32 %v8270_v0, %v8257_v27  ;;  %v3379_v39 = vmul.f32 %v8270_v0, %v8270_v0  ;;  %v8285_v34 = vadd.f32 %v3099_v33, %v8079_v16  ;;  %v3285_v5 = vadd.f32 %v3284_v58, %v8267_v49  ;;  %4398 = vmatprep.subr.bf16.mxu1 %v6278_v29  ;;  %v6284_v29 = vld [vmem:[%s6701_s18 + $0xd4] ss:$8 sps:$4 sm:$0xff]   ;;  %v6285_v27 = vld [vmem:[%s6701_s18 + $0x1d0] ss:$8 sps:$4 sm:$0xff]  }
 0x453   : > { %v3101_v55 = vpop.f32.mrf.mxu1  ;;  %v3214_v46 = vpop.f32.mrf.mxu0  ;;  %v3445_v1 = vadd.f32 %v3444_v11, %v3376_v61  ;;  %v8296_v31 = vadd.f32 %v3212_v14, %v8082_v37  ;;  %v3377_v33 = vmul.f32 %v8267_v49, %v8267_v49  ;;  %v3380_v21 = vmul.f32 %v8275_v22, %v8275_v22  ;;  %4511 = vmatprep.subr.bf16.mxu0 %v6281_v19 }
 0x454   : > { %9843 = vst [vmem:[#allocation28_spill] sm:$0xff] %v8285_v34  ;;  %v8299_v57 = vadd.f32 %v3101_v55, %v8085_v17  ;;  %3286 = vadd.xlane.f32.xlu1 %v3285_v5  ;;  %3442 = vadd.xlane.f32.xlu0 %v3441_v18  ;;  %v3289_v43 = vadd.f32 %v3288_v7, %v8275_v22  ;;  %v6287_v55 = vld [vmem:[%s6701_s18 + $0x1d4] ss:$8 sps:$4 sm:$0xff]   ;;  %v6282_v22 = vld [vmem:[%s6701_s18 + $0xd0] ss:$8 sps:$4 sm:$0xff]  }
 0x455   : > { %9844 = vst [vmem:[#allocation29_spill] sm:$0xff] %v8296_v31  ;;  %v3103_v23 = vpop.f32.mrf.mxu1  ;;  %v3216_v50 = vpop.f32.mrf.mxu0  ;;  %v3449_v61 = vadd.f32 %v3379_v39, %v3378_v4  ;;  %v3382_v41 = vmul.f32 %v8285_v34, %v8285_v34  ;;  %v3446_v18 = vadd.f32 %v3445_v1, %v3377_v33  ;;  %4399 = vmatpush2.bf16.msra.mxu1 %v6276_v48 }
 0x456   : > { %9845 = vst [vmem:[#allocation30_spill] sm:$0xff] %v8299_v57  ;;  %v3293_v14 = vadd.f32 %v8299_v57, %v8285_v34  ;;  %v3383_v58 = vmul.f32 %v8299_v57, %v8299_v57  ;;  %v8313_v11 = vadd.f32 %v3103_v23, %v8079_v16  ;;  %v3290_v4 = vadd.f32 %v3289_v43, %v8293_v26 }
 0x457   : > { %v3105_v5 = vpop.f32.mrf.mxu1  ;;  %v3218_v7 = vpop.f32.mrf.mxu0  ;;  %v3450_v39 = vadd.f32 %v3449_v61, %v3380_v21  ;;  %4512 = vmatpush2.bf16.msra.mxu0 %v6279_v56  ;;  %v3384_v34 = vmul.f32 %v8296_v31, %v8296_v31  ;;  %v8323_v57 = vadd.f32 %v3214_v46, %v8099_v40  ;;  %v3381_v1 = vmul.f32 %v8293_v26, %v8293_v26 }
 0x458   : > { %9846 = vst [vmem:[#allocation31_spill] sm:$0xff] %v8313_v11  ;;  %v8326_v19 = vadd.f32 %v3105_v5, %v8085_v17  ;;  %4400 = vmatprep.subr.bf16.mxu1 %v6284_v29  ;;  %v8331_v48 = vadd.f32 %v3216_v50, %v8082_v37  ;;  %3447 = vadd.xlane.f32.xlu1 %v3446_v18  ;;  %v6290_v29 = vld [vmem:[%s6701_s18 + $0xc4] ss:$8 sps:$4 sm:$0xff]  }
 0x459   : > { %9847 = vst [vmem:[#allocation32_spill] sm:$0xff] %v8323_v57  ;;  %3291 = vadd.xlane.f32.xlu0 %v3290_v4  ;;  %v3109_v56 = vpop.f32.mrf.mxu1  ;;  %v3222_v33 = vpop.f32.mrf.mxu0  ;;  %v3294_v21 = vadd.f32 %v3293_v14, %v8296_v31  ;;  %v3454_v46 = vadd.f32 %v3383_v58, %v3382_v41  ;;  %v3386_v23 = vmul.f32 %v8313_v11, %v8313_v11  ;;  %v6293_v5 = vld [vmem:[%s6701_s18 + $0x1c4] ss:$8 sps:$4 sm:$0xff]   ;;  %v6288_v31 = vld [vmem:[%s6701_s18 + $0xc0] ss:$8 sps:$4 sm:$0xff]  }
 0x45a   : > { %9848 = vst [vmem:[#allocation33_spill] sm:$0xff] %v8326_v19  ;;  %9849 = vst [vmem:[#allocation34_spill] sm:$0xff] %v8331_v48  ;;  %v3298_v43 = vadd.f32 %v8326_v19, %v8313_v11  ;;  %v3387_v61 = vmul.f32 %v8326_v19, %v8326_v19  ;;  %v8341_v50 = vadd.f32 %v3109_v56, %v8079_v16  ;;  %4513 = vmatprep.subr.bf16.mxu0 %v6287_v55 }
 0x45b   : > { %v3111_v18 = vpop.f32.mrf.mxu1  ;;  %v3224_v14 = vpop.f32.mrf.mxu0  ;;  %v3295_v41 = vadd.f32 %v3294_v21, %v8323_v57  ;;  %v3451_v58 = vadd.f32 %v3450_v39, %v3381_v1  ;;  %v3455_v4 = vadd.f32 %v3454_v46, %v3384_v34  ;;  %4401 = vmatpush2.bf16.msra.mxu1 %v6282_v22  ;;  %4514 = vmatpush2.bf16.msra.mxu0 %v6285_v27 }
 0x45c   : > { %9850 = vst [vmem:[#allocation35_spill] sm:$0xff] %v8341_v50  ;;  %v8349_v11 = vadd.f32 %v3218_v7, %v8099_v40  ;;  %v8352_v19 = vadd.f32 %v3222_v33, %v8082_v37  ;;  %v8355_v55 = vadd.f32 %v3111_v18, %v8085_v17  ;;  %v3385_v56 = vmul.f32 %v8323_v57, %v8323_v57  ;;  %v6299_v18 = vld [vmem:[%s6701_s18 + $0x1b4] ss:$8 sps:$4 sm:$0xff]   ;;  %v6297_v57 = vld [vmem:[%s6701_s18 + $0x1b0] ss:$8 sps:$4 sm:$0xff]  }
 0x45d   : > { %4402 = vmatprep.subr.bf16.mxu1 %v6290_v29  ;;  %v3388_v27 = vmul.f32 %v8331_v48, %v8331_v48  ;;  %3296 = vadd.xlane.f32.xlu1 %v3295_v41  ;;  %v3113_v22 = vpop.f32.mrf.mxu1  ;;  %v3226_v34 = vpop.f32.mrf.mxu0  ;;  %v3299_v7 = vadd.f32 %v3298_v43, %v8331_v48  ;;  %v3459_v39 = vadd.f32 %v3387_v61, %v3386_v23  ;;  %v6296_v29 = vld [vmem:[%s6701_s18 + $0xb4] ss:$8 sps:$4 sm:$0xff]   ;;  %v6294_v48 = vld [vmem:[%s6701_s18 + $0xb0] ss:$8 sps:$4 sm:$0xff]  }
 0x45e   : > { %9851 = vst [vmem:[#allocation36_spill] sm:$0xff] %v8349_v11  ;;  %9852 = vst [vmem:[#allocation37_spill] sm:$0xff] %v8352_v19  ;;  %3452 = vadd.xlane.f32.xlu0 %v3451_v58  ;;  %v3390_v1 = vmul.f32 %v8341_v50, %v8341_v50  ;;  %v3303_v33 = vadd.f32 %v8355_v55, %v8341_v50  ;;  %v3391_v21 = vmul.f32 %v8355_v55, %v8355_v55 }
 0x45f   : > { %9853 = vst [vmem:[#allocation38_spill] sm:$0xff] %v8355_v55  ;;  %v8369_v46 = vadd.f32 %v3113_v22, %v8079_v16  ;;  %4515 = vmatprep.subr.bf16.mxu0 %v6293_v5  ;;  %v3115_v41 = vpop.f32.mrf.mxu1  ;;  %v3228_v43 = vpop.f32.mrf.mxu0  ;;  %v3456_v58 = vadd.f32 %v3455_v4, %v3385_v56  ;;  %v3300_v23 = vadd.f32 %v3299_v7, %v8349_v11 }
 0x460   : > { %v3460_v61 = vadd.f32 %v3459_v39, %v3388_v27  ;;  %4403 = vmatpush2.bf16.msra.mxu1 %v6288_v31  ;;  %4516 = vmatpush2.bf16.msra.mxu0 %v6291_v53  ;;  %v3392_v50 = vmul.f32 %v8352_v19, %v8352_v19  ;;  %v8379_v55 = vadd.f32 %v3224_v14, %v8099_v40 }
 0x461   : > { %9854 = vst [vmem:[#allocation39_spill] sm:$0xff] %v8369_v46  ;;  %v8382_v5 = vadd.f32 %v3115_v41, %v8085_v17  ;;  %v3389_v4 = vmul.f32 %v8349_v11, %v8349_v11  ;;  %4404 = vmatprep.subr.bf16.mxu1 %v6296_v29  ;;  %v8387_v31 = vadd.f32 %v3226_v34, %v8082_v37  ;;  %v3119_v53 = vpop.f32.mrf.mxu1  ;;  %v3232_v56 = vpop.f32.mrf.mxu0  ;;  %v6302_v29 = vld [vmem:[%s6701_s18 + $0xa4] ss:$8 sps:$4 sm:$0xff]   ;;  %v6303_v11 = vld [vmem:[%s6701_s18 + $0x1a0] ss:$8 sps:$4 sm:$0xff]  }
 0x462   : > { %9855 = vst [vmem:[#allocation40_spill] sm:$0xff] %v8379_v55  ;;  %3457 = vadd.xlane.f32.xlu1 %v3456_v58  ;;  %3301 = vadd.xlane.f32.xlu0 %v3300_v23  ;;  %v3304_v27 = vadd.f32 %v3303_v33, %v8352_v19  ;;  %v3464_v14 = vadd.f32 %v3391_v21, %v3390_v1  ;;  %v6305_v41 = vld [vmem:[%s6701_s18 + $0x1a4] ss:$8 sps:$4 sm:$0xff]   ;;  %v6300_v19 = vld [vmem:[%s6701_s18 + $0xa0] ss:$8 sps:$4 sm:$0xff]  }
 0x463   : > { %9856 = vst [vmem:[#allocation41_spill] sm:$0xff] %v8382_v5  ;;  %9857 = vst [vmem:[#allocation42_spill] sm:$0xff] %v8387_v31  ;;  %v3394_v22 = vmul.f32 %v8369_v46, %v8369_v46  ;;  %v3308_v7 = vadd.f32 %v8382_v5, %v8369_v46  ;;  %v3395_v39 = vmul.f32 %v8382_v5, %v8382_v5  ;;  %4517 = vmatprep.subr.bf16.mxu0 %v6299_v18  ;;  %v3121_v58 = vpop.f32.mrf.mxu1  ;;  %v3234_v33 = vpop.f32.mrf.mxu0 }
 0x464   : > { %v8397_v34 = vadd.f32 %v3119_v53, %v8079_v16  ;;  %v3305_v1 = vadd.f32 %v3304_v27, %v8379_v55  ;;  %v3461_v21 = vadd.f32 %v3460_v61, %v3389_v4  ;;  %v3465_v23 = vadd.f32 %v3464_v14, %v3392_v50  ;;  %4405 = vmatpush2.bf16.msra.mxu1 %v6294_v48 }
 0x465   : > { %4518 = vmatpush2.bf16.msra.mxu0 %v6297_v57  ;;  %v8405_v46 = vadd.f32 %v3228_v43, %v8099_v40  ;;  %v8408_v5 = vadd.f32 %v3232_v56, %v8082_v37  ;;  %v8411_v18 = vadd.f32 %v3121_v58, %v8085_v17  ;;  %v3393_v53 = vmul.f32 %v8379_v55, %v8379_v55  ;;  %v3123_v48 = vpop.f32.mrf.mxu1  ;;  %v3236_v50 = vpop.f32.mrf.mxu0  ;;  %v6311_v58 = vld [vmem:[%s6701_s18 + $0x194] ss:$8 sps:$4 sm:$0xff]   ;;  %v6309_v55 = vld [vmem:[%s6701_s18 + $0x190] ss:$8 sps:$4 sm:$0xff]  }
 0x466   : > { %9858 = vst [vmem:[#allocation43_spill] sm:$0xff] %v8397_v34  ;;  %4406 = vmatprep.subr.bf16.mxu1 %v6302_v29  ;;  %v3396_v57 = vmul.f32 %v8387_v31, %v8387_v31  ;;  %3306 = vadd.xlane.f32.xlu1 %v3305_v1  ;;  %v3309_v43 = vadd.f32 %v3308_v7, %v8387_v31  ;;  %v6308_v29 = vld [vmem:[%s6701_s18 + $0x94] ss:$8 sps:$4 sm:$0xff]   ;;  %v6306_v31 = vld [vmem:[%s6701_s18 + $0x90] ss:$8 sps:$4 sm:$0xff]  }
 0x467   : > { %9859 = vst [vmem:[#allocation44_spill] sm:$0xff] %v8405_v46  ;;  %9860 = vst [vmem:[#allocation45_spill] sm:$0xff] %v8408_v5  ;;  %3462 = vadd.xlane.f32.xlu0 %v3461_v21  ;;  %v3469_v61 = vadd.f32 %v3395_v39, %v3394_v22  ;;  %v3398_v4 = vmul.f32 %v8397_v34, %v8397_v34  ;;  %v3313_v56 = vadd.f32 %v8411_v18, %v8397_v34  ;;  %v3125_v1 = vpop.f32.mrf.mxu1  ;;  %v3238_v7 = vpop.f32.mrf.mxu0 }
 0x468   : > { %9861 = vst [vmem:[#allocation46_spill] sm:$0xff] %v8411_v18  ;;  %v3399_v27 = vmul.f32 %v8411_v18, %v8411_v18  ;;  %v8425_v14 = vadd.f32 %v3123_v48, %v8079_v16  ;;  %4519 = vmatprep.subr.bf16.mxu0 %v6305_v41  ;;  %v3466_v21 = vadd.f32 %v3465_v23, %v3393_v53 }
 0x469   : > { %v3310_v22 = vadd.f32 %v3309_v43, %v8405_v46  ;;  %v3470_v39 = vadd.f32 %v3469_v61, %v3396_v57  ;;  %4407 = vmatpush2.bf16.msra.mxu1 %v6300_v19  ;;  %4520 = vmatpush2.bf16.msra.mxu0 %v6303_v11  ;;  %v3400_v34 = vmul.f32 %v8408_v5, %v8408_v5  ;;  %v3129_v11 = vpop.f32.mrf.mxu1  ;;  %v3242_v53 = vpop.f32.mrf.mxu0 }
 0x46a   : > { %9862 = vst [vmem:[#allocation47_spill] sm:$0xff] %v8425_v14  ;;  %v8435_v18 = vadd.f32 %v3234_v33, %v8099_v40  ;;  %v8438_v41 = vadd.f32 %v3125_v1, %v8085_v17  ;;  %v3397_v23 = vmul.f32 %v8405_v46, %v8405_v46  ;;  %4408 = vmatprep.subr.bf16.mxu1 %v6308_v29  ;;  %v6314_v29 = vld [vmem:[%s6701_s18 + $0x84] ss:$8 sps:$4 sm:$0xff]   ;;  %v6315_v46 = vld [vmem:[%s6701_s18 + $0x180] ss:$8 sps:$4 sm:$0xff]  }
 0x46b   : > { %v8443_v19 = vadd.f32 %v3236_v50, %v8082_v37  ;;  %3467 = vadd.xlane.f32.xlu1 %v3466_v21  ;;  %3311 = vadd.xlane.f32.xlu0 %v3310_v22  ;;  %v3314_v57 = vadd.f32 %v3313_v56, %v8408_v5  ;;  %v3474_v33 = vadd.f32 %v3399_v27, %v3398_v4  ;;  %v6317_v1 = vld [vmem:[%s6701_s18 + $0x184] ss:$8 sps:$4 sm:$0xff]   ;;  %v3131_v21 = vpop.f32.mrf.mxu1  ;;  %v3244_v56 = vpop.f32.mrf.mxu0  ;;  %v6312_v5 = vld [vmem:[%s6701_s18 + $0x80] ss:$8 sps:$4 sm:$0xff]  }
 0x46c   : > { %9863 = vst [vmem:[#allocation48_spill] sm:$0xff] %v8438_v41  ;;  %v3402_v48 = vmul.f32 %v8425_v14, %v8425_v14  ;;  %v3318_v43 = vadd.f32 %v8438_v41, %v8425_v14  ;;  %v3403_v61 = vmul.f32 %v8438_v41, %v8438_v41  ;;  %v8453_v50 = vadd.f32 %v3129_v11, %v8079_v16 }
 0x46d   : > { %9864 = vst [vmem:[#allocation49_spill] sm:$0xff] %v8443_v19  ;;  %4521 = vmatprep.subr.bf16.mxu0 %v6311_v58  ;;  %v3315_v4 = vadd.f32 %v3314_v57, %v8435_v18  ;;  %v3471_v27 = vadd.f32 %v3470_v39, %v3397_v23  ;;  %v3475_v22 = vadd.f32 %v3474_v33, %v3400_v34 }
 0x46e   : > { %9865 = vst [vmem:[#allocation50_spill] sm:$0xff] %v8453_v50  ;;  %4409 = vmatpush2.bf16.msra.mxu1 %v6306_v31  ;;  %4522 = vmatpush2.bf16.msra.mxu0 %v6309_v55  ;;  %v8461_v14 = vadd.f32 %v3238_v7, %v8099_v40  ;;  %v8464_v41 = vadd.f32 %v3242_v53, %v8082_v37  ;;  %v3133_v55 = vpop.f32.mrf.mxu1  ;;  %v3246_v31 = vpop.f32.mrf.mxu0 }
 0x46f   : > { %v8467_v58 = vadd.f32 %v3131_v21, %v8085_v17  ;;  %v3401_v11 = vmul.f32 %v8435_v18, %v8435_v18  ;;  %4410 = vmatprep.subr.bf16.mxu1 %v6314_v29  ;;  %v3404_v34 = vmul.f32 %v8443_v19, %v8443_v19  ;;  %3316 = vadd.xlane.f32.xlu1 %v3315_v4 }
 0x470   : > { %9866 = vst [vmem:[#allocation51_spill] sm:$0xff] %v8461_v14  ;;  %9867 = vst [vmem:[#allocation52_spill] sm:$0xff] %v8464_v41  ;;  %3472 = vadd.xlane.f32.xlu0 %v3471_v27  ;;  %v3319_v7 = vadd.f32 %v3318_v43, %v8443_v19  ;;  %v3479_v39 = vadd.f32 %v3403_v61, %v3402_v48  ;;  %v3406_v23 = vmul.f32 %v8453_v50, %v8453_v50  ;;  %v3135_v29 = vpop.f32.mrf.mxu1 }
 0x471   : > { %9868 = vst [vmem:[#allocation53_spill] sm:$0xff] %v8467_v58  ;;  %v3323_v53 = vadd.f32 %v8467_v58, %v8453_v50  ;;  %v3407_v57 = vmul.f32 %v8467_v58, %v8467_v58  ;;  %v8481_v33 = vadd.f32 %v3133_v55, %v8079_v16  ;;  %4523 = vmatprep.subr.bf16.mxu0 %v6317_v1 }
 0x472   : > { %v3476_v21 = vadd.f32 %v3475_v22, %v3401_v11  ;;  %v3320_v4 = vadd.f32 %v3319_v7, %v8461_v14  ;;  %v3480_v27 = vadd.f32 %v3479_v39, %v3404_v34  ;;  %4411 = vmatpush2.bf16.msra.mxu1 %v6312_v5  ;;  %4524 = vmatpush2.bf16.msra.mxu0 %v6315_v46  ;;  %v3248_v22 = vpop.f32.mrf.mxu0 }
 0x473   : > { %9869 = vst [vmem:[#allocation54_spill] sm:$0xff] %v8481_v33  ;;  %v3408_v48 = vmul.f32 %v8464_v41, %v8464_v41  ;;  %v8487_v43 = vadd.f32 %v3244_v56, %v8099_v40  ;;  %v8490_v61 = vadd.f32 %v3135_v29, %v8085_v17  ;;  %v3405_v16 = vmul.f32 %v8461_v14, %v8461_v14 }
 0x474   : > { %v8495_v1 = vadd.f32 %v3246_v31, %v8082_v37  ;;  %3477 = vadd.xlane.f32.xlu1 %v3476_v21  ;;  %3321 = vadd.xlane.f32.xlu0 %v3320_v4  ;;  %v3324_v46 = vadd.f32 %v3323_v53, %v8464_v41  ;;  %v3484_v5 = vadd.f32 %v3407_v57, %v3406_v23 }
 0x475   : > { %9870 = vst [vmem:[#allocation55_spill] sm:$0xff] %v8487_v43  ;;  %9871 = vst [vmem:[#allocation56_spill] sm:$0xff] %v8490_v61  ;;  %v3410_v11 = vmul.f32 %v8481_v33, %v8481_v33  ;;  %v3328_v56 = vadd.f32 %v8490_v61, %v8481_v33  ;;  %v3411_v17 = vmul.f32 %v8490_v61, %v8490_v61 }
 0x476   : > { %9872 = vst [vmem:[#allocation57_spill] sm:$0xff] %v8495_v1  ;;  %v3481_v34 = vadd.f32 %v3480_v27, %v3405_v16  ;;  %v3325_v55 = vadd.f32 %v3324_v46, %v8487_v43  ;;  %v3485_v37 = vadd.f32 %v3484_v5, %v3408_v48  ;;  %v8506_v31 = vadd.f32 %v3248_v22, %v8099_v40 }
 0x477   : > { %v3329_v7 = vadd.f32 %v3328_v56, %v8495_v1  ;;  %v3489_v39 = vadd.f32 %v3411_v17, %v3410_v11  ;;  %v3412_v23 = vmul.f32 %v8495_v1, %v8495_v1  ;;  %v3409_v53 = vmul.f32 %v8487_v43, %v8487_v43 }
 0x478   : > { %9873 = vst [vmem:[#allocation58_spill] sm:$0xff] %v8506_v31  ;;  %3482 = vadd.xlane.f32.xlu0 %v3481_v34  ;;  %3326 = vadd.xlane.f32.xlu1 %v3325_v55  ;;  %v3413_v40 = vmul.f32 %v8506_v31, %v8506_v31  ;;  %v3251_v55 = vld [vmem:[%s9874_s19] sm:$0xf] }
 0x479   : > { %v3330_v57 = vadd.f32 %v3329_v7, %v8506_v31  ;;  %v3486_v29 = vadd.f32 %v3485_v37, %v3409_v53  ;;  %v3490_v21 = vadd.f32 %v3489_v39, %v3412_v23  ;;  %v3252_v53 = vld [vmem:[%s676_s26] sm:$0xf] }
 0x47b   : > { %v3491_v4 = vadd.f32 %v3490_v21, %v3413_v40  ;;  %v8537_v21 = vrot.slane %v3251_v55, %v8074_v6 }
 0x47c   : > { %3331 = vadd.xlane.f32.xlu0 %v3330_v57  ;;  %3487 = vadd.xlane.f32.xlu1 %v3486_v29 }
 0x480   : > { %3492 = vadd.xlane.f32.xlu0 %v3491_v4 }
 0x4c4   : > { %v3257_v27 = vpop.xlane.xlu0 %3256 }
 0x4c5   : > { %v8516_v48 = vmul.f32 0.001953125, %v3257_v27 }
 0x4c7   : > { %v3510_v5 = vmul.f32 %v8516_v48, %v8516_v48  ;;  %v3561_v1 = vsub.f32 %v8116_v47, %v8516_v48 }
 0x4c8   : > { %v3262_v16 = vpop.xlane.xlu1 %3261  ;;  %v3418_v22 = vpop.xlane.xlu0 %3417 }
 0x4c9   : > { %v8518_v46 = vmul.f32 0.001953125, %v3262_v16  ;;  %v3494_v11 = vmul.f32 0.001953125, %v3418_v22 }
 0x4cb   : > { %v3526_v56 = vsub.f32 %v3494_v11, %v3510_v5  ;;  %v3511_v39 = vmul.f32 %v8518_v46, %v8518_v46  ;;  %v8544_v11 = vrot.slane %v3252_v53, %v8074_v6  ;;  %v3558_v6 = vsub.f32 %v8090_v24, %v8516_v48 }
 0x4cc   : > { %v3267_v17 = vpop.xlane.xlu1 %3266  ;;  %v3423_v34 = vpop.xlane.xlu0 %3422 }
 0x4cd   : > { %v3542_v37 = vmax.f32 %v3526_v56, 0.0  ;;  %v8527_v7 = vmul.f32 0.001953125, %v3267_v17  ;;  %v3495_v23 = vmul.f32 0.001953125, %v3423_v34  ;;  %v8547_v56 = vrot.slane %v3251_v55, %v8076_v54 }
 0x4ce   : > { %v8550_v17 = vrot.slane %v3252_v53, %v8076_v54  ;;  %v8553_v34 = vrot.slane %v3251_v55, %v8087_v52 }
 0x4cf   : > { %v3622_v57 = vadd.f32 1e-05, %v3542_v37  ;;  %v3527_v29 = vsub.f32 %v3495_v23, %v3511_v39  ;;  %v3512_v40 = vmul.f32 %v8527_v7, %v8527_v7  ;;  %v8556_v23 = vrot.slane %v3252_v53, %v8087_v52 }
 0x4d0   : > { %v3428_v4 = vpop.xlane.xlu1 %3427  ;;  %v3272_v27 = vpop.xlane.xlu0 %3271 }
 0x4d1   : > { %6446 = vrsqrt.f32 %v3622_v57  ;;  %v3543_v16 = vmax.f32 %v3527_v29, 0.0  ;;  %v3496_v22 = vmul.f32 0.001953125, %v3428_v4  ;;  %v8541_v5 = vmul.f32 0.001953125, %v3272_v27 }
 0x4d2   : > { %v8559_v57 = vrot.slane %v3251_v55, %v8067_v28  ;;  %v3560_v29 = vsub.f32 %v8093_v60, %v8516_v48  ;;  %v3559_v60 = vsub.f32 %v8096_v42, %v8516_v48 }
 0x4d3   : > { %v3623_v37 = vadd.f32 1e-05, %v3543_v16  ;;  %v3528_v39 = vsub.f32 %v3496_v22, %v3512_v40  ;;  %v3513_v27 = vmul.f32 %v8541_v5, %v8541_v5  ;;  %v8568_v16 = vrot.slane %v3252_v53, %v8067_v28 }
 0x4d4   : > { %v3433_v54 = vpop.xlane.xlu0 %3432  ;;  %v3563_v53 = vsub.f32 %v8113_v3, %v8518_v46 }
 0x4d5   : > { %v3277_v4 = vpop.xlane.xlu1 %3276  ;;  %6448 = vrsqrt.f32 %v3623_v37  ;;  %v3544_v52 = vmax.f32 %v3528_v39, 0.0  ;;  %v3497_v55 = vmul.f32 0.001953125, %v3433_v54  ;;  %v3565_v37 = vsub.f32 %v8133_v10, %v8518_v46 }
 0x4d6   : > { %v8570_v40 = vmul.f32 0.001953125, %v3277_v4 }
 0x4d7   : > { %v3529_v41 = vsub.f32 %v3497_v55, %v3513_v27  ;;  %v3624_v39 = vadd.f32 1e-05, %v3544_v52 }
 0x4d8   : > { %v3514_v3 = vmul.f32 %v8570_v40, %v8570_v40 }
 0x4d9   : > { %v3438_v4 = vpop.xlane.xlu1 %3437  ;;  %v3282_v22 = vpop.xlane.xlu0 %3281  ;;  %v3545_v48 = vmax.f32 %v3529_v41, 0.0  ;;  %6450 = vrsqrt.f32 %v3624_v39 }
 0x4da   : > { %v3498_v10 = vmul.f32 0.001953125, %v3438_v4  ;;  %v8594_v27 = vmul.f32 0.001953125, %v3282_v22 }
 0x4db   : > { %v3625_v47 = vadd.f32 1e-05, %v3545_v48 }
 0x4dc   : > { %v3530_v41 = vsub.f32 %v3498_v10, %v3514_v3  ;;  %v3515_v52 = vmul.f32 %v8594_v27, %v8594_v27 }
 0x4dd   : > { %v3287_v4 = vpop.xlane.xlu1 %3286  ;;  %v3443_v55 = vpop.xlane.xlu0 %3442  ;;  %6452 = vrsqrt.f32 %v3625_v47 }
 0x4de   : > { %v3546_v48 = vmax.f32 %v3530_v41, 0.0  ;;  %v8614_v3 = vmul.f32 0.001953125, %v3287_v4  ;;  %v3499_v10 = vmul.f32 0.001953125, %v3443_v55  ;;  %v6447_v22 = vpop.eup %6446 }
 0x4df   : > { %v3655_v55 = vmul.f32 %v6447_v22, %v3559_v60  ;;  %v3657_v54 = vmul.f32 %v6447_v22, %v3561_v1  ;;  %v3654_v31 = vmul.f32 %v6447_v22, %v3558_v6  ;;  %v3656_v47 = vmul.f32 %v6447_v22, %v3560_v29 }
 0x4e0   : > { %v3626_v33 = vadd.f32 1e-05, %v3546_v48  ;;  %v3531_v42 = vsub.f32 %v3499_v10, %v3515_v52  ;;  %v3516_v41 = vmul.f32 %v8614_v3, %v8614_v3 }
 0x4e1   : > { %v3448_v4 = vpop.xlane.xlu1 %3447  ;;  %v3740_v52 = vmul.f32 %v8547_v56, %v3655_v55  ;;  %v3742_v48 = vmul.f32 %v8553_v34, %v3657_v54  ;;  %v3739_v60 = vmul.f32 %v8559_v57, %v3654_v31  ;;  %v3741_v10 = vmul.f32 %v8537_v21, %v3656_v47 }
 0x4e2   : > { %v3292_v50 = vpop.xlane.xlu0 %3291  ;;  %6454 = vrsqrt.f32 %v3626_v33  ;;  %v3547_v43 = vmax.f32 %v3531_v42, 0.0  ;;  %v3500_v28 = vmul.f32 0.001953125, %v3448_v4  ;;  %v6449_v24 = vpop.eup %6448  ;;  %v9875_v54 = vsub.f32 %v8108_v2, %v8518_v46 }
 0x4e3   : > { %v8628_v61 = vmul.f32 0.001953125, %v3292_v50  ;;  %v3659_v22 = vmul.f32 %v6449_v24, %v3563_v53  ;;  %v3825_v50 = vadd.f32 %v8550_v17, %v3740_v52  ;;  %v3661_v4 = vmul.f32 %v6449_v24, %v3565_v37 }
 0x4e4   : > { %v3627_v1 = vadd.f32 1e-05, %v3547_v43  ;;  %v3532_v6 = vsub.f32 %v3500_v28, %v3516_v41  ;;  %v3827_v39 = vadd.f32 %v8556_v23, %v3742_v48  ;;  %v3658_v55 = vmul.f32 %v6449_v24, %v9875_v54 }
 0x4e5   : > { %v3517_v29 = vmul.f32 %v8628_v61, %v8628_v61  ;;  %v3744_v43 = vmul.f32 %v8547_v56, %v3659_v22  ;;  %v3889_v41 = vmax.f32 %v3825_v50, 0.0  ;;  %v3746_v53 = vmul.f32 %v8553_v34, %v3661_v4 }
 0x4e6   : > { %v3297_v33 = vpop.xlane.xlu1 %3296  ;;  %6456 = vrsqrt.f32 %v3627_v1  ;;  %v3548_v31 = vmax.f32 %v3532_v6, 0.0  ;;  %v3891_v58 = vmax.f32 %v3827_v39, 0.0  ;;  %v3743_v48 = vmul.f32 %v8559_v57, %v3658_v55  ;;  %v8654_v39 = vpop.eup %6450 }
 0x4e7   : > { %v3453_v42 = vpop.xlane.xlu0 %3452  ;;  %v8641_v47 = vmul.f32 0.001953125, %v3297_v33  ;;  %v3829_v1 = vadd.f32 %v8550_v17, %v3744_v43  ;;  %v3831_v6 = vadd.f32 %v8556_v23, %v3746_v53  ;;  %v3824_v33 = vadd.f32 %v8568_v16, %v3739_v60 }
 0x4e8   : > { %v3501_v28 = vmul.f32 0.001953125, %v3453_v42  ;;  %v3628_v19 = vadd.f32 1e-05, %v3548_v31  ;;  %v9876_v22 = vsub.f32 %v8119_v63, %v8518_v46 }
 0x4e9   : > { %v3518_v37 = vmul.f32 %v8641_v47, %v8641_v47  ;;  %v3893_v55 = vmax.f32 %v3829_v1, 0.0  ;;  %v3895_v31 = vmax.f32 %v3831_v6, 0.0  ;;  %v3888_v43 = vmax.f32 %v3824_v33, 0.0 }
 0x4ea   : > { %v3533_v52 = vsub.f32 %v3501_v28, %v3517_v29  ;;  %v3660_v42 = vmul.f32 %v6449_v24, %v9876_v22  ;;  %6458 = vrsqrt.f32 %v3628_v19  ;;  %v3828_v28 = vadd.f32 %v8568_v16, %v3743_v48  ;;  %v8659_v14 = vpop.eup %6452 }
 0x4eb   : > { %v3458_v2 = vpop.xlane.xlu1 %3457  ;;  %v3302_v54 = vpop.xlane.xlu0 %3301  ;;  %v3826_v1 = vadd.f32 %v8544_v11, %v3741_v10 }
 0x4ec   : > { %v3549_v29 = vmax.f32 %v3533_v52, 0.0  ;;  %v3502_v50 = vmul.f32 0.001953125, %v3458_v2  ;;  %v8656_v4 = vmul.f32 0.001953125, %v3302_v54  ;;  %v3745_v46 = vmul.f32 %v8537_v21, %v3660_v42 }
 0x4ed   : > { %v3953_v52 = vpack.c.bf16 %v3893_v55, %v3889_v41  ;;  %v3955_v2 = vpack.c.bf16 %v3895_v31, %v3891_v58  ;;  %v3892_v54 = vmax.f32 %v3828_v28, 0.0  ;;  %v3890_v42 = vmax.f32 %v3826_v1, 0.0 }
 0x4ee   : > { %v3629_v53 = vadd.f32 1e-05, %v3549_v29  ;;  %v3534_v60 = vsub.f32 %v3502_v50, %v3518_v37  ;;  %v3519_v63 = vmul.f32 %v8656_v4, %v8656_v4  ;;  %v3830_v29 = vadd.f32 %v8544_v11, %v3745_v46 }
 0x4ef   : > { %v3307_v24 = vpop.xlane.xlu1 %3306  ;;  %v8667_v22 = vpop.eup %6454  ;;  %4412 = vmatprep.mubr.bf16.mxu1 %v3953_v52  ;;  %4525 = vmatprep.mubr.bf16.mxu0 %v3955_v2  ;;  %v3952_v37 = vpack.c.bf16 %v3892_v54, %v3888_v43  ;;  %v9877_v41 = vsub.f32 %v8139_v62, %v8527_v7  ;;  %v9878_v31 = vsub.f32 %v8162_v59, %v8541_v5 }
 0x4f0   : > { %v3463_v19 = vpop.xlane.xlu0 %3462  ;;  %6460 = vrsqrt.f32 %v3629_v53  ;;  %v3550_v6 = vmax.f32 %v3534_v60, 0.0  ;;  %v8665_v48 = vmul.f32 0.001953125, %v3307_v24  ;;  %v3894_v43 = vmax.f32 %v3830_v29, 0.0 }
 0x4f1   : > { %v3503_v33 = vmul.f32 0.001953125, %v3463_v19  ;;  %v3663_v58 = vmul.f32 %v8654_v39, %v9877_v41  ;;  %v3667_v28 = vmul.f32 %v8659_v14, %v9878_v31  ;;  %4413 = vmatmul.mubr.bf16.vlgmr.msra.gmra.mxu1 %v3952_v37  ;;  %v9879_v62 = vsub.f32 %v8159_v12, %v8527_v7 }
 0x4f2   : > { %v3630_v50 = vadd.f32 1e-05, %v3550_v6  ;;  %v3520_v55 = vmul.f32 %v8665_v48, %v8665_v48  ;;  %v3954_v1 = vpack.c.bf16 %v3894_v43, %v3890_v42 }
 0x4f3   : > { %v3535_v10 = vsub.f32 %v3503_v33, %v3519_v63  ;;  %v3748_v46 = vmul.f32 %v8547_v56, %v3663_v58  ;;  %v3665_v24 = vmul.f32 %v8654_v39, %v9879_v62  ;;  %v9880_v63 = vsub.f32 %v8181_v35, %v8541_v5  ;;  %v8691_v54 = vpop.eup %6456 }
 0x4f4   : > { %v3468_v53 = vpop.xlane.xlu1 %3467  ;;  %v3312_v60 = vpop.xlane.xlu0 %3311  ;;  %6462 = vrsqrt.f32 %v3630_v50  ;;  %v3752_v6 = vmul.f32 %v8547_v56, %v3667_v28  ;;  %4526 = vmatmul.mubr.bf16.vlgmr.msra.gmra.mxu0 %v3954_v1  ;;  %v9881_v28 = vsub.f32 %v8129_v20, %v8527_v7 }
 0x4f5   : > { %v3669_v19 = vmul.f32 %v8659_v14, %v9880_v63  ;;  %v3551_v59 = vmax.f32 %v3535_v10, 0.0  ;;  %v3504_v52 = vmul.f32 0.001953125, %v3468_v53  ;;  %v8689_v2 = vmul.f32 0.001953125, %v3312_v60 }
 0x4f6   : > { %v3833_v33 = vadd.f32 %v8550_v17, %v3748_v46  ;;  %v3750_v12 = vmul.f32 %v8553_v34, %v3665_v24  ;;  %v3837_v10 = vadd.f32 %v8550_v17, %v3752_v6  ;;  %v3662_v43 = vmul.f32 %v8654_v39, %v9881_v28 }
 0x4f7   : > { %v3631_v37 = vadd.f32 1e-05, %v3551_v59  ;;  %v3536_v29 = vsub.f32 %v3504_v52, %v3520_v55  ;;  %v3521_v35 = vmul.f32 %v8689_v2, %v8689_v2  ;;  %v3754_v41 = vmul.f32 %v8553_v34, %v3669_v19  ;;  %v8707_v46 = vpop.eup %6458 }
 0x4f8   : > { %v3317_v58 = vpop.xlane.xlu1 %3316  ;;  %v3897_v31 = vmax.f32 %v3833_v33, 0.0  ;;  %v3835_v42 = vadd.f32 %v8556_v23, %v3750_v12  ;;  %v3901_v62 = vmax.f32 %v3837_v10, 0.0  ;;  %v9882_v19 = vsub.f32 %v8151_v44, %v8541_v5 }
 0x4f9   : > { %v3473_v50 = vpop.xlane.xlu0 %3472  ;;  %6464 = vrsqrt.f32 %v3631_v37  ;;  %v3552_v55 = vmax.f32 %v3536_v29, 0.0  ;;  %v8705_v53 = vmul.f32 0.001953125, %v3317_v58  ;;  %v3839_v24 = vadd.f32 %v8556_v23, %v3754_v41 }
 0x4fa   : > { %v3505_v60 = vmul.f32 0.001953125, %v3473_v50  ;;  %v3899_v63 = vmax.f32 %v3835_v42, 0.0  ;;  %v3666_v59 = vmul.f32 %v8659_v14, %v9882_v19  ;;  %v3747_v1 = vmul.f32 %v8559_v57, %v3662_v43 }
 0x4fb   : > { %v3632_v52 = vadd.f32 1e-05, %v3552_v55  ;;  %v9883_v6 = vsub.f32 %v8136_v51, %v8527_v7  ;;  %v3957_v12 = vpack.c.bf16 %v3901_v62, %v3897_v31  ;;  %v3903_v37 = vmax.f32 %v3839_v24, 0.0 }
 0x4fc   : > { %v3537_v20 = vsub.f32 %v3505_v60, %v3521_v35  ;;  %v3751_v29 = vmul.f32 %v8559_v57, %v3666_v59  ;;  %v9884_v41 = vsub.f32 %v8167_v45, %v8541_v5  ;;  %v3832_v10 = vadd.f32 %v8568_v16, %v3747_v1 }
 0x4fd   : > { %v3664_v33 = vmul.f32 %v8654_v39, %v9883_v6  ;;  %v3478_v58 = vpop.xlane.xlu1 %3477  ;;  %v3322_v50 = vpop.xlane.xlu0 %3321  ;;  %6466 = vrsqrt.f32 %v3632_v52  ;;  %4422 = vmatprep.mubr.bf16.mxu1 %v3957_v12  ;;  %v3959_v7 = vpack.c.bf16 %v3903_v37, %v3899_v63  ;;  %v3522_v45 = vmul.f32 %v8705_v53, %v8705_v53 }
 0x4fe   : > { %v3668_v44 = vmul.f32 %v8659_v14, %v9884_v41  ;;  %v3553_v35 = vmax.f32 %v3537_v20, 0.0  ;;  %v8726_v51 = vpop.eup %6460  ;;  %v3836_v39 = vadd.f32 %v8568_v16, %v3751_v29  ;;  %v3896_v5 = vmax.f32 %v3832_v10, 0.0 }
 0x4ff   : > { %v3749_v42 = vmul.f32 %v8537_v21, %v3664_v33  ;;  %v3506_v43 = vmul.f32 0.001953125, %v3478_v58  ;;  %4535 = vmatprep.mubr.bf16.mxu0 %v3959_v7  ;;  %v8734_v62 = vmul.f32 0.001953125, %v3322_v50  ;;  %v9885_v19 = vsub.f32 %v8187_v36, %v8570_v40 }
 0x500   : > { %v3753_v31 = vmul.f32 %v8537_v21, %v3668_v44  ;;  %v3633_v14 = vadd.f32 1e-05, %v3553_v35  ;;  %v3900_v55 = vmax.f32 %v3836_v39, 0.0  ;;  %v9886_v44 = vsub.f32 %v8214_v30, %v8594_v27 }
 0x501   : > { %v3834_v28 = vadd.f32 %v8544_v11, %v3749_v42  ;;  %v3483_v24 = vpop.xlane.xlu0 %3482  ;;  %v3327_v63 = vpop.xlane.xlu1 %3326  ;;  %v3671_v59 = vmul.f32 %v8667_v22, %v9885_v19  ;;  %v3538_v20 = vsub.f32 %v3506_v43, %v3522_v45  ;;  %v3523_v37 = vmul.f32 %v8734_v62, %v8734_v62 }
 0x502   : > { %v3838_v60 = vadd.f32 %v8544_v11, %v3753_v31  ;;  %6468 = vrsqrt.f32 %v3633_v14  ;;  %v3507_v1 = vmul.f32 0.001953125, %v3483_v24  ;;  %v8740_v6 = vpop.eup %6462  ;;  %v3956_v33 = vpack.c.bf16 %v3900_v55, %v3896_v5 }
 0x503   : > { %v3898_v52 = vmax.f32 %v3834_v28, 0.0  ;;  %v8744_v29 = vmul.f32 0.001953125, %v3327_v63  ;;  %v3554_v41 = vmax.f32 %v3538_v20, 0.0  ;;  %v3675_v36 = vmul.f32 %v8691_v54, %v9886_v44 }
 0x504   : > { %v3902_v12 = vmax.f32 %v3838_v60, 0.0  ;;  %v3756_v58 = vmul.f32 %v8547_v56, %v3671_v59  ;;  %v9887_v50 = vsub.f32 %v8211_v25, %v8570_v40  ;;  %4423 = vmatmul.mubr.bf16.gmra.mxu1 %v3956_v33  ;;  %v3539_v42 = vsub.f32 %v3507_v1, %v3523_v37 }
 0x505   : > { %v9888_v7 = vsub.f32 %v8237_v13, %v8594_v27  ;;  %v9889_v30 = vsub.f32 %v8177_v9, %v8570_v40  ;;  %v3332_v45 = vpop.xlane.xlu0 %3331  ;;  %v3634_v14 = vadd.f32 1e-05, %v3554_v41  ;;  %v3760_v5 = vmul.f32 %v8547_v56, %v3675_v36 }
 0x506   : > { %v3673_v35 = vmul.f32 %v8667_v22, %v9887_v50  ;;  %v3958_v10 = vpack.c.bf16 %v3902_v12, %v3898_v52  ;;  %v3841_v25 = vadd.f32 %v8550_v17, %v3756_v58  ;;  %v8766_v43 = vpop.eup %6464  ;;  %v3555_v55 = vmax.f32 %v3539_v42, 0.0  ;;  %v3488_v58 = vpop.xlane.xlu1 %3487 }
 0x507   : > { %v3677_v39 = vmul.f32 %v8691_v54, %v9888_v7  ;;  %v3670_v31 = vmul.f32 %v8667_v22, %v9889_v30  ;;  %v9890_v60 = vsub.f32 %v8199_v38, %v8594_v27  ;;  %6470 = vrsqrt.f32 %v3634_v14 }
 0x508   : > { %v3758_v28 = vmul.f32 %v8553_v34, %v3673_v35  ;;  %4536 = vmatmul.mubr.bf16.gmra.mxu0 %v3958_v10  ;;  %v3845_v63 = vadd.f32 %v8550_v17, %v3760_v5  ;;  %v3905_v19 = vmax.f32 %v3841_v25, 0.0  ;;  %v3635_v52 = vadd.f32 1e-05, %v3555_v55 }
 0x509   : > { %v3762_v13 = vmul.f32 %v8553_v34, %v3677_v39  ;;  %v3674_v9 = vmul.f32 %v8691_v54, %v9890_v60  ;;  %v3755_v24 = vmul.f32 %v8559_v57, %v3670_v31  ;;  %v9891_v38 = vsub.f32 %v8184_v15, %v8570_v40  ;;  %v3493_v7 = vpop.xlane.xlu0 %3492 }
 0x50a   : > { %v3843_v59 = vadd.f32 %v8556_v23, %v3758_v28  ;;  %v3909_v12 = vmax.f32 %v3845_v63, 0.0  ;;  %v9892_v44 = vsub.f32 %v8219_v32, %v8594_v27  ;;  %v8787_v50 = vpop.eup %6466  ;;  %6472 = vrsqrt.f32 %v3635_v52 }
 0x50b   : > { %v3847_v20 = vadd.f32 %v8556_v23, %v3762_v13  ;;  %v3759_v1 = vmul.f32 %v8559_v57, %v3674_v9  ;;  %v3840_v33 = vadd.f32 %v8568_v16, %v3755_v24  ;;  %v3672_v41 = vmul.f32 %v8667_v22, %v9891_v38 }
 0x50c   : > { %v3907_v37 = vmax.f32 %v3843_v59, 0.0  ;;  %v3676_v36 = vmul.f32 %v8691_v54, %v9892_v44  ;;  %v3961_v39 = vpack.c.bf16 %v3909_v12, %v3905_v19  ;;  %v8792_v40 = vmul.f32 0.001953125, %v3332_v45 }
 0x50d   : > { %v3911_v35 = vmax.f32 %v3847_v20, 0.0  ;;  %v3844_v10 = vadd.f32 %v8568_v16, %v3759_v1  ;;  %v3904_v42 = vmax.f32 %v3840_v33, 0.0  ;;  %v3757_v30 = vmul.f32 %v8537_v21, %v3672_v41 }
 0x50e   : > { %v3761_v15 = vmul.f32 %v8537_v21, %v3676_v36  ;;  %v3524_v27 = vmul.f32 %v8744_v29, %v8744_v29  ;;  %v3508_v54 = vmul.f32 0.001953125, %v3488_v58  ;;  %4432 = vmatprep.mubr.bf16.mxu1 %v3961_v39  ;;  %v3525_v5 = vmul.f32 %v8792_v40, %v8792_v40 }
 0x50f   : > { %v3963_v22 = vpack.c.bf16 %v3911_v35, %v3907_v37  ;;  %v3908_v32 = vmax.f32 %v3844_v10, 0.0  ;;  %v3842_v31 = vadd.f32 %v8544_v11, %v3757_v30  ;;  %v3509_v25 = vmul.f32 0.001953125, %v3493_v7  ;;  %v8800_v28 = vpop.eup %6468  ;;  %v9894_v37 = vld [vmem:[#allocation24_spill] sm:$0xff] }
 0x510   : > { %v3846_v14 = vadd.f32 %v8544_v11, %v3761_v15  ;;  %v3540_v55 = vsub.f32 %v3508_v54, %v3524_v27  ;;  %v3587_v13 = vsub.f32 %v8270_v0, %v8628_v61  ;;  %v9893_v60 = vsub.f32 %v8243_v8, %v8614_v3 }
 0x511   : > { %4545 = vmatprep.mubr.bf16.mxu0 %v3963_v22  ;;  %v3960_v45 = vpack.c.bf16 %v3908_v32, %v3904_v42  ;;  %v3906_v24 = vmax.f32 %v3842_v31, 0.0  ;;  %v3541_v19 = vsub.f32 %v3509_v25, %v3525_v5  ;;  %v3585_v59 = vsub.f32 %v8267_v49, %v8614_v3  ;;  %v9897_v25 = vld [vmem:[#allocation27_spill] sm:$0xff] }
 0x512   : > { %v3679_v9 = vmul.f32 %v8707_v46, %v9893_v60  ;;  %v3910_v63 = vmax.f32 %v3846_v14, 0.0  ;;  %v3556_v52 = vmax.f32 %v3540_v55, 0.0  ;;  %v3683_v20 = vmul.f32 %v8726_v51, %v3587_v13  ;;  %v9896_v14 = vld [vmem:[#allocation25_spill] sm:$0xff] }
 0x513   : > { %4433 = vmatmul.mubr.bf16.gmra.mxu1 %v3960_v45  ;;  %v3589_v0 = vsub.f32 %v8293_v26, %v8628_v61  ;;  %v3557_v12 = vmax.f32 %v3541_v19, 0.0  ;;  %v3681_v8 = vmul.f32 %v8707_v46, %v3585_v59  ;;  %v3582_v38 = vsub.f32 %v9894_v37, %v8614_v3  ;;  %v9895_v26 = vld [vmem:[#allocation26_spill] sm:$0xff] }
 0x514   : > { %v3764_v1 = vmul.f32 %v8547_v56, %v3679_v9  ;;  %v3962_v33 = vpack.c.bf16 %v3910_v63, %v3906_v24  ;;  %v3636_v41 = vadd.f32 1e-05, %v3556_v52  ;;  %v3768_v44 = vmul.f32 %v8547_v56, %v3683_v20  ;;  %v8824_v7 = vpop.eup %6470  ;;  %v9898_v24 = vld [vmem:[#allocation30_spill] sm:$0xff] }
 0x515   : > { %v3685_v36 = vmul.f32 %v8726_v51, %v3589_v0  ;;  %v3637_v58 = vadd.f32 1e-05, %v3557_v12  ;;  %v3766_v35 = vmul.f32 %v8553_v34, %v3681_v8  ;;  %v3586_v10 = vsub.f32 %v9895_v26, %v8628_v61 }
 0x516   : > { %v3849_v49 = vadd.f32 %v8550_v17, %v3764_v1  ;;  %4546 = vmatmul.mubr.bf16.gmra.mxu0 %v3962_v33  ;;  %v3678_v42 = vmul.f32 %v8707_v46, %v3582_v38  ;;  %6474 = vrsqrt.f32 %v3636_v41  ;;  %v3853_v39 = vadd.f32 %v8550_v17, %v3768_v44  ;;  %v9900_v38 = vld [vmem:[#allocation32_spill] sm:$0xff] }
 0x517   : > { %v3770_v15 = vmul.f32 %v8553_v34, %v3685_v36  ;;  %6476 = vrsqrt.f32 %v3637_v58  ;;  %v3851_v22 = vadd.f32 %v8556_v23, %v3766_v35  ;;  %v3682_v32 = vmul.f32 %v8726_v51, %v3586_v10  ;;  %v8836_v55 = vpop.eup %6472  ;;  %v9902_v10 = vld [vmem:[#allocation28_spill] sm:$0xff] }
 0x518   : > { %v3913_v30 = vmax.f32 %v3849_v49, 0.0  ;;  %v3763_v27 = vmul.f32 %v8559_v57, %v3678_v42  ;;  %v3917_v54 = vmax.f32 %v3853_v39, 0.0  ;;  %v3584_v5 = vsub.f32 %v9896_v14, %v8614_v3  ;;  %v9901_v49 = vld [vmem:[#allocation36_spill] sm:$0xff] }
 0x519   : > { %v3855_v31 = vadd.f32 %v8556_v23, %v3770_v15  ;;  %v3588_v45 = vsub.f32 %v9897_v25, %v8628_v61  ;;  %v3915_v13 = vmax.f32 %v3851_v22, 0.0  ;;  %v3767_v60 = vmul.f32 %v8559_v57, %v3682_v32  ;;  %v9899_v61 = vld [vmem:[#allocation33_spill] sm:$0xff] }
 0x51a   : > { %v3848_v9 = vadd.f32 %v8568_v16, %v3763_v27  ;;  %v3591_v63 = vsub.f32 %v9898_v24, %v8641_v47  ;;  %v3965_v19 = vpack.c.bf16 %v3917_v54, %v3913_v30  ;;  %v3680_v52 = vmul.f32 %v8707_v46, %v3584_v5 }
 0x51b   : > { %v3919_v59 = vmax.f32 %v3855_v31, 0.0  ;;  %v3684_v20 = vmul.f32 %v8726_v51, %v3588_v45  ;;  %v3852_v3 = vadd.f32 %v8568_v16, %v3767_v60  ;;  %v3595_v0 = vsub.f32 %v9899_v61, %v8656_v4  ;;  %v9903_v31 = vld [vmem:[#allocation31_spill] sm:$0xff] }
 0x51c   : > { %v3912_v1 = vmax.f32 %v3848_v9, 0.0  ;;  %v3687_v33 = vmul.f32 %v8740_v6, %v3591_v63  ;;  %4442 = vmatprep.mubr.bf16.mxu1 %v3965_v19  ;;  %v3765_v8 = vmul.f32 %v8537_v21, %v3680_v52  ;;  %v3593_v41 = vsub.f32 %v9900_v38, %v8641_v47  ;;  %v9904_v63 = vld [vmem:[#allocation29_spill] sm:$0xff] }
 0x51d   : > { %v3967_v12 = vpack.c.bf16 %v3919_v59, %v3915_v13  ;;  %v3769_v37 = vmul.f32 %v8537_v21, %v3684_v20  ;;  %v3916_v46 = vmax.f32 %v3852_v3, 0.0  ;;  %v3691_v51 = vmul.f32 %v8766_v43, %v3595_v0 }
 0x51e   : > { %v3772_v44 = vmul.f32 %v8547_v56, %v3687_v33  ;;  %v3597_v36 = vsub.f32 %v9901_v49, %v8656_v4  ;;  %v3850_v58 = vadd.f32 %v8544_v11, %v3765_v8  ;;  %v3689_v26 = vmul.f32 %v8740_v6, %v3593_v41  ;;  %v9907_v49 = vld [vmem:[#allocation41_spill] sm:$0xff] }
 0x51f   : > { %4555 = vmatprep.mubr.bf16.mxu0 %v3967_v12  ;;  %v3854_v35 = vadd.f32 %v8544_v11, %v3769_v37  ;;  %v3590_v42 = vsub.f32 %v9902_v10, %v8641_v47  ;;  %v3964_v39 = vpack.c.bf16 %v3916_v46, %v3912_v1  ;;  %v3776_v30 = vmul.f32 %v8547_v56, %v3691_v51  ;;  %v9905_v1 = vld [vmem:[#allocation34_spill] sm:$0xff]  ;;  %v9908_v10 = vld [vmem:[#allocation40_spill] sm:$0xff] }
 0x520   : > { %v3857_v15 = vadd.f32 %v8550_v17, %v3772_v44  ;;  %v3693_v22 = vmul.f32 %v8766_v43, %v3597_v36  ;;  %v3914_v32 = vmax.f32 %v3850_v58, 0.0  ;;  %v3774_v54 = vmul.f32 %v8553_v34, %v3689_v26 }
 0x521   : > { %v3918_v27 = vmax.f32 %v3854_v35, 0.0  ;;  %v3594_v14 = vsub.f32 %v9903_v31, %v8656_v4  ;;  %4443 = vmatmul.mubr.bf16.gmra.mxu1 %v3964_v39  ;;  %v3861_v5 = vadd.f32 %v8550_v17, %v3776_v30  ;;  %v3686_v13 = vmul.f32 %v8740_v6, %v3590_v42  ;;  %v9910_v31 = vld [vmem:[#allocation35_spill] sm:$0xff] }
 0x522   : > { %v3921_v25 = vmax.f32 %v3857_v15, 0.0  ;;  %v3778_v45 = vmul.f32 %v8553_v34, %v3693_v22  ;;  %v3859_v9 = vadd.f32 %v8556_v23, %v3774_v54  ;;  %v3592_v19 = vsub.f32 %v9904_v63, %v8641_v47  ;;  %v9906_v47 = vld [vmem:[#allocation38_spill] sm:$0xff]  ;;  %v9911_v63 = vld [vmem:[#allocation39_spill] sm:$0xff] }
 0x523   : > { %v3966_v60 = vpack.c.bf16 %v3918_v27, %v3914_v32  ;;  %v3690_v24 = vmul.f32 %v8766_v43, %v3594_v14  ;;  %v8874_v59 = vpop.eup %6474  ;;  %v3925_v52 = vmax.f32 %v3861_v5, 0.0  ;;  %v3771_v3 = vmul.f32 %v8559_v57, %v3686_v13  ;;  %v9909_v32 = vld [vmem:[#allocation44_spill] sm:$0xff] }
 0x524   : > { %v3863_v20 = vadd.f32 %v8556_v23, %v3778_v45  ;;  %v3596_v61 = vsub.f32 %v9905_v1, %v8656_v4  ;;  %v8880_v0 = vpop.eup %6476  ;;  %v3923_v33 = vmax.f32 %v3859_v9, 0.0  ;;  %v3688_v8 = vmul.f32 %v8740_v6, %v3592_v19  ;;  %v9912_v1 = vld [vmem:[#allocation37_spill] sm:$0xff] }
 0x525   : > { %4556 = vmatmul.mubr.bf16.gmra.mxu0 %v3966_v60  ;;  %v3775_v12 = vmul.f32 %v8559_v57, %v3690_v24  ;;  %v3599_v37 = vsub.f32 %v9906_v47, %v8665_v48  ;;  %v3969_v38 = vpack.c.bf16 %v3925_v52, %v3921_v25  ;;  %v3856_v46 = vadd.f32 %v8568_v16, %v3771_v3 }
 0x526   : > { %v3927_v41 = vmax.f32 %v3863_v20, 0.0  ;;  %v3692_v51 = vmul.f32 %v8766_v43, %v3596_v61  ;;  %v3773_v4 = vmul.f32 %v8537_v21, %v3688_v8  ;;  %v3603_v36 = vsub.f32 %v9907_v49, %v8689_v2  ;;  %v9914_v49 = vld [vmem:[#allocation46_spill] sm:$0xff] }
 0x527   : > { %v3860_v44 = vadd.f32 %v8568_v16, %v3775_v12  ;;  %v3695_v58 = vmul.f32 %v8787_v50, %v3599_v37  ;;  %4452 = vmatprep.mubr.bf16.mxu1 %v3969_v38  ;;  %v3920_v35 = vmax.f32 %v3856_v46, 0.0  ;;  %v3601_v42 = vsub.f32 %v9908_v10, %v8665_v48 }
 0x528   : > { %v3971_v6 = vpack.c.bf16 %v3927_v41, %v3923_v33  ;;  %v3777_v26 = vmul.f32 %v8537_v21, %v3692_v51  ;;  %v3858_v43 = vadd.f32 %v8544_v11, %v3773_v4  ;;  %v3699_v30 = vmul.f32 %v8800_v28, %v3603_v36  ;;  %v9913_v41 = vld [vmem:[#allocation42_spill] sm:$0xff] }
 0x529   : > { %v3924_v39 = vmax.f32 %v3860_v44, 0.0  ;;  %v3780_v15 = vmul.f32 %v8547_v56, %v3695_v58  ;;  %v3605_v27 = vsub.f32 %v9909_v32, %v8689_v2  ;;  %v3697_v54 = vmul.f32 %v8787_v50, %v3601_v42 }
 0x52a   : > { %4565 = vmatprep.mubr.bf16.mxu0 %v3971_v6  ;;  %v3862_v22 = vadd.f32 %v8544_v11, %v3777_v26  ;;  %v3598_v14 = vsub.f32 %v9910_v31, %v8665_v48  ;;  %v3922_v25 = vmax.f32 %v3858_v43, 0.0  ;;  %v3784_v45 = vmul.f32 %v8547_v56, %v3699_v30 }
 0x52b   : > { %v3968_v5 = vpack.c.bf16 %v3924_v39, %v3920_v35  ;;  %v3865_v13 = vadd.f32 %v8550_v17, %v3780_v15  ;;  %v3701_v9 = vmul.f32 %v8800_v28, %v3605_v27  ;;  %v3782_v24 = vmul.f32 %v8553_v34, %v3697_v54 }
 0x52c   : > { %v3926_v60 = vmax.f32 %v3862_v22, 0.0  ;;  %v3602_v19 = vsub.f32 %v9911_v63, %v8689_v2  ;;  %v3869_v52 = vadd.f32 %v8550_v17, %v3784_v45  ;;  %v3694_v3 = vmul.f32 %v8787_v50, %v3598_v14 }
 0x52d   : > { %4453 = vmatmul.mubr.bf16.gmra.mxu1 %v3968_v5  ;;  %v3929_v20 = vmax.f32 %v3865_v13, 0.0  ;;  %v3600_v61 = vsub.f32 %v9912_v1, %v8665_v48  ;;  %v3786_v12 = vmul.f32 %v8553_v34, %v3701_v9  ;;  %v3867_v8 = vadd.f32 %v8556_v23, %v3782_v24  ;;  %v9916_v5 = vld [vmem:[#allocation51_spill] sm:$0xff] }
 0x52e   : > { %v3970_v33 = vpack.c.bf16 %v3926_v60, %v3922_v25  ;;  %v3698_v47 = vmul.f32 %v8800_v28, %v3602_v19  ;;  %v3933_v37 = vmax.f32 %v3869_v52, 0.0  ;;  %v3779_v38 = vmul.f32 %v8559_v57, %v3694_v3  ;;  %v9917_v9 = vld [vmem:[#allocation43_spill] sm:$0xff] }
 0x52f   : > { %v3604_v46 = vsub.f32 %v9913_v41, %v8689_v2  ;;  %v3696_v51 = vmul.f32 %v8787_v50, %v3600_v61  ;;  %v3871_v44 = vadd.f32 %v8556_v23, %v3786_v12  ;;  %v3931_v4 = vmax.f32 %v3867_v8, 0.0  ;;  %v9915_v50 = vld [vmem:[#allocation48_spill] sm:$0xff]  ;;  %v9919_v12 = vld [vmem:[#allocation45_spill] sm:$0xff] }
 0x530   : > { %4566 = vmatmul.mubr.bf16.gmra.mxu0 %v3970_v33  ;;  %v3783_v48 = vmul.f32 %v8559_v57, %v3698_v47  ;;  %v3607_v36 = vsub.f32 %v9914_v49, %v8705_v53  ;;  %v3973_v58 = vpack.c.bf16 %v3933_v37, %v3929_v20  ;;  %v3864_v6 = vadd.f32 %v8568_v16, %v3779_v38  ;;  %v9918_v20 = vld [vmem:[#allocation47_spill] sm:$0xff] }
 0x531   : > { %v3700_v35 = vmul.f32 %v8800_v28, %v3604_v46  ;;  %v3781_v26 = vmul.f32 %v8537_v21, %v3696_v51  ;;  %v3935_v10 = vmax.f32 %v3871_v44, 0.0  ;;  %v3611_v42 = vsub.f32 %v9915_v50, %v8734_v62  ;;  %v9920_v44 = vld [vmem:[#allocation49_spill] sm:$0xff] }
 0x532   : > { %v3868_v2 = vadd.f32 %v8568_v16, %v3783_v48  ;;  %v3703_v39 = vmul.f32 %v8824_v7, %v3607_v36  ;;  %4462 = vmatprep.mubr.bf16.mxu1 %v3973_v58  ;;  %v3928_v43 = vmax.f32 %v3864_v6, 0.0  ;;  %v3609_v22 = vsub.f32 %v8435_v18, %v8705_v53  ;;  %v9921_v58 = vld [vmem:[#allocation53_spill] sm:$0xff] }
 0x533   : > { %v3785_v30 = vmul.f32 %v8537_v21, %v3700_v35  ;;  %v3866_v15 = vadd.f32 %v8544_v11, %v3781_v26  ;;  %v3975_v28 = vpack.c.bf16 %v3935_v10, %v3931_v4  ;;  %v3707_v27 = vmul.f32 %v8836_v55, %v3611_v42 }
 0x534   : > { %v3932_v32 = vmax.f32 %v3868_v2, 0.0  ;;  %v3788_v54 = vmul.f32 %v8547_v56, %v3703_v39  ;;  %v3613_v25 = vsub.f32 %v9916_v5, %v8734_v62  ;;  %v3705_v45 = vmul.f32 %v8824_v7, %v3609_v22  ;;  %v9923_v22 = vld [vmem:[#allocation55_spill] sm:$0xff]  ;;  %v9924_v5 = vld [vmem:[#allocation58_spill] sm:$0xff] }
 0x535   : > { %v3870_v31 = vadd.f32 %v8544_v11, %v3785_v30  ;;  %v3930_v14 = vmax.f32 %v3866_v15, 0.0  ;;  %4575 = vmatprep.mubr.bf16.mxu0 %v3975_v28  ;;  %v3792_v60 = vmul.f32 %v8547_v56, %v3707_v27  ;;  %v3606_v24 = vsub.f32 %v9917_v9, %v8705_v53  ;;  %v9925_v9 = vld [vmem:[#allocation50_spill] sm:$0xff] }
 0x536   : > { %v3972_v13 = vpack.c.bf16 %v3932_v32, %v3928_v43  ;;  %v3873_v18 = vadd.f32 %v8550_v17, %v3788_v54  ;;  %v3709_v19 = vmul.f32 %v8836_v55, %v3613_v25  ;;  %v3790_v52 = vmul.f32 %v8553_v34, %v3705_v45 }
 0x537   : > { %v3934_v63 = vmax.f32 %v3870_v31, 0.0  ;;  %v3610_v3 = vsub.f32 %v9918_v20, %v8734_v62  ;;  %v3877_v1 = vadd.f32 %v8550_v17, %v3792_v60  ;;  %v3702_v33 = vmul.f32 %v8824_v7, %v3606_v24  ;;  %v9926_v20 = vld [vmem:[#allocation54_spill] sm:$0xff] }
 0x538   : > { %4463 = vmatmul.mubr.bf16.gmra.mxu1 %v3972_v13  ;;  %v3937_v61 = vmax.f32 %v3873_v18, 0.0  ;;  %v3608_v8 = vsub.f32 %v9919_v12, %v8705_v53  ;;  %v3794_v37 = vmul.f32 %v8553_v34, %v3709_v19  ;;  %v3875_v38 = vadd.f32 %v8556_v23, %v3790_v52 }
 0x539   : > { %v3974_v47 = vpack.c.bf16 %v3934_v63, %v3930_v14  ;;  %v3706_v41 = vmul.f32 %v8836_v55, %v3610_v3  ;;  %v3941_v46 = vmax.f32 %v3877_v1, 0.0  ;;  %v3787_v51 = vmul.f32 %v8559_v57, %v3702_v33 }
 0x53a   : > { %v3612_v4 = vsub.f32 %v9920_v44, %v8734_v62  ;;  %v3704_v48 = vmul.f32 %v8824_v7, %v3608_v8  ;;  %v3879_v49 = vadd.f32 %v8556_v23, %v3794_v37  ;;  %v3939_v36 = vmax.f32 %v3875_v38, 0.0  ;;  %v9922_v7 = vld [vmem:[#allocation56_spill] sm:$0xff] }
 0x53b   : > { %4576 = vmatmul.mubr.bf16.gmra.mxu0 %v3974_v47  ;;  %v3791_v53 = vmul.f32 %v8559_v57, %v3706_v41  ;;  %v3615_v6 = vsub.f32 %v9921_v58, %v8744_v29  ;;  %v3977_v35 = vpack.c.bf16 %v3941_v46, %v3937_v61  ;;  %v3872_v26 = vadd.f32 %v8568_v16, %v3787_v51  ;;  %v9928_v51 = vld [vmem:[#allocation57_spill] sm:$0xff] }
 0x53c   : > { %v3708_v10 = vmul.f32 %v8836_v55, %v3612_v4  ;;  %v3789_v2 = vmul.f32 %v8537_v21, %v3704_v48  ;;  %v3943_v50 = vmax.f32 %v3879_v49, 0.0  ;;  %v3619_v42 = vsub.f32 %v9922_v7, %v8792_v40  ;;  %v9931_v7 = vld [vmem:[#allocation23_spill] sm:$0xff] }
 0x53d   : > { %v3876_v62 = vadd.f32 %v8568_v16, %v3791_v53  ;;  %v3711_v39 = vmul.f32 %v8874_v59, %v3615_v6  ;;  %4472 = vmatprep.mubr.bf16.mxu1 %v3977_v35  ;;  %v3936_v43 = vmax.f32 %v3872_v26, 0.0  ;;  %v3617_v28 = vsub.f32 %v9923_v22, %v8744_v29  ;;  %v4606_v22 = vld [vmem:[#allocation3 + $0xb0] sm:$0xff] }
 0x53e   : > { %v3793_v30 = vmul.f32 %v8537_v21, %v3708_v10  ;;  %v3874_v15 = vadd.f32 %v8544_v11, %v3789_v2  ;;  %v3979_v55 = vpack.c.bf16 %v3943_v50, %v3939_v36  ;;  %v3715_v27 = vmul.f32 %v8880_v0, %v3619_v42 }
 0x53f   : > { %v3940_v32 = vmax.f32 %v3876_v62, 0.0  ;;  %v3796_v54 = vmul.f32 %v8547_v56, %v3711_v39  ;;  %v3621_v25 = vsub.f32 %v9924_v5, %v8792_v40  ;;  %v3713_v45 = vmul.f32 %v8874_v59, %v3617_v28 }
 0x540   : > { %v3878_v31 = vadd.f32 %v8544_v11, %v3793_v30  ;;  %v3938_v14 = vmax.f32 %v3874_v15, 0.0  ;;  %4585 = vmatprep.mubr.bf16.mxu0 %v3979_v55  ;;  %v3800_v60 = vmul.f32 %v8547_v56, %v3715_v27  ;;  %v3614_v24 = vsub.f32 %v9925_v9, %v8744_v29  ;;  %v9927_v56 = vld [vmem:[#allocation52_spill] sm:$0xff] }
 0x541   : > { %v3976_v13 = vpack.c.bf16 %v3940_v32, %v3936_v43  ;;  %v3881_v18 = vadd.f32 %v8550_v17, %v3796_v54  ;;  %v3717_v19 = vmul.f32 %v8880_v0, %v3621_v25  ;;  %v3798_v52 = vmul.f32 %v8553_v34, %v3713_v45  ;;  %v4607_v54 = vld [vmem:[#allocation3] sm:$0xff] }
 0x542   : > { %v3942_v63 = vmax.f32 %v3878_v31, 0.0  ;;  %v3618_v3 = vsub.f32 %v9926_v20, %v8792_v40  ;;  %v3885_v1 = vadd.f32 %v8550_v17, %v3800_v60  ;;  %v3710_v33 = vmul.f32 %v8874_v59, %v3614_v24  ;;  %v4609_v24 = vld [vmem:[#allocation3 + $0x18] sm:$0xff] }
 0x543   : > { %4473 = vmatmul.mubr.bf16.gmra.mxu1 %v3976_v13  ;;  %v3945_v61 = vmax.f32 %v3881_v18, 0.0  ;;  %v3616_v12 = vsub.f32 %v9927_v56, %v8744_v29  ;;  %v3802_v47 = vmul.f32 %v8553_v34, %v3717_v19  ;;  %v3883_v37 = vadd.f32 %v8556_v23, %v3798_v52  ;;  %v4608_v13 = vld [vmem:[#allocation3 + $0xd8] sm:$0xff] }
 0x544   : > { %v3978_v8 = vpack.c.bf16 %v3942_v63, %v3938_v14  ;;  %v3714_v38 = vmul.f32 %v8880_v0, %v3618_v3  ;;  %v3949_v41 = vmax.f32 %v3885_v1, 0.0  ;;  %v3795_v46 = vmul.f32 %v8559_v57, %v3710_v33 }
 0x545   : > { %v3620_v44 = vsub.f32 %v9928_v51, %v8792_v40  ;;  %v3712_v17 = vmul.f32 %v8874_v59, %v3616_v12  ;;  %v3887_v4 = vadd.f32 %v8556_v23, %v3802_v47  ;;  %v3947_v53 = vmax.f32 %v3883_v37, 0.0  ;;  %v4611_v47 = vld [vmem:[#allocation3 + $0x68] sm:$0xff] }
 0x546   : > { %4586 = vmatmul.mubr.bf16.gmra.mxu0 %v3978_v8  ;;  %v3799_v29 = vmul.f32 %v8559_v57, %v3714_v38  ;;  %v3981_v48 = vpack.c.bf16 %v3949_v41, %v3945_v61  ;;  %v3880_v34 = vadd.f32 %v8568_v16, %v3795_v46  ;;  %v4610_v61 = vld [vmem:[#allocation3 + $0x50] sm:$0xff] }
 0x547   : > { %v3716_v49 = vmul.f32 %v8880_v0, %v3620_v44  ;;  %v3797_v36 = vmul.f32 %v8537_v21, %v3712_v17  ;;  %v3951_v58 = vmax.f32 %v3887_v4, 0.0  ;;  %v4612_v44 = vld [vmem:[#allocation3 + $0x30] sm:$0xff] }
 0x548   : > { %v3884_v6 = vadd.f32 %v8568_v16, %v3799_v29  ;;  %4482 = vmatprep.mubr.bf16.mxu1 %v3981_v48  ;;  %v3944_v35 = vmax.f32 %v3880_v34, 0.0  ;;  %v4048_v16 = vld [vmem:[%s9929_s30] sm:$0x3] }
 0x549   : > { %v3801_v40 = vmul.f32 %v8537_v21, %v3716_v49  ;;  %v3882_v59 = vadd.f32 %v8544_v11, %v3797_v36  ;;  %v3983_v23 = vpack.c.bf16 %v3951_v58, %v3947_v53  ;;  %v9930_v21 = vld [vmem:[#allocation22_spill] sm:$0xff]  ;;  %v9020_v42 = vrot.slane %v4048_v16, %v9931_v7 }
 0x54a   : > { %v3948_v57 = vmax.f32 %v3884_v6, 0.0  ;;  %v9017_v62 = vrot.slane %v4048_v16, %v9930_v21  ;;  %v4613_v49 = vld [vmem:[#allocation3 + $0x48] sm:$0xff] }
 0x54b   : > { %v3886_v26 = vadd.f32 %v8544_v11, %v3801_v40  ;;  %4595 = vmatprep.mubr.bf16.mxu0 %v3983_v23  ;;  %v3946_v0 = vmax.f32 %v3882_v59, 0.0 }
 0x54c   : > { %v3980_v10 = vpack.c.bf16 %v3948_v57, %v3944_v35  ;;  %v4614_v35 = vld [vmem:[#allocation3 + $0x80] sm:$0xff] }
 0x54d   : > { %v3950_v2 = vmax.f32 %v3886_v26, 0.0 }
 0x54e   : > { %4483 = vmatmul.mubr.bf16.gmra.mxu1 %v3980_v10 }
 0x54f   : > { %v3982_v50 = vpack.c.bf16 %v3950_v2, %v3946_v0  ;;  %v4615_v2 = vld [vmem:[#allocation3 + $0x88] sm:$0xff] }
 0x551   : > { %4596 = vmatmul.mubr.bf16.gmra.mxu0 %v3982_v50 }
 0x5b1   : > { %v4414_v39 = vpop.f32.mrf.mxu1 }
 0x5b2   : > { %v4415_v11 = vadd.f32 %v4414_v39, %v9017_v62 }
 0x5b3   : > { %v4416_v43 = vpop.f32.mrf.mxu1 }
 0x5b4   : > { %v4417_v30 = vadd.f32 %v4416_v43, %v9020_v42  ;;  %v4527_v15 = vpop.f32.mrf.mxu0 }
 0x5b5   : > { %v4418_v28 = vpop.f32.mrf.mxu1  ;;  %v4528_v55 = vadd.f32 %v4527_v15, %v4415_v11  ;;  %v4616_v11 = vld [vmem:[#allocation3 + $0xe8] sm:$0xff] }
 0x5b6   : > { %v4419_v32 = vadd.f32 %v4418_v28, %v9017_v62  ;;  %v4529_v27 = vpop.f32.mrf.mxu0  ;;  %v4617_v28 = vld [vmem:[#allocation3 + $0xb8] sm:$0xff] }
 0x5b7   : > { %v4420_v31 = vpop.f32.mrf.mxu1  ;;  %v9025_v14 = vadd.f32 %v4606_v22, %v4528_v55  ;;  %v4530_v5 = vadd.f32 %v4529_v27, %v4417_v30 }
 0x5b8   : > { %v4421_v25 = vadd.f32 %v4420_v31, %v9020_v42  ;;  %v4531_v45 = vpop.f32.mrf.mxu0 }
 0x5b9   : > { %4670 = vst [vmem:[#allocation3 + $0xb0] sm:$0xff] %v9025_v14  ;;  %v9029_v60 = vadd.f32 %v4607_v54, %v4530_v5  ;;  %v4532_v18 = vadd.f32 %v4531_v45, %v4419_v32  ;;  %v4618_v45 = vld [vmem:[#allocation3 + $0x60] sm:$0xff] }
 0x5ba   : > { %v4533_v9 = vpop.f32.mrf.mxu0 }
 0x5bb   : > { %4671 = vst [vmem:[#allocation3] sm:$0xff] %v9029_v60  ;;  %v9032_v63 = vadd.f32 %v4608_v13, %v4532_v18  ;;  %v4534_v19 = vadd.f32 %v4533_v9, %v4421_v25 }
 0x5bd   : > { %4672 = vst [vmem:[#allocation3 + $0xd8] sm:$0xff] %v9032_v63  ;;  %v9035_v52 = vadd.f32 %v4609_v24, %v4534_v19  ;;  %v4619_v19 = vld [vmem:[#allocation3 + $0xf0] sm:$0xff] }
 0x5bf   : > { %4673 = vst [vmem:[#allocation3 + $0x18] sm:$0xff] %v9035_v52 }
 0x5c4   : > { %v4424_v20 = vpop.f32.mrf.mxu1 }
 0x5c5   : > { %v4425_v3 = vadd.f32 %v4424_v20, %v9017_v62 }
 0x5c6   : > { %v4426_v33 = vpop.f32.mrf.mxu1 }
 0x5c7   : > { %v4427_v12 = vadd.f32 %v4426_v33, %v9020_v42 }
 0x5c8   : > { %v4537_v1 = vpop.f32.mrf.mxu0  ;;  %v4428_v37 = vpop.f32.mrf.mxu1 }
 0x5c9   : > { %v4538_v56 = vadd.f32 %v4537_v1, %v4425_v3  ;;  %v4429_v46 = vadd.f32 %v4428_v37, %v9017_v62 }
 0x5ca   : > { %v4539_v8 = vpop.f32.mrf.mxu0  ;;  %v4430_v17 = vpop.f32.mrf.mxu1 }
 0x5cb   : > { %v9040_v38 = vadd.f32 %v4610_v61, %v4538_v56  ;;  %v4540_v41 = vadd.f32 %v4539_v8, %v4427_v12  ;;  %v4431_v48 = vadd.f32 %v4430_v17, %v9020_v42  ;;  %v4620_v56 = vld [vmem:[#allocation3 + $0x8] sm:$0xff] }
 0x5cc   : > { %v4541_v51 = vpop.f32.mrf.mxu0 }
 0x5cd   : > { %4674 = vst [vmem:[#allocation3 + $0x50] sm:$0xff] %v9040_v38  ;;  %v9044_v4 = vadd.f32 %v4611_v47, %v4540_v41  ;;  %v4542_v29 = vadd.f32 %v4541_v51, %v4429_v46  ;;  %v4621_v41 = vld [vmem:[#allocation3 + $0x78] sm:$0xff] }
 0x5ce   : > { %v4543_v34 = vpop.f32.mrf.mxu0 }
 0x5cf   : > { %4675 = vst [vmem:[#allocation3 + $0x68] sm:$0xff] %v9044_v4  ;;  %v9048_v36 = vadd.f32 %v4612_v44, %v4542_v29  ;;  %v4544_v53 = vadd.f32 %v4543_v34, %v4431_v48 }
 0x5d1   : > { %4676 = vst [vmem:[#allocation3 + $0x30] sm:$0xff] %v9048_v36  ;;  %v9051_v58 = vadd.f32 %v4613_v49, %v4544_v53  ;;  %v4622_v49 = vld [vmem:[#allocation3 + $0x38] sm:$0xff] }
 0x5d3   : > { %v4434_v6 = vpop.f32.mrf.mxu1  ;;  %4677 = vst [vmem:[#allocation3 + $0x48] sm:$0xff] %v9051_v58 }
 0x5d4   : > { %v4435_v40 = vadd.f32 %v4434_v6, %v9017_v62 }
 0x5d5   : > { %v4436_v59 = vpop.f32.mrf.mxu1 }
 0x5d6   : > { %v4547_v23 = vpop.f32.mrf.mxu0  ;;  %v4437_v57 = vadd.f32 %v4436_v59, %v9020_v42 }
 0x5d7   : > { %v4548_v26 = vadd.f32 %v4547_v23, %v4435_v40  ;;  %v4438_v10 = vpop.f32.mrf.mxu1  ;;  %v4623_v23 = vld [vmem:[#allocation3 + $0x58] sm:$0xff] }
 0x5d8   : > { %v4549_v0 = vpop.f32.mrf.mxu0  ;;  %v4439_v50 = vadd.f32 %v4438_v10, %v9017_v62 }
 0x5d9   : > { %v9057_v16 = vadd.f32 %v4614_v35, %v4548_v26  ;;  %v4550_v21 = vadd.f32 %v4549_v0, %v4437_v57  ;;  %v4440_v7 = vpop.f32.mrf.mxu1 }
 0x5da   : > { %v4551_v39 = vpop.f32.mrf.mxu0  ;;  %v4441_v43 = vadd.f32 %v4440_v7, %v9020_v42 }
 0x5db   : > { %4678 = vst [vmem:[#allocation3 + $0x80] sm:$0xff] %v9057_v16  ;;  %v9061_v30 = vadd.f32 %v4615_v2, %v4550_v21  ;;  %v4552_v15 = vadd.f32 %v4551_v39, %v4439_v50  ;;  %v4624_v2 = vld [vmem:[#allocation3 + $0x40] sm:$0xff] }
 0x5dc   : > { %v4553_v22 = vpop.f32.mrf.mxu0 }
 0x5dd   : > { %4679 = vst [vmem:[#allocation3 + $0x88] sm:$0xff] %v9061_v30  ;;  %v9064_v55 = vadd.f32 %v4616_v11, %v4552_v15  ;;  %v4554_v32 = vadd.f32 %v4553_v22, %v4441_v43  ;;  %v4625_v11 = vld [vmem:[#allocation3 + $0xc8] sm:$0xff] }
 0x5df   : > { %4680 = vst [vmem:[#allocation3 + $0xe8] sm:$0xff] %v9064_v55  ;;  %v9067_v27 = vadd.f32 %v4617_v28, %v4554_v32 }
 0x5e1   : > { %4681 = vst [vmem:[#allocation3 + $0xb8] sm:$0xff] %v9067_v27  ;;  %v4444_v54 = vpop.f32.mrf.mxu1 }
 0x5e2   : > { %v4445_v31 = vadd.f32 %v4444_v54, %v9017_v62 }
 0x5e3   : > { %v4446_v5 = vpop.f32.mrf.mxu1 }
 0x5e4   : > { %v4447_v13 = vadd.f32 %v4446_v5, %v9020_v42  ;;  %v4626_v5 = vld [vmem:[#allocation3 + $0xe0] sm:$0xff] }
 0x5e5   : > { %v4557_v25 = vpop.f32.mrf.mxu0  ;;  %v4448_v9 = vpop.f32.mrf.mxu1 }
 0x5e6   : > { %v4558_v18 = vadd.f32 %v4557_v25, %v4445_v31  ;;  %v4449_v20 = vadd.f32 %v4448_v9, %v9017_v62  ;;  %v4627_v9 = vld [vmem:[#allocation3 + $0x90] sm:$0xff] }
 0x5e7   : > { %v4559_v24 = vpop.f32.mrf.mxu0  ;;  %v4450_v61 = vpop.f32.mrf.mxu1 }
 0x5e8   : > { %v9073_v3 = vadd.f32 %v4618_v45, %v4558_v18  ;;  %v4560_v1 = vadd.f32 %v4559_v24, %v4447_v13  ;;  %v4451_v12 = vadd.f32 %v4450_v61, %v9020_v42 }
 0x5e9   : > { %v4561_v33 = vpop.f32.mrf.mxu0 }
 0x5ea   : > { %4682 = vst [vmem:[#allocation3 + $0x60] sm:$0xff] %v9073_v3  ;;  %v9077_v8 = vadd.f32 %v4619_v19, %v4560_v1  ;;  %v4562_v47 = vadd.f32 %v4561_v33, %v4449_v20  ;;  %v4628_v33 = vld [vmem:[#allocation3 + $0x70] sm:$0xff] }
 0x5eb   : > { %v4563_v37 = vpop.f32.mrf.mxu0 }
 0x5ec   : > { %4683 = vst [vmem:[#allocation3 + $0xf0] sm:$0xff] %v9077_v8  ;;  %v9080_v46 = vadd.f32 %v4620_v56, %v4562_v47  ;;  %v4564_v51 = vadd.f32 %v4563_v37, %v4451_v12 }
 0x5ed   : > { %v4454_v44 = vpop.f32.mrf.mxu1 }
 0x5ee   : > { %4684 = vst [vmem:[#allocation3 + $0x8] sm:$0xff] %v9080_v46  ;;  %v9083_v17 = vadd.f32 %v4621_v41, %v4564_v51  ;;  %v4455_v29 = vadd.f32 %v4454_v44, %v9017_v62  ;;  %v4629_v41 = vld [vmem:[#allocation3 + $0xc0] sm:$0xff] }
 0x5ef   : > { %v4456_v48 = vpop.f32.mrf.mxu1 }
 0x5f0   : > { %4685 = vst [vmem:[#allocation3 + $0x78] sm:$0xff] %v9083_v17  ;;  %v4567_v34 = vpop.f32.mrf.mxu0  ;;  %v4457_v53 = vadd.f32 %v4456_v48, %v9020_v42 }
 0x5f1   : > { %v4568_v6 = vadd.f32 %v4567_v34, %v4455_v29  ;;  %v4458_v40 = vpop.f32.mrf.mxu1 }
 0x5f2   : > { %v4569_v59 = vpop.f32.mrf.mxu0  ;;  %v4459_v35 = vadd.f32 %v4458_v40, %v9017_v62 }
 0x5f3   : > { %v9089_v57 = vadd.f32 %v4622_v49, %v4568_v6  ;;  %v4570_v26 = vadd.f32 %v4569_v59, %v4457_v53  ;;  %v4460_v10 = vpop.f32.mrf.mxu1  ;;  %v4630_v6 = vld [vmem:[#allocation3 + $0xa8] sm:$0xff] }
 0x5f4   : > { %v4571_v0 = vpop.f32.mrf.mxu0  ;;  %v4461_v50 = vadd.f32 %v4460_v10, %v9020_v42 }
 0x5f5   : > { %4686 = vst [vmem:[#allocation3 + $0x38] sm:$0xff] %v9089_v57  ;;  %v9093_v21 = vadd.f32 %v4623_v23, %v4570_v26  ;;  %v4572_v7 = vadd.f32 %v4571_v0, %v4459_v35  ;;  %v4631_v26 = vld [vmem:[#allocation3 + $0xd0] sm:$0xff] }
 0x5f6   : > { %v4573_v39 = vpop.f32.mrf.mxu0 }
 0x5f7   : > { %4687 = vst [vmem:[#allocation3 + $0x58] sm:$0xff] %v9093_v21  ;;  %v9096_v43 = vadd.f32 %v4624_v2, %v4572_v7  ;;  %v4574_v15 = vadd.f32 %v4573_v39, %v4461_v50  ;;  %v4632_v39 = vld [vmem:[#allocation3 + $0x10] sm:$0xff] }
 0x5f8   : > { %v4464_v22 = vpop.f32.mrf.mxu1 }
 0x5f9   : > { %4688 = vst [vmem:[#allocation3 + $0x40] sm:$0xff] %v9096_v43  ;;  %v9099_v28 = vadd.f32 %v4625_v11, %v4574_v15  ;;  %v4465_v32 = vadd.f32 %v4464_v22, %v9017_v62 }
 0x5fa   : > { %v4466_v54 = vpop.f32.mrf.mxu1 }
 0x5fb   : > { %4689 = vst [vmem:[#allocation3 + $0xc8] sm:$0xff] %v9099_v28  ;;  %v4577_v31 = vpop.f32.mrf.mxu0  ;;  %v4467_v25 = vadd.f32 %v4466_v54, %v9020_v42  ;;  %v4633_v54 = vld [vmem:[#allocation3 + $0x28] sm:$0xff] }
 0x5fc   : > { %v4578_v45 = vadd.f32 %v4577_v31, %v4465_v32  ;;  %v4468_v13 = vpop.f32.mrf.mxu1 }
 0x5fd   : > { %v4579_v18 = vpop.f32.mrf.mxu0  ;;  %v4469_v24 = vadd.f32 %v4468_v13, %v9017_v62 }
 0x5fe   : > { %v9105_v19 = vadd.f32 %v4626_v5, %v4578_v45  ;;  %v4580_v20 = vadd.f32 %v4579_v18, %v4467_v25  ;;  %v4470_v1 = vpop.f32.mrf.mxu1 }
 0x5ff   : > { %v4581_v61 = vpop.f32.mrf.mxu0  ;;  %v4471_v56 = vadd.f32 %v4470_v1, %v9020_v42 }
 0x600   : > { %4690 = vst [vmem:[#allocation3 + $0xe0] sm:$0xff] %v9105_v19  ;;  %v9109_v12 = vadd.f32 %v4627_v9, %v4580_v20  ;;  %v4582_v47 = vadd.f32 %v4581_v61, %v4469_v24  ;;  %v4634_v24 = vld [vmem:[#allocation3 + $0xa0] sm:$0xff] }
 0x601   : > { %v4583_v37 = vpop.f32.mrf.mxu0 }
 0x602   : > { %4691 = vst [vmem:[#allocation3 + $0x90] sm:$0xff] %v9109_v12  ;;  %v9112_v51 = vadd.f32 %v4628_v33, %v4582_v47  ;;  %v4584_v44 = vadd.f32 %v4583_v37, %v4471_v56  ;;  %v4635_v56 = vld [vmem:[#allocation3 + $0xf8] sm:$0xff] }
 0x603   : > { %v4474_v29 = vpop.f32.mrf.mxu1 }
 0x604   : > { %4692 = vst [vmem:[#allocation3 + $0x70] sm:$0xff] %v9112_v51  ;;  %v9115_v48 = vadd.f32 %v4629_v41, %v4584_v44  ;;  %v4475_v34 = vadd.f32 %v4474_v29, %v9017_v62 }
 0x605   : > { %v4476_v49 = vpop.f32.mrf.mxu1 }
 0x606   : > { %4693 = vst [vmem:[#allocation3 + $0xc0] sm:$0xff] %v9115_v48  ;;  %v4587_v53 = vpop.f32.mrf.mxu0  ;;  %v4477_v40 = vadd.f32 %v4476_v49, %v9020_v42 }
 0x607   : > { %v4588_v59 = vadd.f32 %v4587_v53, %v4475_v34  ;;  %v4478_v23 = vpop.f32.mrf.mxu1  ;;  %v4636_v34 = vld [vmem:[#allocation3 + $0x20] sm:$0xff] }
 0x608   : > { %v4589_v35 = vpop.f32.mrf.mxu0  ;;  %v4479_v10 = vadd.f32 %v4478_v23, %v9017_v62 }
 0x609   : > { %v9121_v0 = vadd.f32 %v4630_v6, %v4588_v59  ;;  %v4590_v2 = vadd.f32 %v4589_v35, %v4477_v40  ;;  %v4480_v50 = vpop.f32.mrf.mxu1  ;;  %v4637_v59 = vld [vmem:[#allocation3 + $0x98] sm:$0xff] }
 0x60a   : > { %v4591_v7 = vpop.f32.mrf.mxu0  ;;  %v4481_v11 = vadd.f32 %v4480_v50, %v9020_v42 }
 0x60b   : > { %4694 = vst [vmem:[#allocation3 + $0xa8] sm:$0xff] %v9121_v0  ;;  %v9125_v15 = vadd.f32 %v4631_v26, %v4590_v2  ;;  %v4592_v22 = vadd.f32 %v4591_v7, %v4479_v10 }
 0x60c   : > { %v4593_v32 = vpop.f32.mrf.mxu0 }
 0x60d   : > { %4695 = vst [vmem:[#allocation3 + $0xd0] sm:$0xff] %v9125_v15  ;;  %v9128_v31 = vadd.f32 %v4632_v39, %v4592_v22  ;;  %v4594_v5 = vadd.f32 %v4593_v32, %v4481_v11 }
 0x60e   : > { %v4484_v25 = vpop.f32.mrf.mxu1 }
 0x60f   : > { %4696 = vst [vmem:[#allocation3 + $0x10] sm:$0xff] %v9128_v31  ;;  %v9131_v45 = vadd.f32 %v4633_v54, %v4594_v5  ;;  %v4485_v13 = vadd.f32 %v4484_v25, %v9017_v62 }
 0x610   : > { %v4486_v18 = vpop.f32.mrf.mxu1 }
 0x611   : > { %4697 = vst [vmem:[#allocation3 + $0x28] sm:$0xff] %v9131_v45  ;;  %v4597_v9 = vpop.f32.mrf.mxu0  ;;  %v4487_v20 = vadd.f32 %v4486_v18, %v9020_v42 }
 0x612   : > { %v4598_v1 = vadd.f32 %v4597_v9, %v4485_v13  ;;  %v4488_v61 = vpop.f32.mrf.mxu1 }
 0x613   : > { %v4599_v33 = vpop.f32.mrf.mxu0  ;;  %v4489_v47 = vadd.f32 %v4488_v61, %v9017_v62 }
 0x614   : > { %v9137_v37 = vadd.f32 %v4634_v24, %v4598_v1  ;;  %v4600_v41 = vadd.f32 %v4599_v33, %v4487_v20  ;;  %v4490_v44 = vpop.f32.mrf.mxu1 }
 0x615   : > { %v4601_v29 = vpop.f32.mrf.mxu0  ;;  %v4491_v49 = vadd.f32 %v4490_v44, %v9020_v42 }
 0x616   : > { %4698 = vst [vmem:[#allocation3 + $0xa0] sm:$0xff] %v9137_v37  ;;  %v9141_v53 = vadd.f32 %v4635_v56, %v4600_v41  ;;  %v4602_v6 = vadd.f32 %v4601_v29, %v4489_v47 }
 0x617   : > { %v4603_v40 = vpop.f32.mrf.mxu0 }
 0x618   : > { %4699 = vst [vmem:[#allocation3 + $0xf8] sm:$0xff] %v9141_v53  ;;  %v9144_v23 = vadd.f32 %v4636_v34, %v4602_v6  ;;  %v4604_v62 = vadd.f32 %v4603_v40, %v4491_v49  ;;  %4705 = sbr.rel (%p5844_p6) target bundleno = 2201 (0x899), region = 138 }
 0x61a   : > { %4700 = vst [vmem:[#allocation3 + $0x20] sm:$0xff] %v9144_v23  ;;  %v9147_v35 = vadd.f32 %v4637_v59, %v4604_v62 }
 0x61c   : > { %4701 = vst [vmem:[#allocation3 + $0x98] sm:$0xff] %v9147_v35 }
 0x61d   : > { %v4711_v42 = vadd.f32 %v9035_v52, %v9032_v63  ;;  %v4708_v26 = vadd.f32 %v9029_v60, %v9025_v14  ;;  %v4775_v10 = vmul.f32 %v9032_v63, %v9032_v63  ;;  %v4776_v2 = vmul.f32 %v9035_v52, %v9035_v52  ;;  %v5162_v47 = vld [vmem:[%s9713_s15 + $0xf8] sm:$0xff]  ;;  %v5161_v29 = vld [vmem:[%s9713_s15 + $0xf0] sm:$0xff]  ;;  %v5160_v59 = vld [vmem:[%s9713_s15 + $0xe8] sm:$0xff] }
 0x61e   : > { %v4773_v50 = vmul.f32 %v9025_v14, %v9025_v14  ;;  %v4774_v7 = vmul.f32 %v9029_v60, %v9029_v60  ;;  %v4777_v11 = vmul.f32 %v9040_v38, %v9040_v38  ;;  %v4778_v22 = vmul.f32 %v9044_v4, %v9044_v4  ;;  %5852 = vmatprep.subr.mxu0 %v5162_v47  ;;  %v5146_v41 = vld [vmem:[%s9713_s15 + $0x78] sm:$0xff]  ;;  %v5145_v40 = vld [vmem:[%s9713_s15 + $0x70] sm:$0xff]  ;;  %v5144_v62 = vld [vmem:[%s9713_s15 + $0x68] sm:$0xff] }
 0x61f   : > { %4712 = vadd.xlane.f32.xlu1 %v4711_v42  ;;  %4709 = vadd.xlane.f32.xlu0 %v4708_v26  ;;  %v4808_v39 = vadd.f32 %v4776_v2, %v4775_v10  ;;  %v4714_v54 = vadd.f32 %v9044_v4, %v9040_v38  ;;  %v4779_v25 = vmul.f32 %v9048_v36, %v9048_v36  ;;  %v5159_v26 = vld [vmem:[%s9713_s15 + $0xe0] sm:$0xff]  ;;  %vm5499_vm2 = vcmask 7168  }
 0x620   : > { %v4805_v32 = vadd.f32 %v4774_v7, %v4773_v50  ;;  %v4811_v5 = vadd.f32 %v4778_v22, %v4777_v11  ;;  %v4780_v13 = vmul.f32 %v9051_v58, %v9051_v58  ;;  %v4717_v18 = vadd.f32 %v9051_v58, %v9048_v36  ;;  %5853 = vmatpush3.msra.mxu0 %v5146_v41  ;;  %v5143_v7 = vld [vmem:[%s9713_s15 + $0x60] sm:$0xff]  ;;  %v5142_v22 = vld [vmem:[%s9713_s15 + $0x58] sm:$0xff] }
 0x621   : > { %v4781_v24 = vmul.f32 %v9057_v16, %v9057_v16  ;;  %v4782_v20 = vmul.f32 %v9061_v30, %v9061_v30  ;;  %v4720_v1 = vadd.f32 %v9061_v30, %v9057_v16  ;;  %v4783_v33 = vmul.f32 %v9064_v55, %v9064_v55  ;;  %5854 = vmatprep.subr.mxu0 %v5161_v29  ;;  %v5139_v47 = vld [vmem:[%s9713_s15 + $0x40] sm:$0xff] }
 0x622   : > { %v4814_v9 = vadd.f32 %v4780_v13, %v4779_v25  ;;  %v4784_v56 = vmul.f32 %v9067_v27, %v9067_v27  ;;  %v4723_v44 = vadd.f32 %v9067_v27, %v9064_v55  ;;  %v4785_v49 = vmul.f32 %v9073_v3, %v9073_v3  ;;  %5855 = vmatpush3.msra.mxu0 %v5145_v40  ;;  %v5157_v25 = vld [vmem:[%s9713_s15 + $0xd0] sm:$0xff] }
 0x623   : > { %4809 = vadd.xlane.f32.xlu1 %v4808_v39  ;;  %4806 = vadd.xlane.f32.xlu0 %v4805_v32  ;;  %v4817_v61 = vadd.f32 %v4782_v20, %v4781_v24  ;;  %v4786_v6 = vmul.f32 %v9077_v8, %v9077_v8  ;;  %v4726_v42 = vadd.f32 %v9077_v8, %v9073_v3  ;;  %v5158_v39 = vld [vmem:[%s9713_s15 + $0xd8] sm:$0xff]  ;;  %v5141_v13 = vld [vmem:[%s9713_s15 + $0x50] sm:$0xff] }
 0x624   : > { %v4820_v34 = vadd.f32 %v4784_v56, %v4783_v33  ;;  %5856 = vmatprep.subr.mxu0 %v5160_v59  ;;  %v4787_v2 = vmul.f32 %v9080_v46, %v9080_v46  ;;  %v4788_v50 = vmul.f32 %v9083_v17, %v9083_v17  ;;  %v4729_v11 = vadd.f32 %v9083_v17, %v9080_v46  ;;  %v5155_v33 = vld [vmem:[%s9713_s15 + $0xc0] sm:$0xff]  ;;  %v5153_v40 = vld [vmem:[%s9713_s15 + $0xb0] sm:$0xff] }
 0x625   : > { %v4823_v10 = vadd.f32 %v4786_v6, %v4785_v49  ;;  %5857 = vmatpush3.msra.mxu0 %v5144_v62  ;;  %v4791_v20 = vmul.f32 %v9096_v43, %v9096_v43  ;;  %v4735_v56 = vadd.f32 %v9099_v28, %v9096_v43  ;;  %v4794_v29 = vmul.f32 %v9109_v12, %v9109_v12  ;;  %v5138_v49 = vld [vmem:[%s9713_s15 + $0x38] sm:$0xff] }
 0x626   : > { %5858 = vmatprep.subr.mxu0 %v5159_v26  ;;  %v4826_v32 = vadd.f32 %v4788_v50, %v4787_v2  ;;  %v4738_v6 = vadd.f32 %v9109_v12, %v9105_v19  ;;  %v4795_v62 = vmul.f32 %v9112_v51, %v9112_v51  ;;  %v5137_v26 = vld [vmem:[%s9713_s15 + $0x30] sm:$0xff]  ;;  %v4741_v2 = vadd.f32 %v9115_v48, %v9112_v51  ;;  %v5136_v50 = vld [vmem:[%s9713_s15 + $0x28] sm:$0xff] }
 0x627   : > { %4715 = vadd.xlane.f32.xlu0 %v4714_v54  ;;  %4812 = vadd.xlane.f32.xlu1 %v4811_v5  ;;  %v4789_v54 = vmul.f32 %v9089_v57, %v9089_v57  ;;  %v4790_v5 = vmul.f32 %v9093_v21, %v9093_v21 }
 0x628   : > { %5859 = vmatpush3.msra.mxu0 %v5143_v7 }
 0x629   : > { %5860 = vmatprep.subr.mxu0 %v5158_v39  ;;  %v4829_v24 = vadd.f32 %v4790_v5, %v4789_v54  ;;  %v4797_v39 = vmul.f32 %v9121_v0, %v9121_v0  ;;  %v4744_v54 = vadd.f32 %v9125_v15, %v9121_v0  ;;  %v5150_v5 = vld [vmem:[%s9713_s15 + $0x98] sm:$0xff] }
 0x62a   : > { %5861 = vmatpush3.msra.mxu0 %v5142_v22  ;;  %v5151_v22 = vld [vmem:[%s9713_s15 + $0xa0] sm:$0xff] }
 0x62b   : > { %4718 = vadd.xlane.f32.xlu0 %v4717_v18  ;;  %4815 = vadd.xlane.f32.xlu1 %v4814_v9  ;;  %v4732_v18 = vadd.f32 %v9093_v21, %v9089_v57  ;;  %v5156_v9 = vld [vmem:[%s9713_s15 + $0xc8] sm:$0xff] }
 0x62c   : > { %5862 = vmatprep.subr.mxu0 %v5157_v25 }
 0x62d   : > { %5863 = vmatpush3.msra.mxu0 %v5141_v13  ;;  %v4799_v13 = vmul.f32 %v9128_v31, %v9128_v31 }
 0x62e   : > { %5864 = vmatprep.subr.mxu0 %v5156_v9  ;;  %v5134_v9 = vld [vmem:[%s9713_s15 + $0x18] sm:$0xff] }
 0x62f   : > { %4721 = vadd.xlane.f32.xlu0 %v4720_v1  ;;  %4818 = vadd.xlane.f32.xlu1 %v4817_v61  ;;  %v4792_v1 = vmul.f32 %v9099_v28, %v9099_v28  ;;  %v5140_v61 = vld [vmem:[%s9713_s15 + $0x48] sm:$0xff] }
 0x630   : > { %5865 = vmatpush3.msra.mxu0 %v5140_v61 }
 0x631   : > { %v4832_v41 = vadd.f32 %v4792_v1, %v4791_v20  ;;  %5866 = vmatprep.subr.mxu0 %v5155_v33  ;;  %v4747_v20 = vadd.f32 %v9131_v45, %v9128_v31  ;;  %v5133_v1 = vld [vmem:[%s9713_s15 + $0x10] sm:$0xff]  ;;  %v4801_v33 = vmul.f32 %v9137_v37, %v9137_v37 }
 0x632   : > { %5867 = vmatpush3.msra.mxu0 %v5139_v47  ;;  %v5148_v47 = vld [vmem:[%s9713_s15 + $0x88] sm:$0xff] }
 0x633   : > { %4724 = vadd.xlane.f32.xlu0 %v4723_v44  ;;  %4821 = vadd.xlane.f32.xlu1 %v4820_v34  ;;  %v4793_v44 = vmul.f32 %v9105_v19, %v9105_v19  ;;  %v5154_v34 = vld [vmem:[%s9713_s15 + $0xb8] sm:$0xff] }
 0x634   : > { %5868 = vmatprep.subr.mxu0 %v5154_v34 }
 0x635   : > { %v4835_v59 = vadd.f32 %v4794_v29, %v4793_v44  ;;  %5869 = vmatpush3.msra.mxu0 %v5138_v49  ;;  %v4750_v44 = vadd.f32 %v9141_v53, %v9137_v37  ;;  %v5147_v29 = vld [vmem:[%s9713_s15 + $0x80] sm:$0xff]  ;;  %v4803_v49 = vmul.f32 %v9144_v23, %v9144_v23 }
 0x636   : > { %5870 = vmatprep.subr.mxu0 %v5153_v40  ;;  %v5131_v40 = vld [vmem:[%s9713_s15] sm:$0xff] }
 0x637   : > { %4727 = vadd.xlane.f32.xlu0 %v4726_v42  ;;  %4824 = vadd.xlane.f32.xlu1 %v4823_v10  ;;  %v4796_v42 = vmul.f32 %v9115_v48, %v9115_v48  ;;  %v5152_v10 = vld [vmem:[%s9713_s15 + $0xa8] sm:$0xff] }
 0x638   : > { %5871 = vmatpush3.msra.mxu0 %v5137_v26  ;;  %v5345_v26 = vld [vmem:[%s9715_s17 + $0x70] sm:$0xff] }
 0x639   : > { %v4838_v7 = vadd.f32 %v4796_v42, %v4795_v62  ;;  %5872 = vmatprep.subr.mxu0 %v5152_v10  ;;  %v5346_v42 = vld [vmem:[%s9715_s17 + $0x78] sm:$0xff]  ;;  %v5344_v10 = vld [vmem:[%s9715_s17 + $0x68] sm:$0xff] }
 0x63a   : > { %5873 = vmatpush3.msra.mxu0 %v5136_v50  ;;  %5964 = vmatprep.subr.mxu1 %v5346_v42  ;;  %v5342_v50 = vld [vmem:[%s9715_s17 + $0x58] sm:$0xff] }
 0x63b   : > { %4730 = vadd.xlane.f32.xlu0 %v4729_v11  ;;  %4827 = vadd.xlane.f32.xlu1 %v4826_v32  ;;  %v4798_v11 = vmul.f32 %v9125_v15, %v9125_v15  ;;  %v5135_v32 = vld [vmem:[%s9713_s15 + $0x20] sm:$0xff] }
 0x63c   : > { %5874 = vmatprep.subr.mxu0 %v5151_v22  ;;  %5965 = vmatpush3.msra.mxu1 %v5346_v42  ;;  %v5338_v22 = vld [vmem:[%s9715_s17 + $0x38] sm:$0xff] }
 0x63d   : > { %v4841_v25 = vadd.f32 %v4798_v11, %v4797_v39  ;;  %5875 = vmatpush3.msra.mxu0 %v5135_v32  ;;  %5966 = vmatprep.subr.mxu1 %v5345_v26  ;;  %v5340_v39 = vld [vmem:[%s9715_s17 + $0x48] sm:$0xff]  ;;  %v5339_v11 = vld [vmem:[%s9715_s17 + $0x40] sm:$0xff]  ;;  %v5337_v32 = vld [vmem:[%s9715_s17 + $0x30] sm:$0xff] }
 0x63e   : > { %5876 = vmatprep.subr.mxu0 %v5150_v5  ;;  %5967 = vmatpush3.msra.mxu1 %v5345_v26 }
 0x63f   : > { %4733 = vadd.xlane.f32.xlu0 %v4732_v18  ;;  %4830 = vadd.xlane.f32.xlu1 %v4829_v24  ;;  %v4800_v18 = vmul.f32 %v9131_v45, %v9131_v45  ;;  %v5149_v24 = vld [vmem:[%s9713_s15 + $0x90] sm:$0xff] }
 0x640   : > { %5877 = vmatpush3.msra.mxu0 %v5134_v9  ;;  %5968 = vmatprep.subr.mxu1 %v5344_v10 }
 0x641   : > { %v4844_v61 = vadd.f32 %v4800_v18, %v4799_v13  ;;  %5878 = vmatprep.subr.mxu0 %v5149_v24  ;;  %5969 = vmatpush3.msra.mxu1 %v5344_v10 }
 0x642   : > { %5879 = vmatpush3.msra.mxu0 %v5133_v1 }
 0x643   : > { %4736 = vadd.xlane.f32.xlu0 %v4735_v56  ;;  %4833 = vadd.xlane.f32.xlu1 %v4832_v41  ;;  %v4802_v56 = vmul.f32 %v9141_v53, %v9141_v53  ;;  %v5132_v41 = vld [vmem:[%s9713_s15 + $0x8] sm:$0xff] }
 0x644   : > { %5880 = vmatprep.subr.mxu0 %v5148_v47 }
 0x645   : > { %v4847_v34 = vadd.f32 %v4802_v56, %v4801_v33  ;;  %5881 = vmatpush3.msra.mxu0 %v5132_v41 }
 0x646   : > { %5882 = vmatprep.subr.mxu0 %v5147_v29 }
 0x647   : > { %4739 = vadd.xlane.f32.xlu0 %v4738_v6  ;;  %4836 = vadd.xlane.f32.xlu1 %v4835_v59  ;;  %v4804_v6 = vmul.f32 %v9147_v35, %v9147_v35  ;;  %v4753_v59 = vadd.f32 %v9147_v35, %v9144_v23 }
 0x648   : > { %5883 = vmatpush3.msra.mxu0 %v5131_v40 }
 0x649   : > { %v4850_v62 = vadd.f32 %v4804_v6, %v4803_v49 }
 0x64b   : > { %4742 = vadd.xlane.f32.xlu0 %v4741_v2  ;;  %4839 = vadd.xlane.f32.xlu1 %v4838_v7  ;;  %v5343_v2 = vld [vmem:[%s9715_s17 + $0x60] sm:$0xff]  ;;  %v5341_v7 = vld [vmem:[%s9715_s17 + $0x50] sm:$0xff] }
 0x64c   : > { %5970 = vmatprep.subr.mxu1 %v5343_v2 }
 0x64d   : > { %5971 = vmatpush3.msra.mxu1 %v5343_v2 }
 0x64e   : > { %5972 = vmatprep.subr.mxu1 %v5342_v50 }
 0x64f   : > { %4745 = vadd.xlane.f32.xlu0 %v4744_v54  ;;  %4842 = vadd.xlane.f32.xlu1 %v4841_v25 }
 0x650   : > { %5973 = vmatpush3.msra.mxu1 %v5342_v50 }
 0x651   : > { %5974 = vmatprep.subr.mxu1 %v5341_v7 }
 0x652   : > { %5975 = vmatpush3.msra.mxu1 %v5341_v7 }
 0x653   : > { %4748 = vadd.xlane.f32.xlu0 %v4747_v20  ;;  %4845 = vadd.xlane.f32.xlu1 %v4844_v61 }
 0x654   : > { %5976 = vmatprep.subr.mxu1 %v5340_v39 }
 0x655   : > { %5977 = vmatpush3.msra.mxu1 %v5340_v39 }
 0x656   : > { %5978 = vmatprep.subr.mxu1 %v5339_v11 }
 0x657   : > { %4751 = vadd.xlane.f32.xlu0 %v4750_v44  ;;  %4848 = vadd.xlane.f32.xlu1 %v4847_v34 }
 0x658   : > { %5979 = vmatpush3.msra.mxu1 %v5339_v11 }
 0x659   : > { %5980 = vmatprep.subr.mxu1 %v5338_v22 }
 0x65a   : > { %5981 = vmatpush3.msra.mxu1 %v5338_v22 }
 0x65b   : > { %4754 = vadd.xlane.f32.xlu0 %v4753_v59  ;;  %4851 = vadd.xlane.f32.xlu1 %v4850_v62 }
 0x65c   : > { %5982 = vmatprep.subr.mxu1 %v5337_v32 }
 0x65d   : > { %5983 = vmatpush3.msra.mxu1 %v5337_v32 }
 0x6a8   : > { %v4713_v54 = vpop.xlane.xlu1 %4712  ;;  %v4710_v5 = vpop.xlane.xlu0 %4709 }
 0x6a9   : > { %v9373_v25 = vmul.f32 0.00390625, %v4713_v54  ;;  %v9375_v13 = vmul.f32 0.00390625, %v4710_v5 }
 0x6ab   : > { %v4870_v18 = vmul.f32 %v9373_v25, %v9373_v25  ;;  %v4869_v1 = vmul.f32 %v9375_v13, %v9375_v13 }
 0x6ac   : > { %v4810_v9 = vpop.xlane.xlu1 %4809  ;;  %v4807_v24 = vpop.xlane.xlu0 %4806 }
 0x6ad   : > { %v4854_v20 = vmul.f32 0.00390625, %v4810_v9  ;;  %v4853_v61 = vmul.f32 0.00390625, %v4807_v24 }
 0x6af   : > { %v4886_v33 = vsub.f32 %v4854_v20, %v4870_v18  ;;  %v4885_v56 = vsub.f32 %v4853_v61, %v4869_v1  ;;  %v4706_v1 = vld [vmem:[%s9711_s13] sm:$0x3] }
 0x6b0   : > { %v4716_v47 = vpop.xlane.xlu0 %4715  ;;  %v4813_v41 = vpop.xlane.xlu1 %4812 }
 0x6b1   : > { %v4902_v44 = vmax.f32 %v4886_v33, 0.0  ;;  %v4901_v29 = vmax.f32 %v4885_v56, 0.0  ;;  %v9381_v34 = vmul.f32 0.00390625, %v4716_v47  ;;  %v4855_v49 = vmul.f32 0.00390625, %v4813_v41  ;;  %v4707_v47 = vld [vmem:[%s9712_s14] sm:$0x3] }
 0x6b3   : > { %v4950_v6 = vadd.f32 1e-05, %v4902_v44  ;;  %v4949_v40 = vadd.f32 1e-05, %v4901_v29  ;;  %v4871_v59 = vmul.f32 %v9381_v34, %v9381_v34  ;;  %v9932_v29 = vld [vmem:[#allocation22_spill] sm:$0xff] }
 0x6b4   : > { %v4719_v62 = vpop.xlane.xlu0 %4718  ;;  %v4816_v42 = vpop.xlane.xlu1 %4815 }
 0x6b5   : > { %6510 = vrsqrt.f32 %v4950_v6  ;;  %v9385_v26 = vmul.f32 0.00390625, %v4719_v62  ;;  %v4856_v10 = vmul.f32 0.00390625, %v4816_v42  ;;  %v4887_v2 = vsub.f32 %v4855_v49, %v4871_v59  ;;  %v9933_v62 = vld [vmem:[#allocation23_spill] sm:$0xff] }
 0x6b6   : > { %6512 = vrsqrt.f32 %v4949_v40  ;;  %v9402_v49 = vrot.slane %v4706_v1, %v9932_v29  ;;  %v9407_v42 = vrot.slane %v4706_v1, %v9933_v62 }
 0x6b7   : > { %v4872_v50 = vmul.f32 %v9385_v26, %v9385_v26  ;;  %v4903_v7 = vmax.f32 %v4887_v2, 0.0  ;;  %v9413_v2 = vrot.slane %v4707_v47, %v9933_v62 }
 0x6b8   : > { %v4722_v39 = vpop.xlane.xlu0 %4721  ;;  %v4819_v11 = vpop.xlane.xlu1 %4818 }
 0x6b9   : > { %v4888_v22 = vsub.f32 %v4856_v10, %v4872_v50  ;;  %v9389_v32 = vmul.f32 0.00390625, %v4722_v39  ;;  %v4857_v54 = vmul.f32 0.00390625, %v4819_v11  ;;  %v4951_v5 = vadd.f32 1e-05, %v4903_v7 }
 0x6ba   : > { %v9410_v10 = vrot.slane %v4707_v47, %v9932_v29  ;;  %v4919_v50 = vsub.f32 %v9032_v63, %v9373_v25  ;;  %v4922_v63 = vsub.f32 %v9044_v4, %v9381_v34 }
 0x6bb   : > { %v4904_v18 = vmax.f32 %v4888_v22, 0.0  ;;  %v4873_v9 = vmul.f32 %v9389_v32, %v9389_v32  ;;  %6514 = vrsqrt.f32 %v4951_v5  ;;  %v4917_v5 = vsub.f32 %v9025_v14, %v9375_v13 }
 0x6bc   : > { %v4725_v24 = vpop.xlane.xlu0 %4724  ;;  %v4822_v20 = vpop.xlane.xlu1 %4821 }
 0x6bd   : > { %v4952_v61 = vadd.f32 1e-05, %v4904_v18  ;;  %v4889_v33 = vsub.f32 %v4857_v54, %v4873_v9  ;;  %v9396_v56 = vmul.f32 0.00390625, %v4725_v24  ;;  %v4858_v41 = vmul.f32 0.00390625, %v4822_v20 }
 0x6be   : > { %v4920_v54 = vsub.f32 %v9035_v52, %v9373_v25  ;;  %v4918_v18 = vsub.f32 %v9029_v60, %v9375_v13  ;;  %v4921_v20 = vsub.f32 %v9040_v38, %v9381_v34 }
 0x6bf   : > { %6516 = vrsqrt.f32 %v4952_v61  ;;  %v4905_v44 = vmax.f32 %v4889_v33, 0.0  ;;  %v4874_v6 = vmul.f32 %v9396_v56, %v9396_v56 }
 0x6c0   : > { %v4728_v40 = vpop.xlane.xlu0 %4727  ;;  %v4825_v59 = vpop.xlane.xlu1 %4824 }
 0x6c1   : > { %v4953_v7 = vadd.f32 1e-05, %v4905_v44  ;;  %v9417_v39 = vmul.f32 0.00390625, %v4728_v40  ;;  %v4859_v11 = vmul.f32 0.00390625, %v4825_v59  ;;  %v4890_v9 = vsub.f32 %v4858_v41, %v4874_v6 }
 0x6c2   : > { %v6511_v22 = vpop.eup %6510  ;;  %v4923_v6 = vsub.f32 %v9048_v36, %v9385_v26  ;;  %v4924_v40 = vsub.f32 %v9051_v58, %v9385_v26  ;;  %v4925_v36 = vsub.f32 %v9057_v16, %v9389_v32 }
 0x6c3   : > { %v6513_v24 = vpop.eup %6512  ;;  %6518 = vrsqrt.f32 %v4953_v7  ;;  %v4875_v1 = vmul.f32 %v9417_v39, %v9417_v39  ;;  %v4906_v61 = vmax.f32 %v4890_v9, 0.0  ;;  %v4984_v47 = vmul.f32 %v6511_v22, %v4920_v54 }
 0x6c4   : > { %v4731_v52 = vpop.xlane.xlu0 %4730  ;;  %v4828_v25 = vpop.xlane.xlu1 %4827  ;;  %v4982_v33 = vmul.f32 %v6513_v24, %v4918_v18  ;;  %v4981_v14 = vmul.f32 %v6513_v24, %v4917_v5  ;;  %v4983_v41 = vmul.f32 %v6511_v22, %v4919_v50 }
 0x6c5   : > { %v4891_v44 = vsub.f32 %v4859_v11, %v4875_v1  ;;  %v9431_v60 = vmul.f32 0.00390625, %v4731_v52  ;;  %v4860_v13 = vmul.f32 0.00390625, %v4828_v25  ;;  %v4954_v29 = vadd.f32 1e-05, %v4906_v61 }
 0x6c6   : > { %v5025_v38 = vmul.f32 %v9407_v42, %v4982_v33  ;;  %v5024_v4 = vmul.f32 %v9402_v49, %v4981_v14  ;;  %v5027_v34 = vmul.f32 %v9407_v42, %v4984_v47  ;;  %v5026_v61 = vmul.f32 %v9402_v49, %v4983_v41 }
 0x6c7   : > { %v4907_v59 = vmax.f32 %v4891_v44, 0.0  ;;  %v4876_v62 = vmul.f32 %v9431_v60, %v9431_v60  ;;  %6520 = vrsqrt.f32 %v4954_v29  ;;  %v4926_v52 = vsub.f32 %v9061_v30, %v9389_v32 }
 0x6c8   : > { %v4734_v7 = vpop.xlane.xlu0 %4733  ;;  %v4831_v50 = vpop.xlane.xlu1 %4830  ;;  %v5068_v11 = vadd.f32 %v9413_v2, %v5025_v38  ;;  %v5067_v22 = vadd.f32 %v9410_v10, %v5024_v4  ;;  %v5070_v54 = vadd.f32 %v9413_v2, %v5027_v34  ;;  %v4927_v25 = vsub.f32 %v9064_v55, %v9396_v56 }
 0x6c9   : > { %v6515_v5 = vpop.eup %6514  ;;  %v4955_v18 = vadd.f32 1e-05, %v4907_v59  ;;  %v4892_v9 = vsub.f32 %v4860_v13, %v4876_v62  ;;  %v9447_v58 = vmul.f32 0.00390625, %v4734_v7  ;;  %v4861_v26 = vmul.f32 0.00390625, %v4831_v50 }
 0x6ca   : > { %v5100_v24 = vmax.f32 %v5068_v11, 0.0  ;;  %v5099_v1 = vmax.f32 %v5067_v22, 0.0  ;;  %v5102_v14 = vmax.f32 %v5070_v54, 0.0  ;;  %v5069_v38 = vadd.f32 %v9410_v10, %v5026_v61 }
 0x6cb   : > { %v4908_v33 = vmax.f32 %v4892_v9, 0.0  ;;  %v4877_v44 = vmul.f32 %v9447_v58, %v9447_v58  ;;  %v4986_v4 = vmul.f32 %v6515_v5, %v4922_v63  ;;  %v4985_v34 = vmul.f32 %v6515_v5, %v4921_v20 }
 0x6cc   : > { %v6517_v47 = vpop.eup %6516  ;;  %5234 = vmatprep.mubr.f32.mxu0 %v5100_v24  ;;  %v4737_v13 = vpop.xlane.xlu0 %4736  ;;  %6522 = vrsqrt.f32 %v4955_v18  ;;  %v4928_v22 = vsub.f32 %v9067_v27, %v9396_v56  ;;  %v4929_v63 = vsub.f32 %v9073_v3, %v9417_v39  ;;  %v5101_v54 = vmax.f32 %v5069_v38, 0.0 }
 0x6cd   : > { %v4834_v29 = vpop.xlane.xlu1 %4833  ;;  %v9457_v41 = vmul.f32 0.00390625, %v4737_v13  ;;  %5235 = vmatmul.mubr.f32.vlgmr.msra.gmra.mxu0 %v5099_v1  ;;  %v4988_v59 = vmul.f32 %v6517_v47, %v4924_v40  ;;  %v4956_v62 = vadd.f32 1e-05, %v4908_v33  ;;  %v4893_v7 = vsub.f32 %v4861_v26, %v4877_v44 }
 0x6ce   : > { %v4862_v30 = vmul.f32 0.00390625, %v4834_v29  ;;  %5239 = vmatprep.mubr.f32.mxu0 %v5102_v14  ;;  %v5029_v50 = vmul.f32 %v9407_v42, %v4986_v4  ;;  %v5028_v11 = vmul.f32 %v9402_v49, %v4985_v34  ;;  %v4987_v14 = vmul.f32 %v6517_v47, %v4923_v6 }
 0x6cf   : > { %v4878_v20 = vmul.f32 %v9457_v41, %v9457_v41  ;;  %v4909_v18 = vmax.f32 %v4893_v7, 0.0  ;;  %v5031_v1 = vmul.f32 %v9407_v42, %v4988_v59  ;;  %6524 = vrsqrt.f32 %v4956_v62 }
 0x6d0   : > { %v6519_v5 = vpop.eup %6518  ;;  %v4740_v40 = vpop.xlane.xlu0 %4739  ;;  %v5072_v9 = vadd.f32 %v9413_v2, %v5029_v50  ;;  %v5071_v24 = vadd.f32 %v9410_v10, %v5028_v11  ;;  %v4930_v38 = vsub.f32 %v9077_v8, %v9417_v39  ;;  %v5030_v6 = vmul.f32 %v9402_v49, %v4987_v14 }
 0x6d1   : > { %v4837_v26 = vpop.xlane.xlu1 %4836  ;;  %v4894_v61 = vsub.f32 %v4862_v30, %v4878_v20  ;;  %v9470_v33 = vmul.f32 0.00390625, %v4740_v40  ;;  %5240 = vmatmul.mubr.f32.gmra.mxu0 %v5101_v54  ;;  %v4957_v44 = vadd.f32 1e-05, %v4909_v18  ;;  %v5074_v29 = vadd.f32 %v9413_v2, %v5031_v1 }
 0x6d2   : > { %v4863_v27 = vmul.f32 0.00390625, %v4837_v26  ;;  %v5104_v13 = vmax.f32 %v5072_v9, 0.0  ;;  %v5103_v7 = vmax.f32 %v5071_v24, 0.0  ;;  %v4990_v47 = vmul.f32 %v6519_v5, %v4926_v52 }
 0x6d3   : > { %v4910_v4 = vmax.f32 %v4894_v61, 0.0  ;;  %v4879_v34 = vmul.f32 %v9470_v33, %v9470_v33  ;;  %6526 = vrsqrt.f32 %v4957_v44  ;;  %v5106_v59 = vmax.f32 %v5074_v29, 0.0 }
 0x6d4   : > { %5244 = vmatprep.mubr.f32.mxu0 %v5104_v13  ;;  %v4743_v30 = vpop.xlane.xlu0 %4742  ;;  %v6521_v62 = vpop.eup %6520  ;;  %v5073_v18 = vadd.f32 %v9410_v10, %v5030_v6  ;;  %v5033_v40 = vmul.f32 %v9407_v42, %v4990_v47  ;;  %v4989_v9 = vmul.f32 %v6519_v5, %v4925_v36  ;;  %v4931_v52 = vsub.f32 %v9080_v46, %v9431_v60 }
 0x6d5   : > { %v4840_v50 = vpop.xlane.xlu1 %4839  ;;  %v4958_v11 = vadd.f32 1e-05, %v4910_v4  ;;  %v4895_v20 = vsub.f32 %v4863_v27, %v4879_v34  ;;  %v9478_v54 = vmul.f32 0.00390625, %v4743_v30  ;;  %5245 = vmatmul.mubr.f32.gmra.mxu0 %v5103_v7  ;;  %v4992_v26 = vmul.f32 %v6521_v62, %v4928_v22 }
 0x6d6   : > { %v4864_v8 = vmul.f32 0.00390625, %v4840_v50  ;;  %5249 = vmatprep.mubr.f32.mxu0 %v5106_v59  ;;  %v4932_v24 = vsub.f32 %v9083_v17, %v9431_v60  ;;  %v5105_v14 = vmax.f32 %v5073_v18, 0.0  ;;  %v5076_v44 = vadd.f32 %v9413_v2, %v5033_v40 }
 0x6d7   : > { %6528 = vrsqrt.f32 %v4958_v11  ;;  %v4911_v1 = vmax.f32 %v4895_v20, 0.0  ;;  %v4880_v61 = vmul.f32 %v9478_v54, %v9478_v54  ;;  %v5032_v16 = vmul.f32 %v9402_v49, %v4989_v9 }
 0x6d8   : > { %v4746_v27 = vpop.xlane.xlu0 %4745  ;;  %v5035_v46 = vmul.f32 %v9407_v42, %v4992_v26  ;;  %v5108_v60 = vmax.f32 %v5076_v44, 0.0  ;;  %v4991_v4 = vmul.f32 %v6521_v62, %v4927_v25  ;;  %v4933_v34 = vsub.f32 %v9089_v57, %v9447_v58 }
 0x6d9   : > { %v4843_v13 = vpop.xlane.xlu1 %4842  ;;  %v4959_v32 = vadd.f32 1e-05, %v4911_v1  ;;  %v9493_v36 = vmul.f32 0.00390625, %v4746_v27  ;;  %v6523_v5 = vpop.eup %6522  ;;  %v4896_v17 = vsub.f32 %v4864_v8, %v4880_v61  ;;  %5250 = vmatmul.mubr.f32.gmra.mxu0 %v5105_v14  ;;  %v5075_v29 = vadd.f32 %v9410_v10, %v5032_v16 }
 0x6da   : > { %v4865_v22 = vmul.f32 0.00390625, %v4843_v13  ;;  %v4934_v7 = vsub.f32 %v9093_v21, %v9447_v58  ;;  %5254 = vmatprep.mubr.f32.mxu0 %v5108_v60  ;;  %v5078_v47 = vadd.f32 %v9413_v2, %v5035_v46  ;;  %v5034_v55 = vmul.f32 %v9402_v49, %v4991_v4 }
 0x6db   : > { %6530 = vrsqrt.f32 %v4959_v32  ;;  %v4881_v30 = vmul.f32 %v9493_v36, %v9493_v36  ;;  %v4912_v59 = vmax.f32 %v4896_v17, 0.0  ;;  %v5107_v6 = vmax.f32 %v5075_v29, 0.0 }
 0x6dc   : > { %v4749_v50 = vpop.xlane.xlu0 %4748  ;;  %v4994_v62 = vmul.f32 %v6523_v5, %v4930_v38  ;;  %v5110_v21 = vmax.f32 %v5078_v47, 0.0  ;;  %v5077_v58 = vadd.f32 %v9410_v10, %v5034_v55  ;;  %v4993_v8 = vmul.f32 %v6523_v5, %v4929_v63  ;;  %v6525_v18 = vpop.eup %6524 }
 0x6dd   : > { %v4846_v11 = vpop.xlane.xlu1 %4845  ;;  %v4897_v56 = vsub.f32 %v4865_v22, %v4881_v30  ;;  %v9508_v25 = vmul.f32 0.00390625, %v4749_v50  ;;  %v4960_v20 = vadd.f32 1e-05, %v4912_v59  ;;  %5255 = vmatmul.mubr.f32.gmra.mxu0 %v5107_v6  ;;  %v4935_v40 = vsub.f32 %v9096_v43, %v9457_v41 }
 0x6de   : > { %v4866_v57 = vmul.f32 0.00390625, %v4846_v11  ;;  %v4936_v9 = vsub.f32 %v9099_v28, %v9457_v41  ;;  %5259 = vmatprep.mubr.f32.mxu0 %v5110_v21  ;;  %v5109_v61 = vmax.f32 %v5077_v58, 0.0  ;;  %v5037_v27 = vmul.f32 %v9407_v42, %v4994_v62 }
 0x6df   : > { %v4913_v26 = vmax.f32 %v4897_v56, 0.0  ;;  %v4882_v38 = vmul.f32 %v9508_v25, %v9508_v25  ;;  %6532 = vrsqrt.f32 %v4960_v20  ;;  %v5036_v3 = vmul.f32 %v9402_v49, %v4993_v8 }
 0x6e0   : > { %v4752_v1 = vpop.xlane.xlu0 %4751  ;;  %v6527_v39 = vpop.eup %6526  ;;  %v5080_v28 = vadd.f32 %v9413_v2, %v5037_v27  ;;  %v4996_v16 = vmul.f32 %v6525_v18, %v4932_v24  ;;  %v4995_v32 = vmul.f32 %v6525_v18, %v4931_v52  ;;  %v4937_v22 = vsub.f32 %v9105_v19, %v9470_v33 }
 0x6e1   : > { %v4849_v14 = vpop.xlane.xlu1 %4848  ;;  %v4961_v63 = vadd.f32 1e-05, %v4913_v26  ;;  %v4898_v44 = vsub.f32 %v4866_v57, %v4882_v38  ;;  %v9522_v43 = vmul.f32 0.00390625, %v4752_v1  ;;  %5260 = vmatmul.mubr.f32.gmra.mxu0 %v5109_v61  ;;  %v5079_v41 = vadd.f32 %v9410_v10, %v5036_v3 }
 0x6e2   : > { %v4867_v13 = vmul.f32 0.00390625, %v4849_v14  ;;  %v4938_v46 = vsub.f32 %v9109_v12, %v9470_v33  ;;  %v5112_v60 = vmax.f32 %v5080_v28, 0.0  ;;  %v5039_v59 = vmul.f32 %v9407_v42, %v4996_v16 }
 0x6e3   : > { %6534 = vrsqrt.f32 %v4961_v63  ;;  %v4914_v5 = vmax.f32 %v4898_v44, 0.0  ;;  %v4883_v29 = vmul.f32 %v9522_v43, %v9522_v43  ;;  %v5111_v30 = vmax.f32 %v5079_v41, 0.0 }
 0x6e4   : > { %v6529_v17 = vpop.eup %6528  ;;  %v4755_v4 = vpop.xlane.xlu0 %4754  ;;  %v5038_v19 = vmul.f32 %v9402_v49, %v4995_v32  ;;  %5264 = vmatprep.mubr.f32.mxu0 %v5112_v60  ;;  %v5082_v33 = vadd.f32 %v9413_v2, %v5039_v59  ;;  %v4998_v47 = vmul.f32 %v6527_v39, %v4934_v7  ;;  %v4997_v11 = vmul.f32 %v6527_v39, %v4933_v34 }
 0x6e5   : > { %v4852_v50 = vpop.xlane.xlu1 %4851  ;;  %v4962_v24 = vadd.f32 1e-05, %v4914_v5  ;;  %v9533_v52 = vmul.f32 0.00390625, %v4755_v4  ;;  %v4899_v12 = vsub.f32 %v4867_v13, %v4883_v29  ;;  %v4939_v55 = vsub.f32 %v9112_v51, %v9478_v54  ;;  %5265 = vmatmul.mubr.f32.gmra.mxu0 %v5111_v30 }
 0x6e6   : > { %v4868_v6 = vmul.f32 0.00390625, %v4852_v50  ;;  %v4940_v56 = vsub.f32 %v9115_v48, %v9478_v54  ;;  %v5114_v21 = vmax.f32 %v5082_v33, 0.0  ;;  %v5081_v58 = vadd.f32 %v9410_v10, %v5038_v19 }
 0x6e7   : > { %6536 = vrsqrt.f32 %v4962_v24  ;;  %v4884_v57 = vmul.f32 %v9533_v52, %v9533_v52  ;;  %v4915_v20 = vmax.f32 %v4899_v12, 0.0  ;;  %v5041_v8 = vmul.f32 %v9407_v42, %v4998_v47 }
 0x6e8   : > { %v6531_v62 = vpop.eup %6530  ;;  %v5040_v34 = vmul.f32 %v9402_v49, %v4997_v11  ;;  %v5000_v18 = vmul.f32 %v6529_v17, %v4936_v9  ;;  %v4999_v51 = vmul.f32 %v6529_v17, %v4935_v40  ;;  %5269 = vmatprep.mubr.f32.mxu0 %v5114_v21  ;;  %v5113_v48 = vmax.f32 %v5081_v58, 0.0 }
 0x6e9   : > { %v4900_v7 = vsub.f32 %v4868_v6, %v4884_v57  ;;  %v4963_v26 = vadd.f32 1e-05, %v4915_v20  ;;  %v5084_v54 = vadd.f32 %v9413_v2, %v5041_v8  ;;  %v5002_v38 = vmul.f32 %v6531_v62, %v4938_v46 }
 0x6ea   : > { %v5083_v61 = vadd.f32 %v9410_v10, %v5040_v34  ;;  %v5043_v27 = vmul.f32 %v9407_v42, %v5000_v18  ;;  %v5042_v14 = vmul.f32 %v9402_v49, %v4999_v51  ;;  %5270 = vmatmul.mubr.f32.gmra.mxu0 %v5113_v48  ;;  %v5001_v9 = vmul.f32 %v6531_v62, %v4937_v22 }
 0x6eb   : > { %v4916_v1 = vmax.f32 %v4900_v7, 0.0  ;;  %6538 = vrsqrt.f32 %v4963_v26  ;;  %v5116_v3 = vmax.f32 %v5084_v54, 0.0  ;;  %v5045_v39 = vmul.f32 %v9407_v42, %v5002_v38 }
 0x6ec   : > { %v6533_v40 = vpop.eup %6532  ;;  %v5115_v44 = vmax.f32 %v5083_v61, 0.0  ;;  %v5086_v13 = vadd.f32 %v9413_v2, %v5043_v27  ;;  %v5085_v28 = vadd.f32 %v9410_v10, %v5042_v14  ;;  %v5044_v16 = vmul.f32 %v9402_v49, %v5001_v9 }
 0x6ed   : > { %v4964_v63 = vadd.f32 1e-05, %v4916_v1  ;;  %5274 = vmatprep.mubr.f32.mxu0 %v5116_v3  ;;  %v5088_v41 = vadd.f32 %v9413_v2, %v5045_v39  ;;  %v5004_v32 = vmul.f32 %v6533_v40, %v4940_v56  ;;  %v5003_v46 = vmul.f32 %v6533_v40, %v4939_v55 }
 0x6ee   : > { %v4942_v5 = vsub.f32 %v9125_v15, %v9493_v36  ;;  %v5118_v17 = vmax.f32 %v5086_v13, 0.0  ;;  %v4941_v60 = vsub.f32 %v9121_v0, %v9493_v36  ;;  %5275 = vmatmul.mubr.f32.gmra.mxu0 %v5115_v44  ;;  %v5117_v50 = vmax.f32 %v5085_v28, 0.0  ;;  %v5332_v28 = vld [vmem:[%s9715_s17 + $0x8] sm:$0xff] }
 0x6ef   : > { %6540 = vrsqrt.f32 %v4964_v63  ;;  %v5047_v29 = vmul.f32 %v9407_v42, %v5004_v32  ;;  %v5120_v4 = vmax.f32 %v5088_v41, 0.0  ;;  %v5046_v30 = vmul.f32 %v9402_v49, %v5003_v46  ;;  %v5331_v41 = vld [vmem:[%s9715_s17] sm:$0xff] }
 0x6f0   : > { %v6535_v22 = vpop.eup %6534  ;;  %5279 = vmatprep.mubr.f32.mxu0 %v5118_v17  ;;  %v5087_v24 = vadd.f32 %v9410_v10, %v5044_v16  ;;  %v4944_v19 = vsub.f32 %v9131_v45, %v9508_v25  ;;  %v4943_v36 = vsub.f32 %v9128_v31, %v9508_v25  ;;  %v4945_v20 = vsub.f32 %v9137_v37, %v9522_v43  ;;  %v9613_v46 = vld [vmem:[%s9934_s22] ss:$0 sm:$0xff] }
 0x6f1   : > { %v5006_v59 = vmul.f32 %v6535_v22, %v4942_v5  ;;  %v5090_v6 = vadd.f32 %v9413_v2, %v5047_v29  ;;  %v5005_v15 = vmul.f32 %v6535_v22, %v4941_v60  ;;  %v5089_v47 = vadd.f32 %v9410_v10, %v5046_v30 }
 0x6f2   : > { %5280 = vmatmul.mubr.f32.gmra.mxu0 %v5117_v50  ;;  %v5119_v56 = vmax.f32 %v5087_v24, 0.0  ;;  %v4946_v31 = vsub.f32 %v9141_v53, %v9522_v43  ;;  %v4947_v26 = vsub.f32 %v9144_v23, %v9533_v52  ;;  %v4948_v37 = vsub.f32 %v9147_v35, %v9533_v52 }
 0x6f3   : > { %v5049_v12 = vmul.f32 %v9407_v42, %v5006_v59  ;;  %5284 = vmatprep.mubr.f32.mxu0 %v5120_v4  ;;  %v5122_v33 = vmax.f32 %v5090_v6, 0.0  ;;  %v5048_v57 = vmul.f32 %v9402_v49, %v5005_v15  ;;  %v5121_v21 = vmax.f32 %v5089_v47, 0.0 }
 0x6f4   : > { %v6537_v0 = vpop.eup %6536 }
 0x6f5   : > { %v5092_v11 = vadd.f32 %v9413_v2, %v5049_v12  ;;  %v5008_v55 = vmul.f32 %v6537_v0, %v4944_v19  ;;  %v5007_v62 = vmul.f32 %v6537_v0, %v4943_v36  ;;  %v5091_v7 = vadd.f32 %v9410_v10, %v5048_v57 }
 0x6f6   : > { %5285 = vmatmul.mubr.f32.gmra.mxu0 %v5119_v56 }
 0x6f7   : > { %v5051_v45 = vmul.f32 %v9407_v42, %v5008_v55  ;;  %5289 = vmatprep.mubr.f32.mxu0 %v5122_v33  ;;  %v5124_v58 = vmax.f32 %v5092_v11, 0.0  ;;  %v5050_v34 = vmul.f32 %v9402_v49, %v5007_v62  ;;  %v5123_v1 = vmax.f32 %v5091_v7, 0.0 }
 0x6f8   : > { %v6539_v25 = vpop.eup %6538 }
 0x6f9   : > { %v5094_v8 = vadd.f32 %v9413_v2, %v5051_v45  ;;  %v5010_v18 = vmul.f32 %v6539_v25, %v4946_v31  ;;  %v5009_v51 = vmul.f32 %v6539_v25, %v4945_v20  ;;  %v5093_v61 = vadd.f32 %v9410_v10, %v5050_v34 }
 0x6fa   : > { %5290 = vmatmul.mubr.f32.gmra.mxu0 %v5121_v21 }
 0x6fb   : > { %v5053_v43 = vmul.f32 %v9407_v42, %v5010_v18  ;;  %5294 = vmatprep.mubr.f32.mxu0 %v5124_v58  ;;  %v5126_v48 = vmax.f32 %v5094_v8, 0.0  ;;  %v5052_v14 = vmul.f32 %v9402_v49, %v5009_v51  ;;  %v5125_v9 = vmax.f32 %v5093_v61, 0.0 }
 0x6fc   : > { %v6541_v53 = vpop.eup %6540 }
 0x6fd   : > { %v5012_v54 = vmul.f32 %v6541_v53, %v4948_v37  ;;  %v5011_v38 = vmul.f32 %v6541_v53, %v4947_v26  ;;  %v5096_v27 = vadd.f32 %v9413_v2, %v5053_v43  ;;  %v5095_v40 = vadd.f32 %v9410_v10, %v5052_v14 }
 0x6fe   : > { %5295 = vmatmul.mubr.f32.gmra.mxu0 %v5123_v1 }
 0x6ff   : > { %v5055_v23 = vmul.f32 %v9407_v42, %v5012_v54  ;;  %v5054_v3 = vmul.f32 %v9402_v49, %v5011_v38  ;;  %5299 = vmatprep.mubr.f32.mxu0 %v5126_v48  ;;  %v5128_v35 = vmax.f32 %v5096_v27, 0.0  ;;  %v5127_v44 = vmax.f32 %v5095_v40, 0.0  ;;  %v5336_v49 = vld [vmem:[%s9715_s17 + $0x28] sm:$0xff]  ;;  %v5335_v42 = vld [vmem:[%s9715_s17 + $0x20] sm:$0xff] }
 0x700   : > { %5984 = vmatprep.subr.mxu1 %v5336_v49 }
 0x701   : > { %v5098_v52 = vadd.f32 %v9413_v2, %v5055_v23  ;;  %v5097_v39 = vadd.f32 %v9410_v10, %v5054_v3  ;;  %5985 = vmatpush3.msra.mxu1 %v5336_v49  ;;  %v5334_v10 = vld [vmem:[%s9715_s17 + $0x18] sm:$0xff]  ;;  %v5333_v2 = vld [vmem:[%s9715_s17 + $0x10] sm:$0xff] }
 0x702   : > { %5300 = vmatmul.mubr.f32.gmra.mxu0 %v5125_v9  ;;  %5986 = vmatprep.subr.mxu1 %v5335_v42 }
 0x703   : > { %5304 = vmatprep.mubr.f32.mxu0 %v5128_v35  ;;  %v5130_v63 = vmax.f32 %v5098_v52, 0.0  ;;  %v5129_v13 = vmax.f32 %v5097_v39, 0.0  ;;  %5987 = vmatpush3.msra.mxu1 %v5335_v42 }
 0x704   : > { %5988 = vmatprep.subr.mxu1 %v5334_v10 }
 0x705   : > { %5989 = vmatpush3.msra.mxu1 %v5334_v10 }
 0x706   : > { %5305 = vmatmul.mubr.f32.gmra.mxu0 %v5127_v44  ;;  %5990 = vmatprep.subr.mxu1 %v5333_v2 }
 0x707   : > { %5309 = vmatprep.mubr.f32.mxu0 %v5130_v63  ;;  %5991 = vmatpush3.msra.mxu1 %v5333_v2 }
 0x708   : > { %5992 = vmatprep.subr.mxu1 %v5332_v28 }
 0x709   : > { %5993 = vmatpush3.msra.mxu1 %v5332_v28 }
 0x70a   : > { %5310 = vmatmul.mubr.f32.gmra.mxu0 %v5129_v13  ;;  %5994 = vmatprep.subr.mxu1 %v5331_v41 }
 0x70b   : > { %5995 = vmatpush3.msra.mxu1 %v5331_v41 }
 0x78d   : > { %v5884_v16 = vpop.f32.mrf.mxu0 }
 0x78f   : > { %v5885_v32 = vpop.f32.mrf.mxu0 }
 0x790   : > { %v5886_v5 = vadd.f32 %v5885_v32, %v5884_v16 }
 0x791   : > { %v5887_v17 = vpop.f32.mrf.mxu0 }
 0x792   : > { %v5237_v22 = vadd.f32 %v5886_v5, %v9613_v46 }
 0x793   : > { %v5888_v60 = vpop.f32.mrf.mxu0 }
 0x794   : > { %v5889_v29 = vadd.f32 %v5888_v60, %v5887_v17  ;;  %v5315_v4 = vmax.f32 %v5237_v22, 0.0 }
 0x795   : > { %v5890_v30 = vpop.f32.mrf.mxu0 }
 0x796   : > { %v5242_v59 = vadd.f32 %v5889_v29, %v9613_v46  ;;  %5996 = vmatprep.mubr.f32.mxu1 %v5315_v4 }
 0x797   : > { %v5891_v50 = vpop.f32.mrf.mxu0 }
 0x798   : > { %v5316_v24 = vmax.f32 %v5242_v59, 0.0  ;;  %v5892_v6 = vadd.f32 %v5891_v50, %v5890_v30 }
 0x799   : > { %v5893_v19 = vpop.f32.mrf.mxu0 }
 0x79a   : > { %v5247_v15 = vadd.f32 %v5892_v6, %v9613_v46  ;;  %5997 = vmatmul.mubr.f32.vlgmr.msra.gmra.mxu1 %v5316_v24 }
 0x79b   : > { %v5894_v0 = vpop.f32.mrf.mxu0 }
 0x79c   : > { %v5317_v12 = vmax.f32 %v5247_v15, 0.0  ;;  %v5895_v36 = vadd.f32 %v5894_v0, %v5893_v19 }
 0x79d   : > { %v5896_v33 = vpop.f32.mrf.mxu0 }
 0x79e   : > { %5999 = vmatprep.mubr.f32.mxu1 %v5317_v12  ;;  %v5252_v47 = vadd.f32 %v5895_v36, %v9613_v46  ;;  %v5846_v36 = vld [vmem:[#allocation6] ss:$0 sm:$0xff] }
 0x79f   : > { %v5897_v11 = vpop.f32.mrf.mxu0 }
 0x7a0   : > { %v5318_v55 = vmax.f32 %v5252_v47, 0.0  ;;  %v5898_v56 = vadd.f32 %v5897_v11, %v5896_v33 }
 0x7a1   : > { %v5899_v57 = vpop.f32.mrf.mxu0 }
 0x7a2   : > { %v5257_v62 = vadd.f32 %v5898_v56, %v9613_v46  ;;  %6000 = vmatmul.mubr.f32.gmra.mxu1 %v5318_v55 }
 0x7a3   : > { %v5900_v45 = vpop.f32.mrf.mxu0 }
 0x7a4   : > { %v5319_v20 = vmax.f32 %v5257_v62, 0.0  ;;  %v5901_v31 = vadd.f32 %v5900_v45, %v5899_v57 }
 0x7a5   : > { %v5902_v21 = vpop.f32.mrf.mxu0 }
 0x7a6   : > { %v5262_v25 = vadd.f32 %v5901_v31, %v9613_v46  ;;  %6002 = vmatprep.mubr.f32.mxu1 %v5319_v20 }
 0x7a7   : > { %v5903_v8 = vpop.f32.mrf.mxu0 }
 0x7a8   : > { %v5320_v58 = vmax.f32 %v5262_v25, 0.0  ;;  %v5904_v7 = vadd.f32 %v5903_v8, %v5902_v21 }
 0x7aa   : > { %6003 = vmatmul.mubr.f32.gmra.mxu1 %v5320_v58  ;;  %v5267_v34 = vadd.f32 %v5904_v7, %v9613_v46  ;;  %v5905_v18 = vpop.f32.mrf.mxu0 }
 0x7ac   : > { %v5321_v51 = vmax.f32 %v5267_v34, 0.0  ;;  %v5906_v26 = vpop.f32.mrf.mxu0 }
 0x7ad   : > { %v5907_v37 = vadd.f32 %v5906_v26, %v5905_v18 }
 0x7ae   : > { %v5908_v53 = vpop.f32.mrf.mxu0  ;;  %6005 = vmatprep.mubr.f32.mxu1 %v5321_v51 }
 0x7af   : > { %v5272_v43 = vadd.f32 %v5907_v37, %v9613_v46 }
 0x7b0   : > { %v5909_v48 = vpop.f32.mrf.mxu0 }
 0x7b1   : > { %v5322_v54 = vmax.f32 %v5272_v43, 0.0  ;;  %v5910_v38 = vadd.f32 %v5909_v48, %v5908_v53 }
 0x7b2   : > { %v5911_v1 = vpop.f32.mrf.mxu0 }
 0x7b3   : > { %v5277_v61 = vadd.f32 %v5910_v38, %v9613_v46  ;;  %6006 = vmatmul.mubr.f32.gmra.mxu1 %v5322_v54 }
 0x7b4   : > { %v5912_v27 = vpop.f32.mrf.mxu0 }
 0x7b5   : > { %v5323_v14 = vmax.f32 %v5277_v61, 0.0  ;;  %v5913_v23 = vadd.f32 %v5912_v27, %v5911_v1 }
 0x7b6   : > { %v5914_v3 = vpop.f32.mrf.mxu0 }
 0x7b7   : > { %v5282_v35 = vadd.f32 %v5913_v23, %v9613_v46  ;;  %6008 = vmatprep.mubr.f32.mxu1 %v5323_v14 }
 0x7b8   : > { %v5915_v52 = vpop.f32.mrf.mxu0 }
 0x7b9   : > { %v5324_v39 = vmax.f32 %v5282_v35, 0.0  ;;  %v5916_v9 = vadd.f32 %v5915_v52, %v5914_v3 }
 0x7ba   : > { %v5917_v40 = vpop.f32.mrf.mxu0 }
 0x7bb   : > { %v5287_v63 = vadd.f32 %v5916_v9, %v9613_v46  ;;  %6009 = vmatmul.mubr.f32.gmra.mxu1 %v5324_v39 }
 0x7bc   : > { %v5918_v44 = vpop.f32.mrf.mxu0 }
 0x7bd   : > { %v5325_v13 = vmax.f32 %v5287_v63, 0.0  ;;  %v5919_v49 = vadd.f32 %v5918_v44, %v5917_v40 }
 0x7be   : > { %v5920_v42 = vpop.f32.mrf.mxu0 }
 0x7bf   : > { %v5292_v10 = vadd.f32 %v5919_v49, %v9613_v46  ;;  %6011 = vmatprep.mubr.f32.mxu1 %v5325_v13 }
 0x7c0   : > { %v5921_v2 = vpop.f32.mrf.mxu0 }
 0x7c1   : > { %v5326_v28 = vmax.f32 %v5292_v10, 0.0  ;;  %v5922_v41 = vadd.f32 %v5921_v2, %v5920_v42 }
 0x7c2   : > { %v5923_v16 = vpop.f32.mrf.mxu0 }
 0x7c3   : > { %v5297_v32 = vadd.f32 %v5922_v41, %v9613_v46  ;;  %6012 = vmatmul.mubr.f32.gmra.mxu1 %v5326_v28 }
 0x7c4   : > { %v5924_v5 = vpop.f32.mrf.mxu0 }
 0x7c5   : > { %v5327_v17 = vmax.f32 %v5297_v32, 0.0  ;;  %v5925_v22 = vadd.f32 %v5924_v5, %v5923_v16 }
 0x7c6   : > { %v5926_v60 = vpop.f32.mrf.mxu0 }
 0x7c7   : > { %v5302_v29 = vadd.f32 %v5925_v22, %v9613_v46  ;;  %6014 = vmatprep.mubr.f32.mxu1 %v5327_v17 }
 0x7c8   : > { %v5927_v4 = vpop.f32.mrf.mxu0 }
 0x7c9   : > { %v5328_v30 = vmax.f32 %v5302_v29, 0.0  ;;  %v5928_v59 = vadd.f32 %v5927_v4, %v5926_v60 }
 0x7ca   : > { %v5929_v50 = vpop.f32.mrf.mxu0 }
 0x7cb   : > { %v5307_v24 = vadd.f32 %v5928_v59, %v9613_v46  ;;  %6015 = vmatmul.mubr.f32.gmra.mxu1 %v5328_v30 }
 0x7cc   : > { %v5930_v6 = vpop.f32.mrf.mxu0 }
 0x7cd   : > { %v5329_v15 = vmax.f32 %v5307_v24, 0.0  ;;  %v5931_v19 = vadd.f32 %v5930_v6, %v5929_v50 }
 0x7cf   : > { %v5312_v12 = vadd.f32 %v5931_v19, %v9613_v46  ;;  %6017 = vmatprep.mubr.f32.mxu1 %v5329_v15 }
 0x7d1   : > { %v5330_v0 = vmax.f32 %v5312_v12, 0.0 }
 0x7d3   : > { %6018 = vmatmul.mubr.f32.gmra.mxu1 %v5330_v0 }
 0x85a   : > { %v5998_v33 = vpop.f32.mrf.mxu1 }
 0x85b   : > { %v5426_v47 = vadd.f32 %v5998_v33, %v5846_v36 }
 0x85c   : > { %v5420_v11 = vpop.f32.mrf.mxu1 }
 0x85d   : > { %5501 = vst.msk [vmem:[%s9935_s27 + $0x8] sm:$0xff] %vm5499_vm2, %v5426_v47  ;;  %v5421_v55 = vadd.f32 %v5846_v36, %v5420_v11 }
 0x85f   : > { %5500 = vst.msk [vmem:[%s9935_s27] sm:$0xff] %vm5499_vm2, %v5421_v55 }
 0x862   : > { %v6001_v46 = vpop.f32.mrf.mxu1 }
 0x863   : > { %v5436_v56 = vadd.f32 %v6001_v46, %v5846_v36 }
 0x864   : > { %v5430_v57 = vpop.f32.mrf.mxu1 }
 0x865   : > { %5503 = vst.msk [vmem:[%s9935_s27 + $0x18] sm:$0xff] %vm5499_vm2, %v5436_v56  ;;  %v5431_v62 = vadd.f32 %v5846_v36, %v5430_v57 }
 0x867   : > { %5502 = vst.msk [vmem:[%s9935_s27 + $0x10] sm:$0xff] %vm5499_vm2, %v5431_v62 }
 0x86a   : > { %v6004_v45 = vpop.f32.mrf.mxu1 }
 0x86b   : > { %v5446_v20 = vadd.f32 %v6004_v45, %v5846_v36 }
 0x86c   : > { %v5440_v31 = vpop.f32.mrf.mxu1 }
 0x86d   : > { %5505 = vst.msk [vmem:[%s9935_s27 + $0x28] sm:$0xff] %vm5499_vm2, %v5446_v20  ;;  %v5441_v25 = vadd.f32 %v5846_v36, %v5440_v31 }
 0x86f   : > { %5504 = vst.msk [vmem:[%s9935_s27 + $0x20] sm:$0xff] %vm5499_vm2, %v5441_v25 }
 0x873   : > { %v6007_v21 = vpop.f32.mrf.mxu1 }
 0x874   : > { %v5456_v58 = vadd.f32 %v6007_v21, %v5846_v36 }
 0x875   : > { %v5450_v8 = vpop.f32.mrf.mxu1 }
 0x876   : > { %5507 = vst.msk [vmem:[%s9935_s27 + $0x38] sm:$0xff] %vm5499_vm2, %v5456_v58  ;;  %v5451_v7 = vadd.f32 %v5846_v36, %v5450_v8 }
 0x878   : > { %5506 = vst.msk [vmem:[%s9935_s27 + $0x30] sm:$0xff] %vm5499_vm2, %v5451_v7 }
 0x87b   : > { %v6010_v34 = vpop.f32.mrf.mxu1 }
 0x87c   : > { %v5466_v18 = vadd.f32 %v6010_v34, %v5846_v36 }
 0x87d   : > { %v5460_v51 = vpop.f32.mrf.mxu1 }
 0x87e   : > { %5509 = vst.msk [vmem:[%s9935_s27 + $0x48] sm:$0xff] %vm5499_vm2, %v5466_v18  ;;  %v5461_v26 = vadd.f32 %v5846_v36, %v5460_v51 }
 0x880   : > { %5508 = vst.msk [vmem:[%s9935_s27 + $0x40] sm:$0xff] %vm5499_vm2, %v5461_v26 }
 0x883   : > { %v6013_v37 = vpop.f32.mrf.mxu1 }
 0x884   : > { %v5476_v53 = vadd.f32 %v6013_v37, %v5846_v36 }
 0x885   : > { %v5470_v43 = vpop.f32.mrf.mxu1 }
 0x886   : > { %5511 = vst.msk [vmem:[%s9935_s27 + $0x58] sm:$0xff] %vm5499_vm2, %v5476_v53  ;;  %v5471_v48 = vadd.f32 %v5846_v36, %v5470_v43 }
 0x888   : > { %5510 = vst.msk [vmem:[%s9935_s27 + $0x50] sm:$0xff] %vm5499_vm2, %v5471_v48 }
 0x88b   : > { %v6016_v54 = vpop.f32.mrf.mxu1 }
 0x88c   : > { %v5486_v38 = vadd.f32 %v6016_v54, %v5846_v36 }
 0x88d   : > { %v5480_v1 = vpop.f32.mrf.mxu1 }
 0x88e   : > { %5513 = vst.msk [vmem:[%s9935_s27 + $0x68] sm:$0xff] %vm5499_vm2, %v5486_v38  ;;  %v5481_v61 = vadd.f32 %v5846_v36, %v5480_v1 }
 0x890   : > { %5512 = vst.msk [vmem:[%s9935_s27 + $0x60] sm:$0xff] %vm5499_vm2, %v5481_v61 }
 0x893   : > { %v6019_v27 = vpop.f32.mrf.mxu1 }
 0x894   : > { %v5496_v14 = vadd.f32 %v6019_v27, %v5846_v36 }
 0x895   : > { %v5490_v23 = vpop.f32.mrf.mxu1 }
 0x896   : > { %5515 = vst.msk [vmem:[%s9935_s27 + $0x78] sm:$0xff] %vm5499_vm2, %v5496_v14  ;;  %v5491_v3 = vadd.f32 %v5846_v36, %v5490_v23 }
 0x898   : > { %5514 = vst.msk [vmem:[%s9935_s27 + $0x70] sm:$0xff] %vm5499_vm2, %v5491_v3 }
 0x899 PF: > { %s9936_s19 = sld [smem:[#allocation9_spill]] }
 0x89f   : > { %s31_s20 = sadd.s32 1, %s9936_s19  }
 0x8a0   : > { %p28_p7 = scmp.ge.s32.totalorder %s31_s20, 27  }
 0x8a2   :  { %30 = sbr.rel (!%p28_p7) target bundleno = 8 (0x8), region = 193 }
 0x8a7   :  { %5527 = vsyncmov [#allocation5] }
 0x8aa   :  { %s5528_s28 = vpop.sfrf %5527 }
 0x8ab   :  { %p5849_p8 = scmp.ne.s32.totalorder %s5528_s28, 0 }
 0x8ad   :  { %5532 = shalt.err (%p5849_p8)  }

</bundles_post_ra>
